<compile_context>
chip_gen: v5e
topology: v5e:2x2
jax: 0.10.0
libtpu: 0.0.40
codegen_flags: <defaults>
</compile_context>

<pallas_src>
from functools import partial

import numpy as np
import jax
import jax.numpy as jnp
from jax.experimental import pallas as pl
from jax.experimental.pallas import tpu as pltpu

BN_EPS = 1e-5


# ---------------------------------------------------------------------------
# Pallas kernels
# ---------------------------------------------------------------------------
def _make_conv1_stats_kernel(sp, m, spe, deltas, c):
    """Conv3d(C->C, k=3, p=1) as 27 shifted-tap bf16 GEMMs + per-channel BN partial sums."""

    def kernel(xe_ref, w1_ref, mask_ref, ye_ref, sum_ref, ssq_ref):
        b = pl.program_id(0)

        @pl.when(b == 0)
        def _init():
            sum_ref[...] = jnp.zeros_like(sum_ref)
            ssq_ref[...] = jnp.zeros_like(ssq_ref)

        xe = xe_ref[0]                                   # [spe, c] f32 (flat padded volume)
        acc = jnp.zeros((sp, c), jnp.float32)
        for t, d in enumerate(deltas):
            xs = xe[m + d:m + d + sp, :].astype(jnp.bfloat16)
            acc = acc + jnp.dot(xs, w1_ref[t], preferred_element_type=jnp.float32)
        # NOTE: conv bias omitted -- exactly cancelled by the BatchNorm mean subtraction.

        vmask = mask_ref[...][m:m + sp, :]               # [sp, 1] 1 on valid (non-pad) rows
        accm = acc * vmask
        sum_ref[...] = sum_ref[...] + jnp.sum(accm, axis=0, keepdims=True)
        ssq_ref[...] = ssq_ref[...] + jnp.sum(accm * accm, axis=0, keepdims=True)

        zpad = jnp.zeros((m, c), jnp.float32)
        ye_ref[...] = jnp.concatenate([zpad, acc, zpad], axis=0).reshape(1, spe, c)

    return kernel


def _make_bn_conv2_kernel(sp, m, deltas, c):
    """Fused BatchNorm-apply + ReLU + Conv3d(C->1, k=3, p=1) via shifted-tap GEMMs."""

    def kernel(ye_ref, scale_ref, shift_ref, mask_ref, w2_ref, out_ref):
        ye = ye_ref[0]                                   # [spe, c] f32 (pre-BN conv1 output)
        yn = jnp.maximum(ye * scale_ref[...] + shift_ref[...], 0.0)
        # zero the padding rows AFTER BN+ReLU (jnp.where also guards against any
        # non-finite garbage on the shift-margin rows)
        yn = jnp.where(mask_ref[...] > 0.5, yn, 0.0)

        acc = jnp.zeros((sp, 1), jnp.float32)
        for t, d in enumerate(deltas):
            ys = yn[m + d:m + d + sp, :].astype(jnp.bfloat16)
            acc = acc + jnp.dot(ys, w2_ref[t], preferred_element_type=jnp.float32)
        out_ref[...] = acc.reshape(1, sp, 1)

    return kernel


def _make_upsample_softmax_kernel(dc, hc, dout, wout, th):
    """Separable trilinear upsample + softmax over disparity + disparity regression.

    Tiled over output rows.  The W-axis upsample (per-batch) is computed once per batch
    under pl.when and kept in a VMEM scratch; softmax and regression are fused
    (num / den, pl.reciprocal) so the probability volume is never materialised.
    """

    def kernel(c_ref, wwT_ref, wh_ref, wd_ref, dvals_ref, pred_ref, cw_ref):
        j = pl.program_id(1)

        @pl.when(j == 0)
        def _w_upsample():
            cw_ref[...] = jnp.dot(c_ref[0], wwT_ref[...],
                                  preferred_element_type=jnp.float32)   # [dc*hc, wout]

        wh = wh_ref[...]                                  # [th, hc]   rows of this tile
        wd = wd_ref[...]                                  # [dout, dc]
        dvals = dvals_ref[...]                            # [1, dout]
        cw = cw_ref[...]                                  # [dc*hc, wout]

        rows = []
        for y in range(th):
            wh_y = wh[y:y + 1, :]                         # [1, hc]
            parts = [jnp.dot(wh_y, cw[d * hc:(d + 1) * hc, :],
                             preferred_element_type=jnp.float32) for d in range(dc)]
            s = parts[0] if dc == 1 else jnp.concatenate(parts, axis=0)  # [dc, wout]
            u = jnp.dot(wd, s, preferred_element_type=jnp.float32)       # [dout, wout] logits
            mx = jnp.max(u, axis=0, keepdims=True)
            e = jnp.exp(u - mx)
            den = jnp.sum(e, axis=0, keepdims=True)                      # [1, wout]
            num = jnp.dot(dvals, e, preferred_element_type=jnp.float32)  # [1, wout]
            rows.append(num * pl.reciprocal(den, approx=True))
        pred_ref[...] = jnp.concatenate(rows, axis=0).reshape(1, th, wout)

    return kernel


# ---------------------------------------------------------------------------
# Helpers (plain JAX / numpy glue)
# ---------------------------------------------------------------------------
def linear_interp_matrix(out_size, in_size):
    """Per-axis weights reproducing F.interpolate(mode='trilinear', align_corners=False)."""
    scale = in_size / out_size
    dst = np.arange(out_size, dtype=np.float64)
    src = np.maximum((dst + 0.5) * scale - 0.5, 0.0)
    i0 = np.minimum(np.floor(src).astype(np.int64), in_size - 1)
    i1 = np.minimum(i0 + 1, in_size - 1)
    lam = np.clip(src - i0, 0.0, 1.0)
    w = np.zeros((out_size, in_size), dtype=np.float32)
    np.add.at(w, (np.arange(out_size), i0), 1.0 - lam)
    np.add.at(w, (np.arange(out_size), i1), lam)
    return w


@partial(jax.jit, static_argnums=(2, 3, 4))
def efficient_stereo_tail(cost_agg, params, max_disp, out_h, out_w):
    """Classifier -> trilinear upsample -> softmax -> disparity regression.

    cost_agg: [B, 32, Dc, Hc, Wc] (PyTorch NCDHW), output of HourGlass(32)
    returns : [B, 1, out_h, out_w]
    """
    w1, b1, gamma, beta, w2 = params      # b1 unused: cancelled exactly by BN mean subtraction
    del b1
    B, C, Dc, Hc, Wc = map(int, cost_agg.shape)
    Dp, Hp, Wp = Dc + 2, Hc + 2, Wc + 2
    Sp = Dp * Hp * Wp                     # flattened padded volume size
    M = Hp * Wp + Wp + 1                  # max |flat shift| of a 3x3x3 tap
    SpE = Sp + 2 * M
    deltas = tuple((kd - 1) * Hp * Wp + (kh - 1) * Wp + (kw - 1)
                   for kd in range(3) for kh in range(3) for kw in range(3))

    # ---- layout prep (cheap: pad + flatten once; NO 27x im2col in HBM) -------------
    x = jnp.transpose(cost_agg, (0, 2, 3, 4, 1))                     # NCDHW -> NDHWC
    x = jnp.pad(x, ((0, 0), (1, 1), (1, 1), (1, 1), (0, 0)))         # zero pad D,H,W
    xe = jnp.pad(x.reshape(B, Sp, C), ((0, 0), (M, M), (0, 0)))      # flat + shift margins

    w1t = jnp.transpose(w1, (2, 3, 4, 1, 0)).reshape(27, C, C).astype(jnp.bfloat16)
    w2t = jnp.transpose(w2, (2, 3, 4, 1, 0)).reshape(27, C, 1).astype(jnp.bfloat16)

    mask3 = np.zeros((Dp, Hp, Wp), np.float32)
    mask3[1:1 + Dc, 1:1 + Hc, 1:1 + Wc] = 1.0
    mask_np = np.zeros((SpE, 1), np.float32)
    mask_np[M:M + Sp, 0] = mask3.reshape(-1)
    mask_ext = jnp.asarray(mask_np)

    # ---- stage A: conv1 (in-kernel shifted-tap GEMMs) + BN partial statistics -------
    ye, ch_sum, ch_ssq = pl.pallas_call(
        _make_conv1_stats_kernel(Sp, M, SpE, deltas, C),
        out_shape=(jax.ShapeDtypeStruct((B, SpE, C), jnp.float32),
                   jax.ShapeDtypeStruct((1, C), jnp.float32),
                   jax.ShapeDtypeStruct((1, C), jnp.float32)),
        grid_spec=pltpu.PrefetchScalarGridSpec(
            num_scalar_prefetch=0, grid=(B,),
            in_specs=[pl.BlockSpec((1, SpE, C), lambda b: (b, 0, 0)),
                      pl.BlockSpec((27, C, C), lambda b: (0, 0, 0)),
                      pl.BlockSpec((SpE, 1), lambda b: (0, 0))],
            out_specs=[pl.BlockSpec((1, SpE, C), lambda b: (b, 0, 0)),
                       pl.BlockSpec((1, C), lambda b: (0, 0)),
                       pl.BlockSpec((1, C), lambda b: (0, 0))]),
        compiler_params=pltpu.CompilerParams(dimension_semantics=("arbitrary",)),
    )(xe, w1t, mask_ext)

    # BatchNorm3d scale/shift from global (training-mode) batch statistics
    nvalid = float(B * Dc * Hc * Wc)
    mean = ch_sum / nvalid
    var = ch_ssq / nvalid - mean * mean
    scale = gamma.reshape(1, C) * jax.lax.rsqrt(var + BN_EPS)
    shift = beta.reshape(1, C) - mean * scale

    # ---- stage B: fused BN-apply + ReLU + conv2 (32 -> 1) ----------------------------
    c_flat = pl.pallas_call(
        _make_bn_conv2_kernel(Sp, M, deltas, C),
        out_shape=jax.ShapeDtypeStruct((B, Sp, 1), jnp.float32),
        grid_spec=pltpu.PrefetchScalarGridSpec(
            num_scalar_prefetch=0, grid=(B,),
            in_specs=[pl.BlockSpec((1, SpE, C), lambda b: (b, 0, 0)),
                      pl.BlockSpec((1, C), lambda b: (0, 0)),
                      pl.BlockSpec((1, C), lambda b: (0, 0)),
                      pl.BlockSpec((SpE, 1), lambda b: (0, 0)),
                      pl.BlockSpec((27, C, 1), lambda b: (0, 0, 0))],
            out_specs=pl.BlockSpec((1, Sp, 1), lambda b: (b, 0, 0))),
        compiler_params=pltpu.CompilerParams(dimension_semantics=("parallel",)),
    )(ye, scale, shift, mask_ext, w2t)

    # extract valid conv2 outputs (tiny array; pure layout plumbing in XLA)
    c = c_flat.reshape(B, Dp, Hp, Wp)[:, 1:1 + Dc, 1:1 + Hc, 1:1 + Wc]
    c = c.reshape(B, Dc * Hc, Wc)

    # ---- stage C: separable trilinear upsample + softmax + disparity regression -----
    Dout, Hout, Wout = max_disp, out_h, out_w
    TH = 8
    assert Hout % TH == 0, "output height must be a multiple of 8"
    wd = jnp.asarray(linear_interp_matrix(Dout, Dc))          # [Dout, Dc]
    wh = jnp.asarray(linear_interp_matrix(Hout, Hc))          # [Hout, Hc]
    wwT = jnp.asarray(linear_interp_matrix(Wout, Wc).T)       # [Wc, Wout]
    dvals = jnp.arange(Dout, dtype=jnp.float32).reshape(1, Dout)

    pred = pl.pallas_call(
        _make_upsample_softmax_kernel(Dc, Hc, Dout, Wout, TH),
        out_shape=jax.ShapeDtypeStruct((B, Hout, Wout), jnp.float32),
        grid_spec=pltpu.PrefetchScalarGridSpec(
            num_scalar_prefetch=0, grid=(B, Hout // TH),
            in_specs=[pl.BlockSpec((1, Dc * Hc, Wc), lambda b, j: (b, 0, 0)),
                      pl.BlockSpec((Wc, Wout), lambda b, j: (0, 0)),
                      pl.BlockSpec((TH, Hc), lambda b, j: (j, 0)),
                      pl.BlockSpec((Dout, Dc), lambda b, j: (0, 0)),
                      pl.BlockSpec((1, Dout), lambda b, j: (0, 0))],
            out_specs=pl.BlockSpec((1, TH, Wout), lambda b, j: (b, j, 0)),
            scratch_shapes=[pltpu.VMEM((Dc * Hc, Wout), jnp.float32)]),
        compiler_params=pltpu.CompilerParams(
            dimension_semantics=("parallel", "arbitrary")),
    )(c, wwT, wh, wd, dvals)

    return pred.reshape(B, 1, Hout, Wout)


# ---------------------------------------------------------------------------
# Pure-JAX reference (f32, HIGHEST precision) for a sanity check
# ---------------------------------------------------------------------------
def reference_tail(cost_agg, w1, b1, gamma, beta, w2, max_disp, out_h, out_w):
    hp = jax.lax.Precision.HIGHEST
    B, C, Dc, Hc, Wc = cost_agg.shape
    x = jnp.transpose(cost_agg, (0, 2, 3, 4, 1))                 # NDHWC
    k1 = jnp.transpose(w1, (2, 3, 4, 1, 0))                      # DHWIO
    dn1 = jax.lax.conv_dimension_numbers(x.shape, k1.shape, ('NDHWC', 'DHWIO', 'NDHWC'))
    y = jax.lax.conv_general_dilated(x, k1, (1, 1, 1), 'SAME',
                                     dimension_numbers=dn1, precision=hp) + b1
    mean = jnp.mean(y, axis=(0, 1, 2, 3))
    var = jnp.mean(jnp.square(y - mean), axis=(0, 1, 2, 3))
    y = (y - mean) * jax.lax.rsqrt(var + BN_EPS) * gamma + beta
    y = jnp.maximum(y, 0.0)
    k2 = jnp.transpose(w2, (2, 3, 4, 1, 0))
    dn2 = jax.lax.conv_dimension_numbers(y.shape, k2.shape, ('NDHWC', 'DHWIO', 'NDHWC'))
    c = jax.lax.conv_general_dilated(y, k2, (1, 1, 1), 'SAME',
                                     dimension_numbers=dn2, precision=hp)[..., 0]
    wd = jnp.asarray(linear_interp_matrix(max_disp, Dc))
    wh = jnp.asarray(linear_interp_matrix(out_h, Hc))
    ww = jnp.asarray(linear_interp_matrix(out_w, Wc))
    u = jnp.einsum('Dd,bdhw->bDhw', wd, c, precision=hp)
    u = jnp.einsum('Yh,bDhw->bDYw', wh, u, precision=hp)
    u = jnp.einsum('Xw,bDYw->bDYX', ww, u, precision=hp)
    p = jax.nn.softmax(u, axis=1)
    disp = jnp.arange(max_disp, dtype=jnp.float32)
    return jnp.sum(p * disp[None, :, None, None, None][:, :, :, 0, :], axis=1, keepdims=True) \
        if False else jnp.sum(p * disp[None, :, None, None], axis=1, keepdims=True)


if __name__ == "__main__":
    B = 2
    C = 32                    # inplanes of Classifier / HourGlass
    max_disp = 16
    H, W = 32, 32             # left/right image spatial size (defines the output size)
    Hc, Wc = H // 8, W // 8   # FeatureExtract downsamples by 8
    Dc = max_disp // 8        # CostVolumeGWC(max_disp / 8, 32)

    key = jax.random.PRNGKey(0)
    ks = jax.random.split(key, 6)
    # Classifier parameters (PyTorch Conv3d layout [Cout, Cin, kD, kH, kW])
    w1 = 0.05 * jax.random.normal(ks[0], (C, C, 3, 3, 3), jnp.float32)
    b1 = 0.05 * jax.random.normal(ks[1], (C,), jnp.float32)
    gamma = 1.0 + 0.1 * jax.random.normal(ks[2], (C,), jnp.float32)
    beta = 0.1 * jax.random.normal(ks[3], (C,), jnp.float32)
    w2 = 0.05 * jax.random.normal(ks[4], (1, C, 3, 3, 3), jnp.float32)

    # Stand-in for the (unspecified) FeatureExtract + CostVolumeGWC + HourGlass output.
    cost_agg = jax.random.normal(ks[5], (B, C, Dc, Hc, Wc), jnp.float32)

    pred = jax.block_until_ready(
        efficient_stereo_tail(cost_agg, (w1, b1, gamma, beta, w2), max_disp, H, W))
    ref = jax.block_until_ready(
        reference_tail(cost_agg, w1, b1, gamma, beta, w2, max_disp, H, W))

    assert pred.shape == (B, 1, H, W), pred.shape
    assert bool(jnp.all(jnp.isfinite(pred)))
    # kernel path uses bf16 MXU operands (f32 accumulation) -> loose but meaningful tolerance
    np.testing.assert_allclose(np.asarray(pred), np.asarray(ref), rtol=5e-2, atol=1e-1)
    print("KERNEL_OK")
</pallas_src>

<mosaic_0001>
module attributes {stable_mosaic.version = 11 : i64} {
  func.func @kernel(%arg0: i32, %arg1: memref<1x230x32xf32, #tpu.memory_space<vmem>>, %arg2: memref<27x32x32xbf16, #tpu.memory_space<vmem>>, %arg3: memref<230x1xf32, #tpu.memory_space<vmem>>, %arg4: memref<1x230x32xf32, #tpu.memory_space<vmem>>, %arg5: memref<1x32xf32, #tpu.memory_space<vmem>>, %arg6: memref<1x32xf32, #tpu.memory_space<vmem>>) attributes {dimension_semantics = [#tpu.dimension_semantics<arbitrary>], iteration_bounds = array<i64: 2>, scalar_prefetch = 0 : i64, scratch_operands = 0 : i64, tpu.core_type = #tpu.core_type<tc>, window_params = [{transform_indices = @transform_0, window_bounds = array<i64: 1, 230, 32>}, {pipeline_mode = #tpu.pipeline_mode<synchronous>, transform_indices = @transform_1, window_bounds = array<i64: 27, 32, 32>}, {pipeline_mode = #tpu.pipeline_mode<synchronous>, transform_indices = @transform_2, window_bounds = array<i64: 230, 1>}, {transform_indices = @transform_3, window_bounds = array<i64: 1, 230, 32>}, {pipeline_mode = #tpu.pipeline_mode<synchronous>, transform_indices = @transform_4, window_bounds = array<i64: 1, 32>}, {pipeline_mode = #tpu.pipeline_mode<synchronous>, transform_indices = @transform_5, window_bounds = array<i64: 1, 32>}]} {
    %c0_i32 = arith.constant 0 : i32
    %0 = arith.cmpi eq, %arg0, %c0_i32 : i32
    %1 = arith.extui %0 : i1 to i32
    %c0_i32_0 = arith.constant 0 : i32
    %2 = arith.cmpi ne, %1, %c0_i32_0 : i32
    scf.if %2 {
      %cst_101 = arith.constant 0.000000e+00 : f32
      %187 = vector.broadcast %cst_101 : f32 to vector<1x32xf32>
      %c0_102 = arith.constant 0 : index
      %c0_103 = arith.constant 0 : index
      %188 = vector.load %arg5[%c0_102, %c0_103] : memref<1x32xf32, #tpu.memory_space<vmem>>, vector<1x32xf32>
      tpu.vector_store %arg5[%c0_102, %c0_103], %187 {strides = array<i32>} : memref<1x32xf32, #tpu.memory_space<vmem>>, vector<1x32xf32>,
      %cst_104 = arith.constant 0.000000e+00 : f32
      %189 = vector.broadcast %cst_104 : f32 to vector<1x32xf32>
      %c0_105 = arith.constant 0 : index
      %c0_106 = arith.constant 0 : index
      %190 = vector.load %arg6[%c0_105, %c0_106] : memref<1x32xf32, #tpu.memory_space<vmem>>, vector<1x32xf32>
      tpu.vector_store %arg6[%c0_105, %c0_106], %189 {strides = array<i32>} : memref<1x32xf32, #tpu.memory_space<vmem>>, vector<1x32xf32>,
    } else {
    }
    %c0 = arith.constant 0 : index
    %c0_1 = arith.constant 0 : index
    %c0_2 = arith.constant 0 : index
    %3 = vector.load %arg1[%c0, %c0_1, %c0_2] : memref<1x230x32xf32, #tpu.memory_space<vmem>>, vector<1x230x32xf32>
    %4 = vector.shape_cast %3 : vector<1x230x32xf32> to vector<230x32xf32>
    %cst = arith.constant 0.000000e+00 : f32
    %5 = vector.broadcast %cst : f32 to vector<144x32xf32>
    %6 = vector.extract_strided_slice %4 {offsets = [0, 0], sizes = [144, 32], strides = [1, 1]} : vector<230x32xf32> to vector<144x32xf32>
    %7 = arith.truncf %6 : vector<144x32xf32> to vector<144x32xbf16>
    %c0_3 = arith.constant 0 : index
    %c0_4 = arith.constant 0 : index
    %c0_5 = arith.constant 0 : index
    %8 = vector.load %arg2[%c0_3, %c0_4, %c0_5] : memref<27x32x32xbf16, #tpu.memory_space<vmem>>, vector<1x32x32xbf16>
    %9 = vector.shape_cast %8 : vector<1x32x32xbf16> to vector<32x32xbf16>
    %cst_6 = arith.constant dense<0.000000e+00> : vector<144x32xf32>
    %10 = tpu.matmul %7, %9, %cst_6 {dimension_numbers = #tpu.dot_dimension_numbers<[1], [0], [0], [1], [0, 0, 1, 1], [], []>} : vector<144x32xbf16>, vector<32x32xbf16>, vector<144x32xf32> -> vector<144x32xf32>
    %11 = arith.addf %5, %10 : vector<144x32xf32>
    %12 = vector.extract_strided_slice %4 {offsets = [1, 0], sizes = [144, 32], strides = [1, 1]} : vector<230x32xf32> to vector<144x32xf32>
    %13 = arith.truncf %12 : vector<144x32xf32> to vector<144x32xbf16>
    %c1 = arith.constant 1 : index
    %c0_7 = arith.constant 0 : index
    %c0_8 = arith.constant 0 : index
    %14 = vector.load %arg2[%c1, %c0_7, %c0_8] : memref<27x32x32xbf16, #tpu.memory_space<vmem>>, vector<1x32x32xbf16>
    %15 = vector.shape_cast %14 : vector<1x32x32xbf16> to vector<32x32xbf16>
    %cst_9 = arith.constant dense<0.000000e+00> : vector<144x32xf32>
    %16 = tpu.matmul %13, %15, %cst_9 {dimension_numbers = #tpu.dot_dimension_numbers<[1], [0], [0], [1], [0, 0, 1, 1], [], []>} : vector<144x32xbf16>, vector<32x32xbf16>, vector<144x32xf32> -> vector<144x32xf32>
    %17 = arith.addf %11, %16 : vector<144x32xf32>
    %18 = vector.extract_strided_slice %4 {offsets = [2, 0], sizes = [144, 32], strides = [1, 1]} : vector<230x32xf32> to vector<144x32xf32>
    %19 = arith.truncf %18 : vector<144x32xf32> to vector<144x32xbf16>
    %c2 = arith.constant 2 : index
    %c0_10 = arith.constant 0 : index
    %c0_11 = arith.constant 0 : index
    %20 = vector.load %arg2[%c2, %c0_10, %c0_11] : memref<27x32x32xbf16, #tpu.memory_space<vmem>>, vector<1x32x32xbf16>
    %21 = vector.shape_cast %20 : vector<1x32x32xbf16> to vector<32x32xbf16>
    %cst_12 = arith.constant dense<0.000000e+00> : vector<144x32xf32>
    %22 = tpu.matmul %19, %21, %cst_12 {dimension_numbers = #tpu.dot_dimension_numbers<[1], [0], [0], [1], [0, 0, 1, 1], [], []>} : vector<144x32xbf16>, vector<32x32xbf16>, vector<144x32xf32> -> vector<144x32xf32>
    %23 = arith.addf %17, %22 : vector<144x32xf32>
    %24 = vector.extract_strided_slice %4 {offsets = [6, 0], sizes = [144, 32], strides = [1, 1]} : vector<230x32xf32> to vector<144x32xf32>
    %25 = arith.truncf %24 : vector<144x32xf32> to vector<144x32xbf16>
    %c3 = arith.constant 3 : index
    %c0_13 = arith.constant 0 : index
    %c0_14 = arith.constant 0 : index
    %26 = vector.load %arg2[%c3, %c0_13, %c0_14] : memref<27x32x32xbf16, #tpu.memory_space<vmem>>, vector<1x32x32xbf16>
    %27 = vector.shape_cast %26 : vector<1x32x32xbf16> to vector<32x32xbf16>
    %cst_15 = arith.constant dense<0.000000e+00> : vector<144x32xf32>
    %28 = tpu.matmul %25, %27, %cst_15 {dimension_numbers = #tpu.dot_dimension_numbers<[1], [0], [0], [1], [0, 0, 1, 1], [], []>} : vector<144x32xbf16>, vector<32x32xbf16>, vector<144x32xf32> -> vector<144x32xf32>
    %29 = arith.addf %23, %28 : vector<144x32xf32>
    %30 = vector.extract_strided_slice %4 {offsets = [7, 0], sizes = [144, 32], strides = [1, 1]} : vector<230x32xf32> to vector<144x32xf32>
    %31 = arith.truncf %30 : vector<144x32xf32> to vector<144x32xbf16>
    %c4 = arith.constant 4 : index
    %c0_16 = arith.constant 0 : index
    %c0_17 = arith.constant 0 : index
    %32 = vector.load %arg2[%c4, %c0_16, %c0_17] : memref<27x32x32xbf16, #tpu.memory_space<vmem>>, vector<1x32x32xbf16>
    %33 = vector.shape_cast %32 : vector<1x32x32xbf16> to vector<32x32xbf16>
    %cst_18 = arith.constant dense<0.000000e+00> : vector<144x32xf32>
    %34 = tpu.matmul %31, %33, %cst_18 {dimension_numbers = #tpu.dot_dimension_numbers<[1], [0], [0], [1], [0, 0, 1, 1], [], []>} : vector<144x32xbf16>, vector<32x32xbf16>, vector<144x32xf32> -> vector<144x32xf32>
    %35 = arith.addf %29, %34 : vector<144x32xf32>
    %36 = vector.extract_strided_slice %4 {offsets = [8, 0], sizes = [144, 32], strides = [1, 1]} : vector<230x32xf32> to vector<144x32xf32>
    %37 = arith.truncf %36 : vector<144x32xf32> to vector<144x32xbf16>
    %c5 = arith.constant 5 : index
    %c0_19 = arith.constant 0 : index
    %c0_20 = arith.constant 0 : index
    %38 = vector.load %arg2[%c5, %c0_19, %c0_20] : memref<27x32x32xbf16, #tpu.memory_space<vmem>>, vector<1x32x32xbf16>
    %39 = vector.shape_cast %38 : vector<1x32x32xbf16> to vector<32x32xbf16>
    %cst_21 = arith.constant dense<0.000000e+00> : vector<144x32xf32>
    %40 = tpu.matmul %37, %39, %cst_21 {dimension_numbers = #tpu.dot_dimension_numbers<[1], [0], [0], [1], [0, 0, 1, 1], [], []>} : vector<144x32xbf16>, vector<32x32xbf16>, vector<144x32xf32> -> vector<144x32xf32>
    %41 = arith.addf %35, %40 : vector<144x32xf32>
    %42 = vector.extract_strided_slice %4 {offsets = [12, 0], sizes = [144, 32], strides = [1, 1]} : vector<230x32xf32> to vector<144x32xf32>
    %43 = arith.truncf %42 : vector<144x32xf32> to vector<144x32xbf16>
    %c6 = arith.constant 6 : index
    %c0_22 = arith.constant 0 : index
    %c0_23 = arith.constant 0 : index
    %44 = vector.load %arg2[%c6, %c0_22, %c0_23] : memref<27x32x32xbf16, #tpu.memory_space<vmem>>, vector<1x32x32xbf16>
    %45 = vector.shape_cast %44 : vector<1x32x32xbf16> to vector<32x32xbf16>
    %cst_24 = arith.constant dense<0.000000e+00> : vector<144x32xf32>
    %46 = tpu.matmul %43, %45, %cst_24 {dimension_numbers = #tpu.dot_dimension_numbers<[1], [0], [0], [1], [0, 0, 1, 1], [], []>} : vector<144x32xbf16>, vector<32x32xbf16>, vector<144x32xf32> -> vector<144x32xf32>
    %47 = arith.addf %41, %46 : vector<144x32xf32>
    %48 = vector.extract_strided_slice %4 {offsets = [13, 0], sizes = [144, 32], strides = [1, 1]} : vector<230x32xf32> to vector<144x32xf32>
    %49 = arith.truncf %48 : vector<144x32xf32> to vector<144x32xbf16>
    %c7 = arith.constant 7 : index
    %c0_25 = arith.constant 0 : index
    %c0_26 = arith.constant 0 : index
    %50 = vector.load %arg2[%c7, %c0_25, %c0_26] : memref<27x32x32xbf16, #tpu.memory_space<vmem>>, vector<1x32x32xbf16>
    %51 = vector.shape_cast %50 : vector<1x32x32xbf16> to vector<32x32xbf16>
    %cst_27 = arith.constant dense<0.000000e+00> : vector<144x32xf32>
    %52 = tpu.matmul %49, %51, %cst_27 {dimension_numbers = #tpu.dot_dimension_numbers<[1], [0], [0], [1], [0, 0, 1, 1], [], []>} : vector<144x32xbf16>, vector<32x32xbf16>, vector<144x32xf32> -> vector<144x32xf32>
    %53 = arith.addf %47, %52 : vector<144x32xf32>
    %54 = vector.extract_strided_slice %4 {offsets = [14, 0], sizes = [144, 32], strides = [1, 1]} : vector<230x32xf32> to vector<144x32xf32>
    %55 = arith.truncf %54 : vector<144x32xf32> to vector<144x32xbf16>
    %c8 = arith.constant 8 : index
    %c0_28 = arith.constant 0 : index
    %c0_29 = arith.constant 0 : index
    %56 = vector.load %arg2[%c8, %c0_28, %c0_29] : memref<27x32x32xbf16, #tpu.memory_space<vmem>>, vector<1x32x32xbf16>
    %57 = vector.shape_cast %56 : vector<1x32x32xbf16> to vector<32x32xbf16>
    %cst_30 = arith.constant dense<0.000000e+00> : vector<144x32xf32>
    %58 = tpu.matmul %55, %57, %cst_30 {dimension_numbers = #tpu.dot_dimension_numbers<[1], [0], [0], [1], [0, 0, 1, 1], [], []>} : vector<144x32xbf16>, vector<32x32xbf16>, vector<144x32xf32> -> vector<144x32xf32>
    %59 = arith.addf %53, %58 : vector<144x32xf32>
    %60 = vector.extract_strided_slice %4 {offsets = [36, 0], sizes = [144, 32], strides = [1, 1]} : vector<230x32xf32> to vector<144x32xf32>
    %61 = arith.truncf %60 : vector<144x32xf32> to vector<144x32xbf16>
    %c9 = arith.constant 9 : index
    %c0_31 = arith.constant 0 : index
    %c0_32 = arith.constant 0 : index
    %62 = vector.load %arg2[%c9, %c0_31, %c0_32] : memref<27x32x32xbf16, #tpu.memory_space<vmem>>, vector<1x32x32xbf16>
    %63 = vector.shape_cast %62 : vector<1x32x32xbf16> to vector<32x32xbf16>
    %cst_33 = arith.constant dense<0.000000e+00> : vector<144x32xf32>
    %64 = tpu.matmul %61, %63, %cst_33 {dimension_numbers = #tpu.dot_dimension_numbers<[1], [0], [0], [1], [0, 0, 1, 1], [], []>} : vector<144x32xbf16>, vector<32x32xbf16>, vector<144x32xf32> -> vector<144x32xf32>
    %65 = arith.addf %59, %64 : vector<144x32xf32>
    %66 = vector.extract_strided_slice %4 {offsets = [37, 0], sizes = [144, 32], strides = [1, 1]} : vector<230x32xf32> to vector<144x32xf32>
    %67 = arith.truncf %66 : vector<144x32xf32> to vector<144x32xbf16>
    %c10 = arith.constant 10 : index
    %c0_34 = arith.constant 0 : index
    %c0_35 = arith.constant 0 : index
    %68 = vector.load %arg2[%c10, %c0_34, %c0_35] : memref<27x32x32xbf16, #tpu.memory_space<vmem>>, vector<1x32x32xbf16>
    %69 = vector.shape_cast %68 : vector<1x32x32xbf16> to vector<32x32xbf16>
    %cst_36 = arith.constant dense<0.000000e+00> : vector<144x32xf32>
    %70 = tpu.matmul %67, %69, %cst_36 {dimension_numbers = #tpu.dot_dimension_numbers<[1], [0], [0], [1], [0, 0, 1, 1], [], []>} : vector<144x32xbf16>, vector<32x32xbf16>, vector<144x32xf32> -> vector<144x32xf32>
    %71 = arith.addf %65, %70 : vector<144x32xf32>
    %72 = vector.extract_strided_slice %4 {offsets = [38, 0], sizes = [144, 32], strides = [1, 1]} : vector<230x32xf32> to vector<144x32xf32>
    %73 = arith.truncf %72 : vector<144x32xf32> to vector<144x32xbf16>
    %c11 = arith.constant 11 : index
    %c0_37 = arith.constant 0 : index
    %c0_38 = arith.constant 0 : index
    %74 = vector.load %arg2[%c11, %c0_37, %c0_38] : memref<27x32x32xbf16, #tpu.memory_space<vmem>>, vector<1x32x32xbf16>
    %75 = vector.shape_cast %74 : vector<1x32x32xbf16> to vector<32x32xbf16>
    %cst_39 = arith.constant dense<0.000000e+00> : vector<144x32xf32>
    %76 = tpu.matmul %73, %75, %cst_39 {dimension_numbers = #tpu.dot_dimension_numbers<[1], [0], [0], [1], [0, 0, 1, 1], [], []>} : vector<144x32xbf16>, vector<32x32xbf16>, vector<144x32xf32> -> vector<144x32xf32>
    %77 = arith.addf %71, %76 : vector<144x32xf32>
    %78 = vector.extract_strided_slice %4 {offsets = [42, 0], sizes = [144, 32], strides = [1, 1]} : vector<230x32xf32> to vector<144x32xf32>
    %79 = arith.truncf %78 : vector<144x32xf32> to vector<144x32xbf16>
    %c12 = arith.constant 12 : index
    %c0_40 = arith.constant 0 : index
    %c0_41 = arith.constant 0 : index
    %80 = vector.load %arg2[%c12, %c0_40, %c0_41] : memref<27x32x32xbf16, #tpu.memory_space<vmem>>, vector<1x32x32xbf16>
    %81 = vector.shape_cast %80 : vector<1x32x32xbf16> to vector<32x32xbf16>
    %cst_42 = arith.constant dense<0.000000e+00> : vector<144x32xf32>
    %82 = tpu.matmul %79, %81, %cst_42 {dimension_numbers = #tpu.dot_dimension_numbers<[1], [0], [0], [1], [0, 0, 1, 1], [], []>} : vector<144x32xbf16>, vector<32x32xbf16>, vector<144x32xf32> -> vector<144x32xf32>
    %83 = arith.addf %77, %82 : vector<144x32xf32>
    %84 = vector.extract_strided_slice %4 {offsets = [43, 0], sizes = [144, 32], strides = [1, 1]} : vector<230x32xf32> to vector<144x32xf32>
    %85 = arith.truncf %84 : vector<144x32xf32> to vector<144x32xbf16>
    %c13 = arith.constant 13 : index
    %c0_43 = arith.constant 0 : index
    %c0_44 = arith.constant 0 : index
    %86 = vector.load %arg2[%c13, %c0_43, %c0_44] : memref<27x32x32xbf16, #tpu.memory_space<vmem>>, vector<1x32x32xbf16>
    %87 = vector.shape_cast %86 : vector<1x32x32xbf16> to vector<32x32xbf16>
    %cst_45 = arith.constant dense<0.000000e+00> : vector<144x32xf32>
    %88 = tpu.matmul %85, %87, %cst_45 {dimension_numbers = #tpu.dot_dimension_numbers<[1], [0], [0], [1], [0, 0, 1, 1], [], []>} : vector<144x32xbf16>, vector<32x32xbf16>, vector<144x32xf32> -> vector<144x32xf32>
    %89 = arith.addf %83, %88 : vector<144x32xf32>
    %90 = vector.extract_strided_slice %4 {offsets = [44, 0], sizes = [144, 32], strides = [1, 1]} : vector<230x32xf32> to vector<144x32xf32>
    %91 = arith.truncf %90 : vector<144x32xf32> to vector<144x32xbf16>
    %c14 = arith.constant 14 : index
    %c0_46 = arith.constant 0 : index
    %c0_47 = arith.constant 0 : index
    %92 = vector.load %arg2[%c14, %c0_46, %c0_47] : memref<27x32x32xbf16, #tpu.memory_space<vmem>>, vector<1x32x32xbf16>
    %93 = vector.shape_cast %92 : vector<1x32x32xbf16> to vector<32x32xbf16>
    %cst_48 = arith.constant dense<0.000000e+00> : vector<144x32xf32>
    %94 = tpu.matmul %91, %93, %cst_48 {dimension_numbers = #tpu.dot_dimension_numbers<[1], [0], [0], [1], [0, 0, 1, 1], [], []>} : vector<144x32xbf16>, vector<32x32xbf16>, vector<144x32xf32> -> vector<144x32xf32>
    %95 = arith.addf %89, %94 : vector<144x32xf32>
    %96 = vector.extract_strided_slice %4 {offsets = [48, 0], sizes = [144, 32], strides = [1, 1]} : vector<230x32xf32> to vector<144x32xf32>
    %97 = arith.truncf %96 : vector<144x32xf32> to vector<144x32xbf16>
    %c15 = arith.constant 15 : index
    %c0_49 = arith.constant 0 : index
    %c0_50 = arith.constant 0 : index
    %98 = vector.load %arg2[%c15, %c0_49, %c0_50] : memref<27x32x32xbf16, #tpu.memory_space<vmem>>, vector<1x32x32xbf16>
    %99 = vector.shape_cast %98 : vector<1x32x32xbf16> to vector<32x32xbf16>
    %cst_51 = arith.constant dense<0.000000e+00> : vector<144x32xf32>
    %100 = tpu.matmul %97, %99, %cst_51 {dimension_numbers = #tpu.dot_dimension_numbers<[1], [0], [0], [1], [0, 0, 1, 1], [], []>} : vector<144x32xbf16>, vector<32x32xbf16>, vector<144x32xf32> -> vector<144x32xf32>
    %101 = arith.addf %95, %100 : vector<144x32xf32>
    %102 = vector.extract_strided_slice %4 {offsets = [49, 0], sizes = [144, 32], strides = [1, 1]} : vector<230x32xf32> to vector<144x32xf32>
    %103 = arith.truncf %102 : vector<144x32xf32> to vector<144x32xbf16>
    %c16 = arith.constant 16 : index
    %c0_52 = arith.constant 0 : index
    %c0_53 = arith.constant 0 : index
    %104 = vector.load %arg2[%c16, %c0_52, %c0_53] : memref<27x32x32xbf16, #tpu.memory_space<vmem>>, vector<1x32x32xbf16>
    %105 = vector.shape_cast %104 : vector<1x32x32xbf16> to vector<32x32xbf16>
    %cst_54 = arith.constant dense<0.000000e+00> : vector<144x32xf32>
    %106 = tpu.matmul %103, %105, %cst_54 {dimension_numbers = #tpu.dot_dimension_numbers<[1], [0], [0], [1], [0, 0, 1, 1], [], []>} : vector<144x32xbf16>, vector<32x32xbf16>, vector<144x32xf32> -> vector<144x32xf32>
    %107 = arith.addf %101, %106 : vector<144x32xf32>
    %108 = vector.extract_strided_slice %4 {offsets = [50, 0], sizes = [144, 32], strides = [1, 1]} : vector<230x32xf32> to vector<144x32xf32>
    %109 = arith.truncf %108 : vector<144x32xf32> to vector<144x32xbf16>
    %c17 = arith.constant 17 : index
    %c0_55 = arith.constant 0 : index
    %c0_56 = arith.constant 0 : index
    %110 = vector.load %arg2[%c17, %c0_55, %c0_56] : memref<27x32x32xbf16, #tpu.memory_space<vmem>>, vector<1x32x32xbf16>
    %111 = vector.shape_cast %110 : vector<1x32x32xbf16> to vector<32x32xbf16>
    %cst_57 = arith.constant dense<0.000000e+00> : vector<144x32xf32>
    %112 = tpu.matmul %109, %111, %cst_57 {dimension_numbers = #tpu.dot_dimension_numbers<[1], [0], [0], [1], [0, 0, 1, 1], [], []>} : vector<144x32xbf16>, vector<32x32xbf16>, vector<144x32xf32> -> vector<144x32xf32>
    %113 = arith.addf %107, %112 : vector<144x32xf32>
    %114 = vector.extract_strided_slice %4 {offsets = [72, 0], sizes = [144, 32], strides = [1, 1]} : vector<230x32xf32> to vector<144x32xf32>
    %115 = arith.truncf %114 : vector<144x32xf32> to vector<144x32xbf16>
    %c18 = arith.constant 18 : index
    %c0_58 = arith.constant 0 : index
    %c0_59 = arith.constant 0 : index
    %116 = vector.load %arg2[%c18, %c0_58, %c0_59] : memref<27x32x32xbf16, #tpu.memory_space<vmem>>, vector<1x32x32xbf16>
    %117 = vector.shape_cast %116 : vector<1x32x32xbf16> to vector<32x32xbf16>
    %cst_60 = arith.constant dense<0.000000e+00> : vector<144x32xf32>
    %118 = tpu.matmul %115, %117, %cst_60 {dimension_numbers = #tpu.dot_dimension_numbers<[1], [0], [0], [1], [0, 0, 1, 1], [], []>} : vector<144x32xbf16>, vector<32x32xbf16>, vector<144x32xf32> -> vector<144x32xf32>
    %119 = arith.addf %113, %118 : vector<144x32xf32>
    %120 = vector.extract_strided_slice %4 {offsets = [73, 0], sizes = [144, 32], strides = [1, 1]} : vector<230x32xf32> to vector<144x32xf32>
    %121 = arith.truncf %120 : vector<144x32xf32> to vector<144x32xbf16>
    %c19 = arith.constant 19 : index
    %c0_61 = arith.constant 0 : index
    %c0_62 = arith.constant 0 : index
    %122 = vector.load %arg2[%c19, %c0_61, %c0_62] : memref<27x32x32xbf16, #tpu.memory_space<vmem>>, vector<1x32x32xbf16>
    %123 = vector.shape_cast %122 : vector<1x32x32xbf16> to vector<32x32xbf16>
    %cst_63 = arith.constant dense<0.000000e+00> : vector<144x32xf32>
    %124 = tpu.matmul %121, %123, %cst_63 {dimension_numbers = #tpu.dot_dimension_numbers<[1], [0], [0], [1], [0, 0, 1, 1], [], []>} : vector<144x32xbf16>, vector<32x32xbf16>, vector<144x32xf32> -> vector<144x32xf32>
    %125 = arith.addf %119, %124 : vector<144x32xf32>
    %126 = vector.extract_strided_slice %4 {offsets = [74, 0], sizes = [144, 32], strides = [1, 1]} : vector<230x32xf32> to vector<144x32xf32>
    %127 = arith.truncf %126 : vector<144x32xf32> to vector<144x32xbf16>
    %c20 = arith.constant 20 : index
    %c0_64 = arith.constant 0 : index
    %c0_65 = arith.constant 0 : index
    %128 = vector.load %arg2[%c20, %c0_64, %c0_65] : memref<27x32x32xbf16, #tpu.memory_space<vmem>>, vector<1x32x32xbf16>
    %129 = vector.shape_cast %128 : vector<1x32x32xbf16> to vector<32x32xbf16>
    %cst_66 = arith.constant dense<0.000000e+00> : vector<144x32xf32>
    %130 = tpu.matmul %127, %129, %cst_66 {dimension_numbers = #tpu.dot_dimension_numbers<[1], [0], [0], [1], [0, 0, 1, 1], [], []>} : vector<144x32xbf16>, vector<32x32xbf16>, vector<144x32xf32> -> vector<144x32xf32>
    %131 = arith.addf %125, %130 : vector<144x32xf32>
    %132 = vector.extract_strided_slice %4 {offsets = [78, 0], sizes = [144, 32], strides = [1, 1]} : vector<230x32xf32> to vector<144x32xf32>
    %133 = arith.truncf %132 : vector<144x32xf32> to vector<144x32xbf16>
    %c21 = arith.constant 21 : index
    %c0_67 = arith.constant 0 : index
    %c0_68 = arith.constant 0 : index
    %134 = vector.load %arg2[%c21, %c0_67, %c0_68] : memref<27x32x32xbf16, #tpu.memory_space<vmem>>, vector<1x32x32xbf16>
    %135 = vector.shape_cast %134 : vector<1x32x32xbf16> to vector<32x32xbf16>
    %cst_69 = arith.constant dense<0.000000e+00> : vector<144x32xf32>
    %136 = tpu.matmul %133, %135, %cst_69 {dimension_numbers = #tpu.dot_dimension_numbers<[1], [0], [0], [1], [0, 0, 1, 1], [], []>} : vector<144x32xbf16>, vector<32x32xbf16>, vector<144x32xf32> -> vector<144x32xf32>
    %137 = arith.addf %131, %136 : vector<144x32xf32>
    %138 = vector.extract_strided_slice %4 {offsets = [79, 0], sizes = [144, 32], strides = [1, 1]} : vector<230x32xf32> to vector<144x32xf32>
    %139 = arith.truncf %138 : vector<144x32xf32> to vector<144x32xbf16>
    %c22 = arith.constant 22 : index
    %c0_70 = arith.constant 0 : index
    %c0_71 = arith.constant 0 : index
    %140 = vector.load %arg2[%c22, %c0_70, %c0_71] : memref<27x32x32xbf16, #tpu.memory_space<vmem>>, vector<1x32x32xbf16>
    %141 = vector.shape_cast %140 : vector<1x32x32xbf16> to vector<32x32xbf16>
    %cst_72 = arith.constant dense<0.000000e+00> : vector<144x32xf32>
    %142 = tpu.matmul %139, %141, %cst_72 {dimension_numbers = #tpu.dot_dimension_numbers<[1], [0], [0], [1], [0, 0, 1, 1], [], []>} : vector<144x32xbf16>, vector<32x32xbf16>, vector<144x32xf32> -> vector<144x32xf32>
    %143 = arith.addf %137, %142 : vector<144x32xf32>
    %144 = vector.extract_strided_slice %4 {offsets = [80, 0], sizes = [144, 32], strides = [1, 1]} : vector<230x32xf32> to vector<144x32xf32>
    %145 = arith.truncf %144 : vector<144x32xf32> to vector<144x32xbf16>
    %c23 = arith.constant 23 : index
    %c0_73 = arith.constant 0 : index
    %c0_74 = arith.constant 0 : index
    %146 = vector.load %arg2[%c23, %c0_73, %c0_74] : memref<27x32x32xbf16, #tpu.memory_space<vmem>>, vector<1x32x32xbf16>
    %147 = vector.shape_cast %146 : vector<1x32x32xbf16> to vector<32x32xbf16>
    %cst_75 = arith.constant dense<0.000000e+00> : vector<144x32xf32>
    %148 = tpu.matmul %145, %147, %cst_75 {dimension_numbers = #tpu.dot_dimension_numbers<[1], [0], [0], [1], [0, 0, 1, 1], [], []>} : vector<144x32xbf16>, vector<32x32xbf16>, vector<144x32xf32> -> vector<144x32xf32>
    %149 = arith.addf %143, %148 : vector<144x32xf32>
    %150 = vector.extract_strided_slice %4 {offsets = [84, 0], sizes = [144, 32], strides = [1, 1]} : vector<230x32xf32> to vector<144x32xf32>
    %151 = arith.truncf %150 : vector<144x32xf32> to vector<144x32xbf16>
    %c24 = arith.constant 24 : index
    %c0_76 = arith.constant 0 : index
    %c0_77 = arith.constant 0 : index
    %152 = vector.load %arg2[%c24, %c0_76, %c0_77] : memref<27x32x32xbf16, #tpu.memory_space<vmem>>, vector<1x32x32xbf16>
    %153 = vector.shape_cast %152 : vector<1x32x32xbf16> to vector<32x32xbf16>
    %cst_78 = arith.constant dense<0.000000e+00> : vector<144x32xf32>
    %154 = tpu.matmul %151, %153, %cst_78 {dimension_numbers = #tpu.dot_dimension_numbers<[1], [0], [0], [1], [0, 0, 1, 1], [], []>} : vector<144x32xbf16>, vector<32x32xbf16>, vector<144x32xf32> -> vector<144x32xf32>
    %155 = arith.addf %149, %154 : vector<144x32xf32>
    %156 = vector.extract_strided_slice %4 {offsets = [85, 0], sizes = [144, 32], strides = [1, 1]} : vector<230x32xf32> to vector<144x32xf32>
    %157 = arith.truncf %156 : vector<144x32xf32> to vector<144x32xbf16>
    %c25 = arith.constant 25 : index
    %c0_79 = arith.constant 0 : index
    %c0_80 = arith.constant 0 : index
    %158 = vector.load %arg2[%c25, %c0_79, %c0_80] : memref<27x32x32xbf16, #tpu.memory_space<vmem>>, vector<1x32x32xbf16>
    %159 = vector.shape_cast %158 : vector<1x32x32xbf16> to vector<32x32xbf16>
    %cst_81 = arith.constant dense<0.000000e+00> : vector<144x32xf32>
    %160 = tpu.matmul %157, %159, %cst_81 {dimension_numbers = #tpu.dot_dimension_numbers<[1], [0], [0], [1], [0, 0, 1, 1], [], []>} : vector<144x32xbf16>, vector<32x32xbf16>, vector<144x32xf32> -> vector<144x32xf32>
    %161 = arith.addf %155, %160 : vector<144x32xf32>
    %162 = vector.extract_strided_slice %4 {offsets = [86, 0], sizes = [144, 32], strides = [1, 1]} : vector<230x32xf32> to vector<144x32xf32>
    %163 = arith.truncf %162 : vector<144x32xf32> to vector<144x32xbf16>
    %c26 = arith.constant 26 : index
    %c0_82 = arith.constant 0 : index
    %c0_83 = arith.constant 0 : index
    %164 = vector.load %arg2[%c26, %c0_82, %c0_83] : memref<27x32x32xbf16, #tpu.memory_space<vmem>>, vector<1x32x32xbf16>
    %165 = vector.shape_cast %164 : vector<1x32x32xbf16> to vector<32x32xbf16>
    %cst_84 = arith.constant dense<0.000000e+00> : vector<144x32xf32>
    %166 = tpu.matmul %163, %165, %cst_84 {dimension_numbers = #tpu.dot_dimension_numbers<[1], [0], [0], [1], [0, 0, 1, 1], [], []>} : vector<144x32xbf16>, vector<32x32xbf16>, vector<144x32xf32> -> vector<144x32xf32>
    %167 = arith.addf %161, %166 : vector<144x32xf32>
    %c0_85 = arith.constant 0 : index
    %c0_86 = arith.constant 0 : index
    %168 = vector.load %arg3[%c0_85, %c0_86] : memref<230x1xf32, #tpu.memory_space<vmem>>, vector<230x1xf32>
    %169 = vector.extract_strided_slice %168 {offsets = [43, 0], sizes = [144, 1], strides = [1, 1]} : vector<230x1xf32> to vector<144x1xf32>
    %170 = vector.broadcast %169 : vector<144x1xf32> to vector<144x32xf32>
    %171 = arith.mulf %167, %170 : vector<144x32xf32>
    %c0_87 = arith.constant 0 : index
    %c0_88 = arith.constant 0 : index
    %172 = vector.load %arg5[%c0_87, %c0_88] : memref<1x32xf32, #tpu.memory_space<vmem>>, vector<1x32xf32>
    %cst_89 = arith.constant dense<0.000000e+00> : vector<32xf32>
    %173 = vector.multi_reduction <add>, %171, %cst_89 [0] : vector<144x32xf32> to vector<32xf32>
    %174 = vector.shape_cast %173 : vector<32xf32> to vector<1x32xf32>
    %175 = arith.addf %172, %174 : vector<1x32xf32>
    %c0_90 = arith.constant 0 : index
    %c0_91 = arith.constant 0 : index
    %176 = vector.load %arg5[%c0_90, %c0_91] : memref<1x32xf32, #tpu.memory_space<vmem>>, vector<1x32xf32>
    tpu.vector_store %arg5[%c0_90, %c0_91], %175 {strides = array<i32>} : memref<1x32xf32, #tpu.memory_space<vmem>>, vector<1x32xf32>,
    %c0_92 = arith.constant 0 : index
    %c0_93 = arith.constant 0 : index
    %177 = vector.load %arg6[%c0_92, %c0_93] : memref<1x32xf32, #tpu.memory_space<vmem>>, vector<1x32xf32>
    %178 = arith.mulf %171, %171 : vector<144x32xf32>
    %cst_94 = arith.constant dense<0.000000e+00> : vector<32xf32>
    %179 = vector.multi_reduction <add>, %178, %cst_94 [0] : vector<144x32xf32> to vector<32xf32>
    %180 = vector.shape_cast %179 : vector<32xf32> to vector<1x32xf32>
    %181 = arith.addf %177, %180 : vector<1x32xf32>
    %c0_95 = arith.constant 0 : index
    %c0_96 = arith.constant 0 : index
    %182 = vector.load %arg6[%c0_95, %c0_96] : memref<1x32xf32, #tpu.memory_space<vmem>>, vector<1x32xf32>
    tpu.vector_store %arg6[%c0_95, %c0_96], %181 {strides = array<i32>} : memref<1x32xf32, #tpu.memory_space<vmem>>, vector<1x32xf32>,
    %cst_97 = arith.constant 0.000000e+00 : f32
    %183 = vector.broadcast %cst_97 : f32 to vector<43x32xf32>
    %184 = tpu.concatenate %183, %167, %183 in 0 : vector<43x32xf32>, vector<144x32xf32>, vector<43x32xf32> -> vector<230x32xf32>
    %185 = vector.shape_cast %184 : vector<230x32xf32> to vector<1x230x32xf32>
    %c0_98 = arith.constant 0 : index
    %c0_99 = arith.constant 0 : index
    %c0_100 = arith.constant 0 : index
    %186 = vector.load %arg4[%c0_98, %c0_99, %c0_100] : memref<1x230x32xf32, #tpu.memory_space<vmem>>, vector<1x230x32xf32>
    tpu.vector_store %arg4[%c0_98, %c0_99, %c0_100], %185 {strides = array<i32>} : memref<1x230x32xf32, #tpu.memory_space<vmem>>, vector<1x230x32xf32>,
    return
  }
  func.func @transform_0(%arg0: i32) -> (i32, i32, i32) {
    %c0_i32 = arith.constant 0 : i32
    %c0_i32_0 = arith.constant 0 : i32
    %c0_i32_1 = arith.constant 0 : i32
    return %arg0, %c0_i32, %c0_i32_0 : i32, i32, i32
  }
  func.func @transform_1(%arg0: i32) -> (i32, i32, i32) {
    %c0_i32 = arith.constant 0 : i32
    %c0_i32_0 = arith.constant 0 : i32
    %c0_i32_1 = arith.constant 0 : i32
    %c0_i32_2 = arith.constant 0 : i32
    return %c0_i32, %c0_i32_0, %c0_i32_1 : i32, i32, i32
  }
  func.func @transform_2(%arg0: i32) -> (i32, i32) {
    %c0_i32 = arith.constant 0 : i32
    %c0_i32_0 = arith.constant 0 : i32
    %c0_i32_1 = arith.constant 0 : i32
    return %c0_i32, %c0_i32_0 : i32, i32
  }
  func.func @transform_3(%arg0: i32) -> (i32, i32, i32) {
    %c0_i32 = arith.constant 0 : i32
    %c0_i32_0 = arith.constant 0 : i32
    %c0_i32_1 = arith.constant 0 : i32
    return %arg0, %c0_i32, %c0_i32_0 : i32, i32, i32
  }
  func.func @transform_4(%arg0: i32) -> (i32, i32) {
    %c0_i32 = arith.constant 0 : i32
    %c0_i32_0 = arith.constant 0 : i32
    %c0_i32_1 = arith.constant 0 : i32
    return %c0_i32, %c0_i32_0 : i32, i32
  }
  func.func @transform_5(%arg0: i32) -> (i32, i32) {
    %c0_i32 = arith.constant 0 : i32
    %c0_i32_0 = arith.constant 0 : i32
    %c0_i32_1 = arith.constant 0 : i32
    return %c0_i32, %c0_i32_0 : i32, i32
  }
}

module attributes {stable_mosaic.version = 11 : i64} {
  func.func @kernel(%arg0: i32, %arg1: memref<1x230x32xf32, #tpu.memory_space<vmem>>, %arg2: memref<1x32xf32, #tpu.memory_space<vmem>>, %arg3: memref<1x32xf32, #tpu.memory_space<vmem>>, %arg4: memref<230x1xf32, #tpu.memory_space<vmem>>, %arg5: memref<27x32x1xbf16, #tpu.memory_space<vmem>>, %arg6: memref<1x144x1xf32, #tpu.memory_space<vmem>>) attributes {dimension_semantics = [#tpu.dimension_semantics<parallel>], iteration_bounds = array<i64: 2>, scalar_prefetch = 0 : i64, scratch_operands = 0 : i64, tpu.core_type = #tpu.core_type<tc>, window_params = [{transform_indices = @transform_0, window_bounds = array<i64: 1, 230, 32>}, {pipeline_mode = #tpu.pipeline_mode<synchronous>, transform_indices = @transform_1, window_bounds = array<i64: 1, 32>}, {pipeline_mode = #tpu.pipeline_mode<synchronous>, transform_indices = @transform_2, window_bounds = array<i64: 1, 32>}, {pipeline_mode = #tpu.pipeline_mode<synchronous>, transform_indices = @transform_3, window_bounds = array<i64: 230, 1>}, {pipeline_mode = #tpu.pipeline_mode<synchronous>, transform_indices = @transform_4, window_bounds = array<i64: 27, 32, 1>}, {transform_indices = @transform_5, window_bounds = array<i64: 1, 144, 1>}]} {
    %c0 = arith.constant 0 : index
    %c0_0 = arith.constant 0 : index
    %c0_1 = arith.constant 0 : index
    %0 = vector.load %arg1[%c0, %c0_0, %c0_1] : memref<1x230x32xf32, #tpu.memory_space<vmem>>, vector<1x230x32xf32>
    %1 = vector.shape_cast %0 : vector<1x230x32xf32> to vector<230x32xf32>
    %c0_2 = arith.constant 0 : index
    %c0_3 = arith.constant 0 : index
    %2 = vector.load %arg2[%c0_2, %c0_3] : memref<1x32xf32, #tpu.memory_space<vmem>>, vector<1x32xf32>
    %3 = vector.broadcast %2 : vector<1x32xf32> to vector<230x32xf32>
    %4 = arith.mulf %1, %3 : vector<230x32xf32>
    %c0_4 = arith.constant 0 : index
    %c0_5 = arith.constant 0 : index
    %5 = vector.load %arg3[%c0_4, %c0_5] : memref<1x32xf32, #tpu.memory_space<vmem>>, vector<1x32xf32>
    %6 = vector.broadcast %5 : vector<1x32xf32> to vector<230x32xf32>
    %7 = arith.addf %4, %6 : vector<230x32xf32>
    %cst = arith.constant 0.000000e+00 : f32
    %8 = vector.broadcast %cst : f32 to vector<230x32xf32>
    %9 = arith.maximumf %7, %8 : vector<230x32xf32>
    %c0_6 = arith.constant 0 : index
    %c0_7 = arith.constant 0 : index
    %10 = vector.load %arg4[%c0_6, %c0_7] : memref<230x1xf32, #tpu.memory_space<vmem>>, vector<230x1xf32>
    %cst_8 = arith.constant 5.000000e-01 : f32
    %11 = vector.broadcast %cst_8 : f32 to vector<230x1xf32>
    %12 = arith.cmpf ogt, %10, %11 : vector<230x1xf32>
    %cst_9 = arith.constant 0.000000e+00 : f32
    %13 = vector.shape_cast %12 : vector<230x1xi1> to vector<230x1xi1>
    %14 = vector.broadcast %13 : vector<230x1xi1> to vector<230x32xi1>
    %15 = vector.broadcast %cst_9 : f32 to vector<230x32xf32>
    %16 = arith.select %14, %9, %15 : vector<230x32xi1>, vector<230x32xf32>
    %cst_10 = arith.constant 0.000000e+00 : f32
    %17 = vector.broadcast %cst_10 : f32 to vector<144x1xf32>
    %18 = vector.extract_strided_slice %16 {offsets = [0, 0], sizes = [144, 32], strides = [1, 1]} : vector<230x32xf32> to vector<144x32xf32>
    %19 = arith.truncf %18 : vector<144x32xf32> to vector<144x32xbf16>
    %c0_11 = arith.constant 0 : index
    %c0_12 = arith.constant 0 : index
    %c0_13 = arith.constant 0 : index
    %20 = vector.load %arg5[%c0_11, %c0_12, %c0_13] : memref<27x32x1xbf16, #tpu.memory_space<vmem>>, vector<1x32x1xbf16>
    %21 = vector.shape_cast %20 : vector<1x32x1xbf16> to vector<32x1xbf16>
    %cst_14 = arith.constant dense<0.000000e+00> : vector<144x1xf32>
    %22 = tpu.matmul %19, %21, %cst_14 {dimension_numbers = #tpu.dot_dimension_numbers<[1], [0], [0], [1], [0, 0, 1, 1], [], []>} : vector<144x32xbf16>, vector<32x1xbf16>, vector<144x1xf32> -> vector<144x1xf32>
    %23 = arith.addf %17, %22 : vector<144x1xf32>
    %24 = vector.extract_strided_slice %16 {offsets = [1, 0], sizes = [144, 32], strides = [1, 1]} : vector<230x32xf32> to vector<144x32xf32>
    %25 = arith.truncf %24 : vector<144x32xf32> to vector<144x32xbf16>
    %c1 = arith.constant 1 : index
    %c0_15 = arith.constant 0 : index
    %c0_16 = arith.constant 0 : index
    %26 = vector.load %arg5[%c1, %c0_15, %c0_16] : memref<27x32x1xbf16, #tpu.memory_space<vmem>>, vector<1x32x1xbf16>
    %27 = vector.shape_cast %26 : vector<1x32x1xbf16> to vector<32x1xbf16>
    %cst_17 = arith.constant dense<0.000000e+00> : vector<144x1xf32>
    %28 = tpu.matmul %25, %27, %cst_17 {dimension_numbers = #tpu.dot_dimension_numbers<[1], [0], [0], [1], [0, 0, 1, 1], [], []>} : vector<144x32xbf16>, vector<32x1xbf16>, vector<144x1xf32> -> vector<144x1xf32>
    %29 = arith.addf %23, %28 : vector<144x1xf32>
    %30 = vector.extract_strided_slice %16 {offsets = [2, 0], sizes = [144, 32], strides = [1, 1]} : vector<230x32xf32> to vector<144x32xf32>
    %31 = arith.truncf %30 : vector<144x32xf32> to vector<144x32xbf16>
    %c2 = arith.constant 2 : index
    %c0_18 = arith.constant 0 : index
    %c0_19 = arith.constant 0 : index
    %32 = vector.load %arg5[%c2, %c0_18, %c0_19] : memref<27x32x1xbf16, #tpu.memory_space<vmem>>, vector<1x32x1xbf16>
    %33 = vector.shape_cast %32 : vector<1x32x1xbf16> to vector<32x1xbf16>
    %cst_20 = arith.constant dense<0.000000e+00> : vector<144x1xf32>
    %34 = tpu.matmul %31, %33, %cst_20 {dimension_numbers = #tpu.dot_dimension_numbers<[1], [0], [0], [1], [0, 0, 1, 1], [], []>} : vector<144x32xbf16>, vector<32x1xbf16>, vector<144x1xf32> -> vector<144x1xf32>
    %35 = arith.addf %29, %34 : vector<144x1xf32>
    %36 = vector.extract_strided_slice %16 {offsets = [6, 0], sizes = [144, 32], strides = [1, 1]} : vector<230x32xf32> to vector<144x32xf32>
    %37 = arith.truncf %36 : vector<144x32xf32> to vector<144x32xbf16>
    %c3 = arith.constant 3 : index
    %c0_21 = arith.constant 0 : index
    %c0_22 = arith.constant 0 : index
    %38 = vector.load %arg5[%c3, %c0_21, %c0_22] : memref<27x32x1xbf16, #tpu.memory_space<vmem>>, vector<1x32x1xbf16>
    %39 = vector.shape_cast %38 : vector<1x32x1xbf16> to vector<32x1xbf16>
    %cst_23 = arith.constant dense<0.000000e+00> : vector<144x1xf32>
    %40 = tpu.matmul %37, %39, %cst_23 {dimension_numbers = #tpu.dot_dimension_numbers<[1], [0], [0], [1], [0, 0, 1, 1], [], []>} : vector<144x32xbf16>, vector<32x1xbf16>, vector<144x1xf32> -> vector<144x1xf32>
    %41 = arith.addf %35, %40 : vector<144x1xf32>
    %42 = vector.extract_strided_slice %16 {offsets = [7, 0], sizes = [144, 32], strides = [1, 1]} : vector<230x32xf32> to vector<144x32xf32>
    %43 = arith.truncf %42 : vector<144x32xf32> to vector<144x32xbf16>
    %c4 = arith.constant 4 : index
    %c0_24 = arith.constant 0 : index
    %c0_25 = arith.constant 0 : index
    %44 = vector.load %arg5[%c4, %c0_24, %c0_25] : memref<27x32x1xbf16, #tpu.memory_space<vmem>>, vector<1x32x1xbf16>
    %45 = vector.shape_cast %44 : vector<1x32x1xbf16> to vector<32x1xbf16>
    %cst_26 = arith.constant dense<0.000000e+00> : vector<144x1xf32>
    %46 = tpu.matmul %43, %45, %cst_26 {dimension_numbers = #tpu.dot_dimension_numbers<[1], [0], [0], [1], [0, 0, 1, 1], [], []>} : vector<144x32xbf16>, vector<32x1xbf16>, vector<144x1xf32> -> vector<144x1xf32>
    %47 = arith.addf %41, %46 : vector<144x1xf32>
    %48 = vector.extract_strided_slice %16 {offsets = [8, 0], sizes = [144, 32], strides = [1, 1]} : vector<230x32xf32> to vector<144x32xf32>
    %49 = arith.truncf %48 : vector<144x32xf32> to vector<144x32xbf16>
    %c5 = arith.constant 5 : index
    %c0_27 = arith.constant 0 : index
    %c0_28 = arith.constant 0 : index
    %50 = vector.load %arg5[%c5, %c0_27, %c0_28] : memref<27x32x1xbf16, #tpu.memory_space<vmem>>, vector<1x32x1xbf16>
    %51 = vector.shape_cast %50 : vector<1x32x1xbf16> to vector<32x1xbf16>
    %cst_29 = arith.constant dense<0.000000e+00> : vector<144x1xf32>
    %52 = tpu.matmul %49, %51, %cst_29 {dimension_numbers = #tpu.dot_dimension_numbers<[1], [0], [0], [1], [0, 0, 1, 1], [], []>} : vector<144x32xbf16>, vector<32x1xbf16>, vector<144x1xf32> -> vector<144x1xf32>
    %53 = arith.addf %47, %52 : vector<144x1xf32>
    %54 = vector.extract_strided_slice %16 {offsets = [12, 0], sizes = [144, 32], strides = [1, 1]} : vector<230x32xf32> to vector<144x32xf32>
    %55 = arith.truncf %54 : vector<144x32xf32> to vector<144x32xbf16>
    %c6 = arith.constant 6 : index
    %c0_30 = arith.constant 0 : index
    %c0_31 = arith.constant 0 : index
    %56 = vector.load %arg5[%c6, %c0_30, %c0_31] : memref<27x32x1xbf16, #tpu.memory_space<vmem>>, vector<1x32x1xbf16>
    %57 = vector.shape_cast %56 : vector<1x32x1xbf16> to vector<32x1xbf16>
    %cst_32 = arith.constant dense<0.000000e+00> : vector<144x1xf32>
    %58 = tpu.matmul %55, %57, %cst_32 {dimension_numbers = #tpu.dot_dimension_numbers<[1], [0], [0], [1], [0, 0, 1, 1], [], []>} : vector<144x32xbf16>, vector<32x1xbf16>, vector<144x1xf32> -> vector<144x1xf32>
    %59 = arith.addf %53, %58 : vector<144x1xf32>
    %60 = vector.extract_strided_slice %16 {offsets = [13, 0], sizes = [144, 32], strides = [1, 1]} : vector<230x32xf32> to vector<144x32xf32>
    %61 = arith.truncf %60 : vector<144x32xf32> to vector<144x32xbf16>
    %c7 = arith.constant 7 : index
    %c0_33 = arith.constant 0 : index
    %c0_34 = arith.constant 0 : index
    %62 = vector.load %arg5[%c7, %c0_33, %c0_34] : memref<27x32x1xbf16, #tpu.memory_space<vmem>>, vector<1x32x1xbf16>
    %63 = vector.shape_cast %62 : vector<1x32x1xbf16> to vector<32x1xbf16>
    %cst_35 = arith.constant dense<0.000000e+00> : vector<144x1xf32>
    %64 = tpu.matmul %61, %63, %cst_35 {dimension_numbers = #tpu.dot_dimension_numbers<[1], [0], [0], [1], [0, 0, 1, 1], [], []>} : vector<144x32xbf16>, vector<32x1xbf16>, vector<144x1xf32> -> vector<144x1xf32>
    %65 = arith.addf %59, %64 : vector<144x1xf32>
    %66 = vector.extract_strided_slice %16 {offsets = [14, 0], sizes = [144, 32], strides = [1, 1]} : vector<230x32xf32> to vector<144x32xf32>
    %67 = arith.truncf %66 : vector<144x32xf32> to vector<144x32xbf16>
    %c8 = arith.constant 8 : index
    %c0_36 = arith.constant 0 : index
    %c0_37 = arith.constant 0 : index
    %68 = vector.load %arg5[%c8, %c0_36, %c0_37] : memref<27x32x1xbf16, #tpu.memory_space<vmem>>, vector<1x32x1xbf16>
    %69 = vector.shape_cast %68 : vector<1x32x1xbf16> to vector<32x1xbf16>
    %cst_38 = arith.constant dense<0.000000e+00> : vector<144x1xf32>
    %70 = tpu.matmul %67, %69, %cst_38 {dimension_numbers = #tpu.dot_dimension_numbers<[1], [0], [0], [1], [0, 0, 1, 1], [], []>} : vector<144x32xbf16>, vector<32x1xbf16>, vector<144x1xf32> -> vector<144x1xf32>
    %71 = arith.addf %65, %70 : vector<144x1xf32>
    %72 = vector.extract_strided_slice %16 {offsets = [36, 0], sizes = [144, 32], strides = [1, 1]} : vector<230x32xf32> to vector<144x32xf32>
    %73 = arith.truncf %72 : vector<144x32xf32> to vector<144x32xbf16>
    %c9 = arith.constant 9 : index
    %c0_39 = arith.constant 0 : index
    %c0_40 = arith.constant 0 : index
    %74 = vector.load %arg5[%c9, %c0_39, %c0_40] : memref<27x32x1xbf16, #tpu.memory_space<vmem>>, vector<1x32x1xbf16>
    %75 = vector.shape_cast %74 : vector<1x32x1xbf16> to vector<32x1xbf16>
    %cst_41 = arith.constant dense<0.000000e+00> : vector<144x1xf32>
    %76 = tpu.matmul %73, %75, %cst_41 {dimension_numbers = #tpu.dot_dimension_numbers<[1], [0], [0], [1], [0, 0, 1, 1], [], []>} : vector<144x32xbf16>, vector<32x1xbf16>, vector<144x1xf32> -> vector<144x1xf32>
    %77 = arith.addf %71, %76 : vector<144x1xf32>
    %78 = vector.extract_strided_slice %16 {offsets = [37, 0], sizes = [144, 32], strides = [1, 1]} : vector<230x32xf32> to vector<144x32xf32>
    %79 = arith.truncf %78 : vector<144x32xf32> to vector<144x32xbf16>
    %c10 = arith.constant 10 : index
    %c0_42 = arith.constant 0 : index
    %c0_43 = arith.constant 0 : index
    %80 = vector.load %arg5[%c10, %c0_42, %c0_43] : memref<27x32x1xbf16, #tpu.memory_space<vmem>>, vector<1x32x1xbf16>
    %81 = vector.shape_cast %80 : vector<1x32x1xbf16> to vector<32x1xbf16>
    %cst_44 = arith.constant dense<0.000000e+00> : vector<144x1xf32>
    %82 = tpu.matmul %79, %81, %cst_44 {dimension_numbers = #tpu.dot_dimension_numbers<[1], [0], [0], [1], [0, 0, 1, 1], [], []>} : vector<144x32xbf16>, vector<32x1xbf16>, vector<144x1xf32> -> vector<144x1xf32>
    %83 = arith.addf %77, %82 : vector<144x1xf32>
    %84 = vector.extract_strided_slice %16 {offsets = [38, 0], sizes = [144, 32], strides = [1, 1]} : vector<230x32xf32> to vector<144x32xf32>
    %85 = arith.truncf %84 : vector<144x32xf32> to vector<144x32xbf16>
    %c11 = arith.constant 11 : index
    %c0_45 = arith.constant 0 : index
    %c0_46 = arith.constant 0 : index
    %86 = vector.load %arg5[%c11, %c0_45, %c0_46] : memref<27x32x1xbf16, #tpu.memory_space<vmem>>, vector<1x32x1xbf16>
    %87 = vector.shape_cast %86 : vector<1x32x1xbf16> to vector<32x1xbf16>
    %cst_47 = arith.constant dense<0.000000e+00> : vector<144x1xf32>
    %88 = tpu.matmul %85, %87, %cst_47 {dimension_numbers = #tpu.dot_dimension_numbers<[1], [0], [0], [1], [0, 0, 1, 1], [], []>} : vector<144x32xbf16>, vector<32x1xbf16>, vector<144x1xf32> -> vector<144x1xf32>
    %89 = arith.addf %83, %88 : vector<144x1xf32>
    %90 = vector.extract_strided_slice %16 {offsets = [42, 0], sizes = [144, 32], strides = [1, 1]} : vector<230x32xf32> to vector<144x32xf32>
    %91 = arith.truncf %90 : vector<144x32xf32> to vector<144x32xbf16>
    %c12 = arith.constant 12 : index
    %c0_48 = arith.constant 0 : index
    %c0_49 = arith.constant 0 : index
    %92 = vector.load %arg5[%c12, %c0_48, %c0_49] : memref<27x32x1xbf16, #tpu.memory_space<vmem>>, vector<1x32x1xbf16>
    %93 = vector.shape_cast %92 : vector<1x32x1xbf16> to vector<32x1xbf16>
    %cst_50 = arith.constant dense<0.000000e+00> : vector<144x1xf32>
    %94 = tpu.matmul %91, %93, %cst_50 {dimension_numbers = #tpu.dot_dimension_numbers<[1], [0], [0], [1], [0, 0, 1, 1], [], []>} : vector<144x32xbf16>, vector<32x1xbf16>, vector<144x1xf32> -> vector<144x1xf32>
    %95 = arith.addf %89, %94 : vector<144x1xf32>
    %96 = vector.extract_strided_slice %16 {offsets = [43, 0], sizes = [144, 32], strides = [1, 1]} : vector<230x32xf32> to vector<144x32xf32>
    %97 = arith.truncf %96 : vector<144x32xf32> to vector<144x32xbf16>
    %c13 = arith.constant 13 : index
    %c0_51 = arith.constant 0 : index
    %c0_52 = arith.constant 0 : index
    %98 = vector.load %arg5[%c13, %c0_51, %c0_52] : memref<27x32x1xbf16, #tpu.memory_space<vmem>>, vector<1x32x1xbf16>
    %99 = vector.shape_cast %98 : vector<1x32x1xbf16> to vector<32x1xbf16>
    %cst_53 = arith.constant dense<0.000000e+00> : vector<144x1xf32>
    %100 = tpu.matmul %97, %99, %cst_53 {dimension_numbers = #tpu.dot_dimension_numbers<[1], [0], [0], [1], [0, 0, 1, 1], [], []>} : vector<144x32xbf16>, vector<32x1xbf16>, vector<144x1xf32> -> vector<144x1xf32>
    %101 = arith.addf %95, %100 : vector<144x1xf32>
    %102 = vector.extract_strided_slice %16 {offsets = [44, 0], sizes = [144, 32], strides = [1, 1]} : vector<230x32xf32> to vector<144x32xf32>
    %103 = arith.truncf %102 : vector<144x32xf32> to vector<144x32xbf16>
    %c14 = arith.constant 14 : index
    %c0_54 = arith.constant 0 : index
    %c0_55 = arith.constant 0 : index
    %104 = vector.load %arg5[%c14, %c0_54, %c0_55] : memref<27x32x1xbf16, #tpu.memory_space<vmem>>, vector<1x32x1xbf16>
    %105 = vector.shape_cast %104 : vector<1x32x1xbf16> to vector<32x1xbf16>
    %cst_56 = arith.constant dense<0.000000e+00> : vector<144x1xf32>
    %106 = tpu.matmul %103, %105, %cst_56 {dimension_numbers = #tpu.dot_dimension_numbers<[1], [0], [0], [1], [0, 0, 1, 1], [], []>} : vector<144x32xbf16>, vector<32x1xbf16>, vector<144x1xf32> -> vector<144x1xf32>
    %107 = arith.addf %101, %106 : vector<144x1xf32>
    %108 = vector.extract_strided_slice %16 {offsets = [48, 0], sizes = [144, 32], strides = [1, 1]} : vector<230x32xf32> to vector<144x32xf32>
    %109 = arith.truncf %108 : vector<144x32xf32> to vector<144x32xbf16>
    %c15 = arith.constant 15 : index
    %c0_57 = arith.constant 0 : index
    %c0_58 = arith.constant 0 : index
    %110 = vector.load %arg5[%c15, %c0_57, %c0_58] : memref<27x32x1xbf16, #tpu.memory_space<vmem>>, vector<1x32x1xbf16>
    %111 = vector.shape_cast %110 : vector<1x32x1xbf16> to vector<32x1xbf16>
    %cst_59 = arith.constant dense<0.000000e+00> : vector<144x1xf32>
    %112 = tpu.matmul %109, %111, %cst_59 {dimension_numbers = #tpu.dot_dimension_numbers<[1], [0], [0], [1], [0, 0, 1, 1], [], []>} : vector<144x32xbf16>, vector<32x1xbf16>, vector<144x1xf32> -> vector<144x1xf32>
    %113 = arith.addf %107, %112 : vector<144x1xf32>
    %114 = vector.extract_strided_slice %16 {offsets = [49, 0], sizes = [144, 32], strides = [1, 1]} : vector<230x32xf32> to vector<144x32xf32>
    %115 = arith.truncf %114 : vector<144x32xf32> to vector<144x32xbf16>
    %c16 = arith.constant 16 : index
    %c0_60 = arith.constant 0 : index
    %c0_61 = arith.constant 0 : index
    %116 = vector.load %arg5[%c16, %c0_60, %c0_61] : memref<27x32x1xbf16, #tpu.memory_space<vmem>>, vector<1x32x1xbf16>
    %117 = vector.shape_cast %116 : vector<1x32x1xbf16> to vector<32x1xbf16>
    %cst_62 = arith.constant dense<0.000000e+00> : vector<144x1xf32>
    %118 = tpu.matmul %115, %117, %cst_62 {dimension_numbers = #tpu.dot_dimension_numbers<[1], [0], [0], [1], [0, 0, 1, 1], [], []>} : vector<144x32xbf16>, vector<32x1xbf16>, vector<144x1xf32> -> vector<144x1xf32>
    %119 = arith.addf %113, %118 : vector<144x1xf32>
    %120 = vector.extract_strided_slice %16 {offsets = [50, 0], sizes = [144, 32], strides = [1, 1]} : vector<230x32xf32> to vector<144x32xf32>
    %121 = arith.truncf %120 : vector<144x32xf32> to vector<144x32xbf16>
    %c17 = arith.constant 17 : index
    %c0_63 = arith.constant 0 : index
    %c0_64 = arith.constant 0 : index
    %122 = vector.load %arg5[%c17, %c0_63, %c0_64] : memref<27x32x1xbf16, #tpu.memory_space<vmem>>, vector<1x32x1xbf16>
    %123 = vector.shape_cast %122 : vector<1x32x1xbf16> to vector<32x1xbf16>
    %cst_65 = arith.constant dense<0.000000e+00> : vector<144x1xf32>
    %124 = tpu.matmul %121, %123, %cst_65 {dimension_numbers = #tpu.dot_dimension_numbers<[1], [0], [0], [1], [0, 0, 1, 1], [], []>} : vector<144x32xbf16>, vector<32x1xbf16>, vector<144x1xf32> -> vector<144x1xf32>
    %125 = arith.addf %119, %124 : vector<144x1xf32>
    %126 = vector.extract_strided_slice %16 {offsets = [72, 0], sizes = [144, 32], strides = [1, 1]} : vector<230x32xf32> to vector<144x32xf32>
    %127 = arith.truncf %126 : vector<144x32xf32> to vector<144x32xbf16>
    %c18 = arith.constant 18 : index
    %c0_66 = arith.constant 0 : index
    %c0_67 = arith.constant 0 : index
    %128 = vector.load %arg5[%c18, %c0_66, %c0_67] : memref<27x32x1xbf16, #tpu.memory_space<vmem>>, vector<1x32x1xbf16>
    %129 = vector.shape_cast %128 : vector<1x32x1xbf16> to vector<32x1xbf16>
    %cst_68 = arith.constant dense<0.000000e+00> : vector<144x1xf32>
    %130 = tpu.matmul %127, %129, %cst_68 {dimension_numbers = #tpu.dot_dimension_numbers<[1], [0], [0], [1], [0, 0, 1, 1], [], []>} : vector<144x32xbf16>, vector<32x1xbf16>, vector<144x1xf32> -> vector<144x1xf32>
    %131 = arith.addf %125, %130 : vector<144x1xf32>
    %132 = vector.extract_strided_slice %16 {offsets = [73, 0], sizes = [144, 32], strides = [1, 1]} : vector<230x32xf32> to vector<144x32xf32>
    %133 = arith.truncf %132 : vector<144x32xf32> to vector<144x32xbf16>
    %c19 = arith.constant 19 : index
    %c0_69 = arith.constant 0 : index
    %c0_70 = arith.constant 0 : index
    %134 = vector.load %arg5[%c19, %c0_69, %c0_70] : memref<27x32x1xbf16, #tpu.memory_space<vmem>>, vector<1x32x1xbf16>
    %135 = vector.shape_cast %134 : vector<1x32x1xbf16> to vector<32x1xbf16>
    %cst_71 = arith.constant dense<0.000000e+00> : vector<144x1xf32>
    %136 = tpu.matmul %133, %135, %cst_71 {dimension_numbers = #tpu.dot_dimension_numbers<[1], [0], [0], [1], [0, 0, 1, 1], [], []>} : vector<144x32xbf16>, vector<32x1xbf16>, vector<144x1xf32> -> vector<144x1xf32>
    %137 = arith.addf %131, %136 : vector<144x1xf32>
    %138 = vector.extract_strided_slice %16 {offsets = [74, 0], sizes = [144, 32], strides = [1, 1]} : vector<230x32xf32> to vector<144x32xf32>
    %139 = arith.truncf %138 : vector<144x32xf32> to vector<144x32xbf16>
    %c20 = arith.constant 20 : index
    %c0_72 = arith.constant 0 : index
    %c0_73 = arith.constant 0 : index
    %140 = vector.load %arg5[%c20, %c0_72, %c0_73] : memref<27x32x1xbf16, #tpu.memory_space<vmem>>, vector<1x32x1xbf16>
    %141 = vector.shape_cast %140 : vector<1x32x1xbf16> to vector<32x1xbf16>
    %cst_74 = arith.constant dense<0.000000e+00> : vector<144x1xf32>
    %142 = tpu.matmul %139, %141, %cst_74 {dimension_numbers = #tpu.dot_dimension_numbers<[1], [0], [0], [1], [0, 0, 1, 1], [], []>} : vector<144x32xbf16>, vector<32x1xbf16>, vector<144x1xf32> -> vector<144x1xf32>
    %143 = arith.addf %137, %142 : vector<144x1xf32>
    %144 = vector.extract_strided_slice %16 {offsets = [78, 0], sizes = [144, 32], strides = [1, 1]} : vector<230x32xf32> to vector<144x32xf32>
    %145 = arith.truncf %144 : vector<144x32xf32> to vector<144x32xbf16>
    %c21 = arith.constant 21 : index
    %c0_75 = arith.constant 0 : index
    %c0_76 = arith.constant 0 : index
    %146 = vector.load %arg5[%c21, %c0_75, %c0_76] : memref<27x32x1xbf16, #tpu.memory_space<vmem>>, vector<1x32x1xbf16>
    %147 = vector.shape_cast %146 : vector<1x32x1xbf16> to vector<32x1xbf16>
    %cst_77 = arith.constant dense<0.000000e+00> : vector<144x1xf32>
    %148 = tpu.matmul %145, %147, %cst_77 {dimension_numbers = #tpu.dot_dimension_numbers<[1], [0], [0], [1], [0, 0, 1, 1], [], []>} : vector<144x32xbf16>, vector<32x1xbf16>, vector<144x1xf32> -> vector<144x1xf32>
    %149 = arith.addf %143, %148 : vector<144x1xf32>
    %150 = vector.extract_strided_slice %16 {offsets = [79, 0], sizes = [144, 32], strides = [1, 1]} : vector<230x32xf32> to vector<144x32xf32>
    %151 = arith.truncf %150 : vector<144x32xf32> to vector<144x32xbf16>
    %c22 = arith.constant 22 : index
    %c0_78 = arith.constant 0 : index
    %c0_79 = arith.constant 0 : index
    %152 = vector.load %arg5[%c22, %c0_78, %c0_79] : memref<27x32x1xbf16, #tpu.memory_space<vmem>>, vector<1x32x1xbf16>
    %153 = vector.shape_cast %152 : vector<1x32x1xbf16> to vector<32x1xbf16>
    %cst_80 = arith.constant dense<0.000000e+00> : vector<144x1xf32>
    %154 = tpu.matmul %151, %153, %cst_80 {dimension_numbers = #tpu.dot_dimension_numbers<[1], [0], [0], [1], [0, 0, 1, 1], [], []>} : vector<144x32xbf16>, vector<32x1xbf16>, vector<144x1xf32> -> vector<144x1xf32>
    %155 = arith.addf %149, %154 : vector<144x1xf32>
    %156 = vector.extract_strided_slice %16 {offsets = [80, 0], sizes = [144, 32], strides = [1, 1]} : vector<230x32xf32> to vector<144x32xf32>
    %157 = arith.truncf %156 : vector<144x32xf32> to vector<144x32xbf16>
    %c23 = arith.constant 23 : index
    %c0_81 = arith.constant 0 : index
    %c0_82 = arith.constant 0 : index
    %158 = vector.load %arg5[%c23, %c0_81, %c0_82] : memref<27x32x1xbf16, #tpu.memory_space<vmem>>, vector<1x32x1xbf16>
    %159 = vector.shape_cast %158 : vector<1x32x1xbf16> to vector<32x1xbf16>
    %cst_83 = arith.constant dense<0.000000e+00> : vector<144x1xf32>
    %160 = tpu.matmul %157, %159, %cst_83 {dimension_numbers = #tpu.dot_dimension_numbers<[1], [0], [0], [1], [0, 0, 1, 1], [], []>} : vector<144x32xbf16>, vector<32x1xbf16>, vector<144x1xf32> -> vector<144x1xf32>
    %161 = arith.addf %155, %160 : vector<144x1xf32>
    %162 = vector.extract_strided_slice %16 {offsets = [84, 0], sizes = [144, 32], strides = [1, 1]} : vector<230x32xf32> to vector<144x32xf32>
    %163 = arith.truncf %162 : vector<144x32xf32> to vector<144x32xbf16>
    %c24 = arith.constant 24 : index
    %c0_84 = arith.constant 0 : index
    %c0_85 = arith.constant 0 : index
    %164 = vector.load %arg5[%c24, %c0_84, %c0_85] : memref<27x32x1xbf16, #tpu.memory_space<vmem>>, vector<1x32x1xbf16>
    %165 = vector.shape_cast %164 : vector<1x32x1xbf16> to vector<32x1xbf16>
    %cst_86 = arith.constant dense<0.000000e+00> : vector<144x1xf32>
    %166 = tpu.matmul %163, %165, %cst_86 {dimension_numbers = #tpu.dot_dimension_numbers<[1], [0], [0], [1], [0, 0, 1, 1], [], []>} : vector<144x32xbf16>, vector<32x1xbf16>, vector<144x1xf32> -> vector<144x1xf32>
    %167 = arith.addf %161, %166 : vector<144x1xf32>
    %168 = vector.extract_strided_slice %16 {offsets = [85, 0], sizes = [144, 32], strides = [1, 1]} : vector<230x32xf32> to vector<144x32xf32>
    %169 = arith.truncf %168 : vector<144x32xf32> to vector<144x32xbf16>
    %c25 = arith.constant 25 : index
    %c0_87 = arith.constant 0 : index
    %c0_88 = arith.constant 0 : index
    %170 = vector.load %arg5[%c25, %c0_87, %c0_88] : memref<27x32x1xbf16, #tpu.memory_space<vmem>>, vector<1x32x1xbf16>
    %171 = vector.shape_cast %170 : vector<1x32x1xbf16> to vector<32x1xbf16>
    %cst_89 = arith.constant dense<0.000000e+00> : vector<144x1xf32>
    %172 = tpu.matmul %169, %171, %cst_89 {dimension_numbers = #tpu.dot_dimension_numbers<[1], [0], [0], [1], [0, 0, 1, 1], [], []>} : vector<144x32xbf16>, vector<32x1xbf16>, vector<144x1xf32> -> vector<144x1xf32>
    %173 = arith.addf %167, %172 : vector<144x1xf32>
    %174 = vector.extract_strided_slice %16 {offsets = [86, 0], sizes = [144, 32], strides = [1, 1]} : vector<230x32xf32> to vector<144x32xf32>
    %175 = arith.truncf %174 : vector<144x32xf32> to vector<144x32xbf16>
    %c26 = arith.constant 26 : index
    %c0_90 = arith.constant 0 : index
    %c0_91 = arith.constant 0 : index
    %176 = vector.load %arg5[%c26, %c0_90, %c0_91] : memref<27x32x1xbf16, #tpu.memory_space<vmem>>, vector<1x32x1xbf16>
    %177 = vector.shape_cast %176 : vector<1x32x1xbf16> to vector<32x1xbf16>
    %cst_92 = arith.constant dense<0.000000e+00> : vector<144x1xf32>
    %178 = tpu.matmul %175, %177, %cst_92 {dimension_numbers = #tpu.dot_dimension_numbers<[1], [0], [0], [1], [0, 0, 1, 1], [], []>} : vector<144x32xbf16>, vector<32x1xbf16>, vector<144x1xf32> -> vector<144x1xf32>
    %179 = arith.addf %173, %178 : vector<144x1xf32>
    %180 = vector.shape_cast %179 : vector<144x1xf32> to vector<1x144x1xf32>
    %c0_93 = arith.constant 0 : index
    %c0_94 = arith.constant 0 : index
    %c0_95 = arith.constant 0 : index
    %181 = vector.load %arg6[%c0_93, %c0_94, %c0_95] : memref<1x144x1xf32, #tpu.memory_space<vmem>>, vector<1x144x1xf32>
    tpu.vector_store %arg6[%c0_93, %c0_94, %c0_95], %180 {strides = array<i32>} : memref<1x144x1xf32, #tpu.memory_space<vmem>>, vector<1x144x1xf32>,
    return
  }
  func.func @transform_0(%arg0: i32) -> (i32, i32, i32) {
    %c0_i32 = arith.constant 0 : i32
    %c0_i32_0 = arith.constant 0 : i32
    %c0_i32_1 = arith.constant 0 : i32
    return %arg0, %c0_i32, %c0_i32_0 : i32, i32, i32
  }
  func.func @transform_1(%arg0: i32) -> (i32, i32) {
    %c0_i32 = arith.constant 0 : i32
    %c0_i32_0 = arith.constant 0 : i32
    %c0_i32_1 = arith.constant 0 : i32
    return %c0_i32, %c0_i32_0 : i32, i32
  }
  func.func @transform_2(%arg0: i32) -> (i32, i32) {
    %c0_i32 = arith.constant 0 : i32
    %c0_i32_0 = arith.constant 0 : i32
    %c0_i32_1 = arith.constant 0 : i32
    return %c0_i32, %c0_i32_0 : i32, i32
  }
  func.func @transform_3(%arg0: i32) -> (i32, i32) {
    %c0_i32 = arith.constant 0 : i32
    %c0_i32_0 = arith.constant 0 : i32
    %c0_i32_1 = arith.constant 0 : i32
    return %c0_i32, %c0_i32_0 : i32, i32
  }
  func.func @transform_4(%arg0: i32) -> (i32, i32, i32) {
    %c0_i32 = arith.constant 0 : i32
    %c0_i32_0 = arith.constant 0 : i32
    %c0_i32_1 = arith.constant 0 : i32
    %c0_i32_2 = arith.constant 0 : i32
    return %c0_i32, %c0_i32_0, %c0_i32_1 : i32, i32, i32
  }
  func.func @transform_5(%arg0: i32) -> (i32, i32, i32) {
    %c0_i32 = arith.constant 0 : i32
    %c0_i32_0 = arith.constant 0 : i32
    %c0_i32_1 = arith.constant 0 : i32
    return %arg0, %c0_i32, %c0_i32_0 : i32, i32, i32
  }
}

module attributes {stable_mosaic.version = 11 : i64} {
  func.func @kernel(%arg0: i32, %arg1: i32, %arg2: memref<1x8x4xf32, #tpu.memory_space<vmem>>, %arg3: memref<4x32xf32, #tpu.memory_space<vmem>>, %arg4: memref<8x4xf32, #tpu.memory_space<vmem>>, %arg5: memref<16x2xf32, #tpu.memory_space<vmem>>, %arg6: memref<1x16xf32, #tpu.memory_space<vmem>>, %arg7: memref<1x8x32xf32, #tpu.memory_space<vmem>>, %arg8: memref<8x32xf32, #tpu.memory_space<vmem>>) attributes {dimension_semantics = [#tpu.dimension_semantics<parallel>, #tpu.dimension_semantics<arbitrary>], iteration_bounds = array<i64: 2, 4>, scalar_prefetch = 0 : i64, scratch_operands = 1 : i64, tpu.core_type = #tpu.core_type<tc>, window_params = [{transform_indices = @transform_0, window_bounds = array<i64: 1, 8, 4>}, {pipeline_mode = #tpu.pipeline_mode<synchronous>, transform_indices = @transform_1, window_bounds = array<i64: 4, 32>}, {transform_indices = @transform_2, window_bounds = array<i64: 8, 4>}, {pipeline_mode = #tpu.pipeline_mode<synchronous>, transform_indices = @transform_3, window_bounds = array<i64: 16, 2>}, {pipeline_mode = #tpu.pipeline_mode<synchronous>, transform_indices = @transform_4, window_bounds = array<i64: 1, 16>}, {transform_indices = @transform_5, window_bounds = array<i64: 1, 8, 32>}]} {
    %c0_i32 = arith.constant 0 : i32
    %0 = arith.cmpi eq, %arg1, %c0_i32 : i32
    %1 = arith.extui %0 : i1 to i32
    %c0_i32_0 = arith.constant 0 : i32
    %2 = arith.cmpi ne, %1, %c0_i32_0 : i32
    scf.if %2 {
      %c0_58 = arith.constant 0 : index
      %c0_59 = arith.constant 0 : index
      %c0_60 = arith.constant 0 : index
      %146 = vector.load %arg2[%c0_58, %c0_59, %c0_60] : memref<1x8x4xf32, #tpu.memory_space<vmem>>, vector<1x8x4xf32>
      %147 = vector.shape_cast %146 : vector<1x8x4xf32> to vector<8x4xf32>
      %c0_61 = arith.constant 0 : index
      %c0_62 = arith.constant 0 : index
      %148 = vector.load %arg3[%c0_61, %c0_62] : memref<4x32xf32, #tpu.memory_space<vmem>>, vector<4x32xf32>
      %cst_63 = arith.constant dense<0.000000e+00> : vector<8x32xf32>
      %149 = tpu.matmul %147, %148, %cst_63 {dimension_numbers = #tpu.dot_dimension_numbers<[1], [0], [0], [1], [0, 0, 1, 1], [], []>} : vector<8x4xf32>, vector<4x32xf32>, vector<8x32xf32> -> vector<8x32xf32>
      %c0_64 = arith.constant 0 : index
      %c0_65 = arith.constant 0 : index
      %150 = vector.load %arg8[%c0_64, %c0_65] : memref<8x32xf32, #tpu.memory_space<vmem>>, vector<8x32xf32>
      tpu.vector_store %arg8[%c0_64, %c0_65], %149 {strides = array<i32>} : memref<8x32xf32, #tpu.memory_space<vmem>>, vector<8x32xf32>,
    } else {
    }
    %c0 = arith.constant 0 : index
    %c0_1 = arith.constant 0 : index
    %3 = vector.load %arg4[%c0, %c0_1] : memref<8x4xf32, #tpu.memory_space<vmem>>, vector<8x4xf32>
    %c0_2 = arith.constant 0 : index
    %c0_3 = arith.constant 0 : index
    %4 = vector.load %arg5[%c0_2, %c0_3] : memref<16x2xf32, #tpu.memory_space<vmem>>, vector<16x2xf32>
    %c0_4 = arith.constant 0 : index
    %c0_5 = arith.constant 0 : index
    %5 = vector.load %arg6[%c0_4, %c0_5] : memref<1x16xf32, #tpu.memory_space<vmem>>, vector<1x16xf32>
    %c0_6 = arith.constant 0 : index
    %c0_7 = arith.constant 0 : index
    %6 = vector.load %arg8[%c0_6, %c0_7] : memref<8x32xf32, #tpu.memory_space<vmem>>, vector<8x32xf32>
    %7 = vector.extract_strided_slice %3 {offsets = [0, 0], sizes = [1, 4], strides = [1, 1]} : vector<8x4xf32> to vector<1x4xf32>
    %8 = vector.extract_strided_slice %6 {offsets = [0, 0], sizes = [4, 32], strides = [1, 1]} : vector<8x32xf32> to vector<4x32xf32>
    %cst = arith.constant dense<0.000000e+00> : vector<1x32xf32>
    %9 = tpu.matmul %7, %8, %cst {dimension_numbers = #tpu.dot_dimension_numbers<[1], [0], [0], [1], [0, 0, 1, 1], [], []>} : vector<1x4xf32>, vector<4x32xf32>, vector<1x32xf32> -> vector<1x32xf32>
    %10 = vector.extract_strided_slice %6 {offsets = [4, 0], sizes = [4, 32], strides = [1, 1]} : vector<8x32xf32> to vector<4x32xf32>
    %cst_8 = arith.constant dense<0.000000e+00> : vector<1x32xf32>
    %11 = tpu.matmul %7, %10, %cst_8 {dimension_numbers = #tpu.dot_dimension_numbers<[1], [0], [0], [1], [0, 0, 1, 1], [], []>} : vector<1x4xf32>, vector<4x32xf32>, vector<1x32xf32> -> vector<1x32xf32>
    %12 = tpu.concatenate %9, %11 in 0 : vector<1x32xf32>, vector<1x32xf32> -> vector<2x32xf32>
    %cst_9 = arith.constant dense<0.000000e+00> : vector<16x32xf32>
    %13 = tpu.matmul %4, %12, %cst_9 {dimension_numbers = #tpu.dot_dimension_numbers<[1], [0], [0], [1], [0, 0, 1, 1], [], []>} : vector<16x2xf32>, vector<2x32xf32>, vector<16x32xf32> -> vector<16x32xf32>
    %cst_10 = arith.constant dense<0xFF800000> : vector<32xf32>
    %14 = vector.multi_reduction <maximumf>, %13, %cst_10 [0] : vector<16x32xf32> to vector<32xf32>
    %15 = vector.shape_cast %14 : vector<32xf32> to vector<1x32xf32>
    %16 = vector.broadcast %15 : vector<1x32xf32> to vector<16x32xf32>
    %17 = arith.subf %13, %16 : vector<16x32xf32>
    %18 = math.exp %17 : vector<16x32xf32>
    %cst_11 = arith.constant dense<0.000000e+00> : vector<32xf32>
    %19 = vector.multi_reduction <add>, %18, %cst_11 [0] : vector<16x32xf32> to vector<32xf32>
    %20 = vector.shape_cast %19 : vector<32xf32> to vector<1x32xf32>
    %cst_12 = arith.constant dense<0.000000e+00> : vector<1x32xf32>
    %21 = tpu.matmul %5, %18, %cst_12 {dimension_numbers = #tpu.dot_dimension_numbers<[1], [0], [0], [1], [0, 0, 1, 1], [], []>} : vector<1x16xf32>, vector<16x32xf32>, vector<1x32xf32> -> vector<1x32xf32>
    %22 = tpu.reciprocal %20 {approx = true} : vector<1x32xf32> -> vector<1x32xf32>
    %23 = arith.mulf %21, %22 : vector<1x32xf32>
    %24 = vector.extract_strided_slice %3 {offsets = [1, 0], sizes = [1, 4], strides = [1, 1]} : vector<8x4xf32> to vector<1x4xf32>
    %25 = vector.extract_strided_slice %6 {offsets = [0, 0], sizes = [4, 32], strides = [1, 1]} : vector<8x32xf32> to vector<4x32xf32>
    %cst_13 = arith.constant dense<0.000000e+00> : vector<1x32xf32>
    %26 = tpu.matmul %24, %25, %cst_13 {dimension_numbers = #tpu.dot_dimension_numbers<[1], [0], [0], [1], [0, 0, 1, 1], [], []>} : vector<1x4xf32>, vector<4x32xf32>, vector<1x32xf32> -> vector<1x32xf32>
    %27 = vector.extract_strided_slice %6 {offsets = [4, 0], sizes = [4, 32], strides = [1, 1]} : vector<8x32xf32> to vector<4x32xf32>
    %cst_14 = arith.constant dense<0.000000e+00> : vector<1x32xf32>
    %28 = tpu.matmul %24, %27, %cst_14 {dimension_numbers = #tpu.dot_dimension_numbers<[1], [0], [0], [1], [0, 0, 1, 1], [], []>} : vector<1x4xf32>, vector<4x32xf32>, vector<1x32xf32> -> vector<1x32xf32>
    %29 = tpu.concatenate %26, %28 in 0 : vector<1x32xf32>, vector<1x32xf32> -> vector<2x32xf32>
    %cst_15 = arith.constant dense<0.000000e+00> : vector<16x32xf32>
    %30 = tpu.matmul %4, %29, %cst_15 {dimension_numbers = #tpu.dot_dimension_numbers<[1], [0], [0], [1], [0, 0, 1, 1], [], []>} : vector<16x2xf32>, vector<2x32xf32>, vector<16x32xf32> -> vector<16x32xf32>
    %cst_16 = arith.constant dense<0xFF800000> : vector<32xf32>
    %31 = vector.multi_reduction <maximumf>, %30, %cst_16 [0] : vector<16x32xf32> to vector<32xf32>
    %32 = vector.shape_cast %31 : vector<32xf32> to vector<1x32xf32>
    %33 = vector.broadcast %32 : vector<1x32xf32> to vector<16x32xf32>
    %34 = arith.subf %30, %33 : vector<16x32xf32>
    %35 = math.exp %34 : vector<16x32xf32>
    %cst_17 = arith.constant dense<0.000000e+00> : vector<32xf32>
    %36 = vector.multi_reduction <add>, %35, %cst_17 [0] : vector<16x32xf32> to vector<32xf32>
    %37 = vector.shape_cast %36 : vector<32xf32> to vector<1x32xf32>
    %cst_18 = arith.constant dense<0.000000e+00> : vector<1x32xf32>
    %38 = tpu.matmul %5, %35, %cst_18 {dimension_numbers = #tpu.dot_dimension_numbers<[1], [0], [0], [1], [0, 0, 1, 1], [], []>} : vector<1x16xf32>, vector<16x32xf32>, vector<1x32xf32> -> vector<1x32xf32>
    %39 = tpu.reciprocal %37 {approx = true} : vector<1x32xf32> -> vector<1x32xf32>
    %40 = arith.mulf %38, %39 : vector<1x32xf32>
    %41 = vector.extract_strided_slice %3 {offsets = [2, 0], sizes = [1, 4], strides = [1, 1]} : vector<8x4xf32> to vector<1x4xf32>
    %42 = vector.extract_strided_slice %6 {offsets = [0, 0], sizes = [4, 32], strides = [1, 1]} : vector<8x32xf32> to vector<4x32xf32>
    %cst_19 = arith.constant dense<0.000000e+00> : vector<1x32xf32>
    %43 = tpu.matmul %41, %42, %cst_19 {dimension_numbers = #tpu.dot_dimension_numbers<[1], [0], [0], [1], [0, 0, 1, 1], [], []>} : vector<1x4xf32>, vector<4x32xf32>, vector<1x32xf32> -> vector<1x32xf32>
    %44 = vector.extract_strided_slice %6 {offsets = [4, 0], sizes = [4, 32], strides = [1, 1]} : vector<8x32xf32> to vector<4x32xf32>
    %cst_20 = arith.constant dense<0.000000e+00> : vector<1x32xf32>
    %45 = tpu.matmul %41, %44, %cst_20 {dimension_numbers = #tpu.dot_dimension_numbers<[1], [0], [0], [1], [0, 0, 1, 1], [], []>} : vector<1x4xf32>, vector<4x32xf32>, vector<1x32xf32> -> vector<1x32xf32>
    %46 = tpu.concatenate %43, %45 in 0 : vector<1x32xf32>, vector<1x32xf32> -> vector<2x32xf32>
    %cst_21 = arith.constant dense<0.000000e+00> : vector<16x32xf32>
    %47 = tpu.matmul %4, %46, %cst_21 {dimension_numbers = #tpu.dot_dimension_numbers<[1], [0], [0], [1], [0, 0, 1, 1], [], []>} : vector<16x2xf32>, vector<2x32xf32>, vector<16x32xf32> -> vector<16x32xf32>
    %cst_22 = arith.constant dense<0xFF800000> : vector<32xf32>
    %48 = vector.multi_reduction <maximumf>, %47, %cst_22 [0] : vector<16x32xf32> to vector<32xf32>
    %49 = vector.shape_cast %48 : vector<32xf32> to vector<1x32xf32>
    %50 = vector.broadcast %49 : vector<1x32xf32> to vector<16x32xf32>
    %51 = arith.subf %47, %50 : vector<16x32xf32>
    %52 = math.exp %51 : vector<16x32xf32>
    %cst_23 = arith.constant dense<0.000000e+00> : vector<32xf32>
    %53 = vector.multi_reduction <add>, %52, %cst_23 [0] : vector<16x32xf32> to vector<32xf32>
    %54 = vector.shape_cast %53 : vector<32xf32> to vector<1x32xf32>
    %cst_24 = arith.constant dense<0.000000e+00> : vector<1x32xf32>
    %55 = tpu.matmul %5, %52, %cst_24 {dimension_numbers = #tpu.dot_dimension_numbers<[1], [0], [0], [1], [0, 0, 1, 1], [], []>} : vector<1x16xf32>, vector<16x32xf32>, vector<1x32xf32> -> vector<1x32xf32>
    %56 = tpu.reciprocal %54 {approx = true} : vector<1x32xf32> -> vector<1x32xf32>
    %57 = arith.mulf %55, %56 : vector<1x32xf32>
    %58 = vector.extract_strided_slice %3 {offsets = [3, 0], sizes = [1, 4], strides = [1, 1]} : vector<8x4xf32> to vector<1x4xf32>
    %59 = vector.extract_strided_slice %6 {offsets = [0, 0], sizes = [4, 32], strides = [1, 1]} : vector<8x32xf32> to vector<4x32xf32>
    %cst_25 = arith.constant dense<0.000000e+00> : vector<1x32xf32>
    %60 = tpu.matmul %58, %59, %cst_25 {dimension_numbers = #tpu.dot_dimension_numbers<[1], [0], [0], [1], [0, 0, 1, 1], [], []>} : vector<1x4xf32>, vector<4x32xf32>, vector<1x32xf32> -> vector<1x32xf32>
    %61 = vector.extract_strided_slice %6 {offsets = [4, 0], sizes = [4, 32], strides = [1, 1]} : vector<8x32xf32> to vector<4x32xf32>
    %cst_26 = arith.constant dense<0.000000e+00> : vector<1x32xf32>
    %62 = tpu.matmul %58, %61, %cst_26 {dimension_numbers = #tpu.dot_dimension_numbers<[1], [0], [0], [1], [0, 0, 1, 1], [], []>} : vector<1x4xf32>, vector<4x32xf32>, vector<1x32xf32> -> vector<1x32xf32>
    %63 = tpu.concatenate %60, %62 in 0 : vector<1x32xf32>, vector<1x32xf32> -> vector<2x32xf32>
    %cst_27 = arith.constant dense<0.000000e+00> : vector<16x32xf32>
    %64 = tpu.matmul %4, %63, %cst_27 {dimension_numbers = #tpu.dot_dimension_numbers<[1], [0], [0], [1], [0, 0, 1, 1], [], []>} : vector<16x2xf32>, vector<2x32xf32>, vector<16x32xf32> -> vector<16x32xf32>
    %cst_28 = arith.constant dense<0xFF800000> : vector<32xf32>
    %65 = vector.multi_reduction <maximumf>, %64, %cst_28 [0] : vector<16x32xf32> to vector<32xf32>
    %66 = vector.shape_cast %65 : vector<32xf32> to vector<1x32xf32>
    %67 = vector.broadcast %66 : vector<1x32xf32> to vector<16x32xf32>
    %68 = arith.subf %64, %67 : vector<16x32xf32>
    %69 = math.exp %68 : vector<16x32xf32>
    %cst_29 = arith.constant dense<0.000000e+00> : vector<32xf32>
    %70 = vector.multi_reduction <add>, %69, %cst_29 [0] : vector<16x32xf32> to vector<32xf32>
    %71 = vector.shape_cast %70 : vector<32xf32> to vector<1x32xf32>
    %cst_30 = arith.constant dense<0.000000e+00> : vector<1x32xf32>
    %72 = tpu.matmul %5, %69, %cst_30 {dimension_numbers = #tpu.dot_dimension_numbers<[1], [0], [0], [1], [0, 0, 1, 1], [], []>} : vector<1x16xf32>, vector<16x32xf32>, vector<1x32xf32> -> vector<1x32xf32>
    %73 = tpu.reciprocal %71 {approx = true} : vector<1x32xf32> -> vector<1x32xf32>
    %74 = arith.mulf %72, %73 : vector<1x32xf32>
    %75 = vector.extract_strided_slice %3 {offsets = [4, 0], sizes = [1, 4], strides = [1, 1]} : vector<8x4xf32> to vector<1x4xf32>
    %76 = vector.extract_strided_slice %6 {offsets = [0, 0], sizes = [4, 32], strides = [1, 1]} : vector<8x32xf32> to vector<4x32xf32>
    %cst_31 = arith.constant dense<0.000000e+00> : vector<1x32xf32>
    %77 = tpu.matmul %75, %76, %cst_31 {dimension_numbers = #tpu.dot_dimension_numbers<[1], [0], [0], [1], [0, 0, 1, 1], [], []>} : vector<1x4xf32>, vector<4x32xf32>, vector<1x32xf32> -> vector<1x32xf32>
    %78 = vector.extract_strided_slice %6 {offsets = [4, 0], sizes = [4, 32], strides = [1, 1]} : vector<8x32xf32> to vector<4x32xf32>
    %cst_32 = arith.constant dense<0.000000e+00> : vector<1x32xf32>
    %79 = tpu.matmul %75, %78, %cst_32 {dimension_numbers = #tpu.dot_dimension_numbers<[1], [0], [0], [1], [0, 0, 1, 1], [], []>} : vector<1x4xf32>, vector<4x32xf32>, vector<1x32xf32> -> vector<1x32xf32>
    %80 = tpu.concatenate %77, %79 in 0 : vector<1x32xf32>, vector<1x32xf32> -> vector<2x32xf32>
    %cst_33 = arith.constant dense<0.000000e+00> : vector<16x32xf32>
    %81 = tpu.matmul %4, %80, %cst_33 {dimension_numbers = #tpu.dot_dimension_numbers<[1], [0], [0], [1], [0, 0, 1, 1], [], []>} : vector<16x2xf32>, vector<2x32xf32>, vector<16x32xf32> -> vector<16x32xf32>
    %cst_34 = arith.constant dense<0xFF800000> : vector<32xf32>
    %82 = vector.multi_reduction <maximumf>, %81, %cst_34 [0] : vector<16x32xf32> to vector<32xf32>
    %83 = vector.shape_cast %82 : vector<32xf32> to vector<1x32xf32>
    %84 = vector.broadcast %83 : vector<1x32xf32> to vector<16x32xf32>
    %85 = arith.subf %81, %84 : vector<16x32xf32>
    %86 = math.exp %85 : vector<16x32xf32>
    %cst_35 = arith.constant dense<0.000000e+00> : vector<32xf32>
    %87 = vector.multi_reduction <add>, %86, %cst_35 [0] : vector<16x32xf32> to vector<32xf32>
    %88 = vector.shape_cast %87 : vector<32xf32> to vector<1x32xf32>
    %cst_36 = arith.constant dense<0.000000e+00> : vector<1x32xf32>
    %89 = tpu.matmul %5, %86, %cst_36 {dimension_numbers = #tpu.dot_dimension_numbers<[1], [0], [0], [1], [0, 0, 1, 1], [], []>} : vector<1x16xf32>, vector<16x32xf32>, vector<1x32xf32> -> vector<1x32xf32>
    %90 = tpu.reciprocal %88 {approx = true} : vector<1x32xf32> -> vector<1x32xf32>
    %91 = arith.mulf %89, %90 : vector<1x32xf32>
    %92 = vector.extract_strided_slice %3 {offsets = [5, 0], sizes = [1, 4], strides = [1, 1]} : vector<8x4xf32> to vector<1x4xf32>
    %93 = vector.extract_strided_slice %6 {offsets = [0, 0], sizes = [4, 32], strides = [1, 1]} : vector<8x32xf32> to vector<4x32xf32>
    %cst_37 = arith.constant dense<0.000000e+00> : vector<1x32xf32>
    %94 = tpu.matmul %92, %93, %cst_37 {dimension_numbers = #tpu.dot_dimension_numbers<[1], [0], [0], [1], [0, 0, 1, 1], [], []>} : vector<1x4xf32>, vector<4x32xf32>, vector<1x32xf32> -> vector<1x32xf32>
    %95 = vector.extract_strided_slice %6 {offsets = [4, 0], sizes = [4, 32], strides = [1, 1]} : vector<8x32xf32> to vector<4x32xf32>
    %cst_38 = arith.constant dense<0.000000e+00> : vector<1x32xf32>
    %96 = tpu.matmul %92, %95, %cst_38 {dimension_numbers = #tpu.dot_dimension_numbers<[1], [0], [0], [1], [0, 0, 1, 1], [], []>} : vector<1x4xf32>, vector<4x32xf32>, vector<1x32xf32> -> vector<1x32xf32>
    %97 = tpu.concatenate %94, %96 in 0 : vector<1x32xf32>, vector<1x32xf32> -> vector<2x32xf32>
    %cst_39 = arith.constant dense<0.000000e+00> : vector<16x32xf32>
    %98 = tpu.matmul %4, %97, %cst_39 {dimension_numbers = #tpu.dot_dimension_numbers<[1], [0], [0], [1], [0, 0, 1, 1], [], []>} : vector<16x2xf32>, vector<2x32xf32>, vector<16x32xf32> -> vector<16x32xf32>
    %cst_40 = arith.constant dense<0xFF800000> : vector<32xf32>
    %99 = vector.multi_reduction <maximumf>, %98, %cst_40 [0] : vector<16x32xf32> to vector<32xf32>
    %100 = vector.shape_cast %99 : vector<32xf32> to vector<1x32xf32>
    %101 = vector.broadcast %100 : vector<1x32xf32> to vector<16x32xf32>
    %102 = arith.subf %98, %101 : vector<16x32xf32>
    %103 = math.exp %102 : vector<16x32xf32>
    %cst_41 = arith.constant dense<0.000000e+00> : vector<32xf32>
    %104 = vector.multi_reduction <add>, %103, %cst_41 [0] : vector<16x32xf32> to vector<32xf32>
    %105 = vector.shape_cast %104 : vector<32xf32> to vector<1x32xf32>
    %cst_42 = arith.constant dense<0.000000e+00> : vector<1x32xf32>
    %106 = tpu.matmul %5, %103, %cst_42 {dimension_numbers = #tpu.dot_dimension_numbers<[1], [0], [0], [1], [0, 0, 1, 1], [], []>} : vector<1x16xf32>, vector<16x32xf32>, vector<1x32xf32> -> vector<1x32xf32>
    %107 = tpu.reciprocal %105 {approx = true} : vector<1x32xf32> -> vector<1x32xf32>
    %108 = arith.mulf %106, %107 : vector<1x32xf32>
    %109 = vector.extract_strided_slice %3 {offsets = [6, 0], sizes = [1, 4], strides = [1, 1]} : vector<8x4xf32> to vector<1x4xf32>
    %110 = vector.extract_strided_slice %6 {offsets = [0, 0], sizes = [4, 32], strides = [1, 1]} : vector<8x32xf32> to vector<4x32xf32>
    %cst_43 = arith.constant dense<0.000000e+00> : vector<1x32xf32>
    %111 = tpu.matmul %109, %110, %cst_43 {dimension_numbers = #tpu.dot_dimension_numbers<[1], [0], [0], [1], [0, 0, 1, 1], [], []>} : vector<1x4xf32>, vector<4x32xf32>, vector<1x32xf32> -> vector<1x32xf32>
    %112 = vector.extract_strided_slice %6 {offsets = [4, 0], sizes = [4, 32], strides = [1, 1]} : vector<8x32xf32> to vector<4x32xf32>
    %cst_44 = arith.constant dense<0.000000e+00> : vector<1x32xf32>
    %113 = tpu.matmul %109, %112, %cst_44 {dimension_numbers = #tpu.dot_dimension_numbers<[1], [0], [0], [1], [0, 0, 1, 1], [], []>} : vector<1x4xf32>, vector<4x32xf32>, vector<1x32xf32> -> vector<1x32xf32>
    %114 = tpu.concatenate %111, %113 in 0 : vector<1x32xf32>, vector<1x32xf32> -> vector<2x32xf32>
    %cst_45 = arith.constant dense<0.000000e+00> : vector<16x32xf32>
    %115 = tpu.matmul %4, %114, %cst_45 {dimension_numbers = #tpu.dot_dimension_numbers<[1], [0], [0], [1], [0, 0, 1, 1], [], []>} : vector<16x2xf32>, vector<2x32xf32>, vector<16x32xf32> -> vector<16x32xf32>
    %cst_46 = arith.constant dense<0xFF800000> : vector<32xf32>
    %116 = vector.multi_reduction <maximumf>, %115, %cst_46 [0] : vector<16x32xf32> to vector<32xf32>
    %117 = vector.shape_cast %116 : vector<32xf32> to vector<1x32xf32>
    %118 = vector.broadcast %117 : vector<1x32xf32> to vector<16x32xf32>
    %119 = arith.subf %115, %118 : vector<16x32xf32>
    %120 = math.exp %119 : vector<16x32xf32>
    %cst_47 = arith.constant dense<0.000000e+00> : vector<32xf32>
    %121 = vector.multi_reduction <add>, %120, %cst_47 [0] : vector<16x32xf32> to vector<32xf32>
    %122 = vector.shape_cast %121 : vector<32xf32> to vector<1x32xf32>
    %cst_48 = arith.constant dense<0.000000e+00> : vector<1x32xf32>
    %123 = tpu.matmul %5, %120, %cst_48 {dimension_numbers = #tpu.dot_dimension_numbers<[1], [0], [0], [1], [0, 0, 1, 1], [], []>} : vector<1x16xf32>, vector<16x32xf32>, vector<1x32xf32> -> vector<1x32xf32>
    %124 = tpu.reciprocal %122 {approx = true} : vector<1x32xf32> -> vector<1x32xf32>
    %125 = arith.mulf %123, %124 : vector<1x32xf32>
    %126 = vector.extract_strided_slice %3 {offsets = [7, 0], sizes = [1, 4], strides = [1, 1]} : vector<8x4xf32> to vector<1x4xf32>
    %127 = vector.extract_strided_slice %6 {offsets = [0, 0], sizes = [4, 32], strides = [1, 1]} : vector<8x32xf32> to vector<4x32xf32>
    %cst_49 = arith.constant dense<0.000000e+00> : vector<1x32xf32>
    %128 = tpu.matmul %126, %127, %cst_49 {dimension_numbers = #tpu.dot_dimension_numbers<[1], [0], [0], [1], [0, 0, 1, 1], [], []>} : vector<1x4xf32>, vector<4x32xf32>, vector<1x32xf32> -> vector<1x32xf32>
    %129 = vector.extract_strided_slice %6 {offsets = [4, 0], sizes = [4, 32], strides = [1, 1]} : vector<8x32xf32> to vector<4x32xf32>
    %cst_50 = arith.constant dense<0.000000e+00> : vector<1x32xf32>
    %130 = tpu.matmul %126, %129, %cst_50 {dimension_numbers = #tpu.dot_dimension_numbers<[1], [0], [0], [1], [0, 0, 1, 1], [], []>} : vector<1x4xf32>, vector<4x32xf32>, vector<1x32xf32> -> vector<1x32xf32>
    %131 = tpu.concatenate %128, %130 in 0 : vector<1x32xf32>, vector<1x32xf32> -> vector<2x32xf32>
    %cst_51 = arith.constant dense<0.000000e+00> : vector<16x32xf32>
    %132 = tpu.matmul %4, %131, %cst_51 {dimension_numbers = #tpu.dot_dimension_numbers<[1], [0], [0], [1], [0, 0, 1, 1], [], []>} : vector<16x2xf32>, vector<2x32xf32>, vector<16x32xf32> -> vector<16x32xf32>
    %cst_52 = arith.constant dense<0xFF800000> : vector<32xf32>
    %133 = vector.multi_reduction <maximumf>, %132, %cst_52 [0] : vector<16x32xf32> to vector<32xf32>
    %134 = vector.shape_cast %133 : vector<32xf32> to vector<1x32xf32>
    %135 = vector.broadcast %134 : vector<1x32xf32> to vector<16x32xf32>
    %136 = arith.subf %132, %135 : vector<16x32xf32>
    %137 = math.exp %136 : vector<16x32xf32>
    %cst_53 = arith.constant dense<0.000000e+00> : vector<32xf32>
    %138 = vector.multi_reduction <add>, %137, %cst_53 [0] : vector<16x32xf32> to vector<32xf32>
    %139 = vector.shape_cast %138 : vector<32xf32> to vector<1x32xf32>
    %cst_54 = arith.constant dense<0.000000e+00> : vector<1x32xf32>
    %140 = tpu.matmul %5, %137, %cst_54 {dimension_numbers = #tpu.dot_dimension_numbers<[1], [0], [0], [1], [0, 0, 1, 1], [], []>} : vector<1x16xf32>, vector<16x32xf32>, vector<1x32xf32> -> vector<1x32xf32>
    %141 = tpu.reciprocal %139 {approx = true} : vector<1x32xf32> -> vector<1x32xf32>
    %142 = arith.mulf %140, %141 : vector<1x32xf32>
    %143 = tpu.concatenate %23, %40, %57, %74, %91, %108, %125, %142 in 0 : vector<1x32xf32>, vector<1x32xf32>, vector<1x32xf32>, vector<1x32xf32>, vector<1x32xf32>, vector<1x32xf32>, vector<1x32xf32>, vector<1x32xf32> -> vector<8x32xf32>
    %144 = vector.shape_cast %143 : vector<8x32xf32> to vector<1x8x32xf32>
    %c0_55 = arith.constant 0 : index
    %c0_56 = arith.constant 0 : index
    %c0_57 = arith.constant 0 : index
    %145 = vector.load %arg7[%c0_55, %c0_56, %c0_57] : memref<1x8x32xf32, #tpu.memory_space<vmem>>, vector<1x8x32xf32>
    tpu.vector_store %arg7[%c0_55, %c0_56, %c0_57], %144 {strides = array<i32>} : memref<1x8x32xf32, #tpu.memory_space<vmem>>, vector<1x8x32xf32>,
    return
  }
  func.func @transform_0(%arg0: i32, %arg1: i32) -> (i32, i32, i32) {
    %c0_i32 = arith.constant 0 : i32
    %c0_i32_0 = arith.constant 0 : i32
    %c0_i32_1 = arith.constant 0 : i32
    return %arg0, %c0_i32, %c0_i32_0 : i32, i32, i32
  }
  func.func @transform_1(%arg0: i32, %arg1: i32) -> (i32, i32) {
    %c0_i32 = arith.constant 0 : i32
    %c0_i32_0 = arith.constant 0 : i32
    %c0_i32_1 = arith.constant 0 : i32
    return %c0_i32, %c0_i32_0 : i32, i32
  }
  func.func @transform_2(%arg0: i32, %arg1: i32) -> (i32, i32) {
    %c0_i32 = arith.constant 0 : i32
    %c0_i32_0 = arith.constant 0 : i32
    return %arg1, %c0_i32 : i32, i32
  }
  func.func @transform_3(%arg0: i32, %arg1: i32) -> (i32, i32) {
    %c0_i32 = arith.constant 0 : i32
    %c0_i32_0 = arith.constant 0 : i32
    %c0_i32_1 = arith.constant 0 : i32
    return %c0_i32, %c0_i32_0 : i32, i32
  }
  func.func @transform_4(%arg0: i32, %arg1: i32) -> (i32, i32) {
    %c0_i32 = arith.constant 0 : i32
    %c0_i32_0 = arith.constant 0 : i32
    %c0_i32_1 = arith.constant 0 : i32
    return %c0_i32, %c0_i32_0 : i32, i32
  }
  func.func @transform_5(%arg0: i32, %arg1: i32) -> (i32, i32, i32) {
    %c0_i32 = arith.constant 0 : i32
    %c0_i32_0 = arith.constant 0 : i32
    return %arg0, %arg1, %c0_i32 : i32, i32, i32
  }
}

</mosaic_0001>

<bundles_post_ra>
// kernel: efficient_stereo_tail.5
= control target key start
LH: loop header
LB: loop body
LE: loop exit
PB: predicated region body
PF: predicated region fallthrough
CT: control target
= control target key end

     0   :  { %10 = vsyncpa [#allocation4], 0  ;;  %s2045_s0 = inlined_call_operand.vmem [shape: f32[2,8,4], index: 0, kind: input, shape index: {}]   ;;  %s2046_s1 = inlined_call_operand.vmem [shape: f32[4,32], index: 1, kind: input, shape index: {}]   ;;  %s2047_s2 = inlined_call_operand.vmem [shape: f32[32,4], index: 2, kind: input, shape index: {}]   ;;  %s2048_s3 = inlined_call_operand.vmem [shape: f32[16,2], index: 3, kind: input, shape index: {}]   ;;  %s2049_s4 = inlined_call_operand.vmem [shape: f32[1,16], index: 4, kind: input, shape index: {}]   ;;  %s2050_s5 = inlined_call_operand.hbm [shape: f32[2,32,32], index: 5, kind: output, shape index: {}]  }
   0x1   :  { %12 = vsyncpa [#allocation4 + $0x1], 0  ;;  %s1726_s18 = smov 0   ;;  %s1728_s19 = smov 0  }
   0x2   :  { %s1730_s20 = smov 0   ;;  %s1732_s21 = smov 0  }
   0x3   :  { %s1734_s22 = smov 0   ;;  %s1736_s23 = smov 0  }
   0x4   :  { %s1738_s24 = smov 0   ;;  %s1740_s25 = smov 0  }
   0x5 LB: > { %s1401_s26 = sadd.s32 4294967295, %s1694_s25   ;;  %s1402_s27 = sadd.s32 4294967294, %s1694_s25   ;;  %s1694_s25 = sphi %s1740_s25, %s18_s25   ;;  %s1690_s24 = sphi %s1738_s24, %s2067_s24   ;;  %s1686_s23 = sphi %s1736_s23, %s2066_s23   ;;  %s1682_s22 = sphi %s1734_s22, %s2065_s22   ;;  %s1678_s21 = sphi %s1732_s21, %s2064_s21   ;;  %s1674_s20 = sphi %s1730_s20, %s2063_s20   ;;  %s1670_s19 = sphi %s1728_s19, %s2062_s19   ;;  %s1666_s18 = sphi %s1726_s18, %s2061_s18  }
   0x6   : > { %s27_s28 = sadd.s32 1, %s1686_s23  ;;  %s30_s29 = sadd.s32 1, %s1690_s24 }
   0x7   : > { %p28_p0 = scmp.ge.s32.totalorder %s27_s28, 4  ;;  %p164_p1 = scmp.ne.s32.totalorder %s1674_s20, %s1670_s19 }
   0x8   : > { %p165_p2 = scmp.eq.s32.totalorder %s1401_s26, 7  ;;  %p170_p5 = scmp.ne.s32.totalorder %s1670_s19, %s1666_s18 }
   0x9   : > { %s2069_s28 = smov (%p28_p0, %s27_s28), 0  ;;  %s2071_s29 = smov (!%p28_p0, %s30_s29), %s1690_s24 }
   0xa   : > { %2054 = sst [smem:[#allocation6_spill]] %s2069_s28  ;;  %s150_s30 = ssub.s32 %s1686_s23, %s2069_s28 }
   0xb   : > { %p1777_p3 = por %p165_p2, %p164_p1  ;;  %p32_p4 = scmp.ge.s32.totalorder %s2071_s29, 2 }
   0xc   : > { %p171_p6 = scmp.eq.s32.totalorder %s1402_s27, 7  ;;  %p1405_p7 = scmp.ge.s32.totalorder %s1694_s25, 1 }
   0xd   : > { %s2073_s29 = smov (%p32_p4, %s2071_s29), 0  ;;  %p212_p9 = scmp.lt.s32.totalorder %s1694_s25, 9 }
   0xe   : > { %2056 = sst [smem:[#allocation7_spill]] %s2073_s29  ;;  %p1786_p8 = por %p171_p6, %p170_p5 }
   0xf   : > { %s149_s8 = ssub.s32 %s1690_s24, %s2073_s29  ;;  %s154_s9 = sadd.s32 1, %s1674_s20 }
  0x10   : > { %s151_s10 = sor.u32 %s150_s30, %s149_s8  ;;  %p213_p10 = pnand %p1405_p7, %p212_p9 }
  0x11   : > { %p152_p11 = scmp.eq.s32.totalorder %s151_s10, 0  ;;  %s2052_s12 = sand.u32 (!%p213_p10), 1, %s1670_s19  }
  0x12   : > { %216 = sbr.rel (%p213_p10) target bundleno = 1836 (0x72c), region = 40  ;;  %p243_p12 = scmp.lt.s32.totalorder (!%p213_p10), %s1682_s22, 1 }
  0x13   : > { %s1795_s11 = scalar_select %p152_p11, %s1674_s20, %s154_s9  }
  0x14   : > { %s1801_s13 = sshll.u32 (!%p213_p10), %s2052_s12, 3  ;;  %p247_p13 = scmp.lt.s32.totalorder (!%p213_p10), %s1678_s21, 3 }
  0x15   : > { %s242_s29 = scalar_lea.vmem (!%p213_p10), [#allocation3], %s1801_s13  ;;  %p1409_p0 = scmp.ne.s32.totalorder (!%p213_p10), %s1678_s21, 0 }
  0x17   : > { %s244_s14 = scalar_select %p243_p12, %s1682_s22, 1 }
  0x18   : > { %s248_s15 = scalar_select %p247_p13, %s1678_s21, 3 }
  0x19   : > { %s1407_s16 = sshll.u32 %s244_s14, 3  ;;  %254 = sbr.rel (%p1409_p0) target bundleno = 159 (0x9f), region = 44 }
  0x1a   : > { %s246_s27 = scalar_lea.vmem %s2045_s0, %s1407_s16  ;;  %s1408_s30 = sshll.u32 %s248_s15, 3 }
  0x1b   : > { %s250_s10 = scalar_lea.vmem %s2047_s2, %s1408_s30 }
  0x1e   : > { %v256_v0 = vld [vmem:[%s2046_s1] sm:$0xf]  ;;  %vm261_vm0 = vcmask 1043456   ;;  %vm257_vm1 = vcmask 31744   ;;  %vm285_vm2 = vcmask 261120  }
  0x1f   : > { %v255_v1 = vld [vmem:[%s246_s27] sm:$0xff]  ;;  %1410 = vmatpush.msk.msra.mxu0 %vm261_vm0, %v256_v0 }
  0x20   : > { %1411 = vmatmul.msk.f32.vlgmr.msra.gmra.mxu0 %vm257_vm1, %v255_v1 }
  0x9d   : > { %v282_v2 = vpop.f32.mrf.mxu0 }
  0x9e   : > { %286 = vst.msk [vmem:[#allocation2] sm:$0xff] %vm285_vm2, %v282_v2 }
  0x9f PF: > { %vm296_vm3 = vcmask 1043456   ;;  %v1822_v5 = vld [vmem:[%s250_s10] sm:$0xff]  ;;  %vm292_vm4 = vcmask 31744   ;;  %vm346_vm5 = vcmask 1040384   ;;  %vm355_vm6 = vcmask 1041408   ;;  %v1857_v12 = vld [vmem:[%s2048_s3 + $0x8] sm:$0xff] }
  0xa0   : > { %v433_v6 = vrot.slane %v1822_v5, 1  ;;  %v1844_v10 = vld [vmem:[%s2048_s3] sm:$0xff]  ;;  %vm348_vm7 = vcmask 15360   ;;  %vm382_vm8 = vcmask 261120   ;;  %v552_v24 = vrot.slane %v1822_v5, 2  ;;  %s1477_s26 = sshll.u32 %s1682_s22, 2 }
  0xa1   : > { %v1870_v35 = vld [vmem:[%s2049_s4] sm:$0x1]  ;;  %vm407_vm9 = vcmask 130048   ;;  %v671_v59 = vrot.slane %v1822_v5, 3  ;;  %vm1289_vm10 = vcmask 1042432   ;;  %vm1292_vm11 = vcmask 1044480   ;;  %s1310_s27 = sadd.s32 %s1678_s21, %s1477_s26 }
  0xa2   : > { %vm1294_vm12 = vcmask 1045504   ;;  %s1478_s30 = sshll.u32 %s1310_s27, 3  ;;  %s1314_s28 = sshll.u32 %s242_s29, 4  ;;  %vm1296_vm13 = vcmask 1046528   ;;  %s1315_s28 = int_to_ptr.vmem [resolvable:$true] %s1314_s28 }
  0xa3   : > { %s1312_s10 = scalar_lea.hbm %s2050_s5, %s1478_s30  ;;  %s2058_s21 = sand.u32 1, %s1670_s19  }
  0xa4   : > { %s1316_s12 = sshll.u32 %s1312_s10, 4  ;;  %s1300_s22 = scalar_lea.sflag [#allocation4], %s2058_s21  ;;  %s1317_s12 = int_to_ptr.hbm [resolvable:$true] %s1316_s12 }
  0xa5   : > { %v1817_v3 = vld [vmem:[#allocation2] sm:$0xff]  ;;  %s1614_s14 = sshra.s32 %s1317_s12, 4  ;;  %s1620_s26 = scalar_lea.hbm %s2050_s5, 64  ;;  %s1615_s14 = int_to_ptr.hbm [resolvable:$true] %s1614_s14 }
  0xa6   : > { %v1820_v4 = vrot.slane %v1817_v3, 4  ;;  %1412 = vmatpush.msk.msra.mxu0 %vm296_vm3, %v1817_v3  ;;  %s1616_s15 = scalar_lea.hbm %s1615_s14, 8  ;;  %p1621_p5 = scmp.lt.s32.totalorder %s1615_s14, %s2050_s5 }
  0xa7   : > { %1413 = vmatmul.msk.f32.vlgmr.msra.gmra.mxu0 %vm292_vm4, %v1822_v5  ;;  %p1617_p1 = scmp.ne.s32.totalorder %s1615_s14, %s1616_s15  ;;  %p1622_p6 = scmp.lt.s32.totalorder %s1620_s26, %s1616_s15 }
  0xa8   : > { %1414 = vmatpush.msk.msra.mxu3 %vm296_vm3, %v1820_v4  ;;  %1422 = vmatpush.msk.msra.mxu1 %vm296_vm3, %v1820_v4 }
  0xa9   : > { %1415 = vmatmul.msk.f32.vlgmr.msra.gmra.mxu3 %vm292_vm4, %v1822_v5  ;;  %1420 = vmatpush.msk.msrb.mxu0 %vm296_vm3, %v1817_v3  ;;  %p1618_p2 = pnand %p1617_p1, %p1777_p3  ;;  %p1623_p7 = por %p1622_p6, %p1621_p5 }
  0xaa   : > { %1428 = vmatpush.msk.msrb.mxu1 %vm296_vm3, %v1817_v3 }
  0xab   : > { %1423 = vmatmul.msk.f32.vlgmr.msra.gmra.mxu1 %vm292_vm4, %v433_v6  ;;  %p1619_p4 = pneg %p1618_p2 }
  0xad   : > { %p1624_p9 = pnand %p1623_p7, %p1619_p4 }
  0xaf   : > { %1421 = vmatmul.msk.f32.vlgmr.msrb.gmra.mxu0 %vm292_vm4, %v433_v6 }
  0xb3   : > { %1429 = vmatmul.msk.f32.vlgmr.msrb.gmra.mxu1 %vm292_vm4, %v552_v24 }
 0x124   : > { %v317_v8 = vpop.f32.mrf.mxu0 }
 0x128   : > { %v473_v29 = vpop.f32.mrf.mxu1 }
 0x129   : > { %v477_v30 = vrot.slane %v473_v29, 7 }
 0x12c   : > { %v340_v7 = vpop.f32.mrf.mxu3  ;;  %v453_v31 = vpop.f32.mrf.mxu0 }
 0x12d   : > { %v344_v9 = vrot.slane %v340_v7, 7  ;;  %v479_v37 = vsel %vm346_vm5, %v453_v31, %v477_v30 }
 0x12f   : > { %v347_v11 = vsel %vm346_vm5, %v317_v8, %v344_v9 }
 0x130   : > { %1416 = vmatpush.msk.msra.mxu2 %vm355_vm6, %v347_v11  ;;  %v572_v6 = vpop.f32.mrf.mxu1 }
 0x131   : > { %1417 = vmatmul.msk.f32.vlgmr.msra.gmra.mxu2 %vm348_vm7, %v1844_v10 }
 0x132   : > { %1430 = vmatpush.msk.msrb.mxu2 %vm296_vm3, %v1820_v4 }
 0x134   : > { %1436 = vmatpush.msk.msra.mxu2 %vm296_vm3, %v1817_v3 }
 0x139   : > { %1418 = vmatmul.msk.f32.gmra.mxu2 %vm348_vm7, %v1857_v12 }
 0x141   : > { %1431 = vmatmul.msk.f32.vlgmr.msrb.gmra.mxu2 %vm292_vm4, %v552_v24 }
 0x149   : > { %1437 = vmatmul.msk.f32.vlgmr.msra.gmra.mxu2 %vm292_vm4, %v671_v59 }
 0x1b4   : > { %v376_v13 = vpop.f32.mrf.mxu2 }
 0x1b5   : > { %v383_v15 = vsel %vm382_vm8, %v376_v13, -inf }
 0x1bc   : > { %v379_v14 = vpop.f32.mrf.mxu2 }
 0x1bd   : > { %v384_v16 = vsel %vm382_vm8, %v379_v14, -inf }
 0x1be   : > { %v385_v17 = vmax.f32 %v383_v15, %v384_v16 }
 0x1c0   : > { %v386_v18 = vrot.slane %v385_v17, 4 }
 0x1c2   : > { %v387_v19 = vmax.f32 %v385_v17, %v386_v18 }
 0x1c4   : > { %v388_v20 = vrot.slane %v387_v19, 2  ;;  %v592_v0 = vpop.f32.mrf.mxu2 }
 0x1c5   : > { %v596_v1 = vrot.slane %v592_v0, 7 }
 0x1c6   : > { %v389_v21 = vmax.f32 %v387_v19, %v388_v20 }
 0x1c8   : > { %v390_v22 = vrot.slane %v389_v21, 1 }
 0x1ca   : > { %v391_v23 = vmax.f32 %v389_v21, %v390_v22 }
 0x1cc   : > { %v392_v25 = vsub.f32 %v376_v13, %v391_v23  ;;  %v393_v26 = vsub.f32 %v379_v14, %v391_v23  ;;  %v598_v13 = vsel %vm346_vm5, %v572_v6, %v596_v1 }
 0x1ce   : > { %v394_v27 = vmul.f32 1.442695, %v392_v25  ;;  %v396_v28 = vmul.f32 1.442695, %v393_v26 }
 0x1d0   : > { %1552 = vpow2.f32 %v396_v28 }
 0x1d1   : > { %1554 = vpow2.f32 %v394_v27 }
 0x1d6   : > { %v1553_v32 = vpop.eup %1552 }
 0x1d7   : > { %v1555_v33 = vpop.eup %1554  ;;  %v399_v34 = vsel %vm382_vm8, %v1553_v32, 0.0  ;;  %425 = vmatpush.msrb.mxu3 %v1553_v32 }
 0x1d8   : > { %v398_v36 = vsel %vm382_vm8, %v1555_v33, 0.0 }
 0x1d9   : > { %426 = vmatpush.msrb.mxu3 %v1555_v33  ;;  %v400_v38 = vadd.f32 %v399_v34, %v398_v36 }
 0x1da   : > { %1419 = vmatmul.msk.f32.vlgmr.msrb.gmra.mxu3 %vm407_vm9, %v1870_v35 }
 0x1db   : > { %1424 = vmatpush.msk.msra.mxu3 %vm355_vm6, %v479_v37  ;;  %v401_v39 = vrot.slane %v400_v38, 4  ;;  %v790_v37 = vrot.slane %v1822_v5, 4 }
 0x1dd   : > { %1438 = vmatpush.msk.msrb.mxu3 %vm296_vm3, %v1820_v4  ;;  %v402_v40 = vadd.f32 %v401_v39, %v400_v38 }
 0x1df   : > { %v403_v41 = vrot.slane %v402_v40, 2 }
 0x1e1   : > { %v404_v42 = vadd.f32 %v403_v41, %v402_v40 }
 0x1e2   : > { %1425 = vmatmul.msk.f32.vlgmr.msra.gmra.mxu3 %vm348_vm7, %v1844_v10 }
 0x1e3   : > { %1444 = vmatpush.msk.msra.mxu3 %vm296_vm3, %v1817_v3  ;;  %v405_v43 = vrot.slane %v404_v42, 1 }
 0x1e5   : > { %v406_v44 = vadd.f32 %v405_v43, %v404_v42 }
 0x1e7   : > { %1556 = vrcp.f32 %v406_v44 }
 0x1ea   : > { %1426 = vmatmul.msk.f32.gmra.mxu3 %vm348_vm7, %v1857_v12 }
 0x1ed   : > { %v1557_v45 = vpop.eup %1556 }
 0x1f2   : > { %1439 = vmatmul.msk.f32.vlgmr.msrb.gmra.mxu3 %vm292_vm4, %v671_v59 }
 0x1fa   : > { %1445 = vmatmul.msk.f32.vlgmr.msra.gmra.mxu3 %vm292_vm4, %v790_v37 }
 0x25d   : > { %v428_v46 = vpop.f32.mrf.mxu3 }
 0x25e   : > { %v432_v47 = vmul.f32 %v1557_v45, %v428_v46  ;;  %v691_v45 = vpop.f32.mrf.mxu2 }
 0x265   : > { %v500_v48 = vpop.f32.mrf.mxu3 }
 0x266   : > { %v506_v50 = vsel %vm382_vm8, %v500_v48, -inf }
 0x26d   : > { %v503_v49 = vpop.f32.mrf.mxu3 }
 0x26e   : > { %v507_v51 = vsel %vm382_vm8, %v503_v49, -inf }
 0x26f   : > { %v508_v52 = vmax.f32 %v506_v50, %v507_v51 }
 0x271   : > { %v509_v53 = vrot.slane %v508_v52, 4 }
 0x273   : > { %v510_v54 = vmax.f32 %v508_v52, %v509_v53 }
 0x275   : > { %v511_v55 = vrot.slane %v510_v54, 2  ;;  %v711_v42 = vpop.f32.mrf.mxu3 }
 0x276   : > { %v715_v43 = vrot.slane %v711_v42, 7 }
 0x277   : > { %v512_v56 = vmax.f32 %v510_v54, %v511_v55 }
 0x278   : > { %v717_v50 = vsel %vm346_vm5, %v691_v45, %v715_v43 }
 0x279   : > { %v513_v57 = vrot.slane %v512_v56, 1 }
 0x27b   : > { %v514_v58 = vmax.f32 %v512_v56, %v513_v57 }
 0x27d   : > { %v515_v60 = vsub.f32 %v500_v48, %v514_v58  ;;  %v516_v61 = vsub.f32 %v503_v49, %v514_v58 }
 0x27f   : > { %v517_v62 = vmul.f32 1.442695, %v515_v60  ;;  %v519_v63 = vmul.f32 1.442695, %v516_v61 }
 0x281   : > { %1558 = vpow2.f32 %v517_v62 }
 0x282   : > { %1560 = vpow2.f32 %v519_v63 }
 0x287   : > { %v1559_v2 = vpop.eup %1558 }
 0x288   : > { %v1561_v7 = vpop.eup %1560  ;;  %v521_v8 = vsel %vm382_vm8, %v1559_v2, 0.0 }
 0x289   : > { %v522_v9 = vsel %vm382_vm8, %v1561_v7, 0.0  ;;  %544 = vmatpush.msra.mxu0 %v1561_v7 }
 0x28a   : > { %v523_v11 = vadd.f32 %v522_v9, %v521_v8 }
 0x28b   : > { %545 = vmatpush.msra.mxu0 %v1559_v2 }
 0x28c   : > { %1427 = vmatmul.msk.f32.vlgmr.msra.gmra.mxu0 %vm407_vm9, %v1870_v35  ;;  %v524_v14 = vrot.slane %v523_v11, 4 }
 0x28d   : > { %1432 = vmatpush.msk.msrb.mxu0 %vm355_vm6, %v598_v13 }
 0x28e   : > { %v525_v15 = vadd.f32 %v524_v14, %v523_v11  ;;  %v909_v14 = vrot.slane %v1822_v5, 5 }
 0x28f   : > { %1446 = vmatpush.msk.msra.mxu0 %vm296_vm3, %v1820_v4 }
 0x290   : > { %v526_v16 = vrot.slane %v525_v15, 2 }
 0x292   : > { %v527_v17 = vadd.f32 %v526_v16, %v525_v15 }
 0x294   : > { %1433 = vmatmul.msk.f32.vlgmr.msrb.gmra.mxu0 %vm348_vm7, %v1844_v10  ;;  %v528_v18 = vrot.slane %v527_v17, 1 }
 0x295   : > { %1452 = vmatpush.msk.msrb.mxu0 %vm296_vm3, %v1817_v3 }
 0x296   : > { %v529_v19 = vadd.f32 %v528_v18, %v527_v17 }
 0x298   : > { %1562 = vrcp.f32 %v529_v19 }
 0x29c   : > { %1434 = vmatmul.msk.f32.gmra.mxu0 %vm348_vm7, %v1857_v12 }
 0x29e   : > { %v1563_v20 = vpop.eup %1562 }
 0x2a4   : > { %1447 = vmatmul.msk.f32.vlgmr.msra.gmra.mxu0 %vm292_vm4, %v790_v37 }
 0x2ac   : > { %1453 = vmatmul.msk.f32.vlgmr.msrb.gmra.mxu0 %vm292_vm4, %v909_v14 }
 0x309   : > { %v547_v21 = vpop.f32.mrf.mxu0 }
 0x30a   : > { %v551_v22 = vmul.f32 %v1563_v20, %v547_v21 }
 0x30c   : > { %v1267_v23 = vrot.slane %v551_v22, 7  ;;  %v810_v22 = vpop.f32.mrf.mxu3 }
 0x30e   : > { %v1287_v24 = vsel %vm346_vm5, %v432_v47, %v1267_v23 }
 0x311   : > { %v619_v25 = vpop.f32.mrf.mxu0 }
 0x312   : > { %v625_v27 = vsel %vm382_vm8, %v619_v25, -inf }
 0x319   : > { %v622_v26 = vpop.f32.mrf.mxu0 }
 0x31a   : > { %v626_v28 = vsel %vm382_vm8, %v622_v26, -inf }
 0x31b   : > { %v627_v29 = vmax.f32 %v625_v27, %v626_v28 }
 0x31d   : > { %v628_v30 = vrot.slane %v627_v29, 4 }
 0x31f   : > { %v629_v31 = vmax.f32 %v627_v29, %v628_v30 }
 0x321   : > { %v630_v32 = vrot.slane %v629_v31, 2  ;;  %v830_v19 = vpop.f32.mrf.mxu0 }
 0x322   : > { %v834_v20 = vrot.slane %v830_v19, 7 }
 0x323   : > { %v631_v33 = vmax.f32 %v629_v31, %v630_v32 }
 0x324   : > { %v836_v27 = vsel %vm346_vm5, %v810_v22, %v834_v20 }
 0x325   : > { %v632_v34 = vrot.slane %v631_v33, 1 }
 0x327   : > { %v633_v36 = vmax.f32 %v631_v33, %v632_v34 }
 0x329   : > { %v634_v38 = vsub.f32 %v619_v25, %v633_v36  ;;  %v635_v39 = vsub.f32 %v622_v26, %v633_v36 }
 0x32b   : > { %v636_v40 = vmul.f32 1.442695, %v634_v38  ;;  %v638_v41 = vmul.f32 1.442695, %v635_v39 }
 0x32d   : > { %1564 = vpow2.f32 %v636_v40 }
 0x32e   : > { %1566 = vpow2.f32 %v638_v41 }
 0x333   : > { %v1565_v44 = vpop.eup %1564 }
 0x334   : > { %v1567_v46 = vpop.eup %1566  ;;  %v640_v47 = vsel %vm382_vm8, %v1565_v44, 0.0 }
 0x335   : > { %v641_v48 = vsel %vm382_vm8, %v1567_v46, 0.0  ;;  %663 = vmatpush.msra.mxu1 %v1567_v46 }
 0x336   : > { %v642_v49 = vadd.f32 %v641_v48, %v640_v47 }
 0x337   : > { %664 = vmatpush.msra.mxu1 %v1565_v44 }
 0x338   : > { %1435 = vmatmul.msk.f32.vlgmr.msra.gmra.mxu1 %vm407_vm9, %v1870_v35  ;;  %v643_v51 = vrot.slane %v642_v49, 4 }
 0x339   : > { %1440 = vmatpush.msk.msrb.mxu1 %vm355_vm6, %v717_v50  ;;  %v1028_v50 = vrot.slane %v1822_v5, 6 }
 0x33a   : > { %v644_v52 = vadd.f32 %v643_v51, %v642_v49 }
 0x33b   : > { %1454 = vmatpush.msk.msra.mxu1 %vm296_vm3, %v1820_v4 }
 0x33c   : > { %v645_v53 = vrot.slane %v644_v52, 2 }
 0x33e   : > { %v646_v54 = vadd.f32 %v645_v53, %v644_v52 }
 0x340   : > { %1441 = vmatmul.msk.f32.vlgmr.msrb.gmra.mxu1 %vm348_vm7, %v1844_v10  ;;  %v647_v55 = vrot.slane %v646_v54, 1 }
 0x341   : > { %1460 = vmatpush.msk.msrb.mxu1 %vm296_vm3, %v1817_v3 }
 0x342   : > { %v648_v56 = vadd.f32 %v647_v55, %v646_v54 }
 0x344   : > { %1568 = vrcp.f32 %v648_v56 }
 0x348   : > { %1442 = vmatmul.msk.f32.gmra.mxu1 %vm348_vm7, %v1857_v12 }
 0x34a   : > { %v1569_v57 = vpop.eup %1568 }
 0x350   : > { %1455 = vmatmul.msk.f32.vlgmr.msra.gmra.mxu1 %vm292_vm4, %v909_v14 }
 0x358   : > { %1461 = vmatmul.msk.f32.vlgmr.msrb.gmra.mxu1 %vm292_vm4, %v1028_v50 }
 0x3b5   : > { %v666_v58 = vpop.f32.mrf.mxu1 }
 0x3b6   : > { %v670_v59 = vmul.f32 %v1569_v57, %v666_v58  ;;  %v929_v58 = vpop.f32.mrf.mxu0 }
 0x3b8   : > { %v1270_v60 = vrot.slane %v670_v59, 6 }
 0x3ba   : > { %v1288_v61 = vsel %vm355_vm6, %v1287_v24, %v1270_v60 }
 0x3bd   : > { %v738_v62 = vpop.f32.mrf.mxu1 }
 0x3be   : > { %v744_v0 = vsel %vm382_vm8, %v738_v62, -inf }
 0x3c5   : > { %v741_v63 = vpop.f32.mrf.mxu1 }
 0x3c6   : > { %v745_v1 = vsel %vm382_vm8, %v741_v63, -inf }
 0x3c7   : > { %v746_v2 = vmax.f32 %v744_v0, %v745_v1 }
 0x3c9   : > { %v747_v6 = vrot.slane %v746_v2, 4 }
 0x3cb   : > { %v748_v7 = vmax.f32 %v746_v2, %v747_v6 }
 0x3cd   : > { %v749_v8 = vrot.slane %v748_v7, 2  ;;  %v949_v55 = vpop.f32.mrf.mxu1 }
 0x3ce   : > { %v953_v56 = vrot.slane %v949_v55, 7 }
 0x3cf   : > { %v750_v9 = vmax.f32 %v748_v7, %v749_v8 }
 0x3d1   : > { %v751_v11 = vrot.slane %v750_v9, 1 }
 0x3d3   : > { %v752_v13 = vmax.f32 %v750_v9, %v751_v11 }
 0x3d5   : > { %v753_v15 = vsub.f32 %v738_v62, %v752_v13  ;;  %v754_v16 = vsub.f32 %v741_v63, %v752_v13  ;;  %v955_v63 = vsel %vm346_vm5, %v929_v58, %v953_v56 }
 0x3d7   : > { %v755_v17 = vmul.f32 1.442695, %v753_v15  ;;  %v757_v18 = vmul.f32 1.442695, %v754_v16 }
 0x3d9   : > { %1570 = vpow2.f32 %v755_v17 }
 0x3da   : > { %1572 = vpow2.f32 %v757_v18 }
 0x3df   : > { %v1571_v21 = vpop.eup %1570 }
 0x3e0   : > { %v1573_v23 = vpop.eup %1572  ;;  %v759_v24 = vsel %vm382_vm8, %v1571_v21, 0.0 }
 0x3e1   : > { %v760_v25 = vsel %vm382_vm8, %v1573_v23, 0.0  ;;  %782 = vmatpush.msrb.mxu2 %v1573_v23 }
 0x3e2   : > { %v761_v26 = vadd.f32 %v760_v25, %v759_v24 }
 0x3e3   : > { %783 = vmatpush.msrb.mxu2 %v1571_v21 }
 0x3e4   : > { %1443 = vmatmul.msk.f32.vlgmr.msrb.gmra.mxu2 %vm407_vm9, %v1870_v35  ;;  %v762_v28 = vrot.slane %v761_v26, 4 }
 0x3e5   : > { %1448 = vmatpush.msk.msra.mxu2 %vm355_vm6, %v836_v27 }
 0x3e6   : > { %v763_v29 = vadd.f32 %v762_v28, %v761_v26  ;;  %v1147_v26 = vrot.slane %v1822_v5, 7 }
 0x3e7   : > { %1462 = vmatpush.msk.msrb.mxu2 %vm296_vm3, %v1820_v4 }
 0x3e8   : > { %v764_v30 = vrot.slane %v763_v29, 2 }
 0x3ea   : > { %v765_v31 = vadd.f32 %v764_v30, %v763_v29 }
 0x3ec   : > { %1449 = vmatmul.msk.f32.vlgmr.msra.gmra.mxu2 %vm348_vm7, %v1844_v10  ;;  %v766_v32 = vrot.slane %v765_v31, 1 }
 0x3ed   : > { %1468 = vmatpush.msk.msra.mxu2 %vm296_vm3, %v1817_v3 }
 0x3ee   : > { %v767_v33 = vadd.f32 %v766_v32, %v765_v31 }
 0x3f0   : > { %1574 = vrcp.f32 %v767_v33 }
 0x3f4   : > { %1450 = vmatmul.msk.f32.gmra.mxu2 %vm348_vm7, %v1857_v12 }
 0x3f6   : > { %v1575_v34 = vpop.eup %1574 }
 0x3fc   : > { %1463 = vmatmul.msk.f32.vlgmr.msrb.gmra.mxu2 %vm292_vm4, %v1028_v50 }
 0x404   : > { %1469 = vmatmul.msk.f32.vlgmr.msra.gmra.mxu2 %vm292_vm4, %v1147_v26 }
 0x467   : > { %v785_v36 = vpop.f32.mrf.mxu2 }
 0x468   : > { %v789_v37 = vmul.f32 %v1575_v34, %v785_v36  ;;  %v1048_v34 = vpop.f32.mrf.mxu1 }
 0x46a   : > { %v1273_v38 = vrot.slane %v789_v37, 5 }
 0x46c   : > { %v1290_v39 = vsel %vm1289_vm10, %v1288_v61, %v1273_v38 }
 0x46f   : > { %v857_v40 = vpop.f32.mrf.mxu2 }
 0x470   : > { %v863_v3 = vsel %vm382_vm8, %v857_v40, -inf }
 0x477   : > { %v860_v41 = vpop.f32.mrf.mxu2 }
 0x478   : > { %v864_v42 = vsel %vm382_vm8, %v860_v41, -inf }
 0x479   : > { %v865_v43 = vmax.f32 %v863_v3, %v864_v42 }
 0x47b   : > { %v866_v44 = vrot.slane %v865_v43, 4 }
 0x47d   : > { %v867_v45 = vmax.f32 %v865_v43, %v866_v44 }
 0x47f   : > { %v868_v46 = vrot.slane %v867_v45, 2  ;;  %v1068_v31 = vpop.f32.mrf.mxu2 }
 0x480   : > { %v1072_v32 = vrot.slane %v1068_v31, 7 }
 0x481   : > { %v869_v47 = vmax.f32 %v867_v45, %v868_v46 }
 0x483   : > { %v870_v48 = vrot.slane %v869_v47, 1 }
 0x485   : > { %v871_v49 = vmax.f32 %v869_v47, %v870_v48 }
 0x487   : > { %v872_v51 = vsub.f32 %v857_v40, %v871_v49  ;;  %v873_v52 = vsub.f32 %v860_v41, %v871_v49 }
 0x489   : > { %v874_v53 = vmul.f32 1.442695, %v872_v51  ;;  %v876_v54 = vmul.f32 1.442695, %v873_v52 }
 0x48b   : > { %1576 = vpow2.f32 %v874_v53 }
 0x48c   : > { %1578 = vpow2.f32 %v876_v54 }
 0x491   : > { %v1577_v57 = vpop.eup %1576 }
 0x492   : > { %v1579_v59 = vpop.eup %1578  ;;  %v878_v60 = vsel %vm382_vm8, %v1577_v57, 0.0 }
 0x493   : > { %v879_v61 = vsel %vm382_vm8, %v1579_v59, 0.0  ;;  %901 = vmatpush.msrb.mxu3 %v1579_v59 }
 0x494   : > { %v880_v62 = vadd.f32 %v879_v61, %v878_v60 }
 0x495   : > { %902 = vmatpush.msrb.mxu3 %v1577_v57 }
 0x496   : > { %1451 = vmatmul.msk.f32.vlgmr.msrb.gmra.mxu3 %vm407_vm9, %v1870_v35  ;;  %v881_v0 = vrot.slane %v880_v62, 4 }
 0x497   : > { %1456 = vmatpush.msk.msra.mxu3 %vm355_vm6, %v955_v63 }
 0x498   : > { %v882_v1 = vadd.f32 %v881_v0, %v880_v62 }
 0x499   : > { %1470 = vmatpush.msk.msrb.mxu3 %vm296_vm3, %v1820_v4 }
 0x49a   : > { %v883_v2 = vrot.slane %v882_v1, 2 }
 0x49c   : > { %v884_v6 = vadd.f32 %v883_v2, %v882_v1 }
 0x49e   : > { %1457 = vmatmul.msk.f32.vlgmr.msra.gmra.mxu3 %vm348_vm7, %v1844_v10  ;;  %v885_v7 = vrot.slane %v884_v6, 1 }
 0x4a0   : > { %v886_v8 = vadd.f32 %v885_v7, %v884_v6  ;;  %v1167_v7 = vpop.f32.mrf.mxu2 }
 0x4a2   : > { %1580 = vrcp.f32 %v886_v8 }
 0x4a6   : > { %1458 = vmatmul.msk.f32.gmra.mxu3 %vm348_vm7, %v1857_v12 }
 0x4a8   : > { %v1581_v9 = vpop.eup %1580 }
 0x4ae   : > { %1471 = vmatmul.msk.f32.vlgmr.msrb.gmra.mxu3 %vm292_vm4, %v1147_v26 }
 0x519   : > { %v904_v11 = vpop.f32.mrf.mxu3 }
 0x51a   : > { %v908_v13 = vmul.f32 %v1581_v9, %v904_v11 }
 0x51c   : > { %v1276_v14 = vrot.slane %v908_v13, 4 }
 0x51e   : > { %v1291_v15 = vsel %vm296_vm3, %v1290_v39, %v1276_v14  ;;  %v1074_v39 = vsel %vm346_vm5, %v1048_v34, %v1072_v32 }
 0x521   : > { %v976_v4 = vpop.f32.mrf.mxu3 }
 0x522   : > { %v982_v17 = vsel %vm382_vm8, %v976_v4, -inf }
 0x529   : > { %v979_v16 = vpop.f32.mrf.mxu3 }
 0x52a   : > { %v983_v18 = vsel %vm382_vm8, %v979_v16, -inf }
 0x52b   : > { %v984_v19 = vmax.f32 %v982_v17, %v983_v18 }
 0x52d   : > { %v985_v20 = vrot.slane %v984_v19, 4 }
 0x52f   : > { %v986_v21 = vmax.f32 %v984_v19, %v985_v20 }
 0x531   : > { %v987_v22 = vrot.slane %v986_v21, 2  ;;  %v1187_v1 = vpop.f32.mrf.mxu3 }
 0x532   : > { %v1191_v2 = vrot.slane %v1187_v1, 7 }
 0x533   : > { %v988_v23 = vmax.f32 %v986_v21, %v987_v22 }
 0x534   : > { %v1193_v14 = vsel %vm346_vm5, %v1167_v7, %v1191_v2 }
 0x535   : > { %v989_v24 = vrot.slane %v988_v23, 1 }
 0x537   : > { %v990_v25 = vmax.f32 %v988_v23, %v989_v24 }
 0x539   : > { %v991_v27 = vsub.f32 %v976_v4, %v990_v25  ;;  %v992_v28 = vsub.f32 %v979_v16, %v990_v25 }
 0x53b   : > { %v993_v29 = vmul.f32 1.442695, %v991_v27  ;;  %v995_v30 = vmul.f32 1.442695, %v992_v28 }
 0x53d   : > { %1582 = vpow2.f32 %v993_v29 }
 0x53e   : > { %1584 = vpow2.f32 %v995_v30 }
 0x543   : > { %v1583_v33 = vpop.eup %1582 }
 0x544   : > { %v1585_v36 = vpop.eup %1584  ;;  %v997_v37 = vsel %vm382_vm8, %v1583_v33, 0.0 }
 0x545   : > { %v998_v38 = vsel %vm382_vm8, %v1585_v36, 0.0  ;;  %1020 = vmatpush.msra.mxu0 %v1585_v36 }
 0x546   : > { %v999_v5 = vadd.f32 %v998_v38, %v997_v37 }
 0x547   : > { %1021 = vmatpush.msra.mxu0 %v1583_v33 }
 0x548   : > { %1459 = vmatmul.msk.f32.vlgmr.msra.gmra.mxu0 %vm407_vm9, %v1870_v35  ;;  %v1000_v40 = vrot.slane %v999_v5, 4 }
 0x549   : > { %1464 = vmatpush.msk.msrb.mxu0 %vm355_vm6, %v1074_v39 }
 0x54a   : > { %v1001_v41 = vadd.f32 %v1000_v40, %v999_v5 }
 0x54c   : > { %v1002_v3 = vrot.slane %v1001_v41, 2 }
 0x54e   : > { %v1003_v42 = vadd.f32 %v1002_v3, %v1001_v41 }
 0x550   : > { %1465 = vmatmul.msk.f32.vlgmr.msrb.gmra.mxu0 %vm348_vm7, %v1844_v10  ;;  %v1004_v43 = vrot.slane %v1003_v42, 1 }
 0x552   : > { %v1005_v44 = vadd.f32 %v1004_v43, %v1003_v42 }
 0x554   : > { %1586 = vrcp.f32 %v1005_v44 }
 0x558   : > { %1466 = vmatmul.msk.f32.gmra.mxu0 %vm348_vm7, %v1857_v12 }
 0x55a   : > { %v1587_v45 = vpop.eup %1586 }
 0x5c5   : > { %v1023_v46 = vpop.f32.mrf.mxu0 }
 0x5c6   : > { %v1027_v47 = vmul.f32 %v1587_v45, %v1023_v46 }
 0x5c8   : > { %v1279_v48 = vrot.slane %v1027_v47, 3 }
 0x5ca   : > { %v1293_v49 = vsel %vm1292_vm11, %v1291_v15, %v1279_v48 }
 0x5cd   : > { %v1095_v50 = vpop.f32.mrf.mxu0 }
 0x5ce   : > { %v1101_v52 = vsel %vm382_vm8, %v1095_v50, -inf }
 0x5d5   : > { %v1098_v51 = vpop.f32.mrf.mxu0 }
 0x5d6   : > { %v1102_v53 = vsel %vm382_vm8, %v1098_v51, -inf }
 0x5d7   : > { %v1103_v54 = vmax.f32 %v1101_v52, %v1102_v53 }
 0x5d9   : > { %v1104_v55 = vrot.slane %v1103_v54, 4 }
 0x5db   : > { %v1105_v56 = vmax.f32 %v1103_v54, %v1104_v55 }
 0x5dd   : > { %v1106_v57 = vrot.slane %v1105_v56, 2 }
 0x5df   : > { %v1107_v58 = vmax.f32 %v1105_v56, %v1106_v57 }
 0x5e1   : > { %v1108_v59 = vrot.slane %v1107_v58, 1 }
 0x5e3   : > { %v1109_v60 = vmax.f32 %v1107_v58, %v1108_v59 }
 0x5e5   : > { %v1110_v61 = vsub.f32 %v1095_v50, %v1109_v60  ;;  %v1111_v62 = vsub.f32 %v1098_v51, %v1109_v60 }
 0x5e7   : > { %v1112_v63 = vmul.f32 1.442695, %v1110_v61  ;;  %v1114_v0 = vmul.f32 1.442695, %v1111_v62 }
 0x5e9   : > { %1588 = vpow2.f32 %v1112_v63 }
 0x5ea   : > { %1590 = vpow2.f32 %v1114_v0 }
 0x5ef   : > { %v1589_v6 = vpop.eup %1588 }
 0x5f0   : > { %v1591_v8 = vpop.eup %1590  ;;  %v1116_v9 = vsel %vm382_vm8, %v1589_v6, 0.0 }
 0x5f1   : > { %v1117_v11 = vsel %vm382_vm8, %v1591_v8, 0.0  ;;  %1139 = vmatpush.msra.mxu1 %v1591_v8 }
 0x5f2   : > { %v1118_v13 = vadd.f32 %v1117_v11, %v1116_v9 }
 0x5f3   : > { %1140 = vmatpush.msra.mxu1 %v1589_v6 }
 0x5f4   : > { %1467 = vmatmul.msk.f32.vlgmr.msra.gmra.mxu1 %vm407_vm9, %v1870_v35  ;;  %v1119_v15 = vrot.slane %v1118_v13, 4 }
 0x5f5   : > { %1472 = vmatpush.msk.msrb.mxu1 %vm355_vm6, %v1193_v14 }
 0x5f6   : > { %v1120_v4 = vadd.f32 %v1119_v15, %v1118_v13 }
 0x5f8   : > { %v1121_v16 = vrot.slane %v1120_v4, 2 }
 0x5fa   : > { %v1122_v17 = vadd.f32 %v1121_v16, %v1120_v4 }
 0x5fc   : > { %1473 = vmatmul.msk.f32.vlgmr.msrb.gmra.mxu1 %vm348_vm7, %v1844_v10  ;;  %v1123_v18 = vrot.slane %v1122_v17, 1 }
 0x5fe   : > { %v1124_v19 = vadd.f32 %v1123_v18, %v1122_v17 }
 0x600   : > { %1592 = vrcp.f32 %v1124_v19 }
 0x604   : > { %1474 = vmatmul.msk.f32.gmra.mxu1 %vm348_vm7, %v1857_v12 }
 0x606   : > { %v1593_v20 = vpop.eup %1592 }
 0x671   : > { %v1142_v21 = vpop.f32.mrf.mxu1 }
 0x672   : > { %v1146_v22 = vmul.f32 %v1593_v20, %v1142_v21 }
 0x674   : > { %v1282_v23 = vrot.slane %v1146_v22, 2 }
 0x676   : > { %v1295_v24 = vsel %vm1294_vm12, %v1293_v49, %v1282_v23 }
 0x679   : > { %v1214_v25 = vpop.f32.mrf.mxu1 }
 0x67a   : > { %v1220_v10 = vsel %vm382_vm8, %v1214_v25, -inf }
 0x681   : > { %v1217_v26 = vpop.f32.mrf.mxu1 }
 0x682   : > { %v1221_v27 = vsel %vm382_vm8, %v1217_v26, -inf }
 0x683   : > { %v1222_v12 = vmax.f32 %v1220_v10, %v1221_v27 }
 0x685   : > { %v1223_v28 = vrot.slane %v1222_v12, 4 }
 0x687   : > { %v1224_v29 = vmax.f32 %v1222_v12, %v1223_v28 }
 0x689   : > { %v1225_v30 = vrot.slane %v1224_v29, 2 }
 0x68b   : > { %v1226_v31 = vmax.f32 %v1224_v29, %v1225_v30 }
 0x68d   : > { %v1227_v32 = vrot.slane %v1226_v31, 1 }
 0x68f   : > { %v1228_v33 = vmax.f32 %v1226_v31, %v1227_v32 }
 0x691   : > { %v1229_v34 = vsub.f32 %v1214_v25, %v1228_v33  ;;  %v1230_v36 = vsub.f32 %v1217_v26, %v1228_v33 }
 0x693   : > { %v1231_v37 = vmul.f32 1.442695, %v1229_v34  ;;  %v1233_v38 = vmul.f32 1.442695, %v1230_v36 }
 0x695   : > { %1594 = vpow2.f32 %v1231_v37 }
 0x696   : > { %1596 = vpow2.f32 %v1233_v38 }
 0x69b   : > { %v1595_v5 = vpop.eup %1594 }
 0x69c   : > { %v1597_v39 = vpop.eup %1596  ;;  %v1235_v40 = vsel %vm382_vm8, %v1595_v5, 0.0 }
 0x69d   : > { %v1236_v41 = vsel %vm382_vm8, %v1597_v39, 0.0  ;;  %1258 = vmatpush.msrb.mxu2 %v1597_v39 }
 0x69e   : > { %v1237_v3 = vadd.f32 %v1236_v41, %v1235_v40 }
 0x69f   : > { %1259 = vmatpush.msrb.mxu2 %v1595_v5 }
 0x6a0   : > { %1475 = vmatmul.msk.f32.vlgmr.msrb.gmra.mxu2 %vm407_vm9, %v1870_v35  ;;  %v1238_v42 = vrot.slane %v1237_v3, 4 }
 0x6a2   : > { %v1239_v43 = vadd.f32 %v1238_v42, %v1237_v3 }
 0x6a4   : > { %v1240_v44 = vrot.slane %v1239_v43, 2 }
 0x6a6   : > { %v1241_v45 = vadd.f32 %v1240_v44, %v1239_v43 }
 0x6a8   : > { %v1242_v46 = vrot.slane %v1241_v45, 1 }
 0x6aa   : > { %v1243_v47 = vadd.f32 %v1242_v46, %v1241_v45 }
 0x6ac   : > { %1598 = vrcp.f32 %v1243_v47 }
 0x6b2   : > { %v1599_v48 = vpop.eup %1598 }
 0x723   : > { %v1261_v49 = vpop.f32.mrf.mxu2 }
 0x724   : > { %v1265_v35 = vmul.f32 %v1599_v48, %v1261_v49 }
 0x726   : > { %v1285_v50 = vrot.slane %v1265_v35, 1 }
 0x728   : > { %v1297_v51 = vsel %vm1296_vm13, %v1295_v24, %v1285_v50 }
 0x729   : > { %1298 = vst.msk [vmem:[%s242_s29] sm:$0xff] %vm382_vm8, %v1297_v51 }
 0x72a   : > { %1627 = shalt.err (!%p1624_p9)
}
 0x72b   : > { %1481 = dma.vmem_to_hbm [thread:$0]  (%p1777_p3), %s1315_s28, 128, %s1317_s12, %s1300_s22  }
 0x72c PF: > { %p1487_p10 = scmp.ge.s32.totalorder %s1694_s25, 2  ;;  %s1328_s29 = sand.u32 1, %s1666_s18  }
 0x72d   : > { %s1329_s13 = scalar_lea.sflag [#allocation4], %s1328_s29 }
 0x72e   : > { %p1484_p11 = pnand %p1487_p10, %p1786_p8 }
 0x730   : > { %p1485_p12 = pneg %p1484_p11 }
 0x732   : > { %1661 = dma.done.wait (%p1485_p12), %s1329_s13, 128  }
 0x733   : > { %1663 = vsyncadd (%p1485_p12), %s1329_s13, 4294967168  ;;  %s18_s25 = sadd.s32 1, %s1694_s25   ;;  %s2059_s6 = sld [smem:[#allocation6_spill]] }
 0x734   : > { %p15_p13 = scmp.ge.s32.totalorder %s18_s25, 10   ;;  %s2060_s8 = sld [smem:[#allocation7_spill]] }
 0x735   : > { %s2061_s18 = smov %s1670_s19  ;;  %s2062_s19 = smov %s1674_s20 }
 0x736   : > { %s2063_s20 = smov %s1795_s11  ;;  %s2064_s21 = smov %s1686_s23 }
 0x737   : > { %s2065_s22 = smov %s1690_s24  ;;  %17 = sbr.rel (!%p15_p13) target bundleno = 5 (0x5), region = 82 }
 0x739   : > { %s2066_s23 = smov %s2059_s6 }
 0x73a   : > { %s2067_s24 = smov %s2060_s8 }
 0x73c   :  { %1335 = vsyncpa [#allocation4], 1 }
 0x73d   :  { %1337 = vsyncpa [#allocation4 + $0x1], 1 }

// kernel: efficient_stereo_tail.3
= control target key start
LH: loop header
LB: loop body
LE: loop exit
PB: predicated region body
PF: predicated region fallthrough
CT: control target
= control target key end

     0   :  { %s4956_s18 = smov 0   ;;  %s6899_s0 = inlined_call_operand.vmem [shape: f32[2,230,32], index: 0, kind: input, shape index: {}]   ;;  %s6900_s1 = inlined_call_operand.vmem [shape: bf16[27,32,32], index: 1, kind: input, shape index: {}]   ;;  %s6901_s2 = inlined_call_operand.vmem [shape: f32[230,1], index: 2, kind: input, shape index: {}]   ;;  %s6902_s3 = inlined_call_operand.vmem [shape: f32[2,230,32], index: 3, kind: output, shape index: {0}]   ;;  %s6903_s4 = inlined_call_operand.vmem [shape: f32[1,32], index: 4, kind: output, shape index: {1}]   ;;  %s6904_s5 = inlined_call_operand.vmem [shape: f32[1,32], index: 5, kind: output, shape index: {2}]  }
   0x1 LB: > { %s4266_s19 = sadd.s32 4294967295, %s4921_s18   ;;  %p4270_p0 = scmp.ge.s32.totalorder %s4921_s18, 1  ;;  %s4921_s18 = sphi %s4956_s18, %s16_s18  }
   0x2   : > { %p182_p1 = scmp.lt.s32.totalorder %s4921_s18, 3 }
   0x4   : > { %p183_p2 = pnand %p4270_p0, %p182_p1 }
   0x6   : > { %186 = sbr.rel (%p183_p2) target bundleno = 1157 (0x485), region = 32 }
   0xb   : > { %p210_p3 = scmp.lt.s32.totalorder %s4266_s19, 1  ;;  %p4273_p4 = scmp.ne.s32.totalorder %s4266_s19, 0 }
   0xd   : > { %s211_s20 = scalar_select %p210_p3, %s4266_s19, 1 }
   0xe   : > { %224 = sbr.rel (%p4273_p4) target bundleno = 22 (0x16), region = 36 }
   0xf   : > { %s4899_s21 = smul.u32 232, %s211_s20 }
  0x11   : > { %s4967_s24 = scalar_lea.vmem %s6899_s0, %s4899_s21  ;;  %s4972_s27 = scalar_lea.vmem %s6902_s3, %s4899_s21 }
  0x13   : > { %vm225_vm0 = vcmask 253952   ;;  %v4923_v0 = vmov 0.0  }
  0x14   : > { %226 = vst.msk [vmem:[%s6903_s4] sm:$0x1] %vm225_vm0, %v4923_v0 }
  0x15   : > { %227 = vst.msk [vmem:[%s6904_s5] sm:$0x1] %vm225_vm0, %v4923_v0 }
  0x16 PF: > { %v4842_v1 = vld [vmem:[%s6900_s1 + $0x18] sm:$0xff]  ;;  %v4840_v2 = vld [vmem:[%s6900_s1 + $0x8] sm:$0xff]  ;;  %v4841_v4 = vld [vmem:[%s6900_s1 + $0x10] sm:$0xff]  ;;  %vm546_vm1 = vcmask 1046528   ;;  %vm365_vm2 = vcmask 261120   ;;  %vm682_vm4 = vcmask 1044480  }
  0x17   : > { %v4844_v3 = vld [vmem:[%s6900_s1 + $0x28] sm:$0xff]  ;;  %v4839_v5 = vld [vmem:[%s6900_s1] sm:$0xff]  ;;  %399 = vmatpush.bf16.msra.mxu0 %v4842_v1  ;;  %4893 = vmatpush.bf16.msra.mxu3 %v4842_v1  ;;  %v5005_v9 = vld [vmem:[%s4967_s24 + $0x10] sm:$0xff]  ;;  %vm276_vm3 = vsmask.f32 7424  ;;  %vm1112_vm5 = vcmask 1045504  }
  0x18   : > { %v4998_v6 = vld [vmem:[%s6900_s1 + $0x20] sm:$0xff]  ;;  %v5002_v8 = vld [vmem:[%s4967_s24 + $0x8] sm:$0xff]  ;;  %483 = vmatpush.bf16.msra.mxu1 %v4840_v2  ;;  %611 = vmatpush.bf16.msra.mxu2 %v4844_v3  ;;  %v5008_v10 = vld [vmem:[%s4967_s24 + $0x18] sm:$0xff]  ;;  %vm818_vm6 = vsmask.f32 4352  ;;  %vm4112_vm9 = vcmask 1042432  }
  0x19   : > { %v228_v7 = vld [vmem:[%s4967_s24] sm:$0xff]  ;;  %v5014_v12 = vld [vmem:[%s4967_s24 + $0x70] sm:$0xff]  ;;  %v5017_v13 = vld [vmem:[%s4967_s24 + $0x78] sm:$0xff]  ;;  %v5021_v14 = vpack.c.bf16 %v5008_v10, %v5005_v9  ;;  %vm1248_vm7 = vsmask.f32 5376  ;;  %vm4197_vm10 = vcmask 259072  }
  0x1a   : > { %v5011_v11 = vpack.c.bf16 %v5002_v8, %v228_v7  ;;  %v5024_v15 = vld [vmem:[%s4967_s24 + $0x80] sm:$0xff]  ;;  %v5027_v16 = vld [vmem:[%s4967_s24 + $0x88] sm:$0xff]  ;;  %v5031_v17 = vpack.c.bf16 %v5017_v13, %v5014_v12  ;;  %v4850_v24 = vld [vmem:[%s6900_s1 + $0x58] sm:$0xff]  ;;  %vm2136_vm8 = vsmask.f32 6400  ;;  %vm4030_vm11 = vcmask 253952  }
  0x1b   : > { %v4852_v18 = vld [vmem:[%s6900_s1 + $0x68] sm:$0xff]  ;;  %v5040_v21 = vpack.c.bf16 %v5027_v16, %v5024_v15  ;;  %400 = vmatpush.bf16.msra.mxu0 %v4841_v4  ;;  %4894 = vmatpush.bf16.msra.mxu3 %v4841_v4  ;;  %v6906_v25 = vshll.u32 %v5021_v14, 16  ;;  %v548_v28 = vrot.slane %v5021_v14, 1  ;;  %v5077_v37 = vld [vmem:[%s4967_s24 + $0x20] sm:$0xff]  ;;  %v5084_v40 = vld [vmem:[%s4967_s24 + $0x90] sm:$0xff]  ;;  %v6907_v44 = vshrl.u32 %v5021_v14, 16 }
  0x1c   : > { %6995 = vst [vmem:[#allocation2_spill] sm:$0xff] %v5031_v17  ;;  %v6909_v19 = vshrl.u32 %v5011_v11, 16  ;;  %v6908_v20 = vshll.u32 %v5011_v11, 16  ;;  %v547_v22 = vrot.slane %v5011_v11, 1  ;;  %v4848_v23 = vld [vmem:[%s6900_s1 + $0x48] sm:$0xff]  ;;  %v5051_v26 = vshll.u32 %v5031_v17, 16  ;;  %484 = vmatpush.bf16.msra.mxu1 %v4839_v5  ;;  %612 = vmatpush.bf16.msra.mxu2 %v4998_v6 }
  0x1d   : > { %6996 = vst [vmem:[#allocation3_spill] sm:$0xff] %v5040_v21  ;;  %v5054_v27 = vshrl.u32 %v5031_v17, 16  ;;  %v5061_v30 = vshll.u32 %v5040_v21, 16  ;;  %v287_v31 = vrot.slane %v6906_v25, 1  ;;  %v5080_v38 = vld [vmem:[%s4967_s24 + $0x28] sm:$0xff]  ;;  %v5098_v43 = vpack.c.bf16 %v5084_v40, %v5084_v40  ;;  %v5126_v56 = vld [vmem:[%s4967_s24 + $0x30] sm:$0xff] }
  0x1e   : > { %v282_v29 = vrot.slane %v6908_v20, 1  ;;  %v335_v32 = vrot.slane %v5051_v26, 1  ;;  %v549_v33 = vsel %vm546_vm1, %v547_v22, %v548_v28  ;;  %v5094_v42 = vpack.c.bf16 %v5080_v38, %v5077_v37  ;;  %v5129_v57 = vld [vmem:[%s4967_s24 + $0x38] sm:$0xff]  ;;  %v4851_v59 = vld [vmem:[%s6900_s1 + $0x60] sm:$0xff]  ;;  %v4849_v61 = vld [vmem:[%s6900_s1 + $0x50] sm:$0xff] }
  0x1f   : > { %6997 = vst [vmem:[#allocation4_spill] sm:$0xff] %v5061_v30  ;;  %905 = vmatpush.bf16.msrb.mxu0 %v4848_v23  ;;  %v343_v35 = vrot.slane %v5061_v30, 1  ;;  %4895 = vmatpush.bf16.msrb.mxu3 %v4840_v2  ;;  %v5105_v46 = vshrl.u32 %v5040_v21, 16  ;;  %v6905_v47 = vshll.u32 %v5098_v43, 16  ;;  %v291_v49 = vor.u32 %v6907_v44, %v287_v31  ;;  %v4847_v60 = vld [vmem:[%s6900_s1 + $0x40] sm:$0xff] }
  0x20   : > { %1177 = vmatpush.bf16.msrb.mxu2 %v4852_v18  ;;  %v283_v34 = vor.u32 %v282_v29, %v6909_v19  ;;  %1030 = vmatpush.bf16.msrb.mxu1 %v4850_v24  ;;  %v339_v36 = vor.u32 %v5054_v27, %v335_v32  ;;  %v5102_v45 = vshll.u32 %v5094_v42, 16  ;;  %v550_v48 = vrot.slane %v5094_v42, 1  ;;  %v4846_v18 = vld [vmem:[%s6900_s1 + $0x38] sm:$0xff] }
  0x21   : > { %4303 = vmatmul.msk.bf16.vlgmr.msra.gmra.mxu1 %vm365_vm2, %v5011_v11  ;;  %4324 = vmatmul.msk.bf16.vlgmr.msra.gmra.mxu2 %vm365_vm2, %v549_v33  ;;  %6999 = vst [vmem:[#allocation6_spill] sm:$0xff] %v5105_v46  ;;  %v5114_v51 = vor.u32 %v5105_v46, %v343_v35  ;;  %v351_v52 = vrot.slane %v6905_v47, 1  ;;  %v5135_v58 = vpack.c.bf16 %v5129_v57, %v5126_v56  ;;  %v5147_v62 = vshrl.u32 %v5094_v42, 16 }
  0x22   : > { %v288_v39 = vsel %vm276_vm3, %v283_v34, %v287_v31  ;;  %v5088_v41 = vsel %vm276_vm3, %v339_v36, %v343_v35  ;;  %v295_v50 = vrot.slane %v5102_v45, 1  ;;  %v551_v53 = vsel %vm546_vm1, %v548_v28, %v550_v48  ;;  %v5196_v34 = vld [vmem:[%s4967_s24 + $0x50] sm:$0xff]  ;;  %v5199_v35 = vld [vmem:[%s4967_s24 + $0x58] sm:$0xff] }
  0x23   : > { %4286 = vmatmul.msk.bf16.vlgmr.msra.gmra.mxu0 %vm365_vm2, %v288_v39  ;;  %6998 = vst [vmem:[#allocation5_spill] sm:$0xff] %v5088_v41  ;;  %4293 = vmatmul.msk.bf16.vlgmr.msra.gmra.mxu3 %vm365_vm2, %v5088_v41  ;;  %v352_v55 = vsel %vm276_vm3, %v5114_v51, %v351_v52  ;;  %v5150_v63 = vshll.u32 %v5135_v58, 16  ;;  %v552_v0 = vrot.slane %v5135_v58, 1  ;;  %v5177_v22 = vshrl.u32 %v5135_v58, 16  ;;  %v4845_v39 = vld [vmem:[%s6900_s1 + $0x30] sm:$0xff] }
  0x24   : > { %4896 = vmatpush.bf16.msrb.mxu3 %v4839_v5  ;;  %7000 = vst [vmem:[#allocation7_spill] sm:$0xff] %v5114_v51  ;;  %v296_v54 = vsel %vm276_vm3, %v291_v49, %v295_v50  ;;  %1178 = vmatpush.bf16.msrb.mxu2 %v4851_v59  ;;  %v299_v1 = vor.u32 %v5147_v62, %v295_v50  ;;  %v5161_v5 = vld [vmem:[%s4967_s24 + $0x40] sm:$0xff]  ;;  %v683_v25 = vrot.slane %v5011_v11, 3  ;;  %v684_v44 = vrot.slane %v5021_v14, 3 }
  0x25   : > { %7001 = vst [vmem:[#allocation8_spill] sm:$0xff] %v5135_v58  ;;  %906 = vmatpush.bf16.msrb.mxu0 %v4847_v60  ;;  %1031 = vmatpush.bf16.msrb.mxu1 %v4849_v61  ;;  %v303_v2 = vrot.slane %v5150_v63, 1  ;;  %v5207_v36 = vpack.c.bf16 %v5199_v35, %v5196_v34  ;;  %v7018_v51 = vshll.u32 %v5021_v14, 16 }
  0x27   : > { %v304_v4 = vsel %vm276_vm3, %v299_v1, %v303_v2  ;;  %v307_v28 = vor.u32 %v5177_v22, %v303_v2  ;;  %7005 = vst [vmem:[#allocation12_spill] sm:$0xff] %v5207_v36  ;;  %v5216_v49 = vshll.u32 %v5207_v36, 16  ;;  %v556_v50 = vrot.slane %v5207_v36, 1  ;;  %v5243_v1 = vld [vmem:[%s4967_s24 + $0x68] sm:$0xff] }
  0x28   : > { %4897 = vmatpush.bf16.msra.mxu3 %v4844_v3  ;;  %v553_v3 = vsel %vm546_vm1, %v550_v48, %v552_v0 }
  0x2c   : > { %4898 = vmatpush.bf16.msra.mxu3 %v4998_v6  ;;  %v5164_v6 = vld [vmem:[%s4967_s24 + $0x48] sm:$0xff] }
  0x2d   : > { %v5171_v7 = vpack.c.bf16 %v5164_v6, %v5161_v5 }
  0x2f   : > { %7002 = vst [vmem:[#allocation9_spill] sm:$0xff] %v5171_v7  ;;  %v5180_v23 = vshll.u32 %v5171_v7, 16  ;;  %v554_v24 = vrot.slane %v5171_v7, 1  ;;  %v5213_v48 = vshrl.u32 %v5171_v7, 16 }
  0x31   : > { %4304 = vmatmul.msk.bf16.gmra.mxu1 %vm365_vm2, %v5021_v14  ;;  %4325 = vmatmul.msk.bf16.gmra.mxu2 %vm365_vm2, %v551_v53  ;;  %v311_v29 = vrot.slane %v5180_v23, 1  ;;  %v5186_v31 = vsel %vm546_vm1, %v552_v0, %v554_v24  ;;  %v319_v53 = vrot.slane %v5216_v49, 1  ;;  %v5226_v59 = vsel %vm546_vm1, %v554_v24, %v556_v50  ;;  %v5240_v0 = vld [vmem:[%s4967_s24 + $0x60] sm:$0xff] }
  0x32   : > { %7003 = vst [vmem:[#allocation10_spill] sm:$0xff] %v5186_v31  ;;  %v5251_v2 = vpack.c.bf16 %v5243_v1, %v5240_v0 }
  0x33   : > { %4287 = vmatmul.msk.bf16.gmra.mxu0 %vm365_vm2, %v296_v54  ;;  %4294 = vmatmul.msk.bf16.gmra.mxu3 %vm365_vm2, %v352_v55  ;;  %v5189_v33 = vsel %vm276_vm3, %v307_v28, %v311_v29  ;;  %v315_v52 = vor.u32 %v5213_v48, %v311_v29  ;;  %v560_v54 = vrot.slane %v5031_v17, 1  ;;  %v5223_v55 = vrot.slane %v5040_v21, 1  ;;  %7007 = vst [vmem:[#allocation14_spill] sm:$0xff] %v5226_v59 }
  0x34   : > { %7004 = vst [vmem:[#allocation11_spill] sm:$0xff] %v5189_v33  ;;  %v558_v24 = vrot.slane %v5251_v2, 1 }
  0x35   : > { %7006 = vst [vmem:[#allocation13_spill] sm:$0xff] %v5223_v55  ;;  %v5229_v60 = vsel %vm276_vm3, %v315_v52, %v319_v53  ;;  %v5237_v61 = vsel %vm546_vm1, %v560_v54, %v5223_v55 }
  0x36   : > { %7008 = vst [vmem:[#allocation15_spill] sm:$0xff] %v5229_v60  ;;  %v5267_v52 = vsel %vm546_vm1, %v556_v50, %v558_v24  ;;  %v4860_v50 = vld [vmem:[%s6900_s1 + $0xa8] sm:$0xff]  ;;  %v5297_v20 = vsel %vm546_vm1, %v558_v24, %v560_v54  ;;  %v5314_v54 = vpack.c.bf16 %v5005_v9, %v5002_v8  ;;  %v7015_v24 = vshrl.u32 %v5011_v11, 16 }
  0x37   : > { %7009 = vst [vmem:[#allocation16_spill] sm:$0xff] %v5237_v61  ;;  %1820 = vmatpush.bf16.msra.mxu2 %v4860_v50 }
  0x38   : > { %7010 = vst [vmem:[#allocation17_spill] sm:$0xff] %v5251_v2  ;;  %v819_v50 = vrot.slane %v7015_v24, 3 }
  0x39   : > { %7011 = vst [vmem:[#allocation18_spill] sm:$0xff] %v5267_v52 }
  0x3a   : > { %7013 = vst [vmem:[#allocation20_spill] sm:$0xff] %v5297_v20 }
  0x41   : > { %4305 = vmatmul.msk.bf16.gmra.mxu1 %vm365_vm2, %v5094_v42  ;;  %4326 = vmatmul.msk.bf16.gmra.mxu2 %vm365_vm2, %v553_v3  ;;  %v4854_v3 = vld [vmem:[%s6900_s1 + $0x78] sm:$0xff] }
  0x43   : > { %4288 = vmatmul.msk.bf16.gmra.mxu0 %vm365_vm2, %v304_v4  ;;  %4310 = vmatmul.msk.bf16.vlgmr.msrb.gmra.mxu3 %vm365_vm2, %v5031_v17  ;;  %v5257_v4 = vshrl.u32 %v5207_v36, 16 }
  0x44   : > { %747 = vmatpush.bf16.msrb.mxu3 %v4846_v18  ;;  %v5260_v18 = vshll.u32 %v5251_v2, 16 }
  0x45   : > { %v323_v28 = vor.u32 %v5257_v4, %v319_v53  ;;  %v4856_v53 = vld [vmem:[%s6900_s1 + $0x88] sm:$0xff] }
  0x46   : > { %v327_v29 = vrot.slane %v5260_v18, 1  ;;  %1509 = vmatpush.bf16.msra.mxu0 %v4856_v53  ;;  %v7016_v53 = vshll.u32 %v5011_v11, 16 }
  0x48   : > { %748 = vmatpush.bf16.msrb.mxu3 %v4845_v39  ;;  %v564_v39 = vrot.slane %v5098_v43, 1  ;;  %v5270_v47 = vsel %vm276_vm3, %v323_v28, %v327_v29  ;;  %v4858_v28 = vld [vmem:[%s6900_s1 + $0x98] sm:$0xff] }
  0x49   : > { %7012 = vst [vmem:[#allocation19_spill] sm:$0xff] %v5270_v47  ;;  %1650 = vmatpush.bf16.msra.mxu1 %v4858_v28  ;;  %v820_v28 = vrot.slane %v7016_v53, 4 }
  0x4b   : > { %v821_v9 = vor.u32 %v820_v28, %v819_v50  ;;  %v688_v28 = vrot.slane %v5135_v58, 3 }
  0x51   : > { %4306 = vmatmul.msk.bf16.gmra.mxu1 %vm365_vm2, %v5135_v58  ;;  %4327 = vmatmul.msk.bf16.gmra.mxu2 %vm365_vm2, %v5186_v31 }
  0x53   : > { %4289 = vmatmul.msk.bf16.gmra.mxu0 %vm365_vm2, %v5189_v33  ;;  %4311 = vmatmul.msk.bf16.gmra.mxu3 %vm365_vm2, %v5040_v21  ;;  %v4857_v33 = vld [vmem:[%s6900_s1 + $0x90] sm:$0xff] }
  0x54   : > { %1651 = vmatpush.bf16.msra.mxu1 %v4857_v33  ;;  %v839_v33 = vrot.slane %v5216_v49, 4 }
  0x61   : > { %4307 = vmatmul.msk.bf16.gmra.mxu1 %vm365_vm2, %v5171_v7  ;;  %4328 = vmatmul.msk.bf16.gmra.mxu2 %vm365_vm2, %v5226_v59 }
  0x63   : > { %4290 = vmatmul.msk.bf16.gmra.mxu0 %vm365_vm2, %v5229_v60  ;;  %4331 = vmatmul.msk.bf16.vlgmr.msra.gmra.mxu3 %vm365_vm2, %v5237_v61 }
  0x64   : > { %1374 = vmatpush.bf16.msra.mxu3 %v4854_v3  ;;  %v565_v3 = vsel %vm546_vm1, %v5223_v55, %v564_v39  ;;  %v5291_v39 = vshrl.u32 %v5251_v2, 16  ;;  %v1113_v55 = vrot.slane %v5314_v54, 2 }
  0x71   : > { %4308 = vmatmul.msk.bf16.gmra.mxu1 %vm365_vm2, %v5207_v36  ;;  %4329 = vmatmul.msk.bf16.gmra.mxu2 %vm365_vm2, %v5267_v52 }
  0x73   : > { %4291 = vmatmul.msk.bf16.gmra.mxu0 %vm365_vm2, %v5270_v47  ;;  %4332 = vmatmul.msk.bf16.gmra.mxu3 %vm365_vm2, %v565_v3  ;;  %v331_v3 = vor.u32 %v5291_v39, %v327_v29  ;;  %v685_v29 = vsel %vm682_vm4, %v683_v25, %v684_v44  ;;  %v7017_v25 = vshrl.u32 %v5021_v14, 16  ;;  %v5341_v14 = vpack.c.bf16 %v5126_v56, %v5080_v38 }
  0x75   : > { %v5302_v19 = vsel %vm276_vm3, %v331_v3, %v335_v32  ;;  %v5318_v32 = vpack.c.bf16 %v5077_v37, %v5008_v10  ;;  %v822_v3 = vrot.slane %v7017_v25, 3  ;;  %v686_v37 = vrot.slane %v5094_v42, 3 }
  0x76   : > { %7014 = vst [vmem:[#allocation21_spill] sm:$0xff] %v5302_v19  ;;  %v1116_v50 = vrot.slane %v5341_v14, 2 }
  0x77   : > { %v1114_v8 = vrot.slane %v5318_v32, 2  ;;  %v687_v53 = vsel %vm682_vm4, %v684_v44, %v686_v37 }
  0x79   : > { %v1115_v24 = vsel %vm1112_vm5, %v1113_v55, %v1114_v8  ;;  %v827_v55 = vrot.slane %v5102_v45, 4 }
  0x81   : > { %4309 = vmatmul.msk.bf16.gmra.mxu1 %vm365_vm2, %v5251_v2  ;;  %4330 = vmatmul.msk.bf16.gmra.mxu2 %vm365_vm2, %v5297_v20 }
  0x83   : > { %4292 = vmatmul.msk.bf16.gmra.mxu0 %vm365_vm2, %v5302_v19  ;;  %4345 = vmatmul.msk.bf16.vlgmr.msrb.gmra.mxu3 %vm365_vm2, %v685_v29  ;;  %v823_v29 = vrot.slane %v7018_v51, 4  ;;  %v826_v51 = vrot.slane %v5147_v62, 3 }
  0x85   : > { %v824_v10 = vor.u32 %v823_v29, %v822_v3  ;;  %v828_v44 = vor.u32 %v827_v55, %v826_v51  ;;  %v1117_v3 = vsel %vm1112_vm5, %v1114_v8, %v1116_v50  ;;  %v830_v51 = vrot.slane %v5177_v22, 3 }
  0x86   : > { %v831_v55 = vrot.slane %v5150_v63, 4 }
  0x87   : > { %v825_v11 = vsel %vm818_vm6, %v821_v9, %v824_v10  ;;  %v829_v9 = vsel %vm818_vm6, %v824_v10, %v828_v44  ;;  %v5362_v10 = vpack.c.bf16 %v5161_v5, %v5129_v57 }
  0x91   : > { %4387 = vmatmul.msk.bf16.vlgmr.msrb.gmra.mxu1 %vm365_vm2, %v5314_v54  ;;  %4408 = vmatmul.msk.bf16.vlgmr.msrb.gmra.mxu2 %vm365_vm2, %v1115_v24 }
  0x93   : > { %4366 = vmatmul.msk.bf16.vlgmr.msrb.gmra.mxu0 %vm365_vm2, %v825_v11  ;;  %4346 = vmatmul.msk.bf16.gmra.mxu3 %vm365_vm2, %v687_v53  ;;  %v5350_v11 = vsel %vm682_vm4, %v686_v37, %v688_v28 }
  0x94   : > { %7019 = vst [vmem:[#allocation22_spill] sm:$0xff] %v5350_v11 }
  0x9e   : > { %v486_v25 = vpop.f32.mrf.mxu1 }
  0xa0   : > { %v402_v29 = vpop.f32.mrf.mxu0 }
  0xa1   : > { %v487_v24 = vadd.f32 %v486_v25, %v402_v29  ;;  %4388 = vmatmul.msk.bf16.gmra.mxu1 %vm365_vm2, %v5318_v32  ;;  %4409 = vmatmul.msk.bf16.gmra.mxu2 %vm365_vm2, %v1117_v3  ;;  %v1118_v3 = vrot.slane %v5362_v10, 2 }
  0xa3   : > { %4367 = vmatmul.msk.bf16.gmra.mxu0 %vm365_vm2, %v829_v9  ;;  %4347 = vmatmul.msk.bf16.gmra.mxu3 %vm365_vm2, %v5350_v11  ;;  %v832_v9 = vor.u32 %v831_v55, %v830_v51  ;;  %v5371_v61 = vsel %vm1112_vm5, %v1116_v50, %v1118_v3 }
  0xa4   : > { %v614_v38 = vpop.f32.mrf.mxu2  ;;  %7020 = vst [vmem:[#allocation23_spill] sm:$0xff] %v5371_v61 }
  0xa5   : > { %v5358_v56 = vadd.f32 %v614_v38, %v487_v24  ;;  %v690_v24 = vrot.slane %v5171_v7, 3  ;;  %v833_v19 = vsel %vm818_vm6, %v828_v44, %v832_v9  ;;  %v4853_v44 = vld [vmem:[%s6900_s1 + $0x70] sm:$0xff] }
  0xa6   : > { %v488_v8 = vpop.f32.mrf.mxu1  ;;  %v437_v37 = vpop.f32.mrf.mxu3  ;;  %1375 = vmatpush.bf16.msra.mxu3 %v4853_v44  ;;  %v692_v44 = vrot.slane %v5207_v36, 3 }
  0xa7   : > { %v5375_v47 = vsel %vm682_vm4, %v688_v28, %v690_v24 }
  0xa8   : > { %v404_v53 = vpop.f32.mrf.mxu0  ;;  %7021 = vst [vmem:[#allocation24_spill] sm:$0xff] %v5375_v47 }
  0xa9   : > { %v489_v25 = vadd.f32 %v488_v8, %v404_v53  ;;  %v5391_v53 = vpack.c.bf16 %v5196_v34, %v5164_v6 }
  0xac   : > { %v616_v29 = vpop.f32.mrf.mxu2 }
  0xad   : > { %v5367_v41 = vadd.f32 %v616_v29, %v489_v25  ;;  %v835_v25 = vrot.slane %v5180_v23, 4 }
  0xae   : > { %v491_v38 = vpop.f32.mrf.mxu1  ;;  %v439_v57 = vpop.f32.mrf.mxu3 }
  0xb0   : > { %v407_v5 = vpop.f32.mrf.mxu0 }
  0xb1   : > { %v492_v20 = vadd.f32 %v491_v38, %v407_v5  ;;  %4389 = vmatmul.msk.bf16.gmra.mxu1 %vm365_vm2, %v5341_v14  ;;  %4410 = vmatmul.msk.bf16.gmra.mxu2 %vm365_vm2, %v5371_v61  ;;  %v4859_v38 = vld [vmem:[%s6900_s1 + $0xa0] sm:$0xff]  ;;  %v1120_v5 = vrot.slane %v5391_v53, 2 }
  0xb2   : > { %1821 = vmatpush.bf16.msra.mxu2 %v4859_v38 }
  0xb3   : > { %4368 = vmatmul.msk.bf16.gmra.mxu0 %vm365_vm2, %v833_v19  ;;  %4348 = vmatmul.msk.bf16.gmra.mxu3 %vm365_vm2, %v5375_v47  ;;  %v834_v19 = vrot.slane %v5213_v48, 3 }
  0xb4   : > { %v619_v50 = vpop.f32.mrf.mxu2 }
  0xb5   : > { %v5387_v8 = vadd.f32 %v619_v50, %v492_v20  ;;  %v4855_v20 = vld [vmem:[%s6900_s1 + $0x80] sm:$0xff]  ;;  %v836_v34 = vor.u32 %v835_v25, %v834_v19 }
  0xb6   : > { %v493_v28 = vpop.f32.mrf.mxu1  ;;  %v442_v51 = vpop.f32.mrf.mxu3  ;;  %1510 = vmatpush.bf16.msra.mxu0 %v4855_v20  ;;  %v5413_v20 = vsel %vm682_vm4, %v690_v24, %v692_v44 }
  0xb7   : > { %v837_v59 = vsel %vm818_vm6, %v832_v9, %v836_v34  ;;  %7023 = vst [vmem:[#allocation26_spill] sm:$0xff] %v5413_v20 }
  0xb8   : > { %v409_v55 = vpop.f32.mrf.mxu0 }
  0xb9   : > { %v494_v29 = vadd.f32 %v493_v28, %v409_v55  ;;  %v5406_v28 = vsel %vm1112_vm5, %v1118_v3, %v1120_v5 }
  0xba   : > { %7022 = vst [vmem:[#allocation25_spill] sm:$0xff] %v5406_v28 }
  0xbc   : > { %v621_v6 = vpop.f32.mrf.mxu2 }
  0xbd   : > { %v5402_v50 = vadd.f32 %v621_v6, %v494_v29  ;;  %v838_v29 = vrot.slane %v5257_v4, 3 }
  0xbe   : > { %v496_v52 = vpop.f32.mrf.mxu1  ;;  %v444_v55 = vpop.f32.mrf.mxu3 }
  0xc0   : > { %v412_v60 = vpop.f32.mrf.mxu0 }
  0xc1   : > { %v497_v38 = vadd.f32 %v496_v52, %v412_v60  ;;  %4390 = vmatmul.msk.bf16.gmra.mxu1 %vm365_vm2, %v5362_v10  ;;  %4411 = vmatmul.msk.bf16.gmra.mxu2 %vm365_vm2, %v5406_v28  ;;  %v5426_v60 = vpack.c.bf16 %v5240_v0, %v5199_v35 }
  0xc3   : > { %4369 = vmatmul.msk.bf16.gmra.mxu0 %vm365_vm2, %v837_v59  ;;  %4349 = vmatmul.msk.bf16.gmra.mxu3 %vm365_vm2, %v5413_v20  ;;  %v1122_v59 = vrot.slane %v5426_v60, 2  ;;  %v840_v20 = vor.u32 %v839_v33, %v838_v29  ;;  %v842_v33 = vrot.slane %v5291_v39, 3 }
  0xc4   : > { %v624_v3 = vpop.f32.mrf.mxu2 }
  0xc5   : > { %v5422_v9 = vadd.f32 %v624_v3, %v497_v38  ;;  %v694_v38 = vrot.slane %v5251_v2, 3  ;;  %v5435_v35 = vsel %vm1112_vm5, %v1120_v5, %v1122_v59  ;;  %v841_v47 = vsel %vm818_vm6, %v836_v34, %v840_v20 }
  0xc6   : > { %v498_v19 = vpop.f32.mrf.mxu1  ;;  %v521_v52 = vpop.f32.mrf.mxu3  ;;  %7024 = vst [vmem:[#allocation27_spill] sm:$0xff] %v5435_v35  ;;  %v5452_v34 = vpack.c.bf16 %v5014_v12, %v5243_v1 }
  0xc7   : > { %v522_v24 = vadd.f32 %v521_v52, %v437_v37 }
  0xc8   : > { %v414_v25 = vpop.f32.mrf.mxu0 }
  0xc9   : > { %v499_v6 = vadd.f32 %v498_v19, %v414_v25  ;;  %v5439_v19 = vsel %vm682_vm4, %v692_v44, %v694_v38 }
  0xca   : > { %7025 = vst [vmem:[#allocation28_spill] sm:$0xff] %v5439_v19 }
  0xcc   : > { %v626_v31 = vpop.f32.mrf.mxu2 }
  0xcd   : > { %v5431_v28 = vadd.f32 %v626_v31, %v499_v6  ;;  %v843_v6 = vrot.slane %v5260_v18, 4 }
  0xce   : > { %v501_v3 = vpop.f32.mrf.mxu1  ;;  %v523_v0 = vpop.f32.mrf.mxu3 }
  0xcf   : > { %v524_v37 = vadd.f32 %v523_v0, %v439_v57 }
  0xd0   : > { %v417_v52 = vpop.f32.mrf.mxu0 }
  0xd1   : > { %v502_v61 = vadd.f32 %v501_v3, %v417_v52  ;;  %4391 = vmatmul.msk.bf16.gmra.mxu1 %vm365_vm2, %v5391_v53  ;;  %4412 = vmatmul.msk.bf16.gmra.mxu2 %vm365_vm2, %v5435_v35  ;;  %v844_v52 = vor.u32 %v843_v6, %v842_v33 }
  0xd3   : > { %4370 = vmatmul.msk.bf16.gmra.mxu0 %vm365_vm2, %v841_v47  ;;  %4350 = vmatmul.msk.bf16.gmra.mxu3 %vm365_vm2, %v5439_v19  ;;  %v1124_v47 = vrot.slane %v5452_v34, 2  ;;  %v845_v35 = vsel %vm818_vm6, %v840_v20, %v844_v52  ;;  %v5478_v20 = vpack.c.bf16 %v5024_v15, %v5017_v13  ;;  %v5488_v13 = vrot.slane %v5040_v21, 3 }
  0xd4   : > { %v629_v31 = vpop.f32.mrf.mxu2 }
  0xd5   : > { %v5448_v57 = vadd.f32 %v629_v31, %v502_v61  ;;  %v696_v61 = vrot.slane %v5031_v17, 3  ;;  %v5461_v12 = vsel %vm1112_vm5, %v1122_v59, %v1124_v47  ;;  %7029 = vst [vmem:[#allocation32_spill] sm:$0xff] %v5488_v13 }
  0xd6   : > { %v503_v5 = vpop.f32.mrf.mxu1  ;;  %v526_v44 = vpop.f32.mrf.mxu3  ;;  %7026 = vst [vmem:[#allocation29_spill] sm:$0xff] %v5461_v12 }
  0xd7   : > { %v527_v25 = vadd.f32 %v526_v44, %v442_v51 }
  0xd8   : > { %v419_v29 = vpop.f32.mrf.mxu0 }
  0xd9   : > { %v504_v3 = vadd.f32 %v503_v5, %v419_v29  ;;  %v5465_v5 = vsel %vm682_vm4, %v694_v38, %v696_v61 }
  0xda   : > { %7027 = vst [vmem:[#allocation30_spill] sm:$0xff] %v5465_v5 }
  0xdc   : > { %v631_v0 = vpop.f32.mrf.mxu2 }
  0xdd   : > { %v5457_v19 = vadd.f32 %v631_v0, %v504_v3  ;;  %v846_v3 = vrot.slane %v5054_v27, 3  ;;  %v847_v0 = vrot.slane %v5051_v26, 4 }
  0xde   : > { %v506_v31 = vpop.f32.mrf.mxu1  ;;  %v528_v1 = vpop.f32.mrf.mxu3 }
  0xdf   : > { %v529_v51 = vadd.f32 %v528_v1, %v444_v55 }
  0xe0   : > { %v422_v44 = vpop.f32.mrf.mxu0 }
  0xe1   : > { %v507_v11 = vadd.f32 %v506_v31, %v422_v44  ;;  %4392 = vmatmul.msk.bf16.gmra.mxu1 %vm365_vm2, %v5426_v60  ;;  %4413 = vmatmul.msk.bf16.gmra.mxu2 %vm365_vm2, %v5461_v12  ;;  %v1126_v31 = vrot.slane %v5478_v20, 2  ;;  %v5498_v12 = vsel %vm682_vm4, %v696_v61, %v5488_v13 }
  0xe2   : > { %7032 = vst [vmem:[#allocation35_spill] sm:$0xff] %v5498_v12 }
  0xe3   : > { %4371 = vmatmul.msk.bf16.gmra.mxu0 %vm365_vm2, %v845_v35  ;;  %4351 = vmatmul.msk.bf16.gmra.mxu3 %vm365_vm2, %v5465_v5 }
  0xe4   : > { %v634_v59 = vpop.f32.mrf.mxu2 }
  0xe5   : > { %v5474_v55 = vadd.f32 %v634_v59, %v507_v11  ;;  %v848_v11 = vor.u32 %v847_v0, %v846_v3  ;;  %v5521_v3 = vpack.c.bf16 %v5084_v40, %v5027_v16 }
  0xe6   : > { %v508_v29 = vpop.f32.mrf.mxu1  ;;  %v649_v38 = vpop.f32.mrf.mxu3 }
  0xe7   : > { %v5480_v33 = vadd.f32 %v649_v38, %v522_v24  ;;  %v5491_v24 = vsel %vm1112_vm5, %v1124_v47, %v1126_v31  ;;  %v5506_v47 = vld [vmem:[%s4967_s24 + $0x98] sm:$0xff] }
  0xe8   : > { %v424_v6 = vpop.f32.mrf.mxu0  ;;  %7030 = vst [vmem:[#allocation33_spill] sm:$0xff] %v5491_v24 }
  0xe9   : > { %7028 = vst [vmem:[#allocation31_spill] sm:$0xff] %v5480_v33  ;;  %v509_v35 = vadd.f32 %v508_v29, %v424_v6  ;;  %v849_v29 = vsel %vm818_vm6, %v844_v52, %v848_v11  ;;  %v4866_v33 = vld [vmem:[%s6900_s1 + $0xd8] sm:$0xff] }
  0xea   : > { %7033 = vst [vmem:[#allocation36_spill] sm:$0xff] %v5506_v47  ;;  %2236 = vmatpush.bf16.msrb.mxu1 %v4866_v33 }
  0xec   : > { %v636_v1 = vpop.f32.mrf.mxu2 }
  0xed   : > { %v5485_v44 = vadd.f32 %v636_v1, %v509_v35 }
  0xee   : > { %v511_v15 = vpop.f32.mrf.mxu1  ;;  %v651_v59 = vpop.f32.mrf.mxu3 }
  0xef   : > { %v5493_v38 = vadd.f32 %v651_v59, %v524_v37  ;;  %v5509_v37 = vld [vmem:[%s4967_s24 + $0xa0] sm:$0xff]  ;;  %v850_v59 = vrot.slane %v5105_v46, 3 }
  0xf0   : > { %v427_v5 = vpop.f32.mrf.mxu0  ;;  %7034 = vst [vmem:[#allocation37_spill] sm:$0xff] %v5509_v37  ;;  %v5515_v61 = vpack.c.bf16 %v5509_v37, %v5506_v47 }
  0xf1   : > { %7031 = vst [vmem:[#allocation34_spill] sm:$0xff] %v5493_v38  ;;  %v512_v6 = vadd.f32 %v511_v15, %v427_v5  ;;  %4393 = vmatmul.msk.bf16.gmra.mxu1 %vm365_vm2, %v5452_v34  ;;  %4414 = vmatmul.msk.bf16.gmra.mxu2 %vm365_vm2, %v5491_v24  ;;  %v5528_v24 = vrot.slane %v5521_v3, 2 }
  0xf2   : > { %7035 = vst [vmem:[#allocation38_spill] sm:$0xff] %v5515_v61 }
  0xf3   : > { %4372 = vmatmul.msk.bf16.gmra.mxu0 %vm365_vm2, %v849_v29  ;;  %4352 = vmatmul.msk.bf16.gmra.mxu3 %vm365_vm2, %v5498_v12  ;;  %v851_v29 = vrot.slane %v5061_v30, 4  ;;  %v5538_v61 = vsel %vm1112_vm5, %v1126_v31, %v5528_v24  ;;  %v1249_v31 = vshrl.u32 %v5314_v54, 16 }
  0xf4   : > { %v639_v52 = vpop.f32.mrf.mxu2  ;;  %7037 = vst [vmem:[#allocation40_spill] sm:$0xff] %v5538_v61 }
  0xf5   : > { %v5517_v5 = vadd.f32 %v639_v52, %v512_v6  ;;  %v4862_v6 = vld [vmem:[%s6900_s1 + $0xb8] sm:$0xff]  ;;  %v852_v16 = vor.u32 %v851_v29, %v850_v59 }
  0xf6   : > { %v513_v0 = vpop.f32.mrf.mxu1  ;;  %v654_v35 = vpop.f32.mrf.mxu3  ;;  %1924 = vmatpush.bf16.msrb.mxu3 %v4862_v6  ;;  %v1252_v6 = vshll.u32 %v5314_v54, 16 }
  0xf7   : > { %v5523_v1 = vadd.f32 %v654_v35, %v527_v25  ;;  %v700_v25 = vrot.slane %v5098_v43, 3  ;;  %v853_v38 = vsel %vm818_vm6, %v848_v11, %v852_v16  ;;  %v4868_v11 = vld [vmem:[%s6900_s1 + $0xe8] sm:$0xff] }
  0xf8   : > { %v429_v15 = vpop.f32.mrf.mxu0  ;;  %2340 = vmatpush.bf16.msrb.mxu2 %v4868_v11 }
  0xf9   : > { %7036 = vst [vmem:[#allocation39_spill] sm:$0xff] %v5523_v1  ;;  %v514_v12 = vadd.f32 %v513_v0, %v429_v15  ;;  %v701_v59 = vsel %vm682_vm4, %v5488_v13, %v700_v25 }
  0xfc   : > { %v641_v52 = vpop.f32.mrf.mxu2 }
  0xfd   : > { %v5533_v40 = vadd.f32 %v641_v52, %v514_v12  ;;  %v1259_v52 = vshll.u32 %v5318_v32, 16 }
  0xfe   : > { %v516_v35 = vpop.f32.mrf.mxu1  ;;  %v656_v0 = vpop.f32.mrf.mxu3 }
  0xff   : > { %v5540_v15 = vadd.f32 %v656_v0, %v529_v51  ;;  %v854_v51 = vshrl.u32 %v5098_v43, 16 }
 0x100   : > { %v432_v1 = vpop.f32.mrf.mxu0 }
 0x101   : > { %7038 = vst [vmem:[#allocation41_spill] sm:$0xff] %v5540_v15  ;;  %v517_v37 = vadd.f32 %v516_v35, %v432_v1  ;;  %4394 = vmatmul.msk.bf16.gmra.mxu1 %vm365_vm2, %v5478_v20  ;;  %4415 = vmatmul.msk.bf16.gmra.mxu2 %vm365_vm2, %v5538_v61  ;;  %v4864_v1 = vld [vmem:[%s6900_s1 + $0xc8] sm:$0xff]  ;;  %v5566_v35 = vpack.c.bf16 %v5506_v47, %v5506_v47  ;;  %v856_v13 = vrot.slane %v854_v51, 3  ;;  %v1251_v15 = vrot.slane %v1249_v31, 2 }
 0x102   : > { %2065 = vmatpush.bf16.msrb.mxu0 %v4864_v1  ;;  %v1261_v47 = vrot.slane %v1259_v52, 3 }
 0x103   : > { %4373 = vmatmul.msk.bf16.gmra.mxu0 %vm365_vm2, %v853_v38  ;;  %4353 = vmatmul.msk.bf16.gmra.mxu3 %vm365_vm2, %v701_v59  ;;  %v1256_v38 = vshrl.u32 %v5318_v32, 16  ;;  %v1130_v11 = vrot.slane %v5566_v35, 2 }
 0x104   : > { %v644_v12 = vpop.f32.mrf.mxu2 }
 0x105   : > { %v5559_v29 = vadd.f32 %v644_v12, %v517_v37  ;;  %v7040_v37 = vshll.u32 %v5098_v43, 16  ;;  %v1258_v30 = vrot.slane %v1256_v38, 2  ;;  %v1131_v31 = vsel %vm1112_vm5, %v5528_v24, %v1130_v11 }
 0x106   : > { %v518_v25 = vpop.f32.mrf.mxu1  ;;  %v750_v0 = vpop.f32.mrf.mxu3 }
 0x107   : > { %7039 = vst [vmem:[#allocation42_spill] sm:$0xff] %v5559_v29  ;;  %v795_v59 = vadd.f32 %v750_v0, %v5358_v56  ;;  %v857_v12 = vrot.slane %v7040_v37, 4  ;;  %v1254_v29 = vrot.slane %v1252_v6, 3  ;;  %v1262_v0 = vor.u32 %v1261_v47, %v1258_v30 }
 0x108   : > { %v434_v61 = vpop.f32.mrf.mxu0 }
 0x109   : > { %v519_v21 = vadd.f32 %v518_v25, %v434_v61  ;;  %v858_v46 = vor.u32 %v857_v12, %v856_v13  ;;  %v1255_v51 = vor.u32 %v1254_v29, %v1251_v15  ;;  %v1722_v15 = vrot.slane %v5102_v45, 3 }
 0x10a   : > { %v1724_v29 = vrot.slane %v5177_v22, 2  ;;  %v1725_v25 = vrot.slane %v5150_v63, 3  ;;  %v1445_v63 = vrot.slane %v5314_v54, 3 }
 0x10b   : > { %v859_v38 = vsel %vm818_vm6, %v852_v16, %v858_v46  ;;  %v6947_v46 = vshll.u32 %v5341_v14, 16  ;;  %v1721_v16 = vrot.slane %v5147_v62, 2  ;;  %v1587_v62 = vrot.slane %v5135_v58, 2 }
 0x10c   : > { %v646_v1 = vpop.f32.mrf.mxu2 }
 0x10d   : > { %v5575_v56 = vadd.f32 %v646_v1, %v519_v21  ;;  %v1263_v21 = vsel %vm1248_vm7, %v1255_v51, %v1262_v0  ;;  %v1723_v45 = vor.u32 %v1722_v15, %v1721_v16 }
 0x10e   : > { %v1033_v43 = vpop.f32.mrf.mxu1  ;;  %v752_v37 = vpop.f32.mrf.mxu3 }
 0x10f   : > { %v796_v61 = vadd.f32 %v752_v37, %v5367_v41  ;;  %v6948_v41 = vshrl.u32 %v5341_v14, 16  ;;  %v1726_v37 = vor.u32 %v1725_v25, %v1724_v29  ;;  %v6945_v25 = vshll.u32 %v5362_v10, 16 }
 0x110   : > { %v908_v6 = vpop.f32.mrf.mxu0 }
 0x111   : > { %v953_v52 = vadd.f32 %v908_v6, %v795_v59  ;;  %4395 = vmatmul.msk.bf16.gmra.mxu1 %vm365_vm2, %v5521_v3  ;;  %4416 = vmatmul.msk.bf16.gmra.mxu2 %vm365_vm2, %v1131_v31  ;;  %v1266_v51 = vrot.slane %v6948_v41, 2  ;;  %v1586_v31 = vrot.slane %v5094_v42, 2  ;;  %v7050_v41 = vld [vmem:[#allocation36_spill] sm:$0xff] }
 0x113   : > { %v1078_v30 = vadd.f32 %v1033_v43, %v953_v52  ;;  %4374 = vmatmul.msk.bf16.gmra.mxu0 %vm365_vm2, %v859_v38  ;;  %4429 = vmatmul.msk.bf16.vlgmr.msra.gmra.mxu3 %vm365_vm2, %v1263_v21  ;;  %v1269_v43 = vrot.slane %v6947_v46, 3  ;;  %v1588_v21 = vsel %vm1112_vm5, %v1586_v31, %v1587_v62 }
 0x114   : > { %v1180_v33 = vpop.f32.mrf.mxu2 }
 0x115   : > { %v5587_v13 = vadd.f32 %v1180_v33, %v1078_v30  ;;  %v1727_v30 = vsel %vm1248_vm7, %v1723_v45, %v1726_v37 }
 0x116   : > { %v1035_v47 = vpop.f32.mrf.mxu1  ;;  %v755_v59 = vpop.f32.mrf.mxu3 }
 0x117   : > { %v797_v12 = vadd.f32 %v755_v59, %v5387_v8  ;;  %v1446_v8 = vrot.slane %v5318_v32, 3 }
 0x118   : > { %v910_v11 = vpop.f32.mrf.mxu0 }
 0x119   : > { %v954_v1 = vadd.f32 %v910_v11, %v796_v61  ;;  %v1270_v61 = vor.u32 %v1269_v43, %v1266_v51  ;;  %v1447_v16 = vsel %vm682_vm4, %v1445_v63, %v1446_v8 }
 0x11b   : > { %v1079_v22 = vadd.f32 %v1035_v47, %v954_v1  ;;  %v1271_v15 = vsel %vm1248_vm7, %v1262_v0, %v1270_v61  ;;  %v1729_v0 = vrot.slane %v5180_v23, 3 }
 0x11c   : > { %v1182_v6 = vpop.f32.mrf.mxu2 }
 0x11d   : > { %v5604_v38 = vadd.f32 %v1182_v6, %v1079_v22  ;;  %v1277_v22 = vrot.slane %v6945_v25, 3  ;;  %v1589_v6 = vrot.slane %v5171_v7, 2  ;;  %v7070_v7 = vld [vmem:[#allocation41_spill] sm:$0xff] }
 0x11e   : > { %v1038_v52 = vpop.f32.mrf.mxu1  ;;  %v757_v33 = vpop.f32.mrf.mxu3 }
 0x11f   : > { %v798_v42 = vadd.f32 %v757_v33, %v5402_v50  ;;  %v6946_v50 = vshrl.u32 %v5362_v10, 16 }
 0x120   : > { %v913_v59 = vpop.f32.mrf.mxu0 }
 0x121   : > { %v955_v47 = vadd.f32 %v913_v59, %v797_v12  ;;  %4471 = vmatmul.msk.bf16.vlgmr.msra.gmra.mxu1 %vm365_vm2, %v1588_v21  ;;  %4492 = vmatmul.msk.bf16.vlgmr.msra.gmra.mxu2 %vm365_vm2, %v1727_v30  ;;  %v1728_v12 = vrot.slane %v5213_v48, 2  ;;  %v1274_v45 = vrot.slane %v6946_v50, 2  ;;  %v1448_v48 = vrot.slane %v5341_v14, 3 }
 0x122   : > { %v1456_v50 = vrot.slane %v5452_v34, 3 }
 0x123   : > { %v1080_v54 = vadd.f32 %v1038_v52, %v955_v47  ;;  %4450 = vmatmul.msk.bf16.vlgmr.msra.gmra.mxu0 %vm365_vm2, %v1447_v16  ;;  %4430 = vmatmul.msk.bf16.gmra.mxu3 %vm365_vm2, %v1271_v15  ;;  %v1730_v63 = vor.u32 %v1729_v0, %v1728_v12  ;;  %v1278_v23 = vor.u32 %v1277_v22, %v1274_v45  ;;  %v1733_v0 = vrot.slane %v5216_v49, 3 }
 0x124   : > { %v1185_v32 = vpop.f32.mrf.mxu2  ;;  %v1449_v15 = vsel %vm682_vm4, %v1446_v8, %v1448_v48  ;;  %v5645_v8 = vshll.u32 %v5391_v53, 16 }
 0x125   : > { %v5615_v29 = vadd.f32 %v1185_v32, %v1080_v54  ;;  %v1279_v32 = vsel %vm1248_vm7, %v1270_v61, %v1278_v23  ;;  %v1732_v61 = vrot.slane %v5257_v4, 2 }
 0x126   : > { %v1040_v11 = vpop.f32.mrf.mxu1  ;;  %v760_v1 = vpop.f32.mrf.mxu3  ;;  %v1285_v22 = vrot.slane %v5645_v8, 3 }
 0x127   : > { %v799_v51 = vadd.f32 %v760_v1, %v5422_v9  ;;  %v1590_v9 = vsel %vm1112_vm5, %v1587_v62, %v1589_v6 }
 0x128   : > { %v915_v43 = vpop.f32.mrf.mxu0 }
 0x129   : > { %v956_v31 = vadd.f32 %v915_v43, %v798_v42  ;;  %v1731_v42 = vsel %vm1248_vm7, %v1726_v37, %v1730_v63 }
 0x12b   : > { %v1081_v52 = vadd.f32 %v1040_v11, %v956_v31 }
 0x12c   : > { %v1187_v21 = vpop.f32.mrf.mxu2 }
 0x12d   : > { %v5628_v30 = vadd.f32 %v1187_v21, %v1081_v52  ;;  %v1591_v52 = vrot.slane %v5207_v36, 2  ;;  %v1734_v21 = vor.u32 %v1733_v0, %v1732_v61  ;;  %v1736_v0 = vrot.slane %v5291_v39, 2  ;;  %v4867_v39 = vld [vmem:[%s6900_s1 + $0xe0] sm:$0xff] }
 0x12e   : > { %v1043_v33 = vpop.f32.mrf.mxu1  ;;  %v762_v59 = vpop.f32.mrf.mxu3  ;;  %2341 = vmatpush.bf16.msrb.mxu2 %v4867_v39 }
 0x12f   : > { %v800_v16 = vadd.f32 %v762_v59, %v5431_v28  ;;  %v5642_v28 = vshrl.u32 %v5391_v53, 16 }
 0x130   : > { %v918_v47 = vpop.f32.mrf.mxu0 }
 0x131   : > { %v957_v54 = vadd.f32 %v918_v47, %v799_v51  ;;  %4472 = vmatmul.msk.bf16.gmra.mxu1 %vm365_vm2, %v1590_v9  ;;  %4493 = vmatmul.msk.bf16.gmra.mxu2 %vm365_vm2, %v1731_v42  ;;  %v1282_v45 = vrot.slane %v5642_v28, 2  ;;  %v1450_v42 = vrot.slane %v5362_v10, 3  ;;  %v1592_v47 = vsel %vm1112_vm5, %v1589_v6, %v1591_v52 }
 0x133   : > { %v1082_v11 = vadd.f32 %v1043_v33, %v957_v54  ;;  %4451 = vmatmul.msk.bf16.gmra.mxu0 %vm365_vm2, %v1449_v15  ;;  %4431 = vmatmul.msk.bf16.gmra.mxu3 %vm365_vm2, %v1279_v32  ;;  %v1286_v4 = vor.u32 %v1285_v22, %v1282_v45  ;;  %v1451_v32 = vsel %vm682_vm4, %v1448_v48, %v1450_v42  ;;  %v5671_v48 = vshrl.u32 %v5426_v60, 16 }
 0x134   : > { %v1190_v62 = vpop.f32.mrf.mxu2 }
 0x135   : > { %v5639_v37 = vadd.f32 %v1190_v62, %v1082_v11  ;;  %v1287_v62 = vsel %vm1248_vm7, %v1278_v23, %v1286_v4  ;;  %v5674_v23 = vshll.u32 %v5426_v60, 16  ;;  %v1290_v22 = vrot.slane %v5671_v48, 2 }
 0x136   : > { %v1045_v12 = vpop.f32.mrf.mxu1  ;;  %v765_v1 = vpop.f32.mrf.mxu3 }
 0x137   : > { %v801_v51 = vadd.f32 %v765_v1, %v5448_v57  ;;  %v1735_v57 = vsel %vm1248_vm7, %v1730_v63, %v1734_v21  ;;  %v1737_v1 = vrot.slane %v5260_v18, 3  ;;  %v4863_v18 = vld [vmem:[%s6900_s1 + $0xc0] sm:$0xff] }
 0x138   : > { %v920_v43 = vpop.f32.mrf.mxu0  ;;  %2066 = vmatpush.bf16.msrb.mxu0 %v4863_v18 }
 0x139   : > { %v958_v31 = vadd.f32 %v920_v43, %v800_v16 }
 0x13b   : > { %v1083_v33 = vadd.f32 %v1045_v12, %v958_v31 }
 0x13c   : > { %v1192_v9 = vpop.f32.mrf.mxu2 }
 0x13d   : > { %v5654_v59 = vadd.f32 %v1192_v9, %v1083_v33  ;;  %v1293_v33 = vrot.slane %v5674_v23, 3  ;;  %v1593_v9 = vrot.slane %v5251_v2, 2 }
 0x13e   : > { %v1048_v49 = vpop.f32.mrf.mxu1  ;;  %v767_v16 = vpop.f32.mrf.mxu3 }
 0x13f   : > { %v802_v15 = vadd.f32 %v767_v16, %v5457_v19  ;;  %v4861_v19 = vld [vmem:[%s6900_s1 + $0xb0] sm:$0xff] }
 0x140   : > { %v923_v54 = vpop.f32.mrf.mxu0  ;;  %1925 = vmatpush.bf16.msrb.mxu3 %v4861_v19 }
 0x141   : > { %v959_v11 = vadd.f32 %v923_v54, %v801_v51  ;;  %4473 = vmatmul.msk.bf16.gmra.mxu1 %vm365_vm2, %v1592_v47  ;;  %4494 = vmatmul.msk.bf16.gmra.mxu2 %vm365_vm2, %v1735_v57 }
 0x143   : > { %v1084_v12 = vadd.f32 %v1048_v49, %v959_v11  ;;  %4452 = vmatmul.msk.bf16.gmra.mxu0 %vm365_vm2, %v1451_v32  ;;  %4432 = vmatmul.msk.bf16.gmra.mxu3 %vm365_vm2, %v1287_v62  ;;  %v1738_v49 = vor.u32 %v1737_v1, %v1736_v0  ;;  %v5692_v32 = vsel %vm1112_vm5, %v1591_v52, %v1593_v9 }
 0x144   : > { %v1195_v6 = vpop.f32.mrf.mxu2  ;;  %7041 = vst [vmem:[#allocation43_spill] sm:$0xff] %v5692_v32 }
 0x145   : > { %v5668_v63 = vadd.f32 %v1195_v6, %v1084_v12  ;;  %v5695_v11 = vsel %vm1248_vm7, %v1734_v21, %v1738_v49 }
 0x146   : > { %v1050_v61 = vpop.f32.mrf.mxu1  ;;  %v770_v51 = vpop.f32.mrf.mxu3  ;;  %7042 = vst [vmem:[#allocation44_spill] sm:$0xff] %v5695_v11 }
 0x147   : > { %v803_v43 = vadd.f32 %v770_v51, %v5474_v55  ;;  %v1452_v55 = vrot.slane %v5391_v53, 3 }
 0x148   : > { %v925_v31 = vpop.f32.mrf.mxu0 }
 0x149   : > { %v960_v45 = vadd.f32 %v925_v31, %v802_v15  ;;  %v1294_v15 = vor.u32 %v1293_v33, %v1290_v22  ;;  %v1453_v19 = vsel %vm682_vm4, %v1450_v42, %v1452_v55  ;;  %v5712_v42 = vshrl.u32 %v5452_v34, 16 }
 0x14a   : > { %v1741_v31 = vrot.slane %v5051_v26, 3 }
 0x14b   : > { %v1085_v47 = vadd.f32 %v1050_v61, %v960_v45  ;;  %v4865_v61 = vld [vmem:[%s6900_s1 + $0xd0] sm:$0xff]  ;;  %v1295_v1 = vsel %vm1248_vm7, %v1286_v4, %v1294_v15  ;;  %v5715_v4 = vshll.u32 %v5452_v34, 16  ;;  %v1298_v39 = vrot.slane %v5712_v42, 2 }
 0x14c   : > { %v1197_v57 = vpop.f32.mrf.mxu2  ;;  %2237 = vmatpush.bf16.msrb.mxu1 %v4865_v61 }
 0x14d   : > { %v5689_v16 = vadd.f32 %v1197_v57, %v1085_v47  ;;  %v1301_v18 = vrot.slane %v5715_v4, 3  ;;  %v1595_v57 = vrot.slane %v5031_v17, 2 }
 0x14e   : > { %v1053_v54 = vpop.f32.mrf.mxu1  ;;  %v772_v62 = vpop.f32.mrf.mxu3 }
 0x14f   : > { %v804_v12 = vadd.f32 %v772_v62, %v5485_v44 }
 0x150   : > { %v928_v6 = vpop.f32.mrf.mxu0 }
 0x151   : > { %v961_v0 = vadd.f32 %v928_v6, %v803_v43  ;;  %4474 = vmatmul.msk.bf16.gmra.mxu1 %vm365_vm2, %v5692_v32  ;;  %4495 = vmatmul.msk.bf16.gmra.mxu2 %vm365_vm2, %v5695_v11  ;;  %v1740_v43 = vrot.slane %v5054_v27, 2  ;;  %v1302_v27 = vor.u32 %v1301_v18, %v1298_v39  ;;  %v7048_v18 = vld [vmem:[#allocation42_spill] sm:$0xff] }
 0x153   : > { %v1086_v52 = vadd.f32 %v1053_v54, %v961_v0  ;;  %4453 = vmatmul.msk.bf16.gmra.mxu0 %vm365_vm2, %v1453_v19  ;;  %4433 = vmatmul.msk.bf16.gmra.mxu3 %vm365_vm2, %v1295_v1  ;;  %v1742_v54 = vor.u32 %v1741_v31, %v1740_v43  ;;  %v1454_v19 = vrot.slane %v5426_v60, 3  ;;  %v5727_v0 = vsel %vm1112_vm5, %v1593_v9, %v1595_v57 }
 0x154   : > { %v1200_v44 = vpop.f32.mrf.mxu2  ;;  %7043 = vst [vmem:[#allocation45_spill] sm:$0xff] %v5727_v0  ;;  %v1303_v43 = vsel %vm1248_vm7, %v1294_v15, %v1302_v27  ;;  %v5750_v15 = vshll.u32 %v5478_v20, 16 }
 0x155   : > { %v5709_v21 = vadd.f32 %v1200_v44, %v1086_v52  ;;  %v5734_v44 = vsel %vm682_vm4, %v1452_v55, %v1454_v19  ;;  %v5747_v55 = vshrl.u32 %v5478_v20, 16 }
 0x156   : > { %v1055_v51 = vpop.f32.mrf.mxu1  ;;  %v775_v45 = vpop.f32.mrf.mxu3  ;;  %7045 = vst [vmem:[#allocation47_spill] sm:$0xff] %v5734_v44 }
 0x157   : > { %v805_v22 = vadd.f32 %v775_v45, %v5517_v5  ;;  %v5730_v5 = vsel %vm1248_vm7, %v1738_v49, %v1742_v54  ;;  %v7046_v45 = vld [vmem:[#allocation6_spill] sm:$0xff] }
 0x158   : > { %v930_v33 = vpop.f32.mrf.mxu0  ;;  %7044 = vst [vmem:[#allocation46_spill] sm:$0xff] %v5730_v5 }
 0x159   : > { %v962_v47 = vadd.f32 %v930_v33, %v804_v12  ;;  %v7047_v33 = vld [vmem:[#allocation4_spill] sm:$0xff] }
 0x15b   : > { %v1087_v62 = vadd.f32 %v1055_v51, %v962_v47  ;;  %v1745_v47 = vrot.slane %v7047_v33, 3  ;;  %v4914_v33 = vld [vmem:[%s4967_s24 + $0x90] sm:$0xff] }
 0x15c   : > { %v1202_v6 = vpop.f32.mrf.mxu2 }
 0x15d   : > { %v5724_v61 = vadd.f32 %v1202_v6, %v1087_v62 }
 0x15e   : > { %v1058_v26 = vpop.f32.mrf.mxu1  ;;  %v777_v12 = vpop.f32.mrf.mxu3 }
 0x15f   : > { %v806_v1 = vadd.f32 %v777_v12, %v5533_v40  ;;  %v1306_v12 = vrot.slane %v5747_v55, 2 }
 0x160   : > { %v933_v52 = vpop.f32.mrf.mxu0 }
 0x161   : > { %v963_v51 = vadd.f32 %v933_v52, %v805_v22  ;;  %4475 = vmatmul.msk.bf16.gmra.mxu1 %vm365_vm2, %v5727_v0  ;;  %4496 = vmatmul.msk.bf16.gmra.mxu2 %vm365_vm2, %v5730_v5  ;;  %v1744_v22 = vrot.slane %v7046_v45, 2  ;;  %v1309_v52 = vrot.slane %v5750_v15, 3  ;;  %v5763_v0 = vpack.c.bf16 %v7050_v41, %v4914_v33 }
 0x163   : > { %v1088_v9 = vadd.f32 %v1058_v26, %v963_v51  ;;  %4454 = vmatmul.msk.bf16.gmra.mxu0 %vm365_vm2, %v5734_v44  ;;  %4434 = vmatmul.msk.bf16.gmra.mxu3 %vm365_vm2, %v1303_v43  ;;  %v7049_v51 = vld [vmem:[#allocation3_spill] sm:$0xff]  ;;  %v1310_v45 = vor.u32 %v1309_v52, %v1306_v12  ;;  %v6954_v41 = vshrl.u32 %v5763_v0, 16 }
 0x164   : > { %v1205_v40 = vpop.f32.mrf.mxu2  ;;  %v1597_v43 = vrot.slane %v7049_v51, 2  ;;  %v7063_v51 = vshrl.u32 %v5341_v14, 16 }
 0x165   : > { %v5744_v49 = vadd.f32 %v1205_v40, %v1088_v9  ;;  %v1746_v9 = vor.u32 %v1745_v47, %v1744_v22  ;;  %v5773_v47 = vsel %vm682_vm4, %v1454_v19, %v1456_v50  ;;  %v1751_v52 = vrot.slane %v6954_v41, 2 }
 0x166   : > { %v1060_v31 = vpop.f32.mrf.mxu1  ;;  %v780_v39 = vpop.f32.mrf.mxu3  ;;  %7053 = vst [vmem:[#allocation42_spill] sm:$0xff] %v5773_v47  ;;  %v1458_v41 = vrot.slane %v5478_v20, 3  ;;  %v2137_v17 = vrot.slane %v7063_v51, 1 }
 0x167   : > { %v807_v62 = vadd.f32 %v780_v39, %v7048_v18  ;;  %v5769_v18 = vsel %vm1248_vm7, %v1742_v54, %v1746_v9 }
 0x168   : > { %v935_v6 = vpop.f32.mrf.mxu0  ;;  %7052 = vst [vmem:[#allocation4_spill] sm:$0xff] %v5769_v18  ;;  %v5819_v44 = vsel %vm682_vm4, %v1456_v50, %v1458_v41 }
 0x169   : > { %v964_v26 = vadd.f32 %v935_v6, %v806_v1  ;;  %v5766_v1 = vsel %vm1112_vm5, %v1595_v57, %v1597_v43  ;;  %v6956_v57 = vshll.u32 %v5763_v0, 16 }
 0x16a   : > { %7051 = vst [vmem:[#allocation6_spill] sm:$0xff] %v5766_v1 }
 0x16b   : > { %v1089_v40 = vadd.f32 %v1060_v31, %v964_v26  ;;  %v1311_v26 = vsel %vm1248_vm7, %v1302_v27, %v1310_v45  ;;  %v5788_v27 = vshrl.u32 %v5521_v3, 16 }
 0x16c   : > { %v1207_v25 = vpop.f32.mrf.mxu2 }
 0x16d   : > { %v5759_v46 = vadd.f32 %v1207_v25, %v1089_v40  ;;  %v1754_v40 = vrot.slane %v6956_v57, 3 }
 0x16e   : > { %v1063_v39 = vpop.f32.mrf.mxu1  ;;  %v782_v6 = vpop.f32.mrf.mxu3 }
 0x16f   : > { %v808_v31 = vadd.f32 %v782_v6, %v5575_v56 }
 0x170   : > { %v938_v22 = vpop.f32.mrf.mxu0 }
 0x171   : > { %v965_v25 = vadd.f32 %v938_v22, %v807_v62  ;;  %4476 = vmatmul.msk.bf16.gmra.mxu1 %vm365_vm2, %v5766_v1  ;;  %4497 = vmatmul.msk.bf16.gmra.mxu2 %vm365_vm2, %v5769_v18  ;;  %v5791_v62 = vshll.u32 %v5521_v3, 16  ;;  %v1755_v1 = vor.u32 %v1754_v40, %v1751_v52  ;;  %v5802_v18 = vld [vmem:[%s4967_s24 + $0xa8] sm:$0xff]  ;;  %v7058_v40 = vld [vmem:[#allocation34_spill] sm:$0xff] }
 0x173   : > { %v1090_v54 = vadd.f32 %v1063_v39, %v965_v25  ;;  %4455 = vmatmul.msk.bf16.gmra.mxu0 %vm365_vm2, %v5773_v47  ;;  %4435 = vmatmul.msk.bf16.gmra.mxu3 %vm365_vm2, %v1311_v26  ;;  %v7054_v39 = vld [vmem:[#allocation31_spill] sm:$0xff]  ;;  %v1314_v26 = vrot.slane %v5788_v27, 2  ;;  %v7055_v47 = vld [vmem:[#allocation37_spill] sm:$0xff] }
 0x174   : > { %v1210_v56 = vpop.f32.mrf.mxu2  ;;  %7059 = vst [vmem:[#allocation37_spill] sm:$0xff] %v5819_v44 }
 0x175   : > { %v5785_v19 = vadd.f32 %v1210_v56, %v1090_v54  ;;  %v1317_v54 = vrot.slane %v5791_v62, 3  ;;  %v1599_v56 = vrot.slane %v5763_v0, 2 }
 0x176   : > { %v1065_v12 = vpop.f32.mrf.mxu1  ;;  %v785_v33 = vpop.f32.mrf.mxu3 }
 0x177   : > { %v809_v6 = vadd.f32 %v785_v33, %v7054_v39  ;;  %v1318_v57 = vor.u32 %v1317_v54, %v1314_v26  ;;  %v5809_v33 = vpack.c.bf16 %v5802_v18, %v7055_v47  ;;  %v5812_v39 = vsel %vm1112_vm5, %v1597_v43, %v1599_v56 }
 0x178   : > { %v940_v22 = vpop.f32.mrf.mxu0  ;;  %7056 = vst [vmem:[#allocation36_spill] sm:$0xff] %v5812_v39  ;;  %v1324_v26 = vshll.u32 %v5566_v35, 16 }
 0x179   : > { %v966_v25 = vadd.f32 %v940_v22, %v808_v31  ;;  %v5815_v22 = vsel %vm1248_vm7, %v1746_v9, %v1755_v1  ;;  %v6966_v43 = vshrl.u32 %v5809_v33, 16  ;;  %v6967_v9 = vshll.u32 %v5809_v33, 16 }
 0x17a   : > { %7057 = vst [vmem:[#allocation31_spill] sm:$0xff] %v5815_v22 }
 0x17b   : > { %v1091_v5 = vadd.f32 %v1065_v12, %v966_v25 }
 0x17c   : > { %v1212_v32 = vpop.f32.mrf.mxu2 }
 0x17d   : > { %v5805_v11 = vadd.f32 %v1212_v32, %v1091_v5  ;;  %v1319_v5 = vsel %vm1248_vm7, %v1310_v45, %v1318_v57  ;;  %v1321_v45 = vshrl.u32 %v5566_v35, 16 }
 0x17e   : > { %v1068_v31 = vpop.f32.mrf.mxu1  ;;  %v787_v52 = vpop.f32.mrf.mxu3 }
 0x17f   : > { %v810_v12 = vadd.f32 %v787_v52, %v7058_v40  ;;  %v1760_v52 = vrot.slane %v6966_v43, 2  ;;  %v5848_v43 = vld [vmem:[%s4967_s24 + $0xb0] sm:$0xff] }
 0x180   : > { %v943_v25 = vpop.f32.mrf.mxu0 }
 0x181   : > { %v967_v32 = vadd.f32 %v943_v25, %v809_v6  ;;  %4477 = vmatmul.msk.bf16.gmra.mxu1 %vm365_vm2, %v5812_v39  ;;  %4498 = vmatmul.msk.bf16.gmra.mxu2 %vm365_vm2, %v5815_v22  ;;  %v7060_v25 = vld [vmem:[#allocation39_spill] sm:$0xff]  ;;  %v1323_v22 = vrot.slane %v1321_v45, 2 }
 0x183   : > { %v1092_v47 = vadd.f32 %v1068_v31, %v967_v32  ;;  %4456 = vmatmul.msk.bf16.gmra.mxu0 %vm365_vm2, %v5819_v44  ;;  %4436 = vmatmul.msk.bf16.gmra.mxu3 %vm365_vm2, %v1319_v5  ;;  %v1763_v31 = vrot.slane %v6967_v9, 3  ;;  %v4870_v9 = vld [vmem:[%s6900_s1 + $0xf8] sm:$0xff] }
 0x184   : > { %v1215_v50 = vpop.f32.mrf.mxu2  ;;  %2437 = vmatpush.bf16.msra.mxu3 %v4870_v9 }
 0x185   : > { %v5831_v6 = vadd.f32 %v1215_v50, %v1092_v47  ;;  %v1326_v47 = vrot.slane %v1324_v26, 3  ;;  %v5841_v50 = vrot.slane %v5809_v33, 2  ;;  %v5843_v44 = vor.u32 %v1763_v31, %v1760_v52 }
 0x186   : > { %v1070_v54 = vpop.f32.mrf.mxu1  ;;  %v790_v40 = vpop.f32.mrf.mxu3  ;;  %v7066_v26 = vshll.u32 %v5362_v10, 16 }
 0x187   : > { %v811_v32 = vadd.f32 %v790_v40, %v7060_v25  ;;  %7061 = vst [vmem:[#allocation34_spill] sm:$0xff] %v5841_v50  ;;  %v7064_v40 = vshll.u32 %v5341_v14, 16  ;;  %v5860_v25 = vrot.slane %v5521_v3, 3  ;;  %v5866_v36 = vsel %vm1112_vm5, %v1599_v56, %v5841_v50 }
 0x188   : > { %v945_v39 = vpop.f32.mrf.mxu0  ;;  %7062 = vst [vmem:[#allocation39_spill] sm:$0xff] %v5843_v44  ;;  %v2141_v52 = vrot.slane %v7066_v26, 2 }
 0x189   : > { %v968_v5 = vadd.f32 %v945_v39, %v810_v12  ;;  %v2138_v39 = vrot.slane %v7064_v40, 2  ;;  %v7065_v12 = vshrl.u32 %v5362_v10, 16  ;;  %7067 = vst [vmem:[#allocation48_spill] sm:$0xff] %v5860_v25  ;;  %v5870_v40 = vsel %vm1248_vm7, %v1755_v1, %v5843_v44 }
 0x18a   : > { %7068 = vst [vmem:[#allocation49_spill] sm:$0xff] %v5866_v36 }
 0x18b   : > { %v1093_v2 = vadd.f32 %v1070_v54, %v968_v5  ;;  %v2140_v45 = vrot.slane %v7065_v12, 1  ;;  %v1327_v54 = vor.u32 %v1326_v47, %v1323_v22  ;;  %7069 = vst [vmem:[#allocation50_spill] sm:$0xff] %v5870_v40  ;;  %v5874_v12 = vpack.c.bf16 %v5848_v43, %v5848_v43 }
 0x18c   : > { %v1217_v31 = vpop.f32.mrf.mxu2  ;;  %v5879_v22 = vsel %vm682_vm4, %v1458_v41, %v5860_v25  ;;  %v2139_v9 = vor.u32 %v2138_v39, %v2137_v17  ;;  %v4872_v39 = vld [vmem:[%s6900_s1 + $0x108] sm:$0xff] }
 0x18d   : > { %v5862_v51 = vadd.f32 %v1217_v31, %v1093_v2  ;;  %7071 = vst [vmem:[#allocation41_spill] sm:$0xff] %v5879_v22  ;;  %v5881_v47 = vor.u32 %v2141_v52, %v2140_v45  ;;  %v1328_v31 = vsel %vm1248_vm7, %v1318_v57, %v1327_v54  ;;  %v1770_v1 = vshll.u32 %v5874_v12, 16  ;;  %2557 = vmatpush.bf16.msra.mxu0 %v4872_v39 }
 0x18e   : > { %v1073_v5 = vpop.f32.mrf.mxu1  ;;  %v792_v26 = vpop.f32.mrf.mxu3 }
 0x18f   : > { %v812_v58 = vadd.f32 %v792_v26, %v7070_v7  ;;  %v1767_v7 = vshrl.u32 %v5874_v12, 16  ;;  %v2143_v41 = vsel %vm2136_vm8, %v2139_v9, %v5881_v47  ;;  %v1772_v26 = vrot.slane %v1770_v1, 3 }
 0x190   : > { %v948_v2 = vpop.f32.mrf.mxu0 }
 0x191   : > { %v969_v56 = vadd.f32 %v948_v2, %v811_v32  ;;  %4478 = vmatmul.msk.bf16.gmra.mxu1 %vm365_vm2, %v5866_v36  ;;  %4499 = vmatmul.msk.bf16.gmra.mxu2 %vm365_vm2, %v5870_v40  ;;  %v4876_v32 = vld [vmem:[%s6900_s1 + $0x128] sm:$0xff]  ;;  %v1769_v54 = vrot.slane %v1767_v7, 2  ;;  %v1603_v36 = vrot.slane %v5874_v12, 2  ;;  %v1462_v7 = vrot.slane %v5566_v35, 3 }
 0x192   : > { %2769 = vmatpush.bf16.msra.mxu2 %v4876_v32 }
 0x193   : > { %v1094_v17 = vadd.f32 %v1073_v5, %v969_v56  ;;  %4457 = vmatmul.msk.bf16.gmra.mxu0 %vm365_vm2, %v5879_v22  ;;  %4437 = vmatmul.msk.bf16.gmra.mxu3 %vm365_vm2, %v1328_v31  ;;  %v4874_v56 = vld [vmem:[%s6900_s1 + $0x118] sm:$0xff]  ;;  %v1773_v40 = vor.u32 %v1772_v26, %v1769_v54  ;;  %v1463_v54 = vsel %vm682_vm4, %v5860_v25, %v1462_v7  ;;  %v7072_v26 = vld [vmem:[#allocation22_spill] sm:$0xff] }
 0x194   : > { %v1220_v57 = vpop.f32.mrf.mxu2  ;;  %2668 = vmatpush.bf16.msra.mxu1 %v4874_v56 }
 0x195   : > { %v5901_v45 = vadd.f32 %v1220_v57, %v1094_v17  ;;  %v1774_v39 = vsel %vm1248_vm7, %v5843_v44, %v1773_v40 }
 0x196   : > { %v1075_v52 = vpop.f32.mrf.mxu1  ;;  %v1377_v5 = vpop.f32.mrf.mxu3 }
 0x197   : > { %v1422_v2 = vadd.f32 %v1377_v5, %v5587_v13  ;;  %v1604_v13 = vsel %vm1112_vm5, %v5841_v50, %v1603_v36 }
 0x198   : > { %v950_v9 = vpop.f32.mrf.mxu0 }
 0x199   : > { %v970_v31 = vadd.f32 %v950_v9, %v812_v58 }
 0x19b   : > { %v1095_v17 = vadd.f32 %v1075_v52, %v970_v31 }
 0x19c   : > { %v1222_v57 = vpop.f32.mrf.mxu2 }
 0x19d   : > { %v5909_v1 = vadd.f32 %v1222_v57, %v1095_v17 }
 0x19e   : > { %v1653_v32 = vpop.f32.mrf.mxu1  ;;  %v1379_v5 = vpop.f32.mrf.mxu3 }
 0x19f   : > { %v1423_v58 = vadd.f32 %v1379_v5, %v5604_v38 }
 0x1a0   : > { %v1512_v9 = vpop.f32.mrf.mxu0 }
 0x1a1   : > { %v1557_v52 = vadd.f32 %v1512_v9, %v1422_v2  ;;  %4479 = vmatmul.msk.bf16.gmra.mxu1 %vm365_vm2, %v1604_v13  ;;  %4500 = vmatmul.msk.bf16.gmra.mxu2 %vm365_vm2, %v1774_v39  ;;  %v2001_v13 = vrot.slane %v5341_v14, 1  ;;  %v7074_v14 = vld [vmem:[#allocation24_spill] sm:$0xff] }
 0x1a3   : > { %v1698_v35 = vadd.f32 %v1653_v32, %v1557_v52  ;;  %4458 = vmatmul.msk.bf16.gmra.mxu0 %vm365_vm2, %v1463_v54  ;;  %4513 = vmatmul.msk.bf16.vlgmr.msrb.gmra.mxu3 %vm365_vm2, %v7072_v26  ;;  %v2002_v32 = vrot.slane %v5362_v10, 1 }
 0x1a4   : > { %v1823_v36 = vpop.f32.mrf.mxu2 }
 0x1a5   : > { %v5923_v40 = vadd.f32 %v1823_v36, %v1698_v35  ;;  %v2003_v35 = vsel %vm546_vm1, %v2001_v13, %v2002_v32 }
 0x1a6   : > { %v1655_v56 = vpop.f32.mrf.mxu1  ;;  %v1382_v38 = vpop.f32.mrf.mxu3 }
 0x1a7   : > { %v1424_v31 = vadd.f32 %v1382_v38, %v5615_v29  ;;  %v7073_v29 = vld [vmem:[#allocation23_spill] sm:$0xff]  ;;  %v2145_v38 = vrot.slane %v5645_v8, 2 }
 0x1a8   : > { %v1514_v17 = vpop.f32.mrf.mxu0 }
 0x1a9   : > { %v1558_v57 = vadd.f32 %v1514_v17, %v1423_v58 }
 0x1ab   : > { %v1699_v2 = vadd.f32 %v1655_v56, %v1558_v57 }
 0x1ac   : > { %v1825_v7 = vpop.f32.mrf.mxu2 }
 0x1ad   : > { %v5928_v39 = vadd.f32 %v1825_v7, %v1699_v2 }
 0x1ae   : > { %v1658_v5 = vpop.f32.mrf.mxu1  ;;  %v1384_v9 = vpop.f32.mrf.mxu3 }
 0x1af   : > { %v1425_v54 = vadd.f32 %v1384_v9, %v5628_v30  ;;  %v2144_v30 = vrot.slane %v5642_v28, 1 }
 0x1b0   : > { %v1517_v52 = vpop.f32.mrf.mxu0 }
 0x1b1   : > { %v1559_v26 = vadd.f32 %v1517_v52, %v1424_v31  ;;  %4555 = vmatmul.msk.bf16.vlgmr.msrb.gmra.mxu1 %vm365_vm2, %v2143_v41  ;;  %4576 = vmatmul.msk.bf16.vlgmr.msrb.gmra.mxu2 %vm365_vm2, %v7073_v29  ;;  %v2146_v2 = vor.u32 %v2145_v38, %v2144_v30 }
 0x1b3   : > { %v1700_v58 = vadd.f32 %v1658_v5, %v1559_v26  ;;  %4534 = vmatmul.msk.bf16.vlgmr.msrb.gmra.mxu0 %vm365_vm2, %v2003_v35  ;;  %4514 = vmatmul.msk.bf16.gmra.mxu3 %vm365_vm2, %v7074_v14  ;;  %v2004_v5 = vrot.slane %v5391_v53, 1  ;;  %v2147_v35 = vsel %vm2136_vm8, %v5881_v47, %v2146_v2 }
 0x1b4   : > { %v1828_v10 = vpop.f32.mrf.mxu2 }
 0x1b5   : > { %v5938_v36 = vadd.f32 %v1828_v10, %v1700_v58  ;;  %v2005_v14 = vsel %vm546_vm1, %v2002_v32, %v2004_v5  ;;  %v2149_v32 = vrot.slane %v5674_v23, 2 }
 0x1b6   : > { %v1660_v56 = vpop.f32.mrf.mxu1  ;;  %v1387_v31 = vpop.f32.mrf.mxu3 }
 0x1b7   : > { %v1426_v41 = vadd.f32 %v1387_v31, %v5639_v37 }
 0x1b8   : > { %v1519_v17 = vpop.f32.mrf.mxu0 }
 0x1b9   : > { %v1560_v57 = vadd.f32 %v1519_v17, %v1425_v54  ;;  %v7075_v54 = vld [vmem:[#allocation25_spill] sm:$0xff] }
 0x1bb   : > { %v1701_v7 = vadd.f32 %v1660_v56, %v1560_v57  ;;  %v7076_v56 = vld [vmem:[#allocation26_spill] sm:$0xff] }
 0x1bc   : > { %v1830_v13 = vpop.f32.mrf.mxu2 }
 0x1bd   : > { %v5944_v9 = vadd.f32 %v1830_v13, %v1701_v7 }
 0x1be   : > { %v1663_v52 = vpop.f32.mrf.mxu1  ;;  %v1389_v26 = vpop.f32.mrf.mxu3 }
 0x1bf   : > { %v1427_v29 = vadd.f32 %v1389_v26, %v5654_v59  ;;  %v2148_v59 = vrot.slane %v5671_v48, 1 }
 0x1c0   : > { %v1522_v58 = vpop.f32.mrf.mxu0 }
 0x1c1   : > { %v1561_v37 = vadd.f32 %v1522_v58, %v1426_v41  ;;  %4556 = vmatmul.msk.bf16.gmra.mxu1 %vm365_vm2, %v2147_v35  ;;  %4577 = vmatmul.msk.bf16.gmra.mxu2 %vm365_vm2, %v7075_v54  ;;  %v2150_v7 = vor.u32 %v2149_v32, %v2148_v59  ;;  %v2006_v35 = vrot.slane %v5426_v60, 1  ;;  %v2152_v32 = vrot.slane %v5712_v42, 1 }
 0x1c3   : > { %v1702_v10 = vadd.f32 %v1663_v52, %v1561_v37  ;;  %4535 = vmatmul.msk.bf16.gmra.mxu0 %vm365_vm2, %v2005_v14  ;;  %4515 = vmatmul.msk.bf16.gmra.mxu3 %vm365_vm2, %v7076_v56  ;;  %v2151_v14 = vsel %vm2136_vm8, %v2146_v2, %v2150_v7  ;;  %v5967_v56 = vsel %vm546_vm1, %v2004_v5, %v2006_v35 }
 0x1c4   : > { %v1833_v30 = vpop.f32.mrf.mxu2 }
 0x1c5   : > { %v5956_v47 = vadd.f32 %v1833_v30, %v1702_v10 }
 0x1c6   : > { %v1665_v38 = vpop.f32.mrf.mxu1  ;;  %v1392_v31 = vpop.f32.mrf.mxu3 }
 0x1c7   : > { %v1428_v41 = vadd.f32 %v1392_v31, %v5668_v63  ;;  %v2153_v31 = vrot.slane %v5715_v4, 2 }
 0x1c8   : > { %v1524_v17 = vpop.f32.mrf.mxu0 }
 0x1c9   : > { %v1562_v57 = vadd.f32 %v1524_v17, %v1427_v29  ;;  %v7077_v29 = vld [vmem:[#allocation27_spill] sm:$0xff] }
 0x1cb   : > { %v1703_v13 = vadd.f32 %v1665_v38, %v1562_v57  ;;  %v7078_v38 = vld [vmem:[#allocation28_spill] sm:$0xff] }
 0x1cc   : > { %v1835_v52 = vpop.f32.mrf.mxu2 }
 0x1cd   : > { %v5962_v26 = vadd.f32 %v1835_v52, %v1703_v13  ;;  %v2154_v52 = vor.u32 %v2153_v31, %v2152_v32  ;;  %v4873_v32 = vld [vmem:[%s6900_s1 + $0x110] sm:$0xff] }
 0x1ce   : > { %v1668_v58 = vpop.f32.mrf.mxu1  ;;  %v1394_v37 = vpop.f32.mrf.mxu3  ;;  %2669 = vmatpush.bf16.msra.mxu1 %v4873_v32  ;;  %v2010_v32 = vrot.slane %v5478_v20, 1 }
 0x1cf   : > { %v1429_v54 = vadd.f32 %v1394_v37, %v5689_v16  ;;  %v4869_v16 = vld [vmem:[%s6900_s1 + $0xf0] sm:$0xff]  ;;  %v4871_v37 = vld [vmem:[%s6900_s1 + $0x100] sm:$0xff] }
 0x1d0   : > { %v1527_v10 = vpop.f32.mrf.mxu0  ;;  %2438 = vmatpush.bf16.msra.mxu3 %v4869_v16  ;;  %2558 = vmatpush.bf16.msra.mxu0 %v4871_v37 }
 0x1d1   : > { %v1563_v63 = vadd.f32 %v1527_v10, %v1428_v41  ;;  %4557 = vmatmul.msk.bf16.gmra.mxu1 %vm365_vm2, %v2151_v14  ;;  %4578 = vmatmul.msk.bf16.gmra.mxu2 %vm365_vm2, %v7077_v29  ;;  %v4875_v14 = vld [vmem:[%s6900_s1 + $0x120] sm:$0xff] }
 0x1d2   : > { %2770 = vmatpush.bf16.msra.mxu2 %v4875_v14 }
 0x1d3   : > { %v1704_v30 = vadd.f32 %v1668_v58, %v1563_v63  ;;  %4536 = vmatmul.msk.bf16.gmra.mxu0 %vm365_vm2, %v5967_v56  ;;  %4516 = vmatmul.msk.bf16.gmra.mxu3 %vm365_vm2, %v7078_v38  ;;  %v2008_v63 = vrot.slane %v5452_v34, 1 }
 0x1d4   : > { %v1838_v2 = vpop.f32.mrf.mxu2 }
 0x1d5   : > { %v5979_v5 = vadd.f32 %v1838_v2, %v1704_v30 }
 0x1d6   : > { %v1670_v59 = vpop.f32.mrf.mxu1  ;;  %v1397_v41 = vpop.f32.mrf.mxu3 }
 0x1d7   : > { %v1430_v17 = vadd.f32 %v1397_v41, %v5709_v21  ;;  %v7079_v41 = vld [vmem:[#allocation29_spill] sm:$0xff] }
 0x1d8   : > { %v1529_v57 = vpop.f32.mrf.mxu0 }
 0x1d9   : > { %v1564_v13 = vadd.f32 %v1529_v57, %v1429_v54  ;;  %v2155_v54 = vsel %vm2136_vm8, %v2150_v7, %v2154_v52 }
 0x1db   : > { %v1705_v58 = vadd.f32 %v1670_v59, %v1564_v13  ;;  %v5996_v59 = vsel %vm546_vm1, %v2006_v35, %v2008_v63 }
 0x1dc   : > { %v1840_v10 = vpop.f32.mrf.mxu2 }
 0x1dd   : > { %v5991_v29 = vadd.f32 %v1840_v10, %v1705_v58  ;;  %v2156_v58 = vrot.slane %v5747_v55, 1 }
 0x1de   : > { %v1673_v21 = vpop.f32.mrf.mxu1  ;;  %v1399_v30 = vpop.f32.mrf.mxu3 }
 0x1df   : > { %v1431_v2 = vadd.f32 %v1399_v30, %v5724_v61  ;;  %v7080_v61 = vld [vmem:[#allocation30_spill] sm:$0xff] }
 0x1e0   : > { %v1532_v16 = vpop.f32.mrf.mxu0 }
 0x1e1   : > { %v1565_v31 = vadd.f32 %v1532_v16, %v1430_v17  ;;  %4558 = vmatmul.msk.bf16.gmra.mxu1 %vm365_vm2, %v2155_v54  ;;  %4579 = vmatmul.msk.bf16.gmra.mxu2 %vm365_vm2, %v7079_v41  ;;  %v2157_v17 = vrot.slane %v5750_v15, 2 }
 0x1e3   : > { %v1706_v57 = vadd.f32 %v1673_v21, %v1565_v31  ;;  %4537 = vmatmul.msk.bf16.gmra.mxu0 %vm365_vm2, %v5996_v59  ;;  %4517 = vmatmul.msk.bf16.gmra.mxu3 %vm365_vm2, %v7080_v61  ;;  %v2158_v21 = vor.u32 %v2157_v17, %v2156_v58  ;;  %v6019_v61 = vsel %vm546_vm1, %v2008_v63, %v2010_v32  ;;  %v7082_v58 = vld [vmem:[#allocation35_spill] sm:$0xff]  ;;  %v2160_v63 = vrot.slane %v5788_v27, 1 }
 0x1e4   : > { %v1843_v7 = vpop.f32.mrf.mxu2 }
 0x1e5   : > { %v6008_v35 = vadd.f32 %v1843_v7, %v1706_v57  ;;  %v2159_v57 = vsel %vm2136_vm8, %v2154_v52, %v2158_v21 }
 0x1e6   : > { %v1675_v13 = vpop.f32.mrf.mxu1  ;;  %v1402_v14 = vpop.f32.mrf.mxu3 }
 0x1e7   : > { %v1432_v37 = vadd.f32 %v1402_v14, %v5744_v49 }
 0x1e8   : > { %v1534_v10 = vpop.f32.mrf.mxu0 }
 0x1e9   : > { %v1566_v54 = vadd.f32 %v1534_v10, %v1431_v2  ;;  %v7081_v2 = vld [vmem:[#allocation33_spill] sm:$0xff] }
 0x1eb   : > { %v1707_v30 = vadd.f32 %v1675_v13, %v1566_v54 }
 0x1ec   : > { %v1845_v16 = vpop.f32.mrf.mxu2 }
 0x1ed   : > { %v6014_v31 = vadd.f32 %v1845_v16, %v1707_v30 }
 0x1ee   : > { %v1678_v41 = vpop.f32.mrf.mxu1  ;;  %v1404_v7 = vpop.f32.mrf.mxu3 }
 0x1ef   : > { %v1433_v50 = vadd.f32 %v1404_v7, %v5759_v46 }
 0x1f0   : > { %v1537_v44 = vpop.f32.mrf.mxu0 }
 0x1f1   : > { %v1567_v49 = vadd.f32 %v1537_v44, %v1432_v37  ;;  %4559 = vmatmul.msk.bf16.gmra.mxu1 %vm365_vm2, %v2159_v57  ;;  %4580 = vmatmul.msk.bf16.gmra.mxu2 %vm365_vm2, %v7081_v2  ;;  %v2161_v44 = vrot.slane %v5791_v62, 2  ;;  %v2012_v57 = vrot.slane %v5521_v3, 1 }
 0x1f3   : > { %v1708_v13 = vadd.f32 %v1678_v41, %v1567_v49  ;;  %4538 = vmatmul.msk.bf16.gmra.mxu0 %vm365_vm2, %v6019_v61  ;;  %4518 = vmatmul.msk.bf16.gmra.mxu3 %vm365_vm2, %v7082_v58  ;;  %v2162_v30 = vor.u32 %v2161_v44, %v2160_v63  ;;  %v1891_v49 = vrot.slane %v5763_v0, 3  ;;  %v7084_v63 = vld [vmem:[#allocation32_spill] sm:$0xff] }
 0x1f4   : > { %v1848_v52 = vpop.f32.mrf.mxu2  ;;  %v7086_v44 = vld [vmem:[#allocation40_spill] sm:$0xff] }
 0x1f5   : > { %v6028_v17 = vadd.f32 %v1848_v52, %v1708_v13  ;;  %v2163_v13 = vsel %vm2136_vm8, %v2158_v21, %v2162_v30 }
 0x1f6   : > { %v1680_v46 = vpop.f32.mrf.mxu1  ;;  %v1407_v14 = vpop.f32.mrf.mxu3 }
 0x1f7   : > { %v1434_v37 = vadd.f32 %v1407_v14, %v5785_v19  ;;  %v6040_v19 = vsel %vm546_vm1, %v2010_v32, %v2012_v57  ;;  %v7087_v14 = vld [vmem:[#allocation38_spill] sm:$0xff] }
 0x1f8   : > { %v1539_v10 = vpop.f32.mrf.mxu0  ;;  %7083 = vst [vmem:[#allocation22_spill] sm:$0xff] %v6040_v19  ;;  %v6053_v21 = vshll.u32 %v7087_v14, 16 }
 0x1f9   : > { %v1568_v54 = vadd.f32 %v1539_v10, %v1433_v50  ;;  %v6050_v10 = vshrl.u32 %v7087_v14, 16 }
 0x1fa   : > { %7089 = vst [vmem:[#allocation25_spill] sm:$0xff] %v6053_v21 }
 0x1fb   : > { %v1709_v16 = vadd.f32 %v1680_v46, %v1568_v54  ;;  %v6044_v46 = vsel %vm682_vm4, %v7084_v63, %v1891_v49  ;;  %7088 = vst [vmem:[#allocation24_spill] sm:$0xff] %v6050_v10  ;;  %v2167_v54 = vrot.slane %v6050_v10, 1 }
 0x1fc   : > { %v1850_v41 = vpop.f32.mrf.mxu2  ;;  %7085 = vst [vmem:[#allocation23_spill] sm:$0xff] %v6044_v46 }
 0x1fd   : > { %v6034_v7 = vadd.f32 %v1850_v41, %v1709_v16  ;;  %v2170_v16 = vrot.slane %v6053_v21, 2 }
 0x1fe   : > { %v1683_v2 = vpop.f32.mrf.mxu1  ;;  %v1409_v52 = vpop.f32.mrf.mxu3 }
 0x1ff   : > { %v1435_v58 = vadd.f32 %v1409_v52, %v5805_v11 }
 0x200   : > { %v1542_v38 = vpop.f32.mrf.mxu0 }
 0x201   : > { %v1569_v50 = vadd.f32 %v1542_v38, %v1434_v37  ;;  %4560 = vmatmul.msk.bf16.gmra.mxu1 %vm365_vm2, %v2163_v13  ;;  %4581 = vmatmul.msk.bf16.gmra.mxu2 %vm365_vm2, %v7086_v44 }
 0x203   : > { %v1710_v11 = vadd.f32 %v1683_v2, %v1569_v50  ;;  %4539 = vmatmul.msk.bf16.gmra.mxu0 %vm365_vm2, %v6040_v19  ;;  %4519 = vmatmul.msk.bf16.gmra.mxu3 %vm365_vm2, %v6044_v46  ;;  %v2171_v2 = vor.u32 %v2170_v16, %v2167_v54  ;;  %v2307_v50 = vrot.slane %v7087_v14, 2  ;;  %v2014_v46 = vrot.slane %v7087_v14, 1 }
 0x204   : > { %v1853_v38 = vpop.f32.mrf.mxu2 }
 0x205   : > { %v6059_v32 = vadd.f32 %v1853_v38, %v1710_v11  ;;  %v6069_v11 = vrot.slane %v5809_v33, 3  ;;  %v6073_v38 = vpack.c.bf16 %v5848_v43, %v5802_v18 }
 0x206   : > { %v1685_v37 = vpop.f32.mrf.mxu1  ;;  %v1412_v41 = vpop.f32.mrf.mxu3 }
 0x207   : > { %v1436_v13 = vadd.f32 %v1412_v41, %v5831_v6  ;;  %7090 = vst [vmem:[#allocation26_spill] sm:$0xff] %v6069_v11  ;;  %v2172_v6 = vsel %vm2136_vm8, %v2162_v30, %v2171_v2  ;;  %v6089_v18 = vshrl.u32 %v6073_v38, 16 }
 0x208   : > { %v1544_v52 = vpop.f32.mrf.mxu0 }
 0x209   : > { %v1570_v63 = vadd.f32 %v1544_v52, %v1435_v58  ;;  %v2308_v58 = vsel %vm1112_vm5, %v5528_v24, %v2307_v50  ;;  %v6084_v52 = vsel %vm682_vm4, %v1891_v49, %v6069_v11  ;;  %7093 = vst [vmem:[#allocation33_spill] sm:$0xff] %v6089_v18  ;;  %v6092_v24 = vshll.u32 %v6073_v38, 16 }
 0x20a   : > { %7092 = vst [vmem:[#allocation29_spill] sm:$0xff] %v6084_v52 }
 0x20b   : > { %v1711_v44 = vadd.f32 %v1685_v37, %v1570_v63  ;;  %7094 = vst [vmem:[#allocation32_spill] sm:$0xff] %v6092_v24  ;;  %v2179_v63 = vrot.slane %v6092_v24, 2 }
 0x20c   : > { %v1855_v25 = vpop.f32.mrf.mxu2 }
 0x20d   : > { %v6066_v19 = vadd.f32 %v1855_v25, %v1711_v44  ;;  %v6080_v25 = vsel %vm546_vm1, %v2012_v57, %v2014_v46 }
 0x20e   : > { %v1688_v10 = vpop.f32.mrf.mxu1  ;;  %v1414_v54 = vpop.f32.mrf.mxu3  ;;  %7091 = vst [vmem:[#allocation27_spill] sm:$0xff] %v6080_v25 }
 0x20f   : > { %v1437_v37 = vadd.f32 %v1414_v54, %v5862_v51 }
 0x210   : > { %v1547_v16 = vpop.f32.mrf.mxu0 }
 0x211   : > { %v1571_v41 = vadd.f32 %v1547_v16, %v1436_v13  ;;  %4561 = vmatmul.msk.bf16.gmra.mxu1 %vm365_vm2, %v2172_v6  ;;  %4582 = vmatmul.msk.bf16.gmra.mxu2 %vm365_vm2, %v2308_v58  ;;  %v2176_v13 = vrot.slane %v6089_v18, 1  ;;  %v2309_v16 = vrot.slane %v6073_v38, 2 }
 0x213   : > { %v1712_v51 = vadd.f32 %v1688_v10, %v1571_v41  ;;  %4540 = vmatmul.msk.bf16.gmra.mxu0 %vm365_vm2, %v6080_v25  ;;  %4520 = vmatmul.msk.bf16.gmra.mxu3 %vm365_vm2, %v6084_v52  ;;  %v2180_v10 = vor.u32 %v2179_v63, %v2176_v13  ;;  %v6105_v25 = vld [vmem:[%s4967_s24 + $0xb8] sm:$0xff]  ;;  %v6111_v52 = vrot.slane %v6073_v38, 1 }
 0x214   : > { %v1858_v30 = vpop.f32.mrf.mxu2  ;;  %v1992_v63 = vpack.c.bf16 %v6105_v25, %v6105_v25 }
 0x215   : > { %v6098_v57 = vadd.f32 %v1858_v30, %v1712_v51  ;;  %v4878_v51 = vld [vmem:[%s6900_s1 + $0x138] sm:$0xff]  ;;  %v2181_v13 = vsel %vm2136_vm8, %v2171_v2, %v2180_v10  ;;  %v6123_v24 = vsel %vm546_vm1, %v2014_v46, %v6111_v52  ;;  %v4884_v46 = vld [vmem:[%s6900_s1 + $0x168] sm:$0xff] }
 0x216   : > { %v1690_v49 = vpop.f32.mrf.mxu1  ;;  %v1417_v44 = vpop.f32.mrf.mxu3  ;;  %2925 = vmatpush.bf16.msrb.mxu3 %v4878_v51  ;;  %7095 = vst [vmem:[#allocation40_spill] sm:$0xff] %v6123_v24  ;;  %v2183_v2 = vshrl.u32 %v1992_v63, 16  ;;  %3303 = vmatpush.bf16.msrb.mxu2 %v4884_v46 }
 0x217   : > { %v1438_v6 = vadd.f32 %v1417_v44, %v5901_v45  ;;  %v1895_v45 = vrot.slane %v5874_v12, 3 }
 0x218   : > { %v1549_v58 = vpop.f32.mrf.mxu0 }
 0x219   : > { %v1572_v54 = vadd.f32 %v1549_v58, %v1437_v37  ;;  %v1896_v12 = vsel %vm682_vm4, %v6069_v11, %v1895_v45 }
 0x21b   : > { %v1713_v41 = vadd.f32 %v1690_v49, %v1572_v54  ;;  %v2310_v49 = vsel %vm1112_vm5, %v2307_v50, %v2309_v16  ;;  %v2186_v50 = vshll.u32 %v1992_v63, 16 }
 0x21c   : > { %v1860_v30 = vpop.f32.mrf.mxu2 }
 0x21d   : > { %v6113_v18 = vadd.f32 %v1860_v30, %v1713_v41 }
 0x21e   : > { %v1693_v37 = vpop.f32.mrf.mxu1  ;;  %v1419_v44 = vpop.f32.mrf.mxu3 }
 0x21f   : > { %v1439_v58 = vadd.f32 %v1419_v44, %v5909_v1 }
 0x220   : > { %v1552_v54 = vpop.f32.mrf.mxu0 }
 0x221   : > { %v1573_v41 = vadd.f32 %v1552_v54, %v1438_v6  ;;  %4562 = vmatmul.msk.bf16.gmra.mxu1 %vm365_vm2, %v2181_v13  ;;  %4583 = vmatmul.msk.bf16.gmra.mxu2 %vm365_vm2, %v2310_v49  ;;  %v4880_v6 = vld [vmem:[%s6900_s1 + $0x148] sm:$0xff]  ;;  %v2185_v13 = vrot.slane %v2183_v2, 1  ;;  %v2188_v49 = vrot.slane %v2186_v50, 2 }
 0x222   : > { %3032 = vmatpush.bf16.msrb.mxu0 %v4880_v6 }
 0x223   : > { %v1714_v51 = vadd.f32 %v1693_v37, %v1573_v41  ;;  %4541 = vmatmul.msk.bf16.gmra.mxu0 %vm365_vm2, %v6123_v24  ;;  %4521 = vmatmul.msk.bf16.gmra.mxu3 %vm365_vm2, %v1896_v12  ;;  %v4882_v41 = vld [vmem:[%s6900_s1 + $0x158] sm:$0xff]  ;;  %v2189_v11 = vor.u32 %v2188_v49, %v2185_v13  ;;  %v2311_v24 = vrot.slane %v1992_v63, 2 }
 0x224   : > { %v1863_v1 = vpop.f32.mrf.mxu2  ;;  %3146 = vmatpush.bf16.msrb.mxu1 %v4882_v41 }
 0x225   : > { %v6138_v30 = vadd.f32 %v1863_v1, %v1714_v51  ;;  %v2018_v1 = vrot.slane %v1992_v63, 1  ;;  %v2190_v50 = vsel %vm2136_vm8, %v2180_v10, %v2189_v11  ;;  %v2312_v46 = vsel %vm1112_vm5, %v2309_v16, %v2311_v24 }
 0x226   : > { %v1695_v45 = vpop.f32.mrf.mxu1  ;;  %v1927_v37 = vpop.f32.mrf.mxu3 }
 0x227   : > { %v1972_v44 = vadd.f32 %v1927_v37, %v5923_v40 }
 0x228   : > { %v1554_v54 = vpop.f32.mrf.mxu0 }
 0x229   : > { %v1574_v12 = vadd.f32 %v1554_v54, %v1439_v58  ;;  %v2019_v58 = vsel %vm546_vm1, %v6111_v52, %v2018_v1 }
 0x22b   : > { %v1715_v22 = vadd.f32 %v1695_v45, %v1574_v12 }
 0x22c   : > { %v1865_v51 = vpop.f32.mrf.mxu2 }
 0x22d   : > { %v6144_v21 = vadd.f32 %v1865_v51, %v1715_v22  ;;  %v7096_v22 = vld [vmem:[#allocation8_spill] sm:$0xff] }
 0x22e   : > { %v2239_v2 = vpop.f32.mrf.mxu1  ;;  %v1929_v40 = vpop.f32.mrf.mxu3 }
 0x22f   : > { %v1973_v6 = vadd.f32 %v1929_v40, %v5928_v39 }
 0x230   : > { %v2068_v37 = vpop.f32.mrf.mxu0 }
 0x231   : > { %v2113_v13 = vadd.f32 %v2068_v37, %v1972_v44  ;;  %4563 = vmatmul.msk.bf16.gmra.mxu1 %vm365_vm2, %v2190_v50  ;;  %4584 = vmatmul.msk.bf16.gmra.mxu2 %vm365_vm2, %v2312_v46  ;;  %v7097_v46 = vld [vmem:[#allocation10_spill] sm:$0xff] }
 0x233   : > { %v2284_v63 = vadd.f32 %v2239_v2, %v2113_v13  ;;  %4542 = vmatmul.msk.bf16.gmra.mxu0 %vm365_vm2, %v2019_v58  ;;  %4597 = vmatmul.msk.bf16.vlgmr.msra.gmra.mxu3 %vm365_vm2, %v7096_v22 }
 0x234   : > { %v2343_v11 = vpop.f32.mrf.mxu2 }
 0x235   : > { %v6156_v24 = vadd.f32 %v2343_v11, %v2284_v63 }
 0x236   : > { %v2241_v10 = vpop.f32.mrf.mxu1  ;;  %v1932_v39 = vpop.f32.mrf.mxu3 }
 0x237   : > { %v1974_v16 = vadd.f32 %v1932_v39, %v5938_v36  ;;  %v7098_v36 = vld [vmem:[#allocation11_spill] sm:$0xff] }
 0x238   : > { %v2070_v45 = vpop.f32.mrf.mxu0 }
 0x239   : > { %v2114_v49 = vadd.f32 %v2070_v45, %v1973_v6  ;;  %v7099_v6 = vld [vmem:[#allocation9_spill] sm:$0xff] }
 0x23b   : > { %v2285_v44 = vadd.f32 %v2241_v10, %v2114_v49 }
 0x23c   : > { %v2345_v54 = vpop.f32.mrf.mxu2 }
 0x23d   : > { %v6159_v41 = vadd.f32 %v2345_v54, %v2285_v44 }
 0x23e   : > { %v2244_v12 = vpop.f32.mrf.mxu1  ;;  %v1934_v51 = vpop.f32.mrf.mxu3 }
 0x23f   : > { %v1975_v1 = vadd.f32 %v1934_v51, %v5944_v9 }
 0x240   : > { %v2073_v2 = vpop.f32.mrf.mxu0 }
 0x241   : > { %v2115_v50 = vadd.f32 %v2073_v2, %v1974_v16  ;;  %4639 = vmatmul.msk.bf16.vlgmr.msra.gmra.mxu1 %vm365_vm2, %v7097_v46  ;;  %4660 = vmatmul.msk.bf16.vlgmr.msra.gmra.mxu2 %vm365_vm2, %v5391_v53 }
 0x243   : > { %v2286_v40 = vadd.f32 %v2244_v12, %v2115_v50  ;;  %4618 = vmatmul.msk.bf16.vlgmr.msra.gmra.mxu0 %vm365_vm2, %v7098_v36  ;;  %4598 = vmatmul.msk.bf16.gmra.mxu3 %vm365_vm2, %v7099_v6  ;;  %v7100_v12 = vld [vmem:[#allocation14_spill] sm:$0xff] }
 0x244   : > { %v2348_v37 = vpop.f32.mrf.mxu2 }
 0x245   : > { %v6170_v58 = vadd.f32 %v2348_v37, %v2286_v40 }
 0x246   : > { %v2246_v13 = vpop.f32.mrf.mxu1  ;;  %v1937_v9 = vpop.f32.mrf.mxu3 }
 0x247   : > { %v1976_v63 = vadd.f32 %v1937_v9, %v5956_v47  ;;  %v7101_v47 = vld [vmem:[#allocation15_spill] sm:$0xff] }
 0x248   : > { %v2075_v22 = vpop.f32.mrf.mxu0 }
 0x249   : > { %v2116_v11 = vadd.f32 %v2075_v22, %v1975_v1  ;;  %v7102_v1 = vld [vmem:[#allocation12_spill] sm:$0xff] }
 0x24b   : > { %v2287_v10 = vadd.f32 %v2246_v13, %v2116_v11 }
 0x24c   : > { %v2350_v39 = vpop.f32.mrf.mxu2 }
 0x24d   : > { %v6173_v16 = vadd.f32 %v2350_v39, %v2287_v10  ;;  %v7103_v39 = vld [vmem:[#allocation18_spill] sm:$0xff] }
 0x24e   : > { %v2249_v53 = vpop.f32.mrf.mxu1  ;;  %v1939_v45 = vpop.f32.mrf.mxu3 }
 0x24f   : > { %v1977_v49 = vadd.f32 %v1939_v45, %v5962_v26  ;;  %v7105_v45 = vld [vmem:[#allocation17_spill] sm:$0xff] }
 0x250   : > { %v2078_v44 = vpop.f32.mrf.mxu0 }
 0x251   : > { %v2117_v54 = vadd.f32 %v2078_v44, %v1976_v63  ;;  %4640 = vmatmul.msk.bf16.gmra.mxu1 %vm365_vm2, %v7100_v12  ;;  %4661 = vmatmul.msk.bf16.gmra.mxu2 %vm365_vm2, %v5426_v60 }
 0x253   : > { %v2288_v51 = vadd.f32 %v2249_v53, %v2117_v54  ;;  %4619 = vmatmul.msk.bf16.gmra.mxu0 %vm365_vm2, %v7101_v47  ;;  %4599 = vmatmul.msk.bf16.gmra.mxu3 %vm365_vm2, %v7102_v1 }
 0x254   : > { %v2353_v2 = vpop.f32.mrf.mxu2 }
 0x255   : > { %v6184_v50 = vadd.f32 %v2353_v2, %v2288_v51 }
 0x256   : > { %v2251_v46 = vpop.f32.mrf.mxu1  ;;  %v1942_v26 = vpop.f32.mrf.mxu3 }
 0x257   : > { %v1978_v40 = vadd.f32 %v1942_v26, %v5979_v5  ;;  %v7104_v5 = vld [vmem:[#allocation19_spill] sm:$0xff]  ;;  %v4879_v26 = vld [vmem:[%s6900_s1 + $0x140] sm:$0xff] }
 0x258   : > { %v2080_v36 = vpop.f32.mrf.mxu0  ;;  %3033 = vmatpush.bf16.msrb.mxu0 %v4879_v26 }
 0x259   : > { %v2118_v6 = vadd.f32 %v2080_v36, %v1977_v49 }
 0x25b   : > { %v2289_v37 = vadd.f32 %v2251_v46, %v2118_v6  ;;  %v4883_v46 = vld [vmem:[%s6900_s1 + $0x160] sm:$0xff] }
 0x25c   : > { %v2355_v13 = vpop.f32.mrf.mxu2  ;;  %3304 = vmatpush.bf16.msrb.mxu2 %v4883_v46 }
 0x25d   : > { %v6187_v9 = vadd.f32 %v2355_v13, %v2289_v37 }
 0x25e   : > { %v2254_v60 = vpop.f32.mrf.mxu1  ;;  %v1944_v63 = vpop.f32.mrf.mxu3 }
 0x25f   : > { %v1979_v22 = vadd.f32 %v1944_v63, %v5991_v29  ;;  %v4877_v29 = vld [vmem:[%s6900_s1 + $0x130] sm:$0xff] }
 0x260   : > { %v2083_v11 = vpop.f32.mrf.mxu0  ;;  %2926 = vmatpush.bf16.msrb.mxu3 %v4877_v29 }
 0x261   : > { %v2119_v10 = vadd.f32 %v2083_v11, %v1978_v40  ;;  %4641 = vmatmul.msk.bf16.gmra.mxu1 %vm365_vm2, %v7103_v39  ;;  %4662 = vmatmul.msk.bf16.gmra.mxu2 %vm365_vm2, %v5452_v34  ;;  %v7108_v39 = vld [vmem:[#allocation2_spill] sm:$0xff] }
 0x263   : > { %v2290_v53 = vadd.f32 %v2254_v60, %v2119_v10  ;;  %4620 = vmatmul.msk.bf16.gmra.mxu0 %vm365_vm2, %v7104_v5  ;;  %4600 = vmatmul.msk.bf16.gmra.mxu3 %vm365_vm2, %v7105_v45  ;;  %v4881_v60 = vld [vmem:[%s6900_s1 + $0x150] sm:$0xff]  ;;  %v7107_v10 = vld [vmem:[#allocation21_spill] sm:$0xff] }
 0x264   : > { %v2358_v49 = vpop.f32.mrf.mxu2  ;;  %3147 = vmatpush.bf16.msrb.mxu1 %v4881_v60 }
 0x265   : > { %v6201_v44 = vadd.f32 %v2358_v49, %v2290_v53 }
 0x266   : > { %v2256_v54 = vpop.f32.mrf.mxu1  ;;  %v1947_v12 = vpop.f32.mrf.mxu3 }
 0x267   : > { %v1980_v51 = vadd.f32 %v1947_v12, %v6008_v35 }
 0x268   : > { %v2085_v34 = vpop.f32.mrf.mxu0 }
 0x269   : > { %v2120_v47 = vadd.f32 %v2085_v34, %v1979_v22  ;;  %v7106_v22 = vld [vmem:[#allocation20_spill] sm:$0xff] }
 0x26b   : > { %v2291_v2 = vadd.f32 %v2256_v54, %v2120_v47 }
 0x26c   : > { %v2360_v40 = vpop.f32.mrf.mxu2 }
 0x26d   : > { %v6210_v36 = vadd.f32 %v2360_v40, %v2291_v2 }
 0x26e   : > { %v2259_v6 = vpop.f32.mrf.mxu1  ;;  %v1949_v37 = vpop.f32.mrf.mxu3 }
 0x26f   : > { %v1981_v35 = vadd.f32 %v1949_v37, %v6014_v31 }
 0x270   : > { %v2088_v13 = vpop.f32.mrf.mxu0 }
 0x271   : > { %v2121_v63 = vadd.f32 %v2088_v13, %v1980_v51  ;;  %4642 = vmatmul.msk.bf16.gmra.mxu1 %vm365_vm2, %v7106_v22  ;;  %4663 = vmatmul.msk.bf16.gmra.mxu2 %vm365_vm2, %v5478_v20 }
 0x273   : > { %v2292_v11 = vadd.f32 %v2259_v6, %v2121_v63  ;;  %4621 = vmatmul.msk.bf16.gmra.mxu0 %vm365_vm2, %v7107_v10  ;;  %4601 = vmatmul.msk.bf16.gmra.mxu3 %vm365_vm2, %v7108_v39  ;;  %v7109_v6 = vld [vmem:[#allocation16_spill] sm:$0xff] }
 0x274   : > { %v2363_v31 = vpop.f32.mrf.mxu2 }
 0x275   : > { %v6224_v53 = vadd.f32 %v2363_v31, %v2292_v11  ;;  %v2630_v31 = vrot.slane %v5763_v0, 1 }
 0x276   : > { %v2261_v5 = vpop.f32.mrf.mxu1  ;;  %v1952_v49 = vpop.f32.mrf.mxu3 }
 0x277   : > { %v1982_v29 = vadd.f32 %v1952_v49, %v6028_v17  ;;  %v7110_v17 = vld [vmem:[#allocation5_spill] sm:$0xff]  ;;  %v7112_v49 = vshll.u32 %v5763_v0, 16 }
 0x278   : > { %v2090_v54 = vpop.f32.mrf.mxu0 }
 0x279   : > { %v2122_v12 = vadd.f32 %v2090_v54, %v1981_v35  ;;  %v7111_v35 = vld [vmem:[#allocation3_spill] sm:$0xff] }
 0x27b   : > { %v2293_v51 = vadd.f32 %v2261_v5, %v2122_v12 }
 0x27c   : > { %v2365_v34 = vpop.f32.mrf.mxu2 }
 0x27d   : > { %v6227_v20 = vadd.f32 %v2365_v34, %v2293_v51  ;;  %v7113_v51 = vld [vmem:[#allocation13_spill] sm:$0xff] }
 0x27e   : > { %v2264_v47 = vpop.f32.mrf.mxu1  ;;  %v1954_v2 = vpop.f32.mrf.mxu3  ;;  %v2631_v34 = vsel %vm546_vm1, %v7113_v51, %v2630_v31 }
 0x27f   : > { %v1983_v46 = vadd.f32 %v1954_v2, %v6034_v7 }
 0x280   : > { %v2093_v26 = vpop.f32.mrf.mxu0 }
 0x281   : > { %v2123_v40 = vadd.f32 %v2093_v26, %v1982_v29  ;;  %4643 = vmatmul.msk.bf16.gmra.mxu1 %vm365_vm2, %v7109_v6  ;;  %4664 = vmatmul.msk.bf16.gmra.mxu2 %vm365_vm2, %v5521_v3  ;;  %v2509_v29 = vrot.slane %v7112_v49, 1 }
 0x283   : > { %v2294_v37 = vadd.f32 %v2264_v47, %v2123_v40  ;;  %4622 = vmatmul.msk.bf16.gmra.mxu0 %vm365_vm2, %v7110_v17  ;;  %4602 = vmatmul.msk.bf16.gmra.mxu3 %vm365_vm2, %v7111_v35 }
 0x284   : > { %v2368_v13 = vpop.f32.mrf.mxu2 }
 0x285   : > { %v6238_v60 = vadd.f32 %v2368_v13, %v2294_v37 }
 0x286   : > { %v2266_v63 = vpop.f32.mrf.mxu1  ;;  %v1957_v7 = vpop.f32.mrf.mxu3 }
 0x287   : > { %v1984_v22 = vadd.f32 %v1957_v7, %v6059_v32  ;;  %v7114_v32 = vld [vmem:[#allocation7_spill] sm:$0xff] }
 0x288   : > { %v2095_v11 = vpop.f32.mrf.mxu0 }
 0x289   : > { %v2124_v10 = vadd.f32 %v2095_v11, %v1983_v46  ;;  %v2510_v46 = vsel %vm276_vm3, %v7114_v32, %v2509_v29  ;;  %v2632_v11 = vrot.slane %v5809_v33, 1 }
 0x28b   : > { %v2295_v5 = vadd.f32 %v2266_v63, %v2124_v10 }
 0x28c   : > { %v2370_v3 = vpop.f32.mrf.mxu2 }
 0x28d   : > { %v6244_v54 = vadd.f32 %v2370_v3, %v2295_v5  ;;  %v7115_v3 = vshrl.u32 %v5763_v0, 16 }
 0x28e   : > { %v2269_v12 = vpop.f32.mrf.mxu1  ;;  %v1959_v47 = vpop.f32.mrf.mxu3 }
 0x28f   : > { %v1985_v2 = vadd.f32 %v1959_v47, %v6066_v19  ;;  %v2511_v49 = vor.u32 %v2509_v29, %v7115_v3  ;;  %v4886_v3 = vld [vmem:[%s6900_s1 + $0x178] sm:$0xff] }
 0x290   : > { %v2098_v26 = vpop.f32.mrf.mxu0  ;;  %3400 = vmatpush.bf16.msra.mxu3 %v4886_v3 }
 0x291   : > { %v2125_v40 = vadd.f32 %v2098_v26, %v1984_v22  ;;  %4644 = vmatmul.msk.bf16.gmra.mxu1 %vm365_vm2, %v2631_v34  ;;  %4665 = vmatmul.msk.bf16.gmra.mxu2 %vm365_vm2, %v7087_v14  ;;  %v2633_v26 = vsel %vm546_vm1, %v2630_v31, %v2632_v11 }
 0x293   : > { %v2296_v6 = vadd.f32 %v2269_v12, %v2125_v40  ;;  %4623 = vmatmul.msk.bf16.gmra.mxu0 %vm365_vm2, %v2510_v46  ;;  %4603 = vmatmul.msk.bf16.gmra.mxu3 %vm365_vm2, %v5763_v0  ;;  %v7116_v12 = vshll.u32 %v5809_v33, 16 }
 0x294   : > { %v2373_v37 = vpop.f32.mrf.mxu2 }
 0x295   : > { %v6257_v17 = vadd.f32 %v2373_v37, %v2296_v6  ;;  %v2512_v51 = vrot.slane %v7116_v12, 1  ;;  %v6276_v6 = vpack.c.bf16 %v6105_v25, %v5848_v43  ;;  %v7117_v12 = vshrl.u32 %v5809_v33, 16 }
 0x296   : > { %v2271_v19 = vpop.f32.mrf.mxu1  ;;  %v1962_v13 = vpop.f32.mrf.mxu3 }
 0x297   : > { %v1986_v63 = vadd.f32 %v1962_v13, %v6098_v57 }
 0x298   : > { %v2100_v7 = vpop.f32.mrf.mxu0 }
 0x299   : > { %v2126_v22 = vadd.f32 %v2100_v7, %v1985_v2  ;;  %v2513_v2 = vsel %vm276_vm3, %v2511_v49, %v2512_v51  ;;  %v6992_v7 = vshll.u32 %v6276_v6, 16 }
 0x29b   : > { %v2297_v10 = vadd.f32 %v2271_v19, %v2126_v22 }
 0x29c   : > { %v2375_v5 = vpop.f32.mrf.mxu2 }
 0x29d   : > { %v6265_v34 = vadd.f32 %v2375_v5, %v2297_v10  ;;  %v2634_v10 = vrot.slane %v6276_v6, 1  ;;  %v6286_v5 = vld [vmem:[%s4967_s24 + $0xc0] sm:$0xff] }
 0x29e   : > { %v2274_v47 = vpop.f32.mrf.mxu1  ;;  %v1964_v32 = vpop.f32.mrf.mxu3 }
 0x29f   : > { %v1987_v57 = vadd.f32 %v1964_v32, %v6113_v18  ;;  %v6299_v32 = vpack.c.bf16 %v6286_v5, %v6105_v25 }
 0x2a0   : > { %v2103_v46 = vpop.f32.mrf.mxu0 }
 0x2a1   : > { %v2127_v40 = vadd.f32 %v2103_v46, %v1986_v63  ;;  %4645 = vmatmul.msk.bf16.gmra.mxu1 %vm365_vm2, %v2633_v26  ;;  %4666 = vmatmul.msk.bf16.gmra.mxu2 %vm365_vm2, %v6073_v38  ;;  %v2635_v46 = vsel %vm546_vm1, %v2632_v11, %v2634_v10  ;;  %v2503_v11 = vpack.c.bf16 %v6286_v5, %v6286_v5 }
 0x2a3   : > { %v2298_v29 = vadd.f32 %v2274_v47, %v2127_v40  ;;  %4624 = vmatmul.msk.bf16.gmra.mxu0 %vm365_vm2, %v2513_v2  ;;  %4604 = vmatmul.msk.bf16.gmra.mxu3 %vm365_vm2, %v5809_v33  ;;  %v2514_v47 = vor.u32 %v2512_v51, %v7117_v12  ;;  %v2523_v12 = vshll.u32 %v2503_v11, 16 }
 0x2a4   : > { %v2378_v18 = vpop.f32.mrf.mxu2 }
 0x2a5   : > { %v6280_v31 = vadd.f32 %v2378_v18, %v2298_v29 }
 0x2a6   : > { %v2276_v37 = vpop.f32.mrf.mxu1  ;;  %v1967_v19 = vpop.f32.mrf.mxu3 }
 0x2a7   : > { %v1988_v13 = vadd.f32 %v1967_v19, %v6138_v30  ;;  %v2517_v30 = vrot.slane %v6992_v7, 1  ;;  %v4888_v19 = vld [vmem:[%s6900_s1 + $0x188] sm:$0xff] }
 0x2a8   : > { %v2105_v63 = vpop.f32.mrf.mxu0  ;;  %3513 = vmatpush.bf16.msra.mxu0 %v4888_v19 }
 0x2a9   : > { %v2128_v22 = vadd.f32 %v2105_v63, %v1987_v57  ;;  %v2518_v18 = vsel %vm276_vm3, %v2514_v47, %v2517_v30  ;;  %v4890_v47 = vld [vmem:[%s6900_s1 + $0x198] sm:$0xff] }
 0x2aa   : > { %3643 = vmatpush.bf16.msra.mxu1 %v4890_v47 }
 0x2ab   : > { %v2299_v43 = vadd.f32 %v2276_v37, %v2128_v22 }
 0x2ac   : > { %v2380_v49 = vpop.f32.mrf.mxu2 }
 0x2ad   : > { %v6295_v26 = vadd.f32 %v2380_v49, %v2299_v43  ;;  %v6993_v49 = vshrl.u32 %v6276_v6, 16 }
 0x2ae   : > { %v2279_v57 = vpop.f32.mrf.mxu1  ;;  %v1969_v2 = vpop.f32.mrf.mxu3 }
 0x2af   : > { %v1989_v40 = vadd.f32 %v1969_v2, %v6144_v21  ;;  %v4892_v21 = vld [vmem:[%s6900_s1 + $0x1a8] sm:$0xff]  ;;  %v2636_v2 = vrot.slane %v2503_v11, 1  ;;  %v2843_v11 = vrot.slane %v5674_v23, 1 }
 0x2b0   : > { %v2108_v29 = vpop.f32.mrf.mxu0  ;;  %3752 = vmatpush.bf16.msra.mxu2 %v4892_v21 }
 0x2b1   : > { %v2129_v51 = vadd.f32 %v2108_v29, %v1988_v13  ;;  %4646 = vmatmul.msk.bf16.gmra.mxu1 %vm365_vm2, %v2635_v46  ;;  %4667 = vmatmul.msk.bf16.gmra.mxu2 %vm365_vm2, %v6299_v32  ;;  %v2841_v46 = vrot.slane %v5645_v8, 1  ;;  %v6327_v29 = vld [vmem:[%s4967_s24 + $0xc8] sm:$0xff] }
 0x2b3   : > { %v2300_v37 = vadd.f32 %v2279_v57, %v2129_v51  ;;  %4625 = vmatmul.msk.bf16.gmra.mxu0 %vm365_vm2, %v2518_v18  ;;  %4605 = vmatmul.msk.bf16.gmra.mxu3 %vm365_vm2, %v6276_v6  ;;  %v6330_v18 = vld [vmem:[%s4967_s24 + $0xd0] sm:$0xff] }
 0x2b4   : > { %v2383_v25 = vpop.f32.mrf.mxu2  ;;  %7118 = vst [vmem:[#allocation38_spill] sm:$0xff] %v6330_v18  ;;  %v6338_v19 = vpack.c.bf16 %v6330_v18, %v6327_v29 }
 0x2b5   : > { %v6318_v13 = vadd.f32 %v2383_v25, %v2300_v37  ;;  %v2525_v25 = vrot.slane %v2523_v12, 1 }
 0x2b6   : > { %v2281_v63 = vpop.f32.mrf.mxu1  ;;  %v2440_v22 = vpop.f32.mrf.mxu3 }
 0x2b7   : > { %v2485_v43 = vadd.f32 %v2440_v22, %v6156_v24  ;;  %v2521_v24 = vor.u32 %v6993_v49, %v2517_v30 }
 0x2b8   : > { %v2110_v3 = vpop.f32.mrf.mxu0 }
 0x2b9   : > { %v2130_v57 = vadd.f32 %v2110_v3, %v1989_v40  ;;  %v2842_v40 = vor.u32 %v2841_v46, %v5642_v28  ;;  %v2637_v3 = vsel %vm546_vm1, %v2634_v10, %v2636_v2  ;;  %v2526_v30 = vsel %vm276_vm3, %v2521_v24, %v2525_v25 }
 0x2ba   : > { %v3220_v24 = vrot.slane %v5671_v48, 3  ;;  %v3221_v25 = vrot.slane %v5674_v23, 4 }
 0x2bb   : > { %v2301_v51 = vadd.f32 %v2281_v63, %v2130_v57 }
 0x2bc   : > { %v2385_v37 = vpop.f32.mrf.mxu2 }
 0x2bd   : > { %v6334_v21 = vadd.f32 %v2385_v37, %v2301_v51  ;;  %v2844_v51 = vsel %vm276_vm3, %v2842_v40, %v2843_v11  ;;  %v3217_v37 = vrot.slane %v5642_v28, 3  ;;  %v2846_v28 = vrot.slane %v5715_v4, 1 }
 0x2be   : > { %v2671_v22 = vpop.f32.mrf.mxu1  ;;  %v2442_v47 = vpop.f32.mrf.mxu3 }
 0x2bf   : > { %v2486_v63 = vadd.f32 %v2442_v47, %v6159_v41 }
 0x2c0   : > { %v2560_v57 = vpop.f32.mrf.mxu0 }
 0x2c1   : > { %v2605_v12 = vadd.f32 %v2560_v57, %v2485_v43  ;;  %4647 = vmatmul.msk.bf16.gmra.mxu1 %vm365_vm2, %v2637_v3  ;;  %4668 = vmatmul.msk.bf16.gmra.mxu2 %vm365_vm2, %v6338_v19  ;;  %v3218_v43 = vrot.slane %v5645_v8, 4 }
 0x2c3   : > { %v2716_v46 = vadd.f32 %v2671_v22, %v2605_v12  ;;  %4626 = vmatmul.msk.bf16.gmra.mxu0 %vm365_vm2, %v2526_v30  ;;  %4681 = vmatmul.msk.bf16.vlgmr.msrb.gmra.mxu3 %vm365_vm2, %v2844_v51  ;;  %v3219_v57 = vor.u32 %v3218_v43, %v3217_v37  ;;  %v3222_v30 = vor.u32 %v3221_v25, %v3220_v24  ;;  %v7119_v37 = vld [vmem:[#allocation47_spill] sm:$0xff] }
 0x2c4   : > { %v2772_v10 = vpop.f32.mrf.mxu2 }
 0x2c5   : > { %v6351_v2 = vadd.f32 %v2772_v10, %v2716_v46  ;;  %v2845_v10 = vor.u32 %v2843_v11, %v5671_v48  ;;  %v3223_v7 = vsel %vm818_vm6, %v3219_v57, %v3222_v30  ;;  %v2849_v57 = vrot.slane %v5750_v15, 1 }
 0x2c6   : > { %v2673_v41 = vpop.f32.mrf.mxu1  ;;  %v2445_v3 = vpop.f32.mrf.mxu3 }
 0x2c7   : > { %v2487_v40 = vadd.f32 %v2445_v3, %v6170_v58 }
 0x2c8   : > { %v2562_v22 = vpop.f32.mrf.mxu0 }
 0x2c9   : > { %v2606_v47 = vadd.f32 %v2562_v22, %v2486_v63  ;;  %v2847_v63 = vsel %vm276_vm3, %v2845_v10, %v2846_v28 }
 0x2cb   : > { %v2717_v12 = vadd.f32 %v2673_v41, %v2606_v47 }
 0x2cc   : > { %v2774_v51 = vpop.f32.mrf.mxu2 }
 0x2cd   : > { %v6358_v46 = vadd.f32 %v2774_v51, %v2717_v12 }
 0x2ce   : > { %v2676_v8 = vpop.f32.mrf.mxu1  ;;  %v2447_v49 = vpop.f32.mrf.mxu3 }
 0x2cf   : > { %v2488_v23 = vadd.f32 %v2447_v49, %v6173_v16  ;;  %v3224_v16 = vrot.slane %v5712_v42, 3  ;;  %v3225_v49 = vrot.slane %v5715_v4, 4 }
 0x2d0   : > { %v2565_v18 = vpop.f32.mrf.mxu0 }
 0x2d1   : > { %v2607_v58 = vadd.f32 %v2565_v18, %v2487_v40  ;;  %4723 = vmatmul.msk.bf16.vlgmr.msrb.gmra.mxu1 %vm365_vm2, %v7119_v37  ;;  %4744 = vmatmul.msk.bf16.vlgmr.msrb.gmra.mxu2 %vm365_vm2, %v3223_v7  ;;  %v3226_v7 = vor.u32 %v3225_v49, %v3224_v16  ;;  %v3229_v37 = vrot.slane %v5750_v15, 4 }
 0x2d3   : > { %v2718_v41 = vadd.f32 %v2676_v8, %v2607_v58  ;;  %4702 = vmatmul.msk.bf16.vlgmr.msrb.gmra.mxu0 %vm365_vm2, %v5967_v56  ;;  %4682 = vmatmul.msk.bf16.gmra.mxu3 %vm365_vm2, %v2847_v63  ;;  %v2848_v56 = vor.u32 %v2846_v28, %v5712_v42  ;;  %v3227_v51 = vsel %vm818_vm6, %v3222_v30, %v3226_v7 }
 0x2d4   : > { %v2777_v48 = vpop.f32.mrf.mxu2 }
 0x2d5   : > { %v6371_v11 = vadd.f32 %v2777_v48, %v2718_v41 }
 0x2d6   : > { %v2678_v43 = vpop.f32.mrf.mxu1  ;;  %v2450_v18 = vpop.f32.mrf.mxu3 }
 0x2d7   : > { %v2489_v24 = vadd.f32 %v2450_v18, %v6184_v50  ;;  %v2850_v50 = vsel %vm276_vm3, %v2848_v56, %v2849_v57 }
 0x2d8   : > { %v2567_v25 = vpop.f32.mrf.mxu0 }
 0x2d9   : > { %v2608_v3 = vadd.f32 %v2567_v25, %v2488_v23  ;;  %v7120_v23 = vld [vmem:[#allocation42_spill] sm:$0xff] }
 0x2db   : > { %v2719_v40 = vadd.f32 %v2678_v43, %v2608_v3  ;;  %v2852_v3 = vrot.slane %v5791_v62, 1 }
 0x2dc   : > { %v2779_v22 = vpop.f32.mrf.mxu2 }
 0x2dd   : > { %v6376_v47 = vadd.f32 %v2779_v22, %v2719_v40 }
 0x2de   : > { %v2681_v12 = vpop.f32.mrf.mxu1  ;;  %v2452_v10 = vpop.f32.mrf.mxu3 }
 0x2df   : > { %v2490_v4 = vadd.f32 %v2452_v10, %v6187_v9  ;;  %v3228_v9 = vrot.slane %v5747_v55, 3  ;;  %v7121_v10 = vld [vmem:[#allocation37_spill] sm:$0xff] }
 0x2e0   : > { %v2570_v8 = vpop.f32.mrf.mxu0 }
 0x2e1   : > { %v2609_v58 = vadd.f32 %v2570_v8, %v2489_v24  ;;  %4724 = vmatmul.msk.bf16.gmra.mxu1 %vm365_vm2, %v7120_v23  ;;  %4745 = vmatmul.msk.bf16.gmra.mxu2 %vm365_vm2, %v3227_v51  ;;  %v3230_v49 = vor.u32 %v3229_v37, %v3228_v9  ;;  %v3232_v8 = vrot.slane %v5788_v27, 3  ;;  %v4891_v9 = vld [vmem:[%s6900_s1 + $0x1a0] sm:$0xff] }
 0x2e2   : > { %v4887_v37 = vld [vmem:[%s6900_s1 + $0x180] sm:$0xff]  ;;  %3753 = vmatpush.bf16.msra.mxu2 %v4891_v9  ;;  %v7126_v9 = vld [vmem:[#allocation32_spill] sm:$0xff] }
 0x2e3   : > { %v2720_v63 = vadd.f32 %v2681_v12, %v2609_v58  ;;  %4703 = vmatmul.msk.bf16.gmra.mxu0 %vm365_vm2, %v5996_v59  ;;  %4683 = vmatmul.msk.bf16.gmra.mxu3 %vm365_vm2, %v2850_v50  ;;  %v2851_v59 = vor.u32 %v2849_v57, %v5747_v55  ;;  %v3231_v22 = vsel %vm818_vm6, %v3226_v7, %v3230_v49  ;;  %v3233_v58 = vrot.slane %v5791_v62, 4 }
 0x2e4   : > { %v2782_v42 = vpop.f32.mrf.mxu2  ;;  %v2854_v62 = vor.u32 %v2852_v3, %v5788_v27  ;;  %3514 = vmatpush.bf16.msra.mxu0 %v4887_v37  ;;  %v2858_v37 = vrot.slane %v7126_v9, 1 }
 0x2e5   : > { %v6389_v30 = vadd.f32 %v2782_v42, %v2720_v63  ;;  %v3234_v42 = vor.u32 %v3233_v58, %v3232_v8  ;;  %v3103_v58 = vrot.slane %v7087_v14, 3 }
 0x2e6   : > { %v2683_v28 = vpop.f32.mrf.mxu1  ;;  %v2455_v41 = vpop.f32.mrf.mxu3 }
 0x2e7   : > { %v2491_v48 = vadd.f32 %v2455_v41, %v6201_v44  ;;  %v2853_v44 = vsel %vm276_vm3, %v2851_v59, %v2852_v3  ;;  %v7124_v3 = vld [vmem:[#allocation22_spill] sm:$0xff] }
 0x2e8   : > { %v2572_v43 = vpop.f32.mrf.mxu0 }
 0x2e9   : > { %v2610_v16 = vadd.f32 %v2572_v43, %v2490_v4  ;;  %v7122_v43 = vld [vmem:[#allocation25_spill] sm:$0xff] }
 0x2eb   : > { %v2721_v18 = vadd.f32 %v2683_v28, %v2610_v16  ;;  %v2855_v16 = vrot.slane %v7122_v43, 1 }
 0x2ec   : > { %v2784_v24 = vpop.f32.mrf.mxu2 }
 0x2ed   : > { %v6394_v25 = vadd.f32 %v2784_v24, %v2721_v18  ;;  %v3235_v18 = vsel %vm818_vm6, %v3230_v49, %v3234_v42 }
 0x2ee   : > { %v2686_v40 = vpop.f32.mrf.mxu1  ;;  %v2457_v56 = vpop.f32.mrf.mxu3 }
 0x2ef   : > { %v2492_v15 = vadd.f32 %v2457_v56, %v6210_v36  ;;  %v4885_v36 = vld [vmem:[%s6900_s1 + $0x170] sm:$0xff] }
 0x2f0   : > { %v2575_v12 = vpop.f32.mrf.mxu0  ;;  %3401 = vmatpush.bf16.msra.mxu3 %v4885_v36 }
 0x2f1   : > { %v2611_v51 = vadd.f32 %v2575_v12, %v2491_v48  ;;  %4725 = vmatmul.msk.bf16.gmra.mxu1 %vm365_vm2, %v7121_v10  ;;  %4746 = vmatmul.msk.bf16.gmra.mxu2 %vm365_vm2, %v3231_v22  ;;  %v4889_v22 = vld [vmem:[%s6900_s1 + $0x190] sm:$0xff]  ;;  %v7123_v12 = vld [vmem:[#allocation41_spill] sm:$0xff] }
 0x2f2   : > { %3644 = vmatpush.bf16.msra.mxu1 %v4889_v22 }
 0x2f3   : > { %v2722_v4 = vadd.f32 %v2686_v40, %v2611_v51  ;;  %4704 = vmatmul.msk.bf16.gmra.mxu0 %vm365_vm2, %v6019_v61  ;;  %4684 = vmatmul.msk.bf16.gmra.mxu3 %vm365_vm2, %v2853_v44  ;;  %v7125_v44 = vld [vmem:[#allocation24_spill] sm:$0xff] }
 0x2f4   : > { %v2787_v55 = vpop.f32.mrf.mxu2  ;;  %v3236_v10 = vrot.slane %v7125_v44, 3 }
 0x2f5   : > { %v6410_v7 = vadd.f32 %v2787_v55, %v2722_v4  ;;  %v3237_v4 = vrot.slane %v7122_v43, 4 }
 0x2f6   : > { %v2688_v57 = vpop.f32.mrf.mxu1  ;;  %v2460_v50 = vpop.f32.mrf.mxu3 }
 0x2f7   : > { %v2493_v23 = vadd.f32 %v2460_v50, %v6224_v53  ;;  %v3238_v50 = vor.u32 %v3237_v4, %v3236_v10  ;;  %v3105_v10 = vrot.slane %v6073_v38, 3 }
 0x2f8   : > { %v2577_v63 = vpop.f32.mrf.mxu0 }
 0x2f9   : > { %v2612_v61 = vadd.f32 %v2577_v63, %v2492_v15  ;;  %v2856_v15 = vsel %vm276_vm3, %v2854_v62, %v2855_v16  ;;  %v7127_v62 = vld [vmem:[#allocation48_spill] sm:$0xff] }
 0x2fa   : > { %v3104_v43 = vsel %vm682_vm4, %v7127_v62, %v3103_v58 }
 0x2fb   : > { %v2723_v28 = vadd.f32 %v2688_v57, %v2612_v61 }
 0x2fc   : > { %v2789_v41 = vpop.f32.mrf.mxu2 }
 0x2fd   : > { %v6421_v48 = vadd.f32 %v2789_v41, %v2723_v28  ;;  %v2857_v28 = vor.u32 %v2855_v16, %v7125_v44  ;;  %v2861_v44 = vshll.u32 %v6299_v32, 16 }
 0x2fe   : > { %v2691_v53 = vpop.f32.mrf.mxu1  ;;  %v2462_v24 = vpop.f32.mrf.mxu3 }
 0x2ff   : > { %v2494_v59 = vadd.f32 %v2462_v24, %v6227_v20 }
 0x300   : > { %v2580_v40 = vpop.f32.mrf.mxu0 }
 0x301   : > { %v2613_v56 = vadd.f32 %v2580_v40, %v2493_v23  ;;  %4726 = vmatmul.msk.bf16.gmra.mxu1 %vm365_vm2, %v7123_v12  ;;  %4747 = vmatmul.msk.bf16.gmra.mxu2 %vm365_vm2, %v3235_v18  ;;  %v7128_v40 = vld [vmem:[#allocation27_spill] sm:$0xff]  ;;  %v3241_v12 = vrot.slane %v7126_v9, 4 }
 0x303   : > { %v2724_v27 = vadd.f32 %v2691_v53, %v2613_v56  ;;  %4705 = vmatmul.msk.bf16.gmra.mxu0 %vm365_vm2, %v7124_v3  ;;  %4685 = vmatmul.msk.bf16.gmra.mxu3 %vm365_vm2, %v2856_v15  ;;  %v3239_v53 = vsel %vm818_vm6, %v3234_v42, %v3238_v50  ;;  %v7129_v15 = vld [vmem:[#allocation33_spill] sm:$0xff] }
 0x304   : > { %v2792_v20 = vpop.f32.mrf.mxu2 }
 0x305   : > { %v6437_v49 = vadd.f32 %v2792_v20, %v2724_v27 }
 0x306   : > { %v2693_v51 = vpop.f32.mrf.mxu1  ;;  %v2465_v55 = vpop.f32.mrf.mxu3 }
 0x307   : > { %v2495_v36 = vadd.f32 %v2465_v55, %v6238_v60 }
 0x308   : > { %v2582_v57 = vpop.f32.mrf.mxu0 }
 0x309   : > { %v2614_v8 = vadd.f32 %v2582_v57, %v2494_v59  ;;  %v2859_v59 = vsel %vm276_vm3, %v2857_v28, %v2858_v37  ;;  %v3106_v28 = vsel %vm682_vm4, %v3103_v58, %v3105_v10 }
 0x30b   : > { %v2725_v23 = vadd.f32 %v2693_v51, %v2614_v8  ;;  %v2860_v8 = vor.u32 %v2858_v37, %v7129_v15 }
 0x30c   : > { %v2794_v63 = vpop.f32.mrf.mxu2 }
 0x30d   : > { %v6443_v61 = vadd.f32 %v2794_v63, %v2725_v23  ;;  %v2863_v23 = vrot.slane %v2861_v44, 1 }
 0x30e   : > { %v2696_v41 = vpop.f32.mrf.mxu1  ;;  %v2467_v60 = vpop.f32.mrf.mxu3 }
 0x30f   : > { %v2496_v18 = vadd.f32 %v2467_v60, %v6244_v54  ;;  %v3240_v54 = vrot.slane %v7129_v15, 3  ;;  %v2864_v38 = vsel %vm276_vm3, %v2860_v8, %v2863_v23  ;;  %v7130_v60 = vld [vmem:[#allocation40_spill] sm:$0xff] }
 0x310   : > { %v2585_v24 = vpop.f32.mrf.mxu0 }
 0x311   : > { %v2615_v14 = vadd.f32 %v2585_v24, %v2495_v36  ;;  %4727 = vmatmul.msk.bf16.gmra.mxu1 %vm365_vm2, %v3104_v43  ;;  %4748 = vmatmul.msk.bf16.gmra.mxu2 %vm365_vm2, %v3239_v53  ;;  %v3242_v4 = vor.u32 %v3241_v12, %v3240_v54  ;;  %v2865_v53 = vshrl.u32 %v6299_v32, 16  ;;  %v3245_v24 = vrot.slane %v2861_v44, 4 }
 0x313   : > { %v2726_v16 = vadd.f32 %v2696_v41, %v2615_v14  ;;  %4706 = vmatmul.msk.bf16.gmra.mxu0 %vm365_vm2, %v7128_v40  ;;  %4686 = vmatmul.msk.bf16.gmra.mxu3 %vm365_vm2, %v2859_v59  ;;  %v3243_v9 = vsel %vm818_vm6, %v3238_v50, %v3242_v4 }
 0x314   : > { %v2797_v22 = vpop.f32.mrf.mxu2 }
 0x315   : > { %v6457_v56 = vadd.f32 %v2797_v22, %v2726_v16  ;;  %v2868_v22 = vshll.u32 %v6338_v19, 16 }
 0x316   : > { %v2698_v42 = vpop.f32.mrf.mxu1  ;;  %v2470_v27 = vpop.f32.mrf.mxu3 }
 0x317   : > { %v2497_v3 = vadd.f32 %v2470_v27, %v6257_v17  ;;  %v2999_v27 = vrot.slane %v6299_v32, 1 }
 0x318   : > { %v2587_v20 = vpop.f32.mrf.mxu0 }
 0x319   : > { %v2616_v51 = vadd.f32 %v2587_v20, %v2496_v18  ;;  %v3244_v18 = vrot.slane %v2865_v53, 3  ;;  %v2867_v20 = vor.u32 %v2865_v53, %v2863_v23 }
 0x31b   : > { %v2727_v55 = vadd.f32 %v2698_v42, %v2616_v51  ;;  %v3107_v42 = vrot.slane %v6299_v32, 3  ;;  %v3246_v15 = vor.u32 %v3245_v24, %v3244_v18  ;;  %v2870_v51 = vrot.slane %v2868_v22, 1  ;;  %v6494_v32 = vld [vmem:[%s4967_s24 + $0xd8] sm:$0xff] }
 0x31c   : > { %v2799_v36 = vpop.f32.mrf.mxu2 }
 0x31d   : > { %v6464_v57 = vadd.f32 %v2799_v36, %v2727_v55  ;;  %v3108_v55 = vsel %vm682_vm4, %v3105_v10, %v3107_v42  ;;  %v2872_v10 = vshrl.u32 %v6338_v19, 16 }
 0x31e   : > { %v2701_v63 = vpop.f32.mrf.mxu1  ;;  %v2472_v17 = vpop.f32.mrf.mxu3 }
 0x31f   : > { %v2498_v41 = vadd.f32 %v2472_v17, %v6265_v34  ;;  %v2871_v17 = vsel %vm276_vm3, %v2867_v20, %v2870_v51 }
 0x320   : > { %v2590_v62 = vpop.f32.mrf.mxu0 }
 0x321   : > { %v2617_v43 = vadd.f32 %v2590_v62, %v2497_v3  ;;  %4728 = vmatmul.msk.bf16.gmra.mxu1 %vm365_vm2, %v3106_v28  ;;  %4749 = vmatmul.msk.bf16.gmra.mxu2 %vm365_vm2, %v3243_v9  ;;  %v3000_v28 = vsel %vm546_vm1, %v6111_v52, %v2999_v27  ;;  %v2835_v52 = vpack.c.bf16 %v6494_v32, %v6494_v32  ;;  %v3248_v62 = vrot.slane %v2872_v10, 3 }
 0x323   : > { %v2728_v37 = vadd.f32 %v2701_v63, %v2617_v43  ;;  %4707 = vmatmul.msk.bf16.gmra.mxu0 %vm365_vm2, %v7130_v60  ;;  %4687 = vmatmul.msk.bf16.gmra.mxu3 %vm365_vm2, %v2864_v38  ;;  %v3249_v43 = vrot.slane %v2868_v22, 4 }
 0x324   : > { %v2802_v58 = vpop.f32.mrf.mxu2 }
 0x325   : > { %v6477_v50 = vadd.f32 %v2802_v58, %v2728_v37  ;;  %v2876_v58 = vshll.u32 %v2835_v52, 16  ;;  %v3250_v18 = vor.u32 %v3249_v43, %v3248_v62  ;;  %v3818_v62 = vld [vmem:[%s6901_s2 + $0x28] sm:$0xff] }
 0x326   : > { %v2703_v34 = vpop.f32.mrf.mxu1  ;;  %v2475_v14 = vpop.f32.mrf.mxu3 }
 0x327   : > { %v2499_v59 = vadd.f32 %v2475_v14, %v6280_v31  ;;  %v3247_v31 = vsel %vm818_vm6, %v3242_v4, %v3246_v15  ;;  %v3251_v20 = vsel %vm818_vm6, %v3246_v15, %v3250_v18 }
 0x328   : > { %v2592_v16 = vpop.f32.mrf.mxu0 }
 0x329   : > { %v2618_v40 = vadd.f32 %v2592_v16, %v2498_v41 }
 0x32b   : > { %v2729_v54 = vadd.f32 %v2703_v34, %v2618_v40  ;;  %v3109_v34 = vrot.slane %v6338_v19, 3  ;;  %v2874_v40 = vor.u32 %v2872_v10, %v2870_v51 }
 0x32c   : > { %v2804_v12 = vpop.f32.mrf.mxu2 }
 0x32d   : > { %v6483_v3 = vadd.f32 %v2804_v12, %v2729_v54  ;;  %v2878_v54 = vrot.slane %v2876_v58, 1  ;;  %v3110_v22 = vsel %vm682_vm4, %v3107_v42, %v3109_v34 }
 0x32e   : > { %v2706_v44 = vpop.f32.mrf.mxu1  ;;  %v2477_v36 = vpop.f32.mrf.mxu3 }
 0x32f   : > { %v2500_v8 = vadd.f32 %v2477_v36, %v6295_v26 }
 0x330   : > { %v2595_v63 = vpop.f32.mrf.mxu0 }
 0x331   : > { %v2619_v9 = vadd.f32 %v2595_v63, %v2499_v59  ;;  %4729 = vmatmul.msk.bf16.gmra.mxu1 %vm365_vm2, %v3108_v55  ;;  %4750 = vmatmul.msk.bf16.gmra.mxu2 %vm365_vm2, %v3247_v31  ;;  %v3001_v59 = vrot.slane %v6338_v19, 1  ;;  %v3252_v19 = vshrl.u32 %v2835_v52, 16 }
 0x333   : > { %v2730_v23 = vadd.f32 %v2706_v44, %v2619_v9  ;;  %4708 = vmatmul.msk.bf16.gmra.mxu0 %vm365_vm2, %v3000_v28  ;;  %4688 = vmatmul.msk.bf16.gmra.mxu3 %vm365_vm2, %v2871_v17  ;;  %v3002_v31 = vsel %vm546_vm1, %v2999_v27, %v3001_v59  ;;  %v3254_v63 = vrot.slane %v3252_v19, 3  ;;  %v3255_v28 = vrot.slane %v2876_v58, 4 }
 0x334   : > { %v2807_v26 = vpop.f32.mrf.mxu2 }
 0x335   : > { %v6499_v4 = vadd.f32 %v2807_v26, %v2730_v23  ;;  %v3111_v23 = vrot.slane %v2835_v52, 3  ;;  %v3256_v26 = vor.u32 %v3255_v28, %v3254_v63  ;;  %v7131_v63 = vld [vmem:[#allocation44_spill] sm:$0xff]  ;;  %v3821_v28 = vld [vmem:[%s6901_s2 + $0x40] sm:$0xff] }
 0x336   : > { %v2708_v41 = vpop.f32.mrf.mxu1  ;;  %v2480_v38 = vpop.f32.mrf.mxu3 }
 0x337   : > { %v2501_v53 = vadd.f32 %v2480_v38, %v6318_v13  ;;  %v3257_v58 = vsel %vm818_vm6, %v3250_v18, %v3256_v26 }
 0x338   : > { %v2597_v37 = vpop.f32.mrf.mxu0 }
 0x339   : > { %v2620_v60 = vadd.f32 %v2597_v37, %v2500_v8  ;;  %v2879_v8 = vsel %vm276_vm3, %v2874_v40, %v2878_v54 }
 0x33b   : > { %v2731_v24 = vadd.f32 %v2708_v41, %v2620_v60  ;;  %v4924_v41 = vmov 0  }
 0x33c   : > { %v2809_v14 = vpop.f32.mrf.mxu2  ;;  %4911 = vset.pattern.permute.xlu0 %v4924_v41  ;;  %4912 = vset.pattern.permute.xlu1 %v4924_v41 }
 0x33d   : > { %v6506_v16 = vadd.f32 %v2809_v14, %v2731_v24  ;;  %3839 = vperm.xlu0 %4911, %v3818_v62   ;;  %4913 = vset.pattern.permute.xlu2 %v4924_v41 }
 0x33e   : > { %v2711_v12 = vpop.f32.mrf.mxu1  ;;  %v2482_v13 = vpop.f32.mrf.mxu3 }
 0x33f   : > { %v2502_v44 = vadd.f32 %v2482_v13, %v6334_v21 }
 0x340   : > { %v2600_v55 = vpop.f32.mrf.mxu0 }
 0x341   : > { %v2621_v36 = vadd.f32 %v2600_v55, %v2501_v53  ;;  %4730 = vmatmul.msk.bf16.gmra.mxu1 %vm365_vm2, %v3110_v22  ;;  %4751 = vmatmul.msk.bf16.gmra.mxu2 %vm365_vm2, %v3251_v20  ;;  %v3003_v53 = vrot.slane %v2835_v52, 1  ;;  %v3819_v52 = vld [vmem:[%s6901_s2 + $0x30] sm:$0xff]  ;;  %v3820_v55 = vld [vmem:[%s6901_s2 + $0x38] sm:$0xff] }
 0x342   : > { %3847 = vperm.xlu1 %4912, %v3820_v55  }
 0x343   : > { %v2732_v51 = vadd.f32 %v2711_v12, %v2621_v36  ;;  %4709 = vmatmul.msk.bf16.gmra.mxu0 %vm365_vm2, %v3002_v31  ;;  %4689 = vmatmul.msk.bf16.gmra.mxu3 %vm365_vm2, %v2879_v8  ;;  %v3004_v54 = vsel %vm546_vm1, %v3001_v59, %v3003_v53 }
 0x344   : > { %v2812_v42 = vpop.f32.mrf.mxu2 }
 0x345   : > { %v6517_v15 = vadd.f32 %v2812_v42, %v2732_v51  ;;  %3843 = vperm.xlu0 %4911, %v3819_v52  }
 0x346   : > { %v2713_v21 = vpop.f32.mrf.mxu1  ;;  %v2928_v27 = vpop.f32.mrf.mxu3 }
 0x347   : > { %v2973_v9 = vadd.f32 %v2928_v27, %v6351_v2  ;;  %v3112_v2 = vsel %vm682_vm4, %v3109_v34, %v3111_v23 }
 0x348   : > { %v2602_v17 = vpop.f32.mrf.mxu0 }
 0x349   : > { %v2622_v10 = vadd.f32 %v2602_v17, %v2502_v44 }
 0x34a   : > { %3851 = vperm.xlu1 %4912, %v3821_v28  }
 0x34b   : > { %v2733_v43 = vadd.f32 %v2713_v21, %v2622_v10 }
 0x34c   : > { %v2814_v38 = vpop.f32.mrf.mxu2 }
 0x34d   : > { %v6523_v37 = vadd.f32 %v2814_v38, %v2733_v43 }
 0x34e   : > { %v3149_v60 = vpop.f32.mrf.mxu1  ;;  %v2930_v24 = vpop.f32.mrf.mxu3 }
 0x34f   : > { %v2974_v14 = vadd.f32 %v2930_v24, %v6358_v46 }
 0x350   : > { %v3035_v40 = vpop.f32.mrf.mxu0 }
 0x351   : > { %v3080_v12 = vadd.f32 %v3035_v40, %v2973_v9  ;;  %4731 = vmatmul.msk.bf16.gmra.mxu1 %vm365_vm2, %v3112_v2  ;;  %4752 = vmatmul.msk.bf16.gmra.mxu2 %vm365_vm2, %v3257_v58  ;;  %v7133_v9 = vld [vmem:[#allocation43_spill] sm:$0xff]  ;;  %v7135_v40 = vld [vmem:[#allocation30_spill] sm:$0xff] }
 0x353   : > { %v3194_v22 = vadd.f32 %v3149_v60, %v3080_v12  ;;  %4710 = vmatmul.msk.bf16.gmra.mxu0 %vm365_vm2, %v3004_v54  ;;  %4765 = vmatmul.msk.bf16.vlgmr.msra.gmra.mxu3 %vm365_vm2, %v7102_v1 }
 0x354   : > { %v3306_v46 = vpop.f32.mrf.mxu2 }
 0x355   : > { %v6537_v34 = vadd.f32 %v3306_v46, %v3194_v22 }
 0x356   : > { %v3151_v18 = vpop.f32.mrf.mxu1  ;;  %v2933_v59 = vpop.f32.mrf.mxu3 }
 0x357   : > { %v2975_v20 = vadd.f32 %v2933_v59, %v6371_v11  ;;  %v7132_v11 = vld [vmem:[#allocation28_spill] sm:$0xff] }
 0x358   : > { %v3037_v13 = vpop.f32.mrf.mxu0 }
 0x359   : > { %v3081_v44 = vadd.f32 %v3037_v13, %v2974_v14 }
 0x35b   : > { %v3195_v31 = vadd.f32 %v3151_v18, %v3081_v44 }
 0x35c   : > { %v3308_v36 = vpop.f32.mrf.mxu2 }
 0x35d   : > { %v6543_v8 = vadd.f32 %v3308_v36, %v3195_v31 }
 0x35e   : > { %v3154_v19 = vpop.f32.mrf.mxu1  ;;  %v2935_v1 = vpop.f32.mrf.mxu3 }
 0x35f   : > { %v2976_v51 = vadd.f32 %v2935_v1, %v6376_v47 }
 0x360   : > { %v3040_v42 = vpop.f32.mrf.mxu0 }
 0x361   : > { %v3082_v21 = vadd.f32 %v3040_v42, %v2975_v20  ;;  %4807 = vmatmul.msk.bf16.vlgmr.msra.gmra.mxu1 %vm365_vm2, %v7131_v63  ;;  %4828 = vmatmul.msk.bf16.vlgmr.msra.gmra.mxu2 %vm365_vm2, %v7132_v11  ;;  %v3824_v20 = vld [vmem:[%s6901_s2 + $0x58] sm:$0xff]  ;;  %v3822_v42 = vld [vmem:[%s6901_s2 + $0x48] sm:$0xff]  ;;  %v7139_v11 = vld [vmem:[#allocation6_spill] sm:$0xff] }
 0x362   : > { %3863 = vperm.xlu0 %4911, %v3824_v20   ;;  %3855 = vperm.xlu2 %4913, %v3822_v42  }
 0x363   : > { %v3196_v27 = vadd.f32 %v3154_v19, %v3082_v21  ;;  %4786 = vmatmul.msk.bf16.vlgmr.msra.gmra.mxu0 %vm365_vm2, %v7133_v9  ;;  %4766 = vmatmul.msk.bf16.gmra.mxu3 %vm365_vm2, %v7105_v45  ;;  %v7134_v45 = vld [vmem:[#allocation46_spill] sm:$0xff] }
 0x364   : > { %v3311_v47 = vpop.f32.mrf.mxu2  ;;  %v3825_v21 = vld [vmem:[%s6901_s2 + $0x60] sm:$0xff] }
 0x365   : > { %v6557_v17 = vadd.f32 %v3311_v47, %v3196_v27  ;;  %3867 = vperm.xlu1 %4912, %v3825_v21   ;;  %v7145_v21 = vld [vmem:[#allocation49_spill] sm:$0xff] }
 0x366   : > { %v3156_v10 = vpop.f32.mrf.mxu1  ;;  %v2938_v23 = vpop.f32.mrf.mxu3 }
 0x367   : > { %v2977_v26 = vadd.f32 %v2938_v23, %v6389_v30  ;;  %v7136_v30 = vld [vmem:[#allocation45_spill] sm:$0xff] }
 0x368   : > { %v3042_v41 = vpop.f32.mrf.mxu0 }
 0x369   : > { %v3083_v62 = vadd.f32 %v3042_v41, %v2976_v51  ;;  %v7137_v51 = vld [vmem:[#allocation4_spill] sm:$0xff] }
 0x36b   : > { %v3197_v43 = vadd.f32 %v3156_v10, %v3083_v62 }
 0x36c   : > { %v3313_v38 = vpop.f32.mrf.mxu2 }
 0x36d   : > { %v6560_v53 = vadd.f32 %v3313_v38, %v3197_v43 }
 0x36e   : > { %v3159_v60 = vpop.f32.mrf.mxu1  ;;  %v2940_v2 = vpop.f32.mrf.mxu3 }
 0x36f   : > { %v2978_v58 = vadd.f32 %v2940_v2, %v6394_v25 }
 0x370   : > { %v3045_v24 = vpop.f32.mrf.mxu0 }
 0x371   : > { %v3084_v14 = vadd.f32 %v3045_v24, %v2977_v26  ;;  %4808 = vmatmul.msk.bf16.gmra.mxu1 %vm365_vm2, %v7134_v45  ;;  %4829 = vmatmul.msk.bf16.gmra.mxu2 %vm365_vm2, %v7135_v40  ;;  %v3823_v26 = vld [vmem:[%s6901_s2 + $0x50] sm:$0xff]  ;;  %v7140_v24 = vld [vmem:[#allocation31_spill] sm:$0xff] }
 0x372   : > { %3859 = vperm.xlu2 %4913, %v3823_v26   ;;  %v7142_v40 = vld [vmem:[#allocation36_spill] sm:$0xff] }
 0x373   : > { %v3198_v54 = vadd.f32 %v3159_v60, %v3084_v14  ;;  %4787 = vmatmul.msk.bf16.gmra.mxu0 %vm365_vm2, %v7136_v30  ;;  %4767 = vmatmul.msk.bf16.gmra.mxu3 %vm365_vm2, %v7108_v39  ;;  %v3827_v14 = vld [vmem:[%s6901_s2 + $0x70] sm:$0xff] }
 0x374   : > { %v3316_v12 = vpop.f32.mrf.mxu2  ;;  %3875 = vperm.xlu0 %4911, %v3827_v14   ;;  %v7148_v14 = vld [vmem:[#allocation39_spill] sm:$0xff] }
 0x375   : > { %v6571_v52 = vadd.f32 %v3316_v12, %v3198_v54 }
 0x376   : > { %v3161_v22 = vpop.f32.mrf.mxu1  ;;  %v2943_v25 = vpop.f32.mrf.mxu3 }
 0x377   : > { %v2979_v46 = vadd.f32 %v2943_v25, %v6410_v7  ;;  %v7138_v7 = vld [vmem:[#allocation35_spill] sm:$0xff] }
 0x378   : > { %v3047_v18 = vpop.f32.mrf.mxu0 }
 0x379   : > { %v3085_v59 = vadd.f32 %v3047_v18, %v2978_v58  ;;  %v3828_v18 = vld [vmem:[%s6901_s2 + $0x78] sm:$0xff] }
 0x37a   : > { %3879 = vperm.xlu1 %4912, %v3828_v18  }
 0x37b   : > { %v3199_v13 = vadd.f32 %v3161_v22, %v3085_v59  ;;  %v3830_v59 = vld [vmem:[%s6901_s2 + $0x88] sm:$0xff] }
 0x37c   : > { %v3318_v44 = vpop.f32.mrf.mxu2  ;;  %3887 = vperm.xlu0 %4911, %v3830_v59  }
 0x37d   : > { %v6577_v55 = vadd.f32 %v3318_v44, %v3199_v13 }
 0x37e   : > { %v3164_v31 = vpop.f32.mrf.mxu1  ;;  %v2945_v39 = vpop.f32.mrf.mxu3 }
 0x37f   : > { %v2980_v36 = vadd.f32 %v2945_v39, %v6421_v48 }
 0x380   : > { %v3050_v19 = vpop.f32.mrf.mxu0 }
 0x381   : > { %v3086_v1 = vadd.f32 %v3050_v19, %v2979_v46  ;;  %4809 = vmatmul.msk.bf16.gmra.mxu1 %vm365_vm2, %v7137_v51  ;;  %4830 = vmatmul.msk.bf16.gmra.mxu2 %vm365_vm2, %v7138_v7  ;;  %v7143_v19 = vld [vmem:[#allocation50_spill] sm:$0xff]  ;;  %v3826_v51 = vld [vmem:[%s6901_s2 + $0x68] sm:$0xff]  ;;  %v3831_v7 = vld [vmem:[%s6901_s2 + $0x90] sm:$0xff] }
 0x382   : > { %3871 = vperm.xlu2 %4913, %v3826_v51   ;;  %3891 = vperm.xlu1 %4912, %v3831_v7  }
 0x383   : > { %v3200_v63 = vadd.f32 %v3164_v31, %v3086_v1  ;;  %4788 = vmatmul.msk.bf16.gmra.mxu0 %vm365_vm2, %v7139_v11  ;;  %4768 = vmatmul.msk.bf16.gmra.mxu3 %vm365_vm2, %v7111_v35  ;;  %v7144_v1 = vld [vmem:[#allocation29_spill] sm:$0xff] }
 0x384   : > { %v3321_v48 = vpop.f32.mrf.mxu2 }
 0x385   : > { %v6594_v28 = vadd.f32 %v3321_v48, %v3200_v63 }
 0x386   : > { %v3166_v27 = vpop.f32.mrf.mxu1  ;;  %v2948_v9 = vpop.f32.mrf.mxu3 }
 0x387   : > { %v2981_v47 = vadd.f32 %v2948_v9, %v6437_v49  ;;  %v7141_v49 = vld [vmem:[#allocation23_spill] sm:$0xff] }
 0x388   : > { %v3052_v10 = vpop.f32.mrf.mxu0 }
 0x389   : > { %v3087_v23 = vadd.f32 %v3052_v10, %v2980_v36 }
 0x38b   : > { %v3201_v41 = vadd.f32 %v3166_v27, %v3087_v23  ;;  %v7146_v27 = vshrl.u32 %v6276_v6, 16 }
 0x38c   : > { %v3323_v62 = vpop.f32.mrf.mxu2 }
 0x38d   : > { %v6600_v43 = vadd.f32 %v3323_v62, %v3201_v41  ;;  %v3584_v9 = vrot.slane %v7146_v27, 2 }
 0x38e   : > { %v3169_v35 = vpop.f32.mrf.mxu1  ;;  %v2950_v38 = vpop.f32.mrf.mxu3 }
 0x38f   : > { %v2982_v60 = vadd.f32 %v2950_v38, %v6443_v61  ;;  %v3834_v38 = vld [vmem:[%s6901_s2 + $0xa8] sm:$0xff] }
 0x390   : > { %v3055_v2 = vpop.f32.mrf.mxu0  ;;  %3903 = vperm.xlu1 %4912, %v3834_v38  }
 0x391   : > { %v3088_v58 = vadd.f32 %v3055_v2, %v2981_v47  ;;  %4810 = vmatmul.msk.bf16.gmra.mxu1 %vm365_vm2, %v7140_v24  ;;  %4831 = vmatmul.msk.bf16.gmra.mxu2 %vm365_vm2, %v7141_v49  ;;  %v7147_v47 = vshll.u32 %v6276_v6, 16  ;;  %v3475_v24 = vrot.slane %v6276_v6, 2 }
 0x393   : > { %v3202_v45 = vadd.f32 %v3169_v35, %v3088_v58  ;;  %4789 = vmatmul.msk.bf16.gmra.mxu0 %vm365_vm2, %v7142_v40  ;;  %4769 = vmatmul.msk.bf16.gmra.mxu3 %vm365_vm2, %v5763_v0  ;;  %v3585_v10 = vrot.slane %v7147_v47, 3  ;;  %v7149_v40 = vld [vmem:[#allocation26_spill] sm:$0xff] }
 0x394   : > { %v3326_v61 = vpop.f32.mrf.mxu2  ;;  %v7151_v47 = vld [vmem:[#allocation38_spill] sm:$0xff] }
 0x395   : > { %v6614_v54 = vadd.f32 %v3326_v61, %v3202_v45  ;;  %v3586_v35 = vor.u32 %v3585_v10, %v3584_v9  ;;  %v6695_v10 = vpack.c.bf16 %v6494_v32, %v7151_v47  ;;  %v3835_v32 = vld [vmem:[%s6901_s2 + $0xb0] sm:$0xff] }
 0x396   : > { %v3171_v30 = vpop.f32.mrf.mxu1  ;;  %v2953_v12 = vpop.f32.mrf.mxu3 }
 0x397   : > { %v2983_v22 = vadd.f32 %v2953_v12, %v6457_v56  ;;  %v3587_v45 = vsel %vm1248_vm7, %v7148_v14, %v3586_v35 }
 0x398   : > { %v3057_v25 = vpop.f32.mrf.mxu0 }
 0x399   : > { %v3089_v46 = vadd.f32 %v3057_v25, %v2982_v60  ;;  %v3836_v60 = vld [vmem:[%s6901_s2 + $0xb8] sm:$0xff] }
 0x39b   : > { %v3203_v20 = vadd.f32 %v3171_v30, %v3089_v46  ;;  %v6666_v30 = vpack.c.bf16 %v6327_v29, %v6286_v5  ;;  %v7150_v46 = vld [vmem:[#allocation34_spill] sm:$0xff] }
 0x39c   : > { %v3328_v0 = vpop.f32.mrf.mxu2  ;;  %v3476_v18 = vsel %vm1112_vm5, %v7150_v46, %v3475_v24  ;;  %v3829_v5 = vld [vmem:[%s6901_s2 + $0x80] sm:$0xff] }
 0x39d   : > { %v6623_v13 = vadd.f32 %v3328_v0, %v3203_v20  ;;  %v3588_v20 = vshrl.u32 %v6666_v30, 16  ;;  %v3591_v0 = vshll.u32 %v6666_v30, 16  ;;  %3883 = vperm.xlu2 %4913, %v3829_v5   ;;  %v256_v46 = vld [vmem:[%s4967_s24 + $0xe0] sm:$0x3f] }
 0x39e   : > { %v3174_v44 = vpop.f32.mrf.mxu1  ;;  %v2955_v31 = vpop.f32.mrf.mxu3 }
 0x39f   : > { %v2984_v56 = vadd.f32 %v2955_v31, %v6464_v57  ;;  %v3833_v57 = vld [vmem:[%s6901_s2 + $0xa0] sm:$0xff] }
 0x3a0   : > { %v3060_v39 = vpop.f32.mrf.mxu0  ;;  %3899 = vperm.xlu0 %4911, %v3833_v57   ;;  %v3716_v57 = vrot.slane %v6666_v30, 3 }
 0x3a1   : > { %v3090_v36 = vadd.f32 %v3060_v39, %v2983_v22  ;;  %4811 = vmatmul.msk.bf16.gmra.mxu1 %vm365_vm2, %v7143_v19  ;;  %4832 = vmatmul.msk.bf16.gmra.mxu2 %vm365_vm2, %v7144_v1  ;;  %v3593_v39 = vrot.slane %v3591_v0, 3 }
 0x3a3   : > { %v3204_v42 = vadd.f32 %v3174_v44, %v3090_v36  ;;  %4790 = vmatmul.msk.bf16.gmra.mxu0 %vm365_vm2, %v7145_v21  ;;  %4770 = vmatmul.msk.bf16.gmra.mxu3 %vm365_vm2, %v5809_v33  ;;  %v3714_v33 = vrot.slane %v6276_v6, 3 }
 0x3a4   : > { %v3331_v63 = vpop.f32.mrf.mxu2 }
 0x3a5   : > { %v6643_v11 = vadd.f32 %v3331_v63, %v3204_v42  ;;  %v3715_v61 = vsel %vm682_vm4, %v7149_v40, %v3714_v33  ;;  %v3832_v42 = vld [vmem:[%s6901_s2 + $0x98] sm:$0xff]  ;;  %v3477_v63 = vrot.slane %v6666_v30, 2 }
 0x3a6   : > { %v3176_v48 = vpop.f32.mrf.mxu1  ;;  %v2958_v23 = vpop.f32.mrf.mxu3  ;;  %3895 = vperm.xlu2 %4913, %v3832_v42  }
 0x3a7   : > { %v2985_v26 = vadd.f32 %v2958_v23, %v6477_v50 }
 0x3a8   : > { %v3062_v41 = vpop.f32.mrf.mxu0  ;;  %3911 = vperm.xlu0 %4911, %v3836_v60   ;;  %v3596_v60 = vshrl.u32 %v6695_v10, 16 }
 0x3a9   : > { %v3091_v62 = vadd.f32 %v3062_v41, %v2984_v56  ;;  %v3590_v56 = vrot.slane %v3588_v20, 2 }
 0x3ab   : > { %v3205_v2 = vadd.f32 %v3176_v48, %v3091_v62  ;;  %v3594_v7 = vor.u32 %v3593_v39, %v3590_v56  ;;  %v3478_v62 = vsel %vm1112_vm5, %v3475_v24, %v3477_v63  ;;  %v3598_v24 = vrot.slane %v3596_v60, 2 }
 0x3ac   : > { %v3333_v58 = vpop.f32.mrf.mxu2 }
 0x3ad   : > { %v6658_v49 = vadd.f32 %v3333_v58, %v3205_v2  ;;  %v3595_v9 = vsel %vm1248_vm7, %v3586_v35, %v3594_v7  ;;  %v3599_v35 = vshll.u32 %v6695_v10, 16 }
 0x3ae   : > { %v3179_v50 = vpop.f32.mrf.mxu1  ;;  %v2960_v12 = vpop.f32.mrf.mxu3  ;;  %3907 = vperm.xlu2 %4913, %v3835_v32  }
 0x3af   : > { %v2986_v22 = vadd.f32 %v2960_v12, %v6483_v3 }
 0x3b0   : > { %v3065_v25 = vpop.f32.mrf.mxu0 }
 0x3b1   : > { %v3092_v59 = vadd.f32 %v3065_v25, %v2985_v26  ;;  %4812 = vmatmul.msk.bf16.gmra.mxu1 %vm365_vm2, %v3587_v45  ;;  %4833 = vmatmul.msk.bf16.gmra.mxu2 %vm365_vm2, %v3715_v61 }
 0x3b3   : > { %v3206_v29 = vadd.f32 %v3179_v50, %v3092_v59  ;;  %4791 = vmatmul.msk.bf16.gmra.mxu0 %vm365_vm2, %v3476_v18  ;;  %4771 = vmatmul.msk.bf16.gmra.mxu3 %vm365_vm2, %v6276_v6  ;;  %v3601_v50 = vrot.slane %v3599_v35, 3  ;;  %v3479_v59 = vrot.slane %v6695_v10, 2 }
 0x3b4   : > { %v3336_v3 = vpop.f32.mrf.mxu2 }
 0x3b5   : > { %v6681_v44 = vadd.f32 %v3336_v3, %v3206_v29  ;;  %v3602_v12 = vor.u32 %v3601_v50, %v3598_v24  ;;  %v3466_v29 = vpack.c.bf16 %v256_v46, %v256_v46  ;;  %v3480_v56 = vsel %vm1112_vm5, %v3477_v63, %v3479_v59  ;;  %v3848_v50 = vpop.permute.xlu1 %3847 }
 0x3b6   : > { %v3181_v31 = vpop.f32.mrf.mxu1  ;;  %v2963_v36 = vpop.f32.mrf.mxu3 }
 0x3b7   : > { %v2987_v19 = vadd.f32 %v2963_v36, %v6499_v4  ;;  %v3717_v4 = vsel %vm682_vm4, %v3714_v33, %v3716_v57  ;;  %v3603_v0 = vsel %vm1248_vm7, %v3594_v7, %v3602_v12  ;;  %v3605_v36 = vshrl.u32 %v3466_v29, 16 }
 0x3b8   : > { %v3067_v1 = vpop.f32.mrf.mxu0 }
 0x3b9   : > { %v3093_v51 = vadd.f32 %v3067_v1, %v2986_v22  ;;  %v3718_v22 = vrot.slane %v6695_v10, 3 }
 0x3bb   : > { %v3207_v21 = vadd.f32 %v3181_v31, %v3093_v51  ;;  %v3719_v5 = vsel %vm682_vm4, %v3716_v57, %v3718_v22  ;;  %v3607_v57 = vrot.slane %v3605_v36, 2 }
 0x3bc   : > { %v3338_v6 = vpop.f32.mrf.mxu2 }
 0x3bd   : > { %v6689_v48 = vadd.f32 %v3338_v6, %v3207_v21  ;;  %v3840_v6 = vpop.permute.xlu0 %3839 }
 0x3be   : > { %v3184_v27 = vpop.f32.mrf.mxu1  ;;  %v2965_v23 = vpop.f32.mrf.mxu3 }
 0x3bf   : > { %v2988_v26 = vadd.f32 %v2965_v23, %v6506_v16 }
 0x3c0   : > { %v3070_v41 = vpop.f32.mrf.mxu0 }
 0x3c1   : > { %v3094_v38 = vadd.f32 %v3070_v41, %v2987_v19  ;;  %4813 = vmatmul.msk.bf16.gmra.mxu1 %vm365_vm2, %v3595_v9  ;;  %4834 = vmatmul.msk.bf16.gmra.mxu2 %vm365_vm2, %v3717_v4  ;;  %v3608_v19 = vshll.u32 %v3466_v29, 16  ;;  %v3720_v4 = vrot.slane %v3466_v29, 3 }
 0x3c3   : > { %v3208_v33 = vadd.f32 %v3184_v27, %v3094_v38  ;;  %4792 = vmatmul.msk.bf16.gmra.mxu0 %vm365_vm2, %v3478_v62  ;;  %4772 = vmatmul.msk.bf16.gmra.mxu3 %vm365_vm2, %v6666_v30  ;;  %v3610_v42 = vrot.slane %v3608_v19, 3  ;;  %v3721_v38 = vsel %vm682_vm4, %v3718_v22, %v3720_v4 }
 0x3c4   : > { %v3341_v16 = vpop.f32.mrf.mxu2 }
 0x3c5   : > { %v6709_v2 = vadd.f32 %v3341_v16, %v3208_v33  ;;  %v3611_v9 = vor.u32 %v3610_v42, %v3607_v57 }
 0x3c6   : > { %v3186_v58 = vpop.f32.mrf.mxu1  ;;  %v2968_v14 = vpop.f32.mrf.mxu3 }
 0x3c7   : > { %v2989_v45 = vadd.f32 %v2968_v14, %v6517_v15  ;;  %v3914_v14 = vrot.slane %v3840_v6, 3 }
 0x3c8   : > { %v3072_v40 = vpop.f32.mrf.mxu0 }
 0x3c9   : > { %v3095_v61 = vadd.f32 %v3072_v40, %v2988_v26  ;;  %v3481_v26 = vrot.slane %v3466_v29, 2 }
 0x3cb   : > { %v3209_v25 = vadd.f32 %v3186_v58, %v3095_v61  ;;  %v3482_v33 = vsel %vm1112_vm5, %v3479_v59, %v3481_v26  ;;  %v3844_v58 = vpop.permute.xlu0 %3843  ;;  %v3917_v59 = vrot.slane %v3848_v50, 3 }
 0x3cc   : > { %v3343_v18 = vpop.f32.mrf.mxu2 }
 0x3cd   : > { %v6715_v30 = vadd.f32 %v3343_v18, %v3209_v25 }
 0x3ce   : > { %v3189_v20 = vpop.f32.mrf.mxu1  ;;  %v2970_v3 = vpop.f32.mrf.mxu3 }
 0x3cf   : > { %v2990_v15 = vadd.f32 %v2970_v3, %v6523_v37 }
 0x3d0   : > { %v3075_v31 = vpop.f32.mrf.mxu0 }
 0x3d1   : > { %v3096_v39 = vadd.f32 %v3075_v31, %v2989_v45  ;;  %4814 = vmatmul.msk.bf16.gmra.mxu1 %vm365_vm2, %v3603_v0  ;;  %4835 = vmatmul.msk.bf16.gmra.mxu2 %vm365_vm2, %v3719_v5  ;;  %v3915_v45 = vrot.slane %v3844_v58, 3 }
 0x3d3   : > { %v3210_v1 = vadd.f32 %v3189_v20, %v3096_v39  ;;  %4793 = vmatmul.msk.bf16.gmra.mxu0 %vm365_vm2, %v3480_v56  ;;  %4773 = vmatmul.msk.bf16.gmra.mxu3 %vm365_vm2, %v6695_v10  ;;  %v3612_v10 = vsel %vm1248_vm7, %v3602_v12, %v3611_v9  ;;  %v3916_v46 = vsel %vm682_vm4, %v3914_v14, %v3915_v45  ;;  %v3852_v56 = vpop.permute.xlu1 %3851 }
 0x3d4   : > { %v3346_v51 = vpop.f32.mrf.mxu2  ;;  %v3919_v42 = vrot.slane %v3852_v56, 3 }
 0x3d5   : > { %v6726_v7 = vadd.f32 %v3346_v51, %v3210_v1 }
 0x3d6   : > { %v3191_v37 = vpop.f32.mrf.mxu1  ;;  %v3403_v21 = vpop.f32.mrf.mxu3 }
 0x3d7   : > { %v3448_v60 = vadd.f32 %v3403_v21, %v6537_v34 }
 0x3d8   : > { %v3077_v63 = vpop.f32.mrf.mxu0 }
 0x3d9   : > { %v3097_v27 = vadd.f32 %v3077_v63, %v2990_v15  ;;  %v3918_v15 = vsel %vm682_vm4, %v3915_v45, %v3917_v59 }
 0x3db   : > { %v3211_v47 = vadd.f32 %v3191_v37, %v3097_v27 }
 0x3dc   : > { %v3348_v23 = vpop.f32.mrf.mxu2 }
 0x3dd   : > { %v6728_v41 = vadd.f32 %v3348_v23, %v3211_v47  ;;  %v3856_v23 = vpop.permute.xlu2 %3855 }
 0x3de   : > { %v3646_v62 = vpop.f32.mrf.mxu1  ;;  %v3405_v35 = vpop.f32.mrf.mxu3 }
 0x3df   : > { %v3449_v12 = vadd.f32 %v3405_v35, %v6543_v8 }
 0x3e0   : > { %v3516_v32 = vpop.f32.mrf.mxu0 }
 0x3e1   : > { %v3561_v16 = vadd.f32 %v3516_v32, %v3448_v60  ;;  %4815 = vmatmul.msk.bf16.gmra.mxu1 %vm365_vm2, %v3612_v10  ;;  %4836 = vmatmul.msk.bf16.gmra.mxu2 %vm365_vm2, %v3721_v38  ;;  %v3920_v10 = vsel %vm682_vm4, %v3917_v59, %v3919_v42 }
 0x3e3   : > { %v3691_v24 = vadd.f32 %v3646_v62, %v3561_v16  ;;  %4794 = vmatmul.msk.bf16.gmra.mxu0 %vm365_vm2, %v3482_v33 }
 0x3e4   : > { %v3755_v40 = vpop.f32.mrf.mxu2 }
 0x3e5   : > { %v3800_v61 = vadd.f32 %v3755_v40, %v3691_v24  ;;  %v3921_v24 = vrot.slane %v3856_v23, 3 }
 0x3e6   : > { %v3648_v34 = vpop.f32.mrf.mxu1  ;;  %v3408_v22 = vpop.f32.mrf.mxu3 }
 0x3e7   : > { %v4113_v25 = vrot.slane %v3800_v61, 5  ;;  %v3969_v5 = vmul.f32 %v3916_v46, %v3800_v61  ;;  %v3450_v39 = vadd.f32 %v3408_v22, %v6557_v17 }
 0x3e8   : > { %v3518_v18 = vpop.f32.mrf.mxu0 }
 0x3e9   : > { %v4167_v20 = vsel %vm4112_vm9, 0.0, %v4113_v25  ;;  %v3562_v0 = vadd.f32 %v3518_v18, %v3449_v12  ;;  %v4033_v36 = vmul.f32 %v3969_v5, %v3969_v5  ;;  %v3988_v37 = vsel %vm365_vm2, %v3969_v5, 0.0  ;;  %v3860_v18 = vpop.permute.xlu2 %3859 }
 0x3ea   : > { %4174 = vst.msk [vmem:[%s4972_s27 + $0x28] sm:$0xff] %vm365_vm2, %v4167_v20 }
 0x3eb   : > { %v3692_v29 = vadd.f32 %v3648_v34, %v3562_v0  ;;  %v4051_v4 = vsel %vm365_vm2, %v4033_v36, 0.0 }
 0x3ec   : > { %v3757_v3 = vpop.f32.mrf.mxu2 }
 0x3ed   : > { %v3801_v31 = vadd.f32 %v3757_v3, %v3692_v29 }
 0x3ee   : > { %v3651_v8 = vpop.f32.mrf.mxu1  ;;  %v3410_v19 = vpop.f32.mrf.mxu3 }
 0x3ef   : > { %v3970_v1 = vmul.f32 %v3918_v15, %v3801_v31  ;;  %v4114_v51 = vrot.slane %v3801_v31, 5  ;;  %v3451_v35 = vadd.f32 %v3410_v19, %v6560_v53  ;;  %v3922_v53 = vsel %vm682_vm4, %v3919_v42, %v3921_v24  ;;  %v3864_v42 = vpop.permute.xlu0 %3863 }
 0x3f0   : > { %v3521_v57 = vpop.f32.mrf.mxu0  ;;  %v3923_v15 = vrot.slane %v3860_v18, 3 }
 0x3f1   : > { %v3989_v21 = vsel %vm365_vm2, %v3970_v1, 0.0  ;;  %v4034_v6 = vmul.f32 %v3970_v1, %v3970_v1  ;;  %v4115_v63 = vsel %vm4112_vm9, %v4113_v25, %v4114_v51  ;;  %v3563_v27 = vadd.f32 %v3521_v57, %v3450_v39 }
 0x3f2   : > { %v3990_v9 = vadd.f32 %v3989_v21, %v3988_v37  ;;  %4175 = vst.msk [vmem:[%s4972_s27 + $0x30] sm:$0xff] %vm365_vm2, %v4115_v63 }
 0x3f3   : > { %v4052_v17 = vsel %vm365_vm2, %v4034_v6, 0.0  ;;  %v3693_v47 = vadd.f32 %v3651_v8, %v3563_v27 }
 0x3f4   : > { %v4053_v26 = vadd.f32 %v4052_v17, %v4051_v4  ;;  %v3760_v62 = vpop.f32.mrf.mxu2  ;;  %v3925_v17 = vrot.slane %v3864_v42, 3 }
 0x3f5   : > { %v3802_v38 = vadd.f32 %v3760_v62, %v3693_v47 }
 0x3f6   : > { %v3653_v60 = vpop.f32.mrf.mxu1  ;;  %v3413_v32 = vpop.f32.mrf.mxu3 }
 0x3f7   : > { %v3971_v33 = vmul.f32 %v3920_v10, %v3802_v38  ;;  %v4116_v16 = vrot.slane %v3802_v38, 5  ;;  %v3452_v20 = vadd.f32 %v3413_v32, %v6571_v52  ;;  %v3924_v52 = vsel %vm682_vm4, %v3921_v24, %v3923_v15 }
 0x3f8   : > { %v3523_v58 = vpop.f32.mrf.mxu0 }
 0x3f9   : > { %v3991_v50 = vsel %vm365_vm2, %v3971_v33, 0.0  ;;  %v4035_v14 = vmul.f32 %v3971_v33, %v3971_v33  ;;  %v4117_v45 = vsel %vm4112_vm9, %v4114_v51, %v4116_v16  ;;  %v3564_v40 = vadd.f32 %v3523_v58, %v3451_v35 }
 0x3fa   : > { %v3992_v61 = vadd.f32 %v3991_v50, %v3990_v9  ;;  %4176 = vst.msk [vmem:[%s4972_s27 + $0x38] sm:$0xff] %vm365_vm2, %v4117_v45 }
 0x3fb   : > { %v4054_v34 = vsel %vm365_vm2, %v4035_v14, 0.0  ;;  %v3694_v12 = vadd.f32 %v3653_v60, %v3564_v40 }
 0x3fc   : > { %v4055_v22 = vadd.f32 %v4054_v34, %v4053_v26  ;;  %v3762_v25 = vpop.f32.mrf.mxu2 }
 0x3fd   : > { %v3803_v46 = vadd.f32 %v3762_v25, %v3694_v12 }
 0x3fe   : > { %v3656_v59 = vpop.f32.mrf.mxu1  ;;  %v3415_v0 = vpop.f32.mrf.mxu3 }
 0x3ff   : > { %v3972_v5 = vmul.f32 %v3922_v53, %v3803_v46  ;;  %v4118_v29 = vrot.slane %v3803_v46, 5  ;;  %v3453_v6 = vadd.f32 %v3415_v0, %v6577_v55  ;;  %v3926_v55 = vsel %vm682_vm4, %v3923_v15, %v3925_v17 }
 0x400   : > { %v3526_v3 = vpop.f32.mrf.mxu0 }
 0x401   : > { %v3993_v31 = vsel %vm365_vm2, %v3972_v5, 0.0  ;;  %v4036_v56 = vmul.f32 %v3972_v5, %v3972_v5  ;;  %v4119_v8 = vsel %vm4112_vm9, %v4116_v16, %v4118_v29  ;;  %v3565_v39 = vadd.f32 %v3526_v3, %v3452_v20  ;;  %v3868_v16 = vpop.permute.xlu1 %3867  ;;  %v3872_v5 = vpop.permute.xlu2 %3871 }
 0x402   : > { %v3994_v36 = vadd.f32 %v3993_v31, %v3992_v61  ;;  %4177 = vst.msk [vmem:[%s4972_s27 + $0x40] sm:$0xff] %vm365_vm2, %v4119_v8  ;;  %v3927_v61 = vrot.slane %v3868_v16, 3 }
 0x403   : > { %v4056_v19 = vsel %vm365_vm2, %v4036_v56, 0.0  ;;  %v3695_v1 = vadd.f32 %v3656_v59, %v3565_v39  ;;  %v3929_v39 = vrot.slane %v3872_v5, 3 }
 0x404   : > { %v4057_v51 = vadd.f32 %v4056_v19, %v4055_v22  ;;  %v3765_v37 = vpop.f32.mrf.mxu2 }
 0x405   : > { %v3804_v57 = vadd.f32 %v3765_v37, %v3695_v1 }
 0x406   : > { %v3658_v21 = vpop.f32.mrf.mxu1  ;;  %v3418_v63 = vpop.f32.mrf.mxu3 }
 0x407   : > { %v3973_v27 = vmul.f32 %v3924_v52, %v3804_v57  ;;  %v4120_v9 = vrot.slane %v3804_v57, 5  ;;  %v3454_v24 = vadd.f32 %v3418_v63, %v6594_v28  ;;  %v3928_v28 = vsel %vm682_vm4, %v3925_v17, %v3927_v61  ;;  %v3876_v63 = vpop.permute.xlu0 %3875 }
 0x408   : > { %v3528_v4 = vpop.f32.mrf.mxu0 }
 0x409   : > { %v3995_v47 = vsel %vm365_vm2, %v3973_v27, 0.0  ;;  %v4037_v23 = vmul.f32 %v3973_v27, %v3973_v27  ;;  %v4121_v26 = vsel %vm4112_vm9, %v4118_v29, %v4120_v9  ;;  %v3566_v62 = vadd.f32 %v3528_v4, %v3453_v6 }
 0x40a   : > { %v3996_v10 = vadd.f32 %v3995_v47, %v3994_v36  ;;  %4178 = vst.msk [vmem:[%s4972_s27 + $0x48] sm:$0xff] %vm365_vm2, %v4121_v26  ;;  %v3931_v26 = vrot.slane %v3876_v63, 3 }
 0x40b   : > { %v4058_v38 = vsel %vm365_vm2, %v4037_v23, 0.0  ;;  %v3696_v60 = vadd.f32 %v3658_v21, %v3566_v62 }
 0x40c   : > { %v4059_v35 = vadd.f32 %v4058_v38, %v4057_v51  ;;  %v3767_v32 = vpop.f32.mrf.mxu2 }
 0x40d   : > { %v3805_v33 = vadd.f32 %v3767_v32, %v3696_v60 }
 0x40e   : > { %v3661_v58 = vpop.f32.mrf.mxu1  ;;  %v3420_v50 = vpop.f32.mrf.mxu3 }
 0x40f   : > { %v3974_v14 = vmul.f32 %v3926_v55, %v3805_v33  ;;  %v4122_v45 = vrot.slane %v3805_v33, 5  ;;  %v3455_v3 = vadd.f32 %v3420_v50, %v6600_v43  ;;  %v3930_v43 = vsel %vm682_vm4, %v3927_v61, %v3929_v39 }
 0x410   : > { %v3531_v40 = vpop.f32.mrf.mxu0 }
 0x411   : > { %v3997_v34 = vsel %vm365_vm2, %v3974_v14, 0.0  ;;  %v4038_v12 = vmul.f32 %v3974_v14, %v3974_v14  ;;  %v4123_v22 = vsel %vm4112_vm9, %v4120_v9, %v4122_v45  ;;  %v3567_v25 = vadd.f32 %v3531_v40, %v3454_v24  ;;  %v3880_v24 = vpop.permute.xlu1 %3879 }
 0x412   : > { %v3998_v53 = vadd.f32 %v3997_v34, %v3996_v10  ;;  %4179 = vst.msk [vmem:[%s4972_s27 + $0x50] sm:$0xff] %vm365_vm2, %v4123_v22 }
 0x413   : > { %v4060_v46 = vsel %vm365_vm2, %v4038_v12, 0.0  ;;  %v3697_v18 = vadd.f32 %v3661_v58, %v3567_v25  ;;  %v3933_v12 = vrot.slane %v3880_v24, 3 }
 0x414   : > { %v4061_v59 = vadd.f32 %v4060_v46, %v4059_v35  ;;  %v3770_v20 = vpop.f32.mrf.mxu2 }
 0x415   : > { %v3806_v0 = vadd.f32 %v3770_v20, %v3697_v18 }
 0x416   : > { %v3663_v29 = vpop.f32.mrf.mxu1  ;;  %v3423_v15 = vpop.f32.mrf.mxu3 }
 0x417   : > { %v3975_v31 = vmul.f32 %v3928_v28, %v3806_v0  ;;  %v4124_v56 = vrot.slane %v3806_v0, 5  ;;  %v3456_v9 = vadd.f32 %v3423_v15, %v6614_v54  ;;  %v3932_v54 = vsel %vm682_vm4, %v3929_v39, %v3931_v26  ;;  %v3884_v15 = vpop.permute.xlu2 %3883 }
 0x418   : > { %v3533_v8 = vpop.f32.mrf.mxu0  ;;  %v3935_v39 = vrot.slane %v3884_v15, 3 }
 0x419   : > { %v3999_v36 = vsel %vm365_vm2, %v3975_v31, 0.0  ;;  %v4039_v19 = vmul.f32 %v3975_v31, %v3975_v31  ;;  %v4125_v1 = vsel %vm4112_vm9, %v4122_v45, %v4124_v56  ;;  %v3568_v51 = vadd.f32 %v3533_v8, %v3455_v3 }
 0x41a   : > { %v4000_v37 = vadd.f32 %v3999_v36, %v3998_v53  ;;  %4180 = vst.msk [vmem:[%s4972_s27 + $0x58] sm:$0xff] %vm365_vm2, %v4125_v1 }
 0x41b   : > { %v4062_v52 = vsel %vm365_vm2, %v4039_v19, 0.0  ;;  %v3698_v57 = vadd.f32 %v3663_v29, %v3568_v51 }
 0x41c   : > { %v4063_v42 = vadd.f32 %v4062_v52, %v4061_v59  ;;  %v3772_v21 = vpop.f32.mrf.mxu2 }
 0x41d   : > { %v3807_v6 = vadd.f32 %v3772_v21, %v3698_v57 }
 0x41e   : > { %v3666_v27 = vpop.f32.mrf.mxu1  ;;  %v3425_v4 = vpop.f32.mrf.mxu3 }
 0x41f   : > { %v3976_v17 = vmul.f32 %v3930_v43, %v3807_v6  ;;  %v4126_v47 = vrot.slane %v3807_v6, 5  ;;  %v3457_v14 = vadd.f32 %v3425_v4, %v6623_v13  ;;  %v3934_v13 = vsel %vm682_vm4, %v3931_v26, %v3933_v12 }
 0x420   : > { %v3536_v23 = vpop.f32.mrf.mxu0  ;;  %v3936_v43 = vsel %vm682_vm4, %v3933_v12, %v3935_v39 }
 0x421   : > { %v4001_v62 = vsel %vm365_vm2, %v3976_v17, 0.0  ;;  %v4040_v10 = vmul.f32 %v3976_v17, %v3976_v17  ;;  %v4127_v38 = vsel %vm4112_vm9, %v4124_v56, %v4126_v47  ;;  %v3569_v60 = vadd.f32 %v3536_v23, %v3456_v9 }
 0x422   : > { %v4002_v35 = vadd.f32 %v4001_v62, %v4000_v37  ;;  %4181 = vst.msk [vmem:[%s4972_s27 + $0x60] sm:$0xff] %vm365_vm2, %v4127_v38 }
 0x423   : > { %v4064_v32 = vsel %vm365_vm2, %v4040_v10, 0.0  ;;  %v3699_v55 = vadd.f32 %v3666_v27, %v3569_v60  ;;  %v3888_v27 = vpop.permute.xlu0 %3887 }
 0x424   : > { %v4065_v33 = vadd.f32 %v4064_v32, %v4063_v42  ;;  %v3775_v16 = vpop.f32.mrf.mxu2  ;;  %v3937_v23 = vrot.slane %v3888_v27, 3 }
 0x425   : > { %v3808_v58 = vadd.f32 %v3775_v16, %v3699_v55 }
 0x426   : > { %v3668_v50 = vpop.f32.mrf.mxu1  ;;  %v3428_v45 = vpop.f32.mrf.mxu3 }
 0x427   : > { %v3977_v40 = vmul.f32 %v3932_v54, %v3808_v58  ;;  %v4128_v61 = vrot.slane %v3808_v58, 5  ;;  %v3458_v3 = vadd.f32 %v3428_v45, %v6643_v11 }
 0x428   : > { %v3538_v34 = vpop.f32.mrf.mxu0 }
 0x429   : > { %v4003_v22 = vsel %vm365_vm2, %v3977_v40, 0.0  ;;  %v4041_v25 = vmul.f32 %v3977_v40, %v3977_v40  ;;  %v4129_v53 = vsel %vm4112_vm9, %v4126_v47, %v4128_v61  ;;  %v3570_v46 = vadd.f32 %v3538_v34, %v3457_v14 }
 0x42a   : > { %v4004_v18 = vadd.f32 %v4003_v22, %v4002_v35  ;;  %4182 = vst.msk [vmem:[%s4972_s27 + $0x68] sm:$0xff] %vm365_vm2, %v4129_v53 }
 0x42b   : > { %v4066_v59 = vsel %vm365_vm2, %v4041_v25, 0.0  ;;  %v3700_v20 = vadd.f32 %v3668_v50, %v3570_v46 }
 0x42c   : > { %v4067_v28 = vadd.f32 %v4066_v59, %v4065_v33  ;;  %v3777_v0 = vpop.f32.mrf.mxu2 }
 0x42d   : > { %v3809_v5 = vadd.f32 %v3777_v0, %v3700_v20 }
 0x42e   : > { %v3671_v29 = vpop.f32.mrf.mxu1  ;;  %v3430_v31 = vpop.f32.mrf.mxu3 }
 0x42f   : > { %v3978_v56 = vmul.f32 %v3934_v13, %v3809_v5  ;;  %v4130_v8 = vrot.slane %v3809_v5, 5  ;;  %v3459_v9 = vadd.f32 %v3430_v31, %v6658_v49  ;;  %v3938_v49 = vsel %vm682_vm4, %v3935_v39, %v3937_v23 }
 0x430   : > { %v3541_v36 = vpop.f32.mrf.mxu0 }
 0x431   : > { %v4005_v19 = vsel %vm365_vm2, %v3978_v56, 0.0  ;;  %v4042_v1 = vmul.f32 %v3978_v56, %v3978_v56  ;;  %v4131_v51 = vsel %vm4112_vm9, %v4128_v61, %v4130_v8  ;;  %v3571_v37 = vadd.f32 %v3541_v36, %v3458_v3  ;;  %v3892_v61 = vpop.permute.xlu1 %3891 }
 0x432   : > { %v4006_v52 = vadd.f32 %v4005_v19, %v4004_v18  ;;  %4183 = vst.msk [vmem:[%s4972_s27 + $0x70] sm:$0xff] %vm365_vm2, %v4131_v51  ;;  %v3939_v53 = vrot.slane %v3892_v61, 3 }
 0x433   : > { %v4068_v57 = vsel %vm365_vm2, %v4042_v1, 0.0  ;;  %v3701_v42 = vadd.f32 %v3671_v29, %v3571_v37  ;;  %v3896_v1 = vpop.permute.xlu2 %3895 }
 0x434   : > { %v4069_v21 = vadd.f32 %v4068_v57, %v4067_v28  ;;  %v3780_v11 = vpop.f32.mrf.mxu2  ;;  %v3940_v0 = vsel %vm682_vm4, %v3937_v23, %v3939_v53 }
 0x435   : > { %v3810_v6 = vadd.f32 %v3780_v11, %v3701_v42 }
 0x436   : > { %v3673_v63 = vpop.f32.mrf.mxu1  ;;  %v3433_v4 = vpop.f32.mrf.mxu3 }
 0x437   : > { %v3979_v17 = vmul.f32 %v3936_v43, %v3810_v6  ;;  %v4132_v47 = vrot.slane %v3810_v6, 5  ;;  %v3460_v24 = vadd.f32 %v3433_v4, %v6681_v44  ;;  %v3900_v4 = vpop.permute.xlu0 %3899 }
 0x438   : > { %v3543_v26 = vpop.f32.mrf.mxu0 }
 0x439   : > { %v4007_v62 = vsel %vm365_vm2, %v3979_v17, 0.0  ;;  %v4043_v10 = vmul.f32 %v3979_v17, %v3979_v17  ;;  %v4133_v38 = vsel %vm4112_vm9, %v4130_v8, %v4132_v47  ;;  %v3572_v60 = vadd.f32 %v3543_v26, %v3459_v9 }
 0x43a   : > { %v4008_v35 = vadd.f32 %v4007_v62, %v4006_v52  ;;  %4184 = vst.msk [vmem:[%s4972_s27 + $0x78] sm:$0xff] %vm365_vm2, %v4133_v38  ;;  %v3941_v52 = vrot.slane %v3896_v1, 3  ;;  %v3943_v62 = vrot.slane %v3900_v4, 3 }
 0x43b   : > { %v4070_v32 = vsel %vm365_vm2, %v4043_v10, 0.0  ;;  %v3702_v55 = vadd.f32 %v3673_v63, %v3572_v60 }
 0x43c   : > { %v4071_v33 = vadd.f32 %v4070_v32, %v4069_v21  ;;  %v3782_v16 = vpop.f32.mrf.mxu2  ;;  %v3942_v21 = vsel %vm682_vm4, %v3939_v53, %v3941_v52 }
 0x43d   : > { %v3811_v54 = vadd.f32 %v3782_v16, %v3702_v55  ;;  %v3944_v55 = vsel %vm682_vm4, %v3941_v52, %v3943_v62  ;;  %v3904_v16 = vpop.permute.xlu1 %3903 }
 0x43e   : > { %v3676_v58 = vpop.f32.mrf.mxu1  ;;  %v3435_v50 = vpop.f32.mrf.mxu3  ;;  %v3945_v61 = vrot.slane %v3904_v16, 3 }
 0x43f   : > { %v3980_v14 = vmul.f32 %v3938_v49, %v3811_v54  ;;  %v4134_v45 = vrot.slane %v3811_v54, 5  ;;  %v3461_v5 = vadd.f32 %v3435_v50, %v6689_v48  ;;  %v3912_v52 = vpop.permute.xlu0 %3911 }
 0x440   : > { %v3546_v40 = vpop.f32.mrf.mxu0 }
 0x441   : > { %v4009_v34 = vsel %vm365_vm2, %v3980_v14, 0.0  ;;  %v4044_v12 = vmul.f32 %v3980_v14, %v3980_v14  ;;  %v4135_v22 = vsel %vm4112_vm9, %v4132_v47, %v4134_v45  ;;  %v3573_v25 = vadd.f32 %v3546_v40, %v3460_v24 }
 0x442   : > { %v4010_v46 = vadd.f32 %v4009_v34, %v4008_v35  ;;  %4185 = vst.msk [vmem:[%s4972_s27 + $0x80] sm:$0xff] %vm365_vm2, %v4135_v22 }
 0x443   : > { %v4072_v18 = vsel %vm365_vm2, %v4044_v12, 0.0  ;;  %v3703_v59 = vadd.f32 %v3676_v58, %v3573_v25 }
 0x444   : > { %v4073_v44 = vadd.f32 %v4072_v18, %v4071_v33  ;;  %v3785_v20 = vpop.f32.mrf.mxu2  ;;  %v3946_v18 = vsel %vm682_vm4, %v3943_v62, %v3945_v61 }
 0x445   : > { %v3812_v28 = vadd.f32 %v3785_v20, %v3703_v59 }
 0x446   : > { %v3678_v13 = vpop.f32.mrf.mxu1  ;;  %v3438_v29 = vpop.f32.mrf.mxu3 }
 0x447   : > { %v3981_v3 = vmul.f32 %v3940_v0, %v3812_v28  ;;  %v4136_v15 = vrot.slane %v3812_v28, 5  ;;  %v3462_v43 = vadd.f32 %v3438_v29, %v6709_v2 }
 0x448   : > { %v3548_v31 = vpop.f32.mrf.mxu0 }
 0x449   : > { %v4011_v56 = vsel %vm365_vm2, %v3981_v3, 0.0  ;;  %v4045_v8 = vmul.f32 %v3981_v3, %v3981_v3  ;;  %v4137_v39 = vsel %vm4112_vm9, %v4134_v45, %v4136_v15  ;;  %v3574_v36 = vadd.f32 %v3548_v31, %v3461_v5 }
 0x44a   : > { %v4012_v19 = vadd.f32 %v4011_v56, %v4010_v46  ;;  %4186 = vst.msk [vmem:[%s4972_s27 + $0x88] sm:$0xff] %vm365_vm2, %v4137_v39 }
 0x44b   : > { %v4074_v51 = vsel %vm365_vm2, %v4045_v8, 0.0  ;;  %v3704_v37 = vadd.f32 %v3678_v13, %v3574_v36  ;;  %v3908_v13 = vpop.permute.xlu2 %3907 }
 0x44c   : > { %v4075_v57 = vadd.f32 %v4074_v51, %v4073_v44  ;;  %v3787_v48 = vpop.f32.mrf.mxu2  ;;  %v3947_v8 = vrot.slane %v3908_v13, 3  ;;  %v4925_v51 = vmov 0.0  }
 0x44d   : > { %v3813_v42 = vadd.f32 %v3787_v48, %v3704_v37  ;;  %4169 = vst.msk [vmem:[%s4972_s27] sm:$0xff] %vm365_vm2, %v4925_v51 }
 0x44e   : > { %v3681_v11 = vpop.f32.mrf.mxu1  ;;  %v3440_v27 = vpop.f32.mrf.mxu3  ;;  %v3948_v37 = vsel %vm682_vm4, %v3945_v61, %v3947_v8  ;;  %4170 = vst.msk [vmem:[%s4972_s27 + $0x8] sm:$0xff] %vm365_vm2, %v4925_v51 }
 0x44f   : > { %v3982_v6 = vmul.f32 %v3942_v21, %v3813_v42  ;;  %v4138_v63 = vrot.slane %v3813_v42, 5  ;;  %v3463_v49 = vadd.f32 %v3440_v27, %v6715_v30  ;;  %4171 = vst.msk [vmem:[%s4972_s27 + $0x10] sm:$0xff] %vm365_vm2, %v4925_v51 }
 0x450   : > { %v3551_v9 = vpop.f32.mrf.mxu0  ;;  %4172 = vst.msk [vmem:[%s4972_s27 + $0x18] sm:$0xff] %vm365_vm2, %v4925_v51 }
 0x451   : > { %v4013_v17 = vsel %vm365_vm2, %v3982_v6, 0.0  ;;  %v4046_v47 = vmul.f32 %v3982_v6, %v3982_v6  ;;  %v4139_v23 = vsel %vm4112_vm9, %v4136_v15, %v4138_v63  ;;  %v3575_v26 = vadd.f32 %v3551_v9, %v3462_v43  ;;  %4173 = vst.msk [vmem:[%s4972_s27 + $0x20] sm:$0xff] %vm365_vm2, %v4925_v51 }
 0x452   : > { %v4014_v10 = vadd.f32 %v4013_v17, %v4012_v19  ;;  %4187 = vst.msk [vmem:[%s4972_s27 + $0x90] sm:$0xff] %vm365_vm2, %v4139_v23 }
 0x453   : > { %v4076_v38 = vsel %vm365_vm2, %v4046_v47, 0.0  ;;  %v3705_v60 = vadd.f32 %v3681_v11, %v3575_v26  ;;  %4193 = vst.msk [vmem:[%s4972_s27 + $0xc0] sm:$0xff] %vm365_vm2, %v4925_v51 }
 0x454   : > { %v4077_v35 = vadd.f32 %v4076_v38, %v4075_v57  ;;  %v3790_v2 = vpop.f32.mrf.mxu2  ;;  %4194 = vst.msk [vmem:[%s4972_s27 + $0xc8] sm:$0xff] %vm365_vm2, %v4925_v51 }
 0x455   : > { %v3814_v32 = vadd.f32 %v3790_v2, %v3705_v60  ;;  %4195 = vst.msk [vmem:[%s4972_s27 + $0xd0] sm:$0xff] %vm365_vm2, %v4925_v51 }
 0x456   : > { %v3683_v33 = vpop.f32.mrf.mxu1  ;;  %v3443_v34 = vpop.f32.mrf.mxu3  ;;  %4196 = vst.msk [vmem:[%s4972_s27 + $0xd8] sm:$0xff] %vm365_vm2, %v4925_v51 }
 0x457   : > { %v3983_v54 = vmul.f32 %v3944_v55, %v3814_v32  ;;  %v4140_v58 = vrot.slane %v3814_v32, 5  ;;  %v3464_v59 = vadd.f32 %v3443_v34, %v6726_v7  ;;  %4198 = vst.msk [vmem:[%s4972_s27 + $0xe0] sm:$0x3f] %vm4197_vm10, %v4925_v51  ;;  %v3987_v34 = vld [vmem:[%s6903_s4] sm:$0x1] }
 0x458   : > { %v3553_v24 = vpop.f32.mrf.mxu0 }
 0x459   : > { %v4015_v50 = vsel %vm365_vm2, %v3983_v54, 0.0  ;;  %v4047_v14 = vmul.f32 %v3983_v54, %v3983_v54  ;;  %v4141_v45 = vsel %vm4112_vm9, %v4138_v63, %v4140_v58  ;;  %v3576_v40 = vadd.f32 %v3553_v24, %v3463_v49 }
 0x45a   : > { %v4016_v12 = vadd.f32 %v4015_v50, %v4014_v10  ;;  %4188 = vst.msk [vmem:[%s4972_s27 + $0x98] sm:$0xff] %vm365_vm2, %v4141_v45 }
 0x45b   : > { %v4078_v22 = vsel %vm365_vm2, %v4047_v14, 0.0  ;;  %v3706_v25 = vadd.f32 %v3683_v33, %v3576_v40 }
 0x45c   : > { %v4079_v53 = vadd.f32 %v4078_v22, %v4077_v35  ;;  %v3792_v30 = vpop.f32.mrf.mxu2 }
 0x45d   : > { %v3815_v46 = vadd.f32 %v3792_v30, %v3706_v25  ;;  %v4032_v25 = vld [vmem:[%s6904_s5] sm:$0x1] }
 0x45e   : > { %v3686_v0 = vpop.f32.mrf.mxu1  ;;  %v3445_v39 = vpop.f32.mrf.mxu3 }
 0x45f   : > { %v3984_v44 = vmul.f32 %v3946_v18, %v3815_v46  ;;  %v4142_v20 = vrot.slane %v3815_v46, 5  ;;  %v3465_v57 = vadd.f32 %v3445_v39, %v6728_v41  ;;  %v3949_v41 = vrot.slane %v3912_v52, 3 }
 0x460   : > { %v3556_v28 = vpop.f32.mrf.mxu0 }
 0x461   : > { %v4017_v5 = vsel %vm365_vm2, %v3984_v44, 0.0  ;;  %v4048_v29 = vmul.f32 %v3984_v44, %v3984_v44  ;;  %v4143_v3 = vsel %vm4112_vm9, %v4140_v58, %v4142_v20  ;;  %v3577_v15 = vadd.f32 %v3556_v28, %v3464_v59 }
 0x462   : > { %v4018_v31 = vadd.f32 %v4017_v5, %v4016_v12  ;;  %4189 = vst.msk [vmem:[%s4972_s27 + $0xa0] sm:$0xff] %vm365_vm2, %v4143_v3  ;;  %v3950_v62 = vsel %vm682_vm4, %v3947_v8, %v3949_v41 }
 0x463   : > { %v4080_v56 = vsel %vm365_vm2, %v4048_v29, 0.0  ;;  %v3707_v7 = vadd.f32 %v3686_v0, %v3577_v15 }
 0x464   : > { %v4081_v36 = vadd.f32 %v4080_v56, %v4079_v53  ;;  %v3795_v19 = vpop.f32.mrf.mxu2 }
 0x465   : > { %v3816_v1 = vadd.f32 %v3795_v19, %v3707_v7 }
 0x466   : > { %v3688_v9 = vpop.f32.mrf.mxu1 }
 0x467   : > { %v3985_v48 = vmul.f32 %v3948_v37, %v3816_v1  ;;  %v4144_v42 = vrot.slane %v3816_v1, 5 }
 0x468   : > { %v3558_v21 = vpop.f32.mrf.mxu0 }
 0x469   : > { %v4019_v11 = vsel %vm365_vm2, %v3985_v48, 0.0  ;;  %v4049_v43 = vmul.f32 %v3985_v48, %v3985_v48  ;;  %v4145_v6 = vsel %vm4112_vm9, %v4142_v20, %v4144_v42  ;;  %v3578_v63 = vadd.f32 %v3558_v21, %v3465_v57 }
 0x46a   : > { %v4020_v27 = vadd.f32 %v4019_v11, %v4018_v31  ;;  %4190 = vst.msk [vmem:[%s4972_s27 + $0xa8] sm:$0xff] %vm365_vm2, %v4145_v6 }
 0x46b   : > { %v4082_v4 = vsel %vm365_vm2, %v4049_v43, 0.0  ;;  %v3708_v17 = vadd.f32 %v3688_v9, %v3578_v63 }
 0x46c   : > { %v4083_v47 = vadd.f32 %v4082_v4, %v4081_v36  ;;  %v3797_v23 = vpop.f32.mrf.mxu2 }
 0x46d   : > { %v3817_v26 = vadd.f32 %v3797_v23, %v3708_v17 }
 0x46f   : > { %v3986_v10 = vmul.f32 %v3950_v62, %v3817_v26  ;;  %v4146_v38 = vrot.slane %v3817_v26, 5 }
 0x471   : > { %v4021_v60 = vsel %vm365_vm2, %v3986_v10, 0.0  ;;  %v4050_v35 = vmul.f32 %v3986_v10, %v3986_v10  ;;  %v4147_v2 = vsel %vm4112_vm9, %v4144_v42, %v4146_v38  ;;  %v4168_v32 = vsel %vm4112_vm9, %v4146_v38, 0.0 }
 0x472   : > { %v4022_v55 = vadd.f32 %v4021_v60, %v4020_v27  ;;  %4191 = vst.msk [vmem:[%s4972_s27 + $0xb0] sm:$0xff] %vm365_vm2, %v4147_v2 }
 0x473   : > { %v4084_v33 = vsel %vm365_vm2, %v4050_v35, 0.0  ;;  %4192 = vst.msk [vmem:[%s4972_s27 + $0xb8] sm:$0xff] %vm365_vm2, %v4168_v32 }
 0x474   : > { %v4023_v16 = vrot.slane %v4022_v55, 4  ;;  %v4085_v49 = vadd.f32 %v4084_v33, %v4083_v47 }
 0x476   : > { %v4024_v54 = vadd.f32 %v4023_v16, %v4022_v55  ;;  %v4086_v58 = vrot.slane %v4085_v49, 4 }
 0x478   : > { %v4025_v24 = vrot.slane %v4024_v54, 2  ;;  %v4087_v50 = vadd.f32 %v4086_v58, %v4085_v49 }
 0x47a   : > { %v4026_v14 = vadd.f32 %v4025_v24, %v4024_v54  ;;  %v4088_v45 = vrot.slane %v4087_v50, 2 }
 0x47c   : > { %v4027_v40 = vrot.slane %v4026_v14, 1  ;;  %v4089_v61 = vadd.f32 %v4088_v45, %v4087_v50 }
 0x47e   : > { %v4028_v12 = vadd.f32 %v4027_v40, %v4026_v14  ;;  %v4090_v22 = vrot.slane %v4089_v61, 1 }
 0x480   : > { %v4029_v53 = vadd.f32 %v4028_v12, %v3987_v34  ;;  %v4091_v30 = vadd.f32 %v4090_v22, %v4089_v61 }
 0x482   : > { %4031 = vst.msk [vmem:[%s6903_s4] sm:$0x1] %vm4030_vm11, %v4029_v53  ;;  %v4092_v46 = vadd.f32 %v4091_v30, %v4032_v25 }
 0x484   : > { %4093 = vst.msk [vmem:[%s6904_s5] sm:$0x1] %vm4030_vm11, %v4092_v46 }
 0x485 PF: > { %s16_s18 = sadd.s32 1, %s4921_s18  }
 0x486   : > { %p13_p5 = scmp.ge.s32.totalorder %s16_s18, 4  }
 0x488   :  { %15 = sbr.rel (!%p13_p5) target bundleno = 1 (0x1), region = 108 }

// kernel: efficient_stereo_tail.4
= control target key start
LH: loop header
LB: loop body
LE: loop exit
PB: predicated region body
PF: predicated region fallthrough
CT: control target
= control target key end

     0   :  { %s4906_s18 = smov 0   ;;  %s7026_s0 = inlined_call_operand.vmem [shape: f32[2,230,32], index: 0, kind: input, shape index: {}]   ;;  %s7027_s1 = inlined_call_operand.vmem [shape: f32[1,32], index: 1, kind: input, shape index: {}]   ;;  %s7028_s2 = inlined_call_operand.vmem [shape: f32[1,32], index: 2, kind: input, shape index: {}]   ;;  %s7029_s3 = inlined_call_operand.vmem [shape: f32[230,1], index: 3, kind: input, shape index: {}]   ;;  %s7030_s4 = inlined_call_operand.vmem [shape: bf16[27,32,1], index: 4, kind: input, shape index: {}]   ;;  %s7031_s5 = inlined_call_operand.vmem [shape: f32[2,144,1], index: 5, kind: output, shape index: {}]  }
   0x1 LB: > { %s4217_s19 = sadd.s32 4294967295, %s4873_s18   ;;  %p4221_p0 = scmp.ge.s32.totalorder %s4873_s18, 1  ;;  %s4873_s18 = sphi %s4906_s18, %s15_s18  }
   0x2   : > { %p187_p1 = scmp.lt.s32.totalorder %s4873_s18, 3 }
   0x4   : > { %p188_p2 = pnand %p4221_p0, %p187_p1 }
   0x6   : > { %191 = sbr.rel (%p188_p2) target bundleno = 1250 (0x4e2), region = 40 }
   0xb   : > { %v364_v0 = vld [vmem:[%s7029_s3 + $0x70] sm:$0xff]  ;;  %v350_v2 = vld [vmem:[%s7029_s3] sm:$0xff]  ;;  %v4875_v3 = vmov 0   ;;  %v365_v7 = vld [vmem:[%s7029_s3 + $0x78] sm:$0xff]  ;;  %p215_p3 = scmp.lt.s32.totalorder %s4217_s19, 1 }
   0xc   : > { %v352_v1 = vld [vmem:[%s7029_s3 + $0x10] sm:$0xff]  ;;  %4862 = vset.pattern.permute.xlu2 %v4875_v3  ;;  %4861 = vset.pattern.permute.xlu1 %v4875_v3  ;;  %vm393_vm0 = vcmp.gt.f32.partialorder %v364_v0, 0.5  ;;  %vm379_vm2 = vcmp.gt.f32.partialorder %v350_v2, 0.5  ;;  %v353_v8 = vld [vmem:[%s7029_s3 + $0x18] sm:$0xff]  ;;  %v351_v9 = vld [vmem:[%s7029_s3 + $0x8] sm:$0xff]  ;;  %vm394_vm3 = vcmp.gt.f32.partialorder %v365_v7, 0.5 }
   0xd   : > { %vm381_vm1 = vcmp.gt.f32.partialorder %v352_v1, 0.5  ;;  %4860 = vset.pattern.permute.xlu0 %v4875_v3  ;;  %v422_v4 = vsel %vm393_vm0, 1, %v4875_v3  ;;  %v408_v6 = vsel %vm379_vm2, 1, %v4875_v3  ;;  %vm382_vm4 = vcmp.gt.f32.partialorder %v353_v8, 0.5  ;;  %v354_v13 = vld [vmem:[%s7029_s3 + $0x20] sm:$0xff]  ;;  %v367_v14 = vld [vmem:[%s7029_s3 + $0x88] sm:$0xff] }
   0xe   : > { %v410_v5 = vsel %vm381_vm1, 1, %v4875_v3  ;;  %480 = vperm.xlu2 %4862, %v422_v4   ;;  %438 = vperm.xlu0 %4860, %v408_v6   ;;  %vm380_vm5 = vcmp.gt.f32.partialorder %v351_v9, 0.5  ;;  %v423_v10 = vsel %vm394_vm3, 1, %v4875_v3  ;;  %v411_v11 = vsel %vm382_vm4, 1, %v4875_v3  ;;  %v366_v15 = vld [vmem:[%s7029_s3 + $0x80] sm:$0xff]  ;;  %v356_v19 = vld [vmem:[%s7029_s3 + $0x30] sm:$0xff] }
   0xf   : > { %444 = vperm.xlu1 %4861, %v410_v5   ;;  %v409_v12 = vsel %vm380_vm5, 1, %v4875_v3  ;;  %vm383_vm6 = vcmp.gt.f32.partialorder %v354_v13, 0.5  ;;  %vm396_vm7 = vcmp.gt.f32.partialorder %v367_v14, 0.5  ;;  %vm395_vm8 = vcmp.gt.f32.partialorder %v366_v15, 0.5  ;;  %v368_v20 = vld [vmem:[%s7029_s3 + $0x90] sm:$0xff]  ;;  %v355_v21 = vld [vmem:[%s7029_s3 + $0x28] sm:$0xff] }
  0x10   : > { %v412_v16 = vsel %vm383_vm6, 1, %v4875_v3  ;;  %v425_v17 = vsel %vm396_vm7, 1, %v4875_v3  ;;  %v424_v18 = vsel %vm395_vm8, 1, %v4875_v3  ;;  %vm385_vm9 = vcmp.gt.f32.partialorder %v356_v19, 0.5  ;;  %v359_v25 = vld [vmem:[%s7029_s3 + $0x48] sm:$0xff]  ;;  %v358_v26 = vld [vmem:[%s7029_s3 + $0x40] sm:$0xff] }
  0x11   : > { %vm397_vm10 = vcmp.gt.f32.partialorder %v368_v20, 0.5  ;;  %vm384_vm11 = vcmp.gt.f32.partialorder %v355_v21, 0.5  ;;  %v414_v22 = vsel %vm385_vm9, 1, %v4875_v3  ;;  %v357_v27 = vld [vmem:[%s7029_s3 + $0x38] sm:$0xff]  ;;  %vm388_vm12 = vcmp.gt.f32.partialorder %v359_v25, 0.5  ;;  %v362_v31 = vld [vmem:[%s7029_s3 + $0x60] sm:$0xff] }
  0x12   : > { %v426_v23 = vsel %vm397_vm10, 1, %v4875_v3  ;;  %v413_v24 = vsel %vm384_vm11, 1, %v4875_v3  ;;  %vm387_vm13 = vcmp.gt.f32.partialorder %v358_v26, 0.5  ;;  %vm386_vm14 = vcmp.gt.f32.partialorder %v357_v27, 0.5  ;;  %v361_v32 = vld [vmem:[%s7029_s3 + $0x58] sm:$0xff]  ;;  %v360_v33 = vld [vmem:[%s7029_s3 + $0x50] sm:$0xff] }
  0x13   : > { %v417_v28 = vsel %vm388_vm12, 1, %v4875_v3  ;;  %v416_v29 = vsel %vm387_vm13, 1, %v4875_v3  ;;  %v415_v30 = vsel %vm386_vm14, 1, %v4875_v3  ;;  %vm391_vm15 = vcmp.gt.f32.partialorder %v362_v31, 0.5  ;;  %v370_v37 = vld [vmem:[%s7029_s3 + $0xa0] sm:$0xff]  ;;  %v369_v38 = vld [vmem:[%s7029_s3 + $0x98] sm:$0xff] }
  0x14   : > { %vm390_vm0 = vcmp.gt.f32.partialorder %v361_v32, 0.5  ;;  %vm389_vm1 = vcmp.gt.f32.partialorder %v360_v33, 0.5  ;;  %v420_v34 = vsel %vm391_vm15, 1, %v4875_v3  ;;  %v363_v39 = vld [vmem:[%s7029_s3 + $0x68] sm:$0xff]  ;;  %vm399_vm2 = vcmp.gt.f32.partialorder %v370_v37, 0.5  ;;  %v373_v43 = vld [vmem:[%s7029_s3 + $0xb8] sm:$0xff] }
  0x15   : > { %v419_v35 = vsel %vm390_vm0, 1, %v4875_v3  ;;  %v418_v36 = vsel %vm389_vm1, 1, %v4875_v3  ;;  %vm398_vm3 = vcmp.gt.f32.partialorder %v369_v38, 0.5  ;;  %vm392_vm4 = vcmp.gt.f32.partialorder %v363_v39, 0.5  ;;  %v372_v44 = vld [vmem:[%s7029_s3 + $0xb0] sm:$0xff]  ;;  %v371_v45 = vld [vmem:[%s7029_s3 + $0xa8] sm:$0xff] }
  0x16   : > { %483 = vperm.xlu2 %4862, %v423_v10   ;;  %441 = vperm.xlu0 %4860, %v409_v12   ;;  %v428_v40 = vsel %vm399_vm2, 1, %v4875_v3  ;;  %v427_v41 = vsel %vm398_vm3, 1, %v4875_v3  ;;  %v421_v42 = vsel %vm392_vm4, 1, %v4875_v3  ;;  %vm402_vm5 = vcmp.gt.f32.partialorder %v373_v43, 0.5  ;;  %v376_v49 = vld [vmem:[%s7029_s3 + $0xd0] sm:$0xff]  ;;  %v375_v50 = vld [vmem:[%s7029_s3 + $0xc8] sm:$0xff] }
  0x17   : > { %447 = vperm.xlu1 %4861, %v411_v11   ;;  %vm401_vm6 = vcmp.gt.f32.partialorder %v372_v44, 0.5  ;;  %vm400_vm7 = vcmp.gt.f32.partialorder %v371_v45, 0.5  ;;  %v431_v46 = vsel %vm402_vm5, 1, %v4875_v3  ;;  %v374_v51 = vld [vmem:[%s7029_s3 + $0xc0] sm:$0xff]  ;;  %vm405_vm8 = vcmp.gt.f32.partialorder %v376_v49, 0.5  ;;  %v377_v56 = vld [vmem:[%s7029_s3 + $0xd8] sm:$0xff] }
  0x18   : > { %v430_v47 = vsel %vm401_vm6, 1, %v4875_v3  ;;  %v429_v48 = vsel %vm400_vm7, 1, %v4875_v3  ;;  %vm404_vm9 = vcmp.gt.f32.partialorder %v375_v50, 0.5  ;;  %vm403_vm10 = vcmp.gt.f32.partialorder %v374_v51, 0.5  ;;  %v378_v55 = vld [vmem:[%s7029_s3 + $0xe0] sm:$0x3f] }
  0x19   : > { %v434_v52 = vsel %vm405_vm8, 1, %v4875_v3  ;;  %v433_v53 = vsel %vm404_vm9, 1, %v4875_v3  ;;  %v432_v54 = vsel %vm403_vm10, 1, %v4875_v3  ;;  %vm407_vm11 = vcmp.gt.f32.partialorder %v378_v55, 0.5  ;;  %v4790_v59 = vld [vmem:[%s7030_s4 + $0x8] sm:$0xff]  ;;  %v4789_v61 = vld [vmem:[%s7030_s4] sm:$0xff] }
  0x1a   : > { %vm406_vm12 = vcmp.gt.f32.partialorder %v377_v56, 0.5  ;;  %v436_v57 = vsel %vm407_vm11, 1, %v4875_v3  ;;  %808 = vmatpush.bf16.msra.mxu1 %v4790_v59  ;;  %v5039_v60 = vld [vmem:[%s7030_s4 + $0x28] sm:$0xff]  ;;  %v4792_v62 = vld [vmem:[%s7030_s4 + $0x18] sm:$0xff]  ;;  %v5053_v63 = vld [vmem:[%s7030_s4 + $0x20] sm:$0xff]  ;;  %s7381_s19 = smov (!%p215_p3, %s4217_s19), 1 }
  0x1b   : > { %v435_v58 = vsel %vm406_vm12, 1, %v4875_v3  ;;  %936 = vmatpush.bf16.msra.mxu2 %v5039_v60  ;;  %724 = vmatpush.bf16.msra.mxu0 %v4792_v62  ;;  %v4791_v1 = vld [vmem:[%s7030_s4 + $0x10] sm:$0xff]  ;;  %s4849_s21 = smul.u32 232, %s7381_s19  ;;  %v4802_v2 = vld [vmem:[%s7030_s4 + $0x68] sm:$0xff]  ;;  %v4800_v4 = vld [vmem:[%s7030_s4 + $0x58] sm:$0xff]  ;;  %vm690_vm3 = vcmask 261120  }
  0x1c   : > { %4843 = vmatpush.bf16.msra.mxu3 %v4792_v62  ;;  %v4798_v3 = vld [vmem:[%s7030_s4 + $0x48] sm:$0xff]  ;;  %v5083_v8 = vld [vmem:[%s7027_s1] ss:$0 sm:$0xff]  ;;  %vm871_vm5 = vcmask 1046528   ;;  %vm1007_vm6 = vcmask 1044480   ;;  %s4850_s15 = smul.u32 144, %s7381_s19 }
  0x1d   : > { %s5076_s30 = scalar_lea.vmem %s7026_s0, %s4849_s21  ;;  %vm601_vm8 = vsmask.f32 7424 }
  0x1e   : > { %450 = vperm.xlu2 %4862, %v412_v16   ;;  %486 = vperm.xlu0 %4860, %v424_v18   ;;  %v240_v6 = vld [vmem:[%s5076_s30 + $0x70] sm:$0xff]  ;;  %v230_v7 = vld [vmem:[%s5076_s30 + $0x20] sm:$0xff]  ;;  %v241_v9 = vld [vmem:[%s5076_s30 + $0x78] sm:$0xff]  ;;  %s6968_s20 = scalar_lea.vmem %s7031_s5, %s4850_s15 }
  0x1f   : > { %489 = vperm.xlu1 %4861, %v425_v17   ;;  %809 = vmatpush.bf16.msra.mxu1 %v4789_v61  ;;  %v228_v10 = vld [vmem:[%s5076_s30 + $0x10] sm:$0xff]  ;;  %v229_v11 = vld [vmem:[%s5076_s30 + $0x18] sm:$0xff]  ;;  %v273_v12 = vmul.f32 %v5083_v8, %v240_v6  ;;  %v263_v13 = vmul.f32 %v5083_v8, %v230_v7  ;;  %v226_v14 = vld [vmem:[%s5076_s30] sm:$0xff]  ;;  %v274_v16 = vmul.f32 %v5083_v8, %v241_v9 }
  0x20   : > { %937 = vmatpush.bf16.msra.mxu2 %v5053_v63  ;;  %725 = vmatpush.bf16.msra.mxu0 %v4791_v1  ;;  %v227_v15 = vld [vmem:[%s5076_s30 + $0x8] sm:$0xff]  ;;  %v5096_v17 = vld [vmem:[%s7028_s2] ss:$0 sm:$0xff]  ;;  %v261_v18 = vmul.f32 %v5083_v8, %v228_v10  ;;  %v262_v19 = vmul.f32 %v5083_v8, %v229_v11  ;;  %v259_v20 = vmul.f32 %v5083_v8, %v226_v14  ;;  %v232_v37 = vld [vmem:[%s5076_s30 + $0x30] sm:$0xff] }
  0x21   : > { %4844 = vmatpush.bf16.msra.mxu3 %v4791_v1  ;;  %v260_v21 = vmul.f32 %v5083_v8, %v227_v15  ;;  %v307_v25 = vadd.f32 %v5096_v17, %v274_v16  ;;  %v242_v33 = vld [vmem:[%s5076_s30 + $0x80] sm:$0xff] }
  0x22   : > { %v292_v31 = vadd.f32 %v5096_v17, %v259_v20 }
  0x23   : > { %1355 = vmatpush.bf16.msrb.mxu1 %v4800_v4  ;;  %v293_v32 = vadd.f32 %v5096_v17, %v260_v21 }
  0x24   : > { %1502 = vmatpush.bf16.msrb.mxu2 %v4802_v2  ;;  %1230 = vmatpush.bf16.msrb.mxu0 %v4798_v3 }
  0x25   : > { %4845 = vmatpush.bf16.msrb.mxu3 %v4790_v59  ;;  %v322_v43 = vmax.f32 %v293_v32, 0.0  ;;  %v244_v59 = vld [vmem:[%s5076_s30 + $0x90] sm:$0xff] }
  0x26   : > { %456 = vperm.xlu2 %4862, %v414_v22   ;;  %453 = vperm.xlu0 %4860, %v413_v24   ;;  %v306_v22 = vadd.f32 %v5096_v17, %v273_v12  ;;  %v277_v9 = vmul.f32 %v5083_v8, %v244_v59 }
  0x27   : > { %492 = vperm.xlu1 %4861, %v426_v23   ;;  %v296_v23 = vadd.f32 %v5096_v17, %v263_v13 }
  0x29   : > { %4846 = vmatpush.bf16.msrb.mxu3 %v4789_v61  ;;  %v231_v61 = vld [vmem:[%s5076_s30 + $0x28] sm:$0xff] }
  0x2a   : > { %v264_v10 = vmul.f32 %v5083_v8, %v231_v61 }
  0x2e   : > { %465 = vperm.xlu2 %4862, %v417_v28   ;;  %459 = vperm.xlu0 %4860, %v415_v30   ;;  %v294_v28 = vadd.f32 %v5096_v17, %v261_v18  ;;  %v243_v30 = vld [vmem:[%s5076_s30 + $0x88] sm:$0xff] }
  0x2f   : > { %462 = vperm.xlu1 %4861, %v416_v29   ;;  %v295_v29 = vadd.f32 %v5096_v17, %v262_v19  ;;  %v276_v38 = vmul.f32 %v5083_v8, %v243_v30 }
  0x30   : > { %v323_v39 = vmax.f32 %v294_v28, 0.0 }
  0x31   : > { %v309_v50 = vadd.f32 %v5096_v17, %v276_v38 }
  0x33   : > { %v338_v6 = vmax.f32 %v309_v50, 0.0 }
  0x36   : > { %474 = vperm.xlu2 %4862, %v420_v34   ;;  %468 = vperm.xlu0 %4860, %v418_v36   ;;  %v335_v34 = vmax.f32 %v306_v22, 0.0  ;;  %v336_v36 = vmax.f32 %v307_v25, 0.0  ;;  %v297_v25 = vadd.f32 %v5096_v17, %v264_v10  ;;  %v237_v10 = vld [vmem:[%s5076_s30 + $0x58] sm:$0xff] }
  0x37   : > { %471 = vperm.xlu1 %4861, %v419_v35   ;;  %v325_v35 = vmax.f32 %v296_v23, 0.0 }
  0x3e   : > { %498 = vperm.xlu2 %4862, %v428_v40   ;;  %477 = vperm.xlu0 %4860, %v421_v42   ;;  %v324_v40 = vmax.f32 %v295_v29, 0.0  ;;  %v321_v42 = vmax.f32 %v292_v31, 0.0  ;;  %v234_v29 = vld [vmem:[%s5076_s30 + $0x40] sm:$0xff] }
  0x3f   : > { %495 = vperm.xlu1 %4861, %v427_v41   ;;  %v275_v41 = vmul.f32 %v5083_v8, %v242_v33 }
  0x46   : > { %507 = vperm.xlu2 %4862, %v431_v46   ;;  %501 = vperm.xlu0 %4860, %v429_v48   ;;  %v265_v46 = vmul.f32 %v5083_v8, %v232_v37 }
  0x47   : > { %504 = vperm.xlu1 %4861, %v430_v47  }
  0x48   : > { %v5137_v3 = vadd.f32 %v5096_v17, %v265_v46  ;;  %v267_v46 = vmul.f32 %v5083_v8, %v234_v29 }
  0x4e   : > { %516 = vperm.xlu2 %4862, %v434_v52   ;;  %510 = vperm.xlu0 %4860, %v432_v54   ;;  %v235_v52 = vld [vmem:[%s5076_s30 + $0x48] sm:$0xff]  ;;  %v308_v54 = vadd.f32 %v5096_v17, %v275_v41 }
  0x4f   : > { %513 = vperm.xlu1 %4861, %v433_v53   ;;  %v268_v4 = vmul.f32 %v5083_v8, %v235_v52 }
  0x50   : > { %v337_v11 = vmax.f32 %v308_v54, 0.0 }
  0x56   : > { %519 = vperm.xlu0 %4860, %v435_v58  }
  0x57   : > { %522 = vperm.xlu1 %4861, %v436_v57  }
  0x68   : > { %v481_v0 = vpop.permute.xlu2 %480 }
  0x69   : > { %vm538_vm13 = vcmp.eq.s32.totalorder %v481_v0, 1 }
  0x6a   : > { %v5114_v44 = vsel %vm538_vm13, %v335_v34, 0.0  ;;  %vm1143_vm13 = vsmask.f32 4352 }
  0x70   : > { %v484_v5 = vpop.permute.xlu2 %483 }
  0x71   : > { %vm539_vm15 = vcmp.eq.s32.totalorder %v484_v5, 1 }
  0x72   : > { %v568_v48 = vsel %vm539_vm15, %v336_v36, 0.0  ;;  %v238_v36 = vld [vmem:[%s5076_s30 + $0x60] sm:$0xff] }
  0x73   : > { %v5130_v62 = vpack.c.bf16 %v568_v48, %v5114_v44 }
  0x75   : > { %v5149_v16 = vshll.u32 %v5130_v62, 16  ;;  %v5169_v34 = vshrl.u32 %v5130_v62, 16 }
  0x77   : > { %v7033_v33 = vrot.slane %v5149_v16, 1 }
  0x78   : > { %v451_v27 = vpop.permute.xlu2 %450 }
  0x79   : > { %vm528_vm14 = vcmp.eq.s32.totalorder %v451_v27, 1 }
  0x7a   : > { %v5116_v45 = vsel %vm528_vm14, %v325_v35, 0.0  ;;  %v233_v35 = vld [vmem:[%s5076_s30 + $0x38] sm:$0xff] }
  0x80   : > { %v439_v26 = vpop.permute.xlu0 %438  ;;  %v5132_v0 = vpop.permute.xlu2 %456 }
  0x81   : > { %v445_v24 = vpop.permute.xlu1 %444  ;;  %vm524_vm1 = vcmp.eq.s32.totalorder %v439_v26, 1  ;;  %vm530_vm10 = vcmp.eq.s32.totalorder %v5132_v0, 1 }
  0x82   : > { %vm526_vm0 = vcmp.eq.s32.totalorder %v445_v24, 1  ;;  %v553_v55 = vsel %vm524_vm1, %v321_v42, 0.0  ;;  %v310_v24 = vadd.f32 %v5096_v17, %v277_v9 }
  0x83   : > { %v555_v51 = vsel %vm526_vm0, %v323_v39, 0.0 }
  0x84   : > { %v339_v42 = vmax.f32 %v310_v24, 0.0 }
  0x88   : > { %v442_v49 = vpop.permute.xlu0 %441  ;;  %v5177_v41 = vpop.permute.xlu2 %465 }
  0x89   : > { %v448_v47 = vpop.permute.xlu1 %447  ;;  %vm525_vm4 = vcmp.eq.s32.totalorder %v442_v49, 1  ;;  %v266_v49 = vmul.f32 %v5083_v8, %v233_v35  ;;  %vm533_vm0 = vcmp.eq.s32.totalorder %v5177_v41, 1 }
  0x8a   : > { %vm527_vm2 = vcmp.eq.s32.totalorder %v448_v47, 1  ;;  %v554_v58 = vsel %vm525_vm4, %v322_v43, 0.0  ;;  %v5185_v47 = vadd.f32 %v5096_v17, %v268_v4 }
  0x8b   : > { %v556_v53 = vsel %vm527_vm2, %v324_v40, 0.0  ;;  %v582_v1 = vpack.c.bf16 %v554_v58, %v553_v55  ;;  %v5134_v2 = vpack.c.bf16 %v555_v51, %v554_v58  ;;  %v327_v40 = vmax.f32 %v5137_v3, 0.0 }
  0x8c   : > { %v5122_v56 = vpack.c.bf16 %v556_v53, %v555_v51  ;;  %v5125_v57 = vpack.c.bf16 %v5116_v45, %v556_v53  ;;  %v271_v51 = vmul.f32 %v5083_v8, %v238_v36  ;;  %v664_v53 = vor.u32 %v5169_v34, %v7033_v33 }
  0x8d   : > { %4253 = vmatmul.msk.bf16.vlgmr.msra.gmra.mxu1 %vm690_vm3, %v582_v1  ;;  %v872_v7 = vrot.slane %v582_v1, 1  ;;  %v605_v12 = vshll.u32 %v582_v1, 16  ;;  %v1008_v18 = vrot.slane %v582_v1, 3  ;;  %v603_v21 = vshrl.u32 %v582_v1, 16 }
  0x8e   : > { %v873_v5 = vrot.slane %v5122_v56, 1  ;;  %v610_v13 = vshll.u32 %v5122_v56, 16  ;;  %v1009_v19 = vrot.slane %v5122_v56, 3  ;;  %v614_v38 = vshrl.u32 %v5122_v56, 16 }
  0x8f   : > { %v607_v22 = vrot.slane %v605_v12, 1  ;;  %v1144_v39 = vrot.slane %v603_v21, 3  ;;  %v1145_v50 = vrot.slane %v605_v12, 4  ;;  %v300_v3 = vadd.f32 %v5096_v17, %v267_v46  ;;  %v239_v46 = vld [vmem:[%s5076_s30 + $0x68] sm:$0xff] }
  0x90   : > { %v874_v15 = vsel %vm871_vm5, %v872_v7, %v873_v5  ;;  %v487_v20 = vpop.permute.xlu0 %486  ;;  %v5155_v28 = vrot.slane %v610_v13, 1  ;;  %v5161_v30 = vsel %vm1007_vm6, %v1008_v18, %v1009_v19  ;;  %v1147_v59 = vrot.slane %v614_v38, 3 }
  0x91   : > { %v490_v14 = vpop.permute.xlu1 %489  ;;  %4274 = vmatmul.msk.bf16.vlgmr.msra.gmra.mxu2 %vm690_vm3, %v874_v15  ;;  %vm540_vm9 = vcmp.eq.s32.totalorder %v487_v20, 1  ;;  %v608_v27 = vor.u32 %v607_v22, %v603_v21  ;;  %v1146_v58 = vor.u32 %v1145_v50, %v1144_v39  ;;  %v1148_v61 = vrot.slane %v610_v13, 4 }
  0x92   : > { %vm541_vm7 = vcmp.eq.s32.totalorder %v490_v14, 1  ;;  %v569_v26 = vsel %vm540_vm9, %v337_v11, 0.0  ;;  %v559_v4 = vsel %vm530_vm10, %v327_v40, 0.0  ;;  %v299_v9 = vadd.f32 %v5096_v17, %v266_v49  ;;  %v236_v14 = vld [vmem:[%s5076_s30 + $0x50] sm:$0xff] }
  0x93   : > { %v570_v23 = vsel %vm541_vm7, %v338_v6, 0.0  ;;  %v5165_v32 = vpack.c.bf16 %v569_v26, %v568_v48  ;;  %v613_v37 = vsel %vm601_vm8, %v608_v27, %v5155_v28  ;;  %v326_v48 = vmax.f32 %v297_v25, 0.0  ;;  %v475_v27 = vpop.permute.xlu2 %474 }
  0x94   : > { %v5163_v31 = vpack.c.bf16 %v570_v23, %v569_v26  ;;  %4236 = vmatmul.msk.bf16.vlgmr.msra.gmra.mxu0 %vm690_vm3, %v613_v37  ;;  %v304_v11 = vadd.f32 %v5096_v17, %v271_v51  ;;  %v5223_v18 = vor.u32 %v1148_v61, %v1147_v59  ;;  %v329_v20 = vmax.f32 %v300_v3, 0.0 }
  0x95   : > { %7140 = vst [vmem:[#allocation2_spill] sm:$0xff] %v5165_v32  ;;  %v270_v22 = vmul.f32 %v5083_v8, %v237_v10  ;;  %v269_v24 = vmul.f32 %v5083_v8, %v236_v14  ;;  %v330_v26 = vmax.f32 %v5185_v47, 0.0  ;;  %v616_v50 = vor.u32 %v614_v38, %v5155_v28  ;;  %v248_v10 = vld [vmem:[%s5076_s30 + $0xb0] sm:$0xff] }
  0x96   : > { %v5181_v43 = vshll.u32 %v5163_v31, 16  ;;  %v5236_v25 = vsel %vm1143_vm13, %v1146_v58, %v5223_v18  ;;  %v333_v29 = vmax.f32 %v304_v11, 0.0  ;;  %vm536_vm1 = vcmp.eq.s32.totalorder %v475_v27, 1  ;;  %v247_v11 = vld [vmem:[%s5076_s30 + $0xa8] sm:$0xff] }
  0x97   : > { %v302_v51 = vadd.f32 %v5096_v17, %v269_v24  ;;  %v272_v58 = vmul.f32 %v5083_v8, %v239_v46  ;;  %v5267_v61 = vshrl.u32 %v5163_v31, 16 }
  0x98   : > { %7141 = vst [vmem:[#allocation3_spill] sm:$0xff] %v5181_v43  ;;  %v668_v54 = vrot.slane %v5181_v43, 1  ;;  %v454_v55 = vpop.permute.xlu0 %453 }
  0x99   : > { %v493_v52 = vpop.permute.xlu1 %492  ;;  %vm529_vm12 = vcmp.eq.s32.totalorder %v454_v55, 1  ;;  %7144 = vst [vmem:[#allocation6_spill] sm:$0xff] %v5267_v61  ;;  %v305_v24 = vadd.f32 %v5096_v17, %v272_v58 }
  0x9a   : > { %vm542_vm11 = vcmp.eq.s32.totalorder %v493_v52, 1  ;;  %v5201_v0 = vsel %vm601_vm8, %v664_v53, %v668_v54  ;;  %v558_v7 = vsel %vm529_vm12, %v326_v48, 0.0  ;;  %v249_v52 = vld [vmem:[%s5076_s30 + $0xb8] sm:$0xff] }
  0x9b   : > { %v5196_v1 = vsel %vm542_vm11, %v339_v42, 0.0  ;;  %7142 = vst [vmem:[#allocation4_spill] sm:$0xff] %v5201_v0  ;;  %4243 = vmatmul.msk.bf16.vlgmr.msra.gmra.mxu3 %vm690_vm3, %v5201_v0  ;;  %v5213_v12 = vpack.c.bf16 %v558_v7, %v5116_v45  ;;  %v5215_v13 = vpack.c.bf16 %v559_v4, %v558_v7  ;;  %v245_v42 = vld [vmem:[%s5076_s30 + $0x98] sm:$0xff]  ;;  %v282_v14 = vmul.f32 %v5083_v8, %v249_v52 }
  0x9c   : > { %v5205_v6 = vpack.c.bf16 %v5196_v1, %v570_v23  ;;  %4847 = vmatpush.bf16.msra.mxu3 %v5039_v60  ;;  %v5221_v15 = vpack.c.bf16 %v5196_v1, %v5196_v1  ;;  %v246_v60 = vld [vmem:[%s5076_s30 + $0xa0] sm:$0xff]  ;;  %v328_v23 = vmax.f32 %v299_v9, 0.0  ;;  %v278_v55 = vmul.f32 %v5083_v8, %v245_v42  ;;  %v499_v42 = vpop.permute.xlu2 %498 }
  0x9d   : > { %4254 = vmatmul.msk.bf16.gmra.mxu1 %vm690_vm3, %v5122_v56  ;;  %v875_v21 = vrot.slane %v5213_v12, 1  ;;  %v5229_v45 = vshll.u32 %v5213_v12, 16  ;;  %v7032_v47 = vrot.slane %v5213_v12, 3  ;;  %v279_v48 = vmul.f32 %v5083_v8, %v246_v60 }
  0x9e   : > { %7143 = vst [vmem:[#allocation5_spill] sm:$0xff] %v5205_v6  ;;  %v7034_v40 = vshll.u32 %v5221_v15, 16  ;;  %v5291_v56 = vshrl.u32 %v5213_v12, 16  ;;  %vm544_vm7 = vcmp.eq.s32.totalorder %v499_v42, 1 }
  0x9f   : > { %v876_v36 = vsel %vm871_vm5, %v873_v5, %v875_v21  ;;  %v620_v39 = vrot.slane %v5229_v45, 1  ;;  %v303_v5 = vadd.f32 %v5096_v17, %v270_v22  ;;  %v5276_v38 = vsel %vm1007_vm6, %v1009_v19, %v7032_v47 }
  0xa0   : > { %4848 = vmatpush.bf16.msra.mxu3 %v5053_v63  ;;  %v460_v37 = vpop.permute.xlu0 %459  ;;  %v676_v28 = vrot.slane %v7034_v40, 1  ;;  %v312_v3 = vadd.f32 %v5096_v17, %v279_v48  ;;  %v5288_v22 = vor.u32 %v5267_v61, %v668_v54  ;;  %v562_v19 = vsel %vm533_vm0, %v330_v26, 0.0 }
  0xa1   : > { %v463_v35 = vpop.permute.xlu1 %462  ;;  %4275 = vmatmul.msk.bf16.gmra.mxu2 %vm690_vm3, %v876_v36  ;;  %vm531_vm15 = vcmp.eq.s32.totalorder %v460_v37, 1  ;;  %v621_v59 = vsel %vm601_vm8, %v616_v50, %v620_v39  ;;  %v332_v9 = vmax.f32 %v303_v5, 0.0  ;;  %v281_v54 = vmul.f32 %v5083_v8, %v248_v10  ;;  %v4801_v10 = vld [vmem:[%s7030_s4 + $0x60] sm:$0xff] }
  0xa2   : > { %vm532_vm14 = vcmp.eq.s32.totalorder %v463_v35, 1  ;;  %v560_v63 = vsel %vm531_vm15, %v328_v23, 0.0  ;;  %7145 = vst [vmem:[#allocation7_spill] sm:$0xff] %v5288_v22  ;;  %v311_v23 = vadd.f32 %v5096_v17, %v278_v55  ;;  %v677_v36 = vsel %vm601_vm8, %v5288_v22, %v676_v28  ;;  %1503 = vmatpush.bf16.msrb.mxu2 %v4801_v10 }
  0xa3   : > { %v561_v49 = vsel %vm532_vm14, %v329_v20, 0.0  ;;  %v5279_v7 = vpack.c.bf16 %v560_v63, %v559_v4  ;;  %v331_v20 = vmax.f32 %v302_v51, 0.0  ;;  %v565_v4 = vsel %vm536_vm1, %v333_v29, 0.0 }
  0xa4   : > { %v5259_v53 = vpack.c.bf16 %v561_v49, %v560_v63  ;;  %4237 = vmatmul.msk.bf16.gmra.mxu0 %vm690_vm3, %v621_v59  ;;  %v280_v37 = vmul.f32 %v5083_v8, %v247_v11  ;;  %v5302_v46 = vpack.c.bf16 %v562_v19, %v561_v49  ;;  %v1151_v5 = vrot.slane %v5291_v56, 3  ;;  %v4797_v11 = vld [vmem:[%s7030_s4 + $0x40] sm:$0xff]  ;;  %v508_v10 = vpop.permute.xlu2 %507 }
  0xa5   : > { %v5305_v26 = vshrl.u32 %v5279_v7, 16  ;;  %v5311_v48 = vshll.u32 %v5279_v7, 16  ;;  %v341_v63 = vmax.f32 %v312_v3, 0.0  ;;  %v7036_v49 = vrot.slane %v5279_v7, 1  ;;  %1231 = vmatpush.bf16.msrb.mxu0 %v4797_v11 }
  0xa6   : > { %v315_v51 = vadd.f32 %v5096_v17, %v282_v14  ;;  %v340_v52 = vmax.f32 %v311_v23, 0.0  ;;  %v1152_v55 = vrot.slane %v5229_v45, 4  ;;  %v334_v59 = vmax.f32 %v305_v24, 0.0  ;;  %v4799_v14 = vld [vmem:[%s7030_s4 + $0x50] sm:$0xff] }
  0xa7   : > { %v314_v28 = vadd.f32 %v5096_v17, %v281_v54  ;;  %v1155_v3 = vrot.slane %v5305_v26, 3  ;;  %v5340_v23 = vsel %vm544_vm7, %v341_v63, 0.0  ;;  %v5351_v54 = vshll.u32 %v5302_v46, 16  ;;  %1356 = vmatpush.bf16.msrb.mxu1 %v4799_v14  ;;  %v250_v14 = vld [vmem:[%s5076_s30 + $0xc0] sm:$0xff] }
  0xa8   : > { %v469_v35 = vpop.permute.xlu0 %468  ;;  %v7035_v42 = vrot.slane %v5311_v48, 1  ;;  %vm547_vm11 = vcmp.eq.s32.totalorder %v508_v10, 1  ;;  %vm2461_vm7 = vsmask.f32 6400 }
  0xa9   : > { %v472_v60 = vpop.permute.xlu1 %471  ;;  %vm534_vm4 = vcmp.eq.s32.totalorder %v469_v35, 1  ;;  %v878_v35 = vsel %vm871_vm5, %v875_v21, %v7036_v49 }
  0xaa   : > { %vm535_vm2 = vcmp.eq.s32.totalorder %v472_v60, 1  ;;  %v563_v29 = vsel %vm534_vm4, %v331_v20, 0.0  ;;  %v5336_v20 = vshrl.u32 %v5302_v46, 16  ;;  %v1156_v60 = vrot.slane %v5311_v48, 4 }
  0xab   : > { %v564_v41 = vsel %vm535_vm2, %v332_v9, 0.0  ;;  %4244 = vmatmul.msk.bf16.gmra.mxu3 %vm690_vm3, %v677_v36  ;;  %v5314_v50 = vpack.c.bf16 %v563_v29, %v562_v19  ;;  %v313_v9 = vadd.f32 %v5096_v17, %v280_v37  ;;  %v1153_v19 = vor.u32 %v1152_v55, %v1151_v5 }
  0xac   : > { %v5307_v27 = vpack.c.bf16 %v565_v4, %v564_v41  ;;  %v5319_v58 = vpack.c.bf16 %v564_v41, %v563_v29  ;;  %v624_v36 = vor.u32 %v5291_v56, %v620_v39  ;;  %v1157_v21 = vor.u32 %v1156_v60, %v1155_v3  ;;  %v517_v61 = vpop.permute.xlu2 %516 }
  0xad   : > { %4255 = vmatmul.msk.bf16.gmra.mxu1 %vm690_vm3, %v5213_v12  ;;  %v5357_v41 = vsel %vm1143_vm13, %v5223_v18, %v1153_v19  ;;  %v1159_v3 = vrot.slane %v5336_v20, 3  ;;  %vm550_vm1 = vcmp.eq.s32.totalorder %v517_v61, 1  ;;  %v4795_v61 = vld [vmem:[%s7030_s4 + $0x30] sm:$0xff]  ;;  %vm1573_vm4 = vsmask.f32 5376 }
  0xae   : > { %v5362_v39 = vshll.u32 %v5319_v58, 16  ;;  %v5365_v5 = vshrl.u32 %v5319_v58, 16  ;;  %v5384_v60 = vsel %vm1143_vm13, %v1153_v19, %v1157_v21  ;;  %v283_v19 = vmul.f32 %v5083_v8, %v250_v14 }
  0xb0   : > { %v478_v37 = vpop.permute.xlu0 %477 }
  0xb1   : > { %v496_v24 = vpop.permute.xlu1 %495  ;;  %4276 = vmatmul.msk.bf16.gmra.mxu2 %vm690_vm3, %v878_v35  ;;  %vm537_vm10 = vcmp.eq.s32.totalorder %v478_v37, 1  ;;  %v1160_v35 = vrot.slane %v5351_v54, 4  ;;  %v342_v37 = vmax.f32 %v313_v9, 0.0 }
  0xb2   : > { %vm543_vm9 = vcmp.eq.s32.totalorder %v496_v24, 1  ;;  %v5375_v55 = vsel %vm537_vm10, %v334_v59, 0.0  ;;  %v344_v24 = vmax.f32 %v315_v51, 0.0  ;;  %v343_v59 = vmax.f32 %v314_v28, 0.0 }
  0xb3   : > { %v5359_v29 = vsel %vm543_vm9, %v340_v52, 0.0  ;;  %v251_v52 = vld [vmem:[%s5076_s30 + $0xc8] sm:$0xff]  ;;  %v5380_v11 = vpack.c.bf16 %v5375_v55, %v565_v4  ;;  %v1163_v4 = vrot.slane %v5365_v5, 3  ;;  %v1161_v33 = vor.u32 %v1160_v35, %v1159_v3 }
  0xb4   : > { %7146 = vst [vmem:[#allocation8_spill] sm:$0xff] %v5359_v29  ;;  %v5369_v63 = vpack.c.bf16 %v5359_v29, %v5196_v1  ;;  %v5373_v18 = vpack.c.bf16 %v5340_v23, %v5359_v29  ;;  %v629_v1 = vsel %vm601_vm8, %v624_v36, %v7035_v42  ;;  %v284_v47 = vmul.f32 %v5083_v8, %v251_v52 }
  0xb5   : > { %4238 = vmatmul.msk.bf16.gmra.mxu0 %vm690_vm3, %v629_v1  ;;  %v1164_v51 = vrot.slane %v5362_v39, 4  ;;  %v5396_v36 = vshll.u32 %v5380_v11, 16  ;;  %v5399_v28 = vshrl.u32 %v5380_v11, 16  ;;  %v5402_v9 = vsel %vm1143_vm13, %v1157_v21, %v1161_v33  ;;  %v252_v1 = vld [vmem:[%s5076_s30 + $0xd0] sm:$0xff] }
  0xb6   : > { %7147 = vst [vmem:[#allocation9_spill] sm:$0xff] %v5369_v63  ;;  %v5404_v10 = vsel %vm547_vm11, %v344_v24, 0.0  ;;  %v317_v3 = vadd.f32 %v5096_v17, %v284_v47  ;;  %v316_v21 = vadd.f32 %v5096_v17, %v283_v19  ;;  %v4796_v24 = vld [vmem:[%s7030_s4 + $0x38] sm:$0xff]  ;;  %v285_v19 = vmul.f32 %v5083_v8, %v252_v1 }
  0xb7   : > { %7148 = vst [vmem:[#allocation10_spill] sm:$0xff] %v5373_v18  ;;  %v1165_v52 = vor.u32 %v1164_v51, %v1163_v4  ;;  %v1167_v4 = vrot.slane %v5399_v28, 3  ;;  %v1168_v51 = vrot.slane %v5396_v36, 4  ;;  %v1179_v29 = vshrl.u32 %v5221_v15, 16 }
  0xb8   : > { %v502_v42 = vpop.permute.xlu0 %501  ;;  %7149 = vst [vmem:[#allocation11_spill] sm:$0xff] %v5404_v10  ;;  %v346_v49 = vmax.f32 %v317_v3, 0.0  ;;  %v7155_v3 = vrot.slane %v5311_v48, 1  ;;  %vm1437_vm9 = vcmask 1045504  }
  0xb9   : > { %v505_v40 = vpop.permute.xlu1 %504  ;;  %vm545_vm14 = vcmp.eq.s32.totalorder %v502_v42, 1  ;;  %v5423_v42 = vsel %vm1143_vm13, %v1161_v33, %v1165_v52  ;;  %v345_v33 = vmax.f32 %v316_v21, 0.0  ;;  %v5437_v0 = vor.u32 %v1168_v51, %v1167_v4 }
  0xba   : > { %vm546_vm12 = vcmp.eq.s32.totalorder %v505_v40, 1  ;;  %v5414_v35 = vsel %vm545_vm14, %v342_v37, 0.0  ;;  %v253_v37 = vld [vmem:[%s5076_s30 + $0xd8] sm:$0xff]  ;;  %v632_v1 = vor.u32 %v5305_v26, %v7155_v3  ;;  %v7156_v21 = vshll.u32 %v5221_v15, 16 }
  0xbb   : > { %v5406_v14 = vsel %vm546_vm12, %v343_v59, 0.0  ;;  %4260 = vmatmul.msk.bf16.vlgmr.msrb.gmra.mxu3 %vm690_vm3, %v5130_v62  ;;  %v879_v59 = vrot.slane %v5302_v46, 1  ;;  %v286_v22 = vmul.f32 %v5083_v8, %v253_v37  ;;  %v5452_v8 = vsel %vm1143_vm13, %v1165_v52, %v5437_v0 }
  0xbc   : > { %7150 = vst [vmem:[#allocation12_spill] sm:$0xff] %v5406_v14  ;;  %v5412_v40 = vpack.c.bf16 %v5404_v10, %v5406_v14  ;;  %v5427_v47 = vpack.c.bf16 %v5406_v14, %v5414_v35  ;;  %1072 = vmatpush.bf16.msrb.mxu3 %v4796_v24  ;;  %v7153_v14 = vrot.slane %v5279_v7, 1  ;;  %v5456_v37 = vrot.slane %v7156_v21, 4 }
  0xbd   : > { %4256 = vmatmul.msk.bf16.gmra.mxu1 %vm690_vm3, %v5279_v7  ;;  %v636_v51 = vrot.slane %v5351_v54, 1  ;;  %v5465_v3 = vrot.slane %v1179_v29, 3  ;;  %v2049_v29 = vrot.slane %v5305_v26, 2  ;;  %v881_v26 = vrot.slane %v5319_v58, 1 }
  0xbe   : > { %7151 = vst [vmem:[#allocation13_spill] sm:$0xff] %v5412_v40  ;;  %v5442_v24 = vsel %vm871_vm5, %v7153_v14, %v879_v59  ;;  %v318_v14 = vadd.f32 %v5096_v17, %v285_v19 }
  0xbf   : > { %7152 = vst [vmem:[#allocation14_spill] sm:$0xff] %v5427_v47  ;;  %v5472_v21 = vsel %vm601_vm8, %v632_v1, %v636_v51 }
  0xc0   : > { %7154 = vst [vmem:[#allocation15_spill] sm:$0xff] %v5442_v24  ;;  %v511_v43 = vpop.permute.xlu0 %510  ;;  %1073 = vmatpush.bf16.msrb.mxu3 %v4795_v61  ;;  %v2061_v61 = vrot.slane %v5399_v28, 2 }
  0xc1   : > { %v514_v10 = vpop.permute.xlu1 %513  ;;  %4277 = vmatmul.msk.bf16.gmra.mxu2 %vm690_vm3, %v5442_v24  ;;  %7157 = vst [vmem:[#allocation16_spill] sm:$0xff] %v5456_v37  ;;  %vm548_vm0 = vcmp.eq.s32.totalorder %v511_v43, 1  ;;  %v319_v24 = vadd.f32 %v5096_v17, %v286_v22  ;;  %v347_v43 = vmax.f32 %v318_v14, 0.0  ;;  %v2046_v17 = vrot.slane %v5291_v56, 2 }
  0xc2   : > { %vm549_vm15 = vcmp.eq.s32.totalorder %v514_v10, 1  ;;  %v5461_v10 = vsel %vm548_vm0, %v345_v33, 0.0  ;;  %7160 = vst [vmem:[#allocation19_spill] sm:$0xff] %v5465_v3  ;;  %v2047_v22 = vrot.slane %v5229_v45, 3  ;;  %v2053_v14 = vrot.slane %v5336_v20, 2 }
  0xc3   : > { %v5459_v4 = vsel %vm549_vm15, %v346_v49, 0.0  ;;  %7159 = vst [vmem:[#allocation18_spill] sm:$0xff] %v5461_v10  ;;  %v348_v19 = vmax.f32 %v319_v24, 0.0  ;;  %v5502_v24 = vsel %vm871_vm5, %v879_v59, %v881_v26  ;;  %v2058_v59 = vrot.slane %v5362_v39, 3 }
  0xc4   : > { %7158 = vst [vmem:[#allocation17_spill] sm:$0xff] %v5459_v4  ;;  %v5469_v52 = vpack.c.bf16 %v5459_v4, %v5461_v10  ;;  %v2050_v4 = vrot.slane %v5311_v48, 3  ;;  %v2048_v1 = vor.u32 %v2047_v22, %v2046_v17  ;;  %v5482_v10 = vsel %vm550_vm1, %v347_v43, 0.0 }
  0xc5   : > { %7162 = vst [vmem:[#allocation21_spill] sm:$0xff] %v5472_v21  ;;  %4239 = vmatmul.msk.bf16.gmra.mxu0 %vm690_vm3, %v5472_v21  ;;  %v644_v43 = vrot.slane %v5362_v39, 1  ;;  %v2057_v17 = vrot.slane %v5365_v5, 2  ;;  %v640_v22 = vor.u32 %v5336_v20, %v636_v51  ;;  %v885_v20 = vrot.slane %v5130_v62, 1 }
  0xc6   : > { %7161 = vst [vmem:[#allocation20_spill] sm:$0xff] %v5469_v52  ;;  %v2051_v56 = vor.u32 %v2050_v4, %v2049_v29  ;;  %v2054_v4 = vrot.slane %v5351_v54, 3  ;;  %v5521_v54 = vrot.slane %v5163_v31, 1  ;;  %v5628_v21 = vshll.u32 %v5205_v6, 16 }
  0xc7   : > { %7163 = vst [vmem:[#allocation22_spill] sm:$0xff] %v5482_v10 }
  0xc8   : > { %v520_v33 = vpop.permute.xlu0 %519  ;;  %v5497_v48 = vsel %vm1573_vm4, %v2048_v1, %v2051_v56  ;;  %7167 = vst [vmem:[#allocation26_spill] sm:$0xff] %v5502_v24  ;;  %v2059_v1 = vor.u32 %v2058_v59, %v2057_v17  ;;  %v4804_v17 = vld [vmem:[%s7030_s4 + $0x78] sm:$0xff]  ;;  %v7056_v59 = vshll.u32 %v5215_v13, 16 }
  0xc9   : > { %vm551_vm2 = vcmp.eq.s32.totalorder %v520_v33, 1  ;;  %7166 = vst [vmem:[#allocation25_spill] sm:$0xff] %v5497_v48  ;;  %v5516_v33 = vsel %vm601_vm8, %v640_v22, %v644_v43  ;;  %v7055_v22 = vshrl.u32 %v5215_v13, 16 }
  0xca   : > { %v5484_v49 = vsel %vm551_vm2, %v348_v19, 0.0  ;;  %v2055_v19 = vor.u32 %v2054_v4, %v2053_v14  ;;  %7169 = vst [vmem:[#allocation28_spill] sm:$0xff] %v5516_v33  ;;  %v2062_v14 = vrot.slane %v5396_v36, 3 }
  0xcb   : > { %7164 = vst [vmem:[#allocation23_spill] sm:$0xff] %v5484_v49  ;;  %4261 = vmatmul.msk.bf16.gmra.mxu3 %vm690_vm3, %v5163_v31  ;;  %v5493_v45 = vpack.c.bf16 %v5484_v49, %v5482_v10  ;;  %v2463_v49 = vrot.slane %v7056_v59, 2  ;;  %v7060_v10 = vshrl.u32 %v5259_v53, 16  ;;  %v4808_v59 = vld [vmem:[%s7030_s4 + $0x98] sm:$0xff] }
  0xcc   : > { %v5512_v29 = vsel %vm1573_vm4, %v2051_v56, %v2055_v19  ;;  %7170 = vst [vmem:[#allocation29_spill] sm:$0xff] %v5521_v54  ;;  %v5527_v51 = vsel %vm1573_vm4, %v2055_v19, %v2059_v1  ;;  %v5529_v39 = vor.u32 %v2062_v14, %v2061_v61  ;;  %v5533_v56 = vsel %vm871_vm5, %v885_v20, %v5521_v54  ;;  %v4810_v14 = vld [vmem:[%s7030_s4 + $0xa8] sm:$0xff] }
  0xcd   : > { %7165 = vst [vmem:[#allocation24_spill] sm:$0xff] %v5493_v45  ;;  %4257 = vmatmul.msk.bf16.gmra.mxu1 %vm690_vm3, %v5302_v46  ;;  %v883_v19 = vrot.slane %v5380_v11, 1  ;;  %v652_v61 = vrot.slane %v5396_v36, 1  ;;  %2145 = vmatpush.bf16.msra.mxu2 %v4810_v14  ;;  %v889_v36 = vrot.slane %v5221_v15, 1  ;;  %v5583_v14 = vpack.c.bf16 %v5114_v44, %v5375_v55 }
  0xce   : > { %7168 = vst [vmem:[#allocation27_spill] sm:$0xff] %v5512_v29  ;;  %v5537_v4 = vsel %vm1573_vm4, %v2059_v1, %v5529_v39  ;;  %1975 = vmatpush.bf16.msra.mxu1 %v4808_v59  ;;  %v5598_v44 = vshll.u32 %v5307_v27, 16 }
  0xcf   : > { %7171 = vst [vmem:[#allocation30_spill] sm:$0xff] %v5527_v51  ;;  %v5550_v1 = vsel %vm871_vm5, %v881_v26, %v883_v19  ;;  %v7061_v26 = vshll.u32 %v5259_v53, 16  ;;  %v5601_v55 = vshrl.u32 %v5583_v14, 16 }
  0xd0   : > { %7172 = vst [vmem:[#allocation31_spill] sm:$0xff] %v5529_v39 }
  0xd1   : > { %4278 = vmatmul.msk.bf16.gmra.mxu2 %vm690_vm3, %v5502_v24  ;;  %7173 = vst [vmem:[#allocation32_spill] sm:$0xff] %v5533_v56  ;;  %v5591_v24 = vshll.u32 %v5314_v50, 16  ;;  %v2477_v39 = vrot.slane %v5601_v55, 1 }
  0xd2   : > { %7174 = vst [vmem:[#allocation33_spill] sm:$0xff] %v5537_v4  ;;  %v656_v4 = vor.u32 %v5399_v28, %v652_v61  ;;  %v7183_v28 = vrot.slane %v5149_v16, 1 }
  0xd3   : > { %7175 = vst [vmem:[#allocation34_spill] sm:$0xff] %v5550_v1 }
  0xd4   : > { %7180 = vst [vmem:[#allocation39_spill] sm:$0xff] %v5628_v21 }
  0xd5   : > { %4240 = vmatmul.msk.bf16.gmra.mxu0 %vm690_vm3, %v5516_v33  ;;  %v890_v33 = vsel %vm871_vm5, %v5521_v54, %v889_v36  ;;  %v2470_v36 = vrot.slane %v5591_v24, 2  ;;  %v5625_v54 = vsel %vm871_vm5, %v883_v19, %v885_v20 }
  0xd6   : > { %7179 = vst [vmem:[#allocation38_spill] sm:$0xff] %v5625_v54 }
  0xdb   : > { %4281 = vmatmul.msk.bf16.vlgmr.msra.gmra.mxu3 %vm690_vm3, %v5533_v56  ;;  %v648_v56 = vor.u32 %v5365_v5, %v644_v43  ;;  %v2465_v5 = vrot.slane %v7060_v10, 1  ;;  %v2466_v43 = vrot.slane %v7061_v26, 2  ;;  %v5594_v10 = vshrl.u32 %v5307_v27, 16 }
  0xdc   : > { %1699 = vmatpush.bf16.msra.mxu3 %v4804_v17  ;;  %v2462_v17 = vrot.slane %v7055_v22, 1  ;;  %v4806_v22 = vld [vmem:[%s7030_s4 + $0x88] sm:$0xff] }
  0xdd   : > { %4258 = vmatmul.msk.bf16.gmra.mxu1 %vm690_vm3, %v5319_v58  ;;  %1834 = vmatpush.bf16.msra.mxu0 %v4806_v22  ;;  %v2467_v26 = vor.u32 %v2466_v43, %v2465_v5  ;;  %v5607_v22 = vshll.u32 %v5583_v14, 16  ;;  %v2473_v5 = vrot.slane %v5594_v10, 1  ;;  %v5621_v43 = vshrl.u32 %v5205_v6, 16 }
  0xdf   : > { %7178 = vst [vmem:[#allocation37_spill] sm:$0xff] %v5621_v43  ;;  %v2478_v29 = vrot.slane %v5607_v22, 2 }
  0xe1   : > { %4279 = vmatmul.msk.bf16.gmra.mxu2 %vm690_vm3, %v5550_v1  ;;  %v5566_v1 = vsel %vm601_vm8, %v648_v56, %v652_v61  ;;  %v2464_v56 = vor.u32 %v2463_v49, %v2462_v17  ;;  %v5616_v17 = vshll.u32 %v5165_v32, 16  ;;  %v5648_v61 = vsel %vm601_vm8, %v656_v4, %v7183_v28 }
  0xe2   : > { %7176 = vst [vmem:[#allocation35_spill] sm:$0xff] %v5566_v1  ;;  %v5666_v4 = vpack.c.bf16 %v5414_v35, %v5340_v23  ;;  %v7071_v28 = vshll.u32 %v5369_v63, 16  ;;  %v1438_v35 = vrot.slane %v5134_v2, 2 }
  0xe3   : > { %v5604_v49 = vsel %vm2461_vm7, %v2464_v56, %v2467_v26  ;;  %v2474_v56 = vrot.slane %v5598_v44, 2  ;;  %v2482_v19 = vrot.slane %v5616_v17, 2  ;;  %7184 = vst [vmem:[#allocation42_spill] sm:$0xff] %v5648_v61 }
  0xe4   : > { %7177 = vst [vmem:[#allocation36_spill] sm:$0xff] %v5604_v49 }
  0xe5   : > { %4241 = vmatmul.msk.bf16.gmra.mxu0 %vm690_vm3, %v5566_v1  ;;  %v5586_v1 = vshrl.u32 %v5314_v50, 16  ;;  %v2475_v51 = vor.u32 %v2474_v56, %v2473_v5  ;;  %v5654_v5 = vshrl.u32 %v5373_v18, 16  ;;  %7187 = vst [vmem:[#allocation45_spill] sm:$0xff] %v5666_v4 }
  0xe7   : > { %v2469_v59 = vrot.slane %v5586_v1, 1 }
  0xe9   : > { %v2471_v49 = vor.u32 %v2470_v36, %v2469_v59  ;;  %v2479_v59 = vor.u32 %v2478_v29, %v2477_v39  ;;  %v2485_v36 = vrot.slane %v5621_v43, 1 }
  0xeb   : > { %4282 = vmatmul.msk.bf16.gmra.mxu3 %vm690_vm3, %v890_v33  ;;  %v5613_v33 = vshrl.u32 %v5165_v32, 16  ;;  %v5636_v48 = vsel %vm2461_vm7, %v2467_v26, %v2471_v49  ;;  %v5641_v3 = vsel %vm2461_vm7, %v2471_v49, %v2475_v51  ;;  %v5651_v26 = vsel %vm2461_vm7, %v2475_v51, %v2479_v59 }
  0xec   : > { %7181 = vst [vmem:[#allocation40_spill] sm:$0xff] %v5636_v48  ;;  %v5657_v49 = vshll.u32 %v5373_v18, 16  ;;  %v2492_v51 = vrot.slane %v5654_v5, 1  ;;  %v3542_v18 = vrot.slane %v5586_v1, 3  ;;  %v5728_v48 = vshrl.u32 %v5427_v47, 16 }
  0xed   : > { %4259 = vmatmul.msk.bf16.gmra.mxu1 %vm690_vm3, %v5380_v11  ;;  %v2481_v20 = vrot.slane %v5613_v33, 1  ;;  %7182 = vst [vmem:[#allocation41_spill] sm:$0xff] %v5641_v3  ;;  %v3174_v3 = vrot.slane %v5616_v17, 1 }
  0xee   : > { %7185 = vst [vmem:[#allocation43_spill] sm:$0xff] %v5651_v26  ;;  %v2495_v56 = vrot.slane %v5657_v49, 2 }
  0xef   : > { %v2483_v37 = vor.u32 %v2482_v19, %v2481_v20  ;;  %7196 = vst [vmem:[#allocation54_spill] sm:$0xff] %v5728_v48 }
  0xf0   : > { %v5673_v19 = vor.u32 %v2495_v56, %v2492_v51 }
  0xf1   : > { %4280 = vmatmul.msk.bf16.gmra.mxu2 %vm690_vm3, %v5625_v54  ;;  %v2486_v54 = vrot.slane %v5628_v21, 2  ;;  %v5662_v29 = vsel %vm2461_vm7, %v2479_v59, %v2483_v37  ;;  %v7074_v59 = vrot.slane %v5125_v57, 2 }
  0xf2   : > { %7186 = vst [vmem:[#allocation44_spill] sm:$0xff] %v5662_v29 }
  0xf3   : > { %v2487_v39 = vor.u32 %v2486_v54, %v2485_v36  ;;  %7189 = vst [vmem:[#allocation47_spill] sm:$0xff] %v5673_v19  ;;  %v2086_v54 = vshll.u32 %v5666_v4, 16  ;;  %v5690_v36 = vrot.slane %v7071_v28, 1  ;;  %v3166_v28 = vrot.slane %v5591_v24, 1 }
  0xf5   : > { %4242 = vmatmul.msk.bf16.gmra.mxu0 %vm690_vm3, %v5648_v61  ;;  %v5671_v20 = vsel %vm2461_vm7, %v2483_v37, %v2487_v39  ;;  %v5681_v23 = vsel %vm2461_vm7, %v2487_v39, %v5673_v19  ;;  %v7075_v37 = vshrl.u32 %v5369_v63, 16  ;;  %7191 = vst [vmem:[#allocation49_spill] sm:$0xff] %v5690_v36  ;;  %v2837_v51 = vrot.slane %v2086_v54, 1 }
  0xf6   : > { %7188 = vst [vmem:[#allocation46_spill] sm:$0xff] %v5671_v20  ;;  %v1440_v39 = vsel %vm1437_vm9, %v1438_v35, %v7074_v59  ;;  %v3543_v20 = vrot.slane %v5591_v24, 4  ;;  %v3545_v35 = vrot.slane %v5594_v10, 3  ;;  %v2088_v29 = vrot.slane %v2086_v54, 3 }
  0xf7   : > { %7190 = vst [vmem:[#allocation48_spill] sm:$0xff] %v5681_v23  ;;  %v2836_v56 = vor.u32 %v5690_v36, %v7075_v37  ;;  %v3168_v23 = vrot.slane %v5598_v44, 1  ;;  %v3167_v37 = vor.u32 %v3166_v28, %v5586_v1  ;;  %v3553_v54 = vrot.slane %v5613_v33, 3 }
  0xf9   : > { %v5703_v19 = vsel %vm601_vm8, %v2836_v56, %v2837_v51  ;;  %v3171_v56 = vrot.slane %v5607_v22, 1  ;;  %v5719_v26 = vsel %vm601_vm8, %v3167_v37, %v3168_v23 }
  0xfa   : > { %7193 = vst [vmem:[#allocation51_spill] sm:$0xff] %v5703_v19  ;;  %v3549_v19 = vrot.slane %v5601_v55, 3 }
  0xfb   : > { %4295 = vmatmul.msk.bf16.vlgmr.msrb.gmra.mxu3 %vm690_vm3, %v5161_v30  ;;  %v2083_v30 = vshrl.u32 %v5666_v4, 16  ;;  %7194 = vst [vmem:[#allocation52_spill] sm:$0xff] %v5719_v26 }
  0xfd   : > { %4337 = vmatmul.msk.bf16.vlgmr.msrb.gmra.mxu1 %vm690_vm3, %v5134_v2  ;;  %v5700_v61 = vor.u32 %v2837_v51, %v2083_v30  ;;  %v3170_v51 = vor.u32 %v3168_v23, %v5594_v10  ;;  %v2085_v36 = vrot.slane %v2083_v30, 2  ;;  %v3554_v23 = vrot.slane %v5616_v17, 4 }
  0xfe   : > { %v3176_v30 = vor.u32 %v3174_v3, %v5613_v33 }
  0xff   : > { %7192 = vst [vmem:[#allocation50_spill] sm:$0xff] %v5700_v61  ;;  %v3544_v61 = vor.u32 %v3543_v20, %v3542_v18  ;;  %v5722_v28 = vsel %vm601_vm8, %v3170_v51, %v3171_v56  ;;  %v3550_v18 = vrot.slane %v5607_v22, 4  ;;  %v3173_v20 = vor.u32 %v3171_v56, %v5601_v55 }
 0x100   : > { %7195 = vst [vmem:[#allocation53_spill] sm:$0xff] %v5722_v28  ;;  %v5739_v51 = vshll.u32 %v5427_v47, 16  ;;  %v3555_v56 = vor.u32 %v3554_v23, %v3553_v54  ;;  %v3558_v28 = vrot.slane %v5628_v21, 4  ;;  %v3565_v54 = vrot.slane %v5728_v48, 3 }
 0x101   : > { %4358 = vmatmul.msk.bf16.vlgmr.msrb.gmra.mxu2 %vm690_vm3, %v1440_v39  ;;  %v3546_v39 = vrot.slane %v5598_v44, 4  ;;  %v3551_v37 = vor.u32 %v3550_v18, %v3549_v19  ;;  %v5749_v18 = vsel %vm601_vm8, %v3173_v20, %v3174_v3  ;;  %v3562_v3 = vrot.slane %v5657_v49, 4 }
 0x102   : > { %7198 = vst [vmem:[#allocation56_spill] sm:$0xff] %v5739_v51 }
 0x103   : > { %v3547_v59 = vor.u32 %v3546_v39, %v3545_v35  ;;  %v3177_v35 = vrot.slane %v5628_v21, 1  ;;  %v3557_v39 = vrot.slane %v5621_v43, 3  ;;  %7200 = vst [vmem:[#allocation58_spill] sm:$0xff] %v5749_v18  ;;  %v5757_v23 = vsel %vm1143_vm13, %v3551_v37, %v3555_v56 }
 0x104   : > { %7202 = vst [vmem:[#allocation60_spill] sm:$0xff] %v5757_v23  ;;  %v3561_v21 = vrot.slane %v5654_v5, 3 }
 0x105   : > { %4316 = vmatmul.msk.bf16.vlgmr.msrb.gmra.mxu0 %vm690_vm3, %v5236_v25  ;;  %v5731_v25 = vsel %vm1143_vm13, %v3544_v61, %v3547_v59  ;;  %v3180_v61 = vrot.slane %v5657_v49, 1  ;;  %v5746_v19 = vsel %vm1143_vm13, %v3547_v59, %v3551_v37  ;;  %v5752_v26 = vsel %vm601_vm8, %v3176_v30, %v3177_v35 }
 0x106   : > { %7197 = vst [vmem:[#allocation55_spill] sm:$0xff] %v5731_v25  ;;  %v3179_v47 = vor.u32 %v3177_v35, %v5621_v43  ;;  %v3559_v4 = vor.u32 %v3558_v28, %v3557_v39  ;;  %v3563_v37 = vor.u32 %v3562_v3, %v3561_v21  ;;  %v7205_v28 = vrot.slane %v5215_v13, 2  ;;  %v7244_v43 = vld [vmem:[#allocation19_spill] sm:$0xff] }
 0x107   : > { %7199 = vst [vmem:[#allocation57_spill] sm:$0xff] %v5746_v19  ;;  %v3182_v20 = vor.u32 %v3180_v61, %v5654_v5  ;;  %v7206_v35 = vrot.slane %v5125_v57, 2  ;;  %v3566_v49 = vrot.slane %v5739_v51, 4  ;;  %v5780_v5 = vor.u32 %v2088_v29, %v2085_v36 }
 0x108   : > { %7201 = vst [vmem:[#allocation59_spill] sm:$0xff] %v5752_v26  ;;  %v5762_v59 = vsel %vm601_vm8, %v3179_v47, %v3180_v61  ;;  %v5769_v30 = vsel %vm1143_vm13, %v3555_v56, %v3559_v4  ;;  %v3183_v47 = vrot.slane %v5739_v51, 1  ;;  %v5783_v56 = vsel %vm1143_vm13, %v3559_v4, %v3563_v37 }
 0x109   : > { %7203 = vst [vmem:[#allocation61_spill] sm:$0xff] %v5762_v59  ;;  %v1442_v39 = vsel %vm1437_vm9, %v7206_v35, %v7205_v28  ;;  %v7209_v61 = vshll.u32 %v5412_v40, 16  ;;  %v5792_v35 = vor.u32 %v3566_v49, %v3565_v54  ;;  %v1013_v54 = vrot.slane %v5279_v7, 3 }
 0x10a   : > { %v811_v25 = vpop.f32.mrf.mxu1  ;;  %7204 = vst [vmem:[#allocation62_spill] sm:$0xff] %v5769_v30  ;;  %v5790_v28 = vsel %vm601_vm8, %v3182_v20, %v3183_v47  ;;  %v5795_v59 = vor.u32 %v3183_v47, %v5728_v48  ;;  %v7215_v47 = vrot.slane %v5213_v12, 3 }
 0x10b   : > { %4296 = vmatmul.msk.bf16.gmra.mxu3 %vm690_vm3, %v5276_v38  ;;  %v7082_v38 = vshrl.u32 %v5412_v40, 16  ;;  %7207 = vst [vmem:[#allocation63_spill] sm:$0xff] %v5780_v5  ;;  %v3910_v3 = vrot.slane %v7209_v61, 3 }
 0x10c   : > { %7208 = vst [vmem:[#allocation64_spill] sm:$0xff] %v5783_v56  ;;  %v5799_v56 = vsel %vm1143_vm13, %v3563_v37, %v5792_v35  ;;  %v3913_v37 = vshrl.u32 %v5469_v52, 16 }
 0x10d   : > { %4338 = vmatmul.msk.bf16.gmra.mxu1 %vm690_vm3, %v5125_v57  ;;  %v3909_v21 = vrot.slane %v7082_v38, 2  ;;  %7210 = vst [vmem:[#allocation65_spill] sm:$0xff] %v5790_v28 }
 0x10e   : > { %7211 = vst [vmem:[#allocation66_spill] sm:$0xff] %v5792_v35 }
 0x10f   : > { %7212 = vst [vmem:[#allocation67_spill] sm:$0xff] %v5795_v59  ;;  %v3911_v36 = vor.u32 %v3910_v3, %v3909_v21  ;;  %v3921_v59 = vshrl.u32 %v5493_v45, 16 }
 0x110   : > { %7213 = vst [vmem:[#allocation68_spill] sm:$0xff] %v5799_v56  ;;  %v7217_v56 = vrot.slane %v5215_v13, 2 }
 0x111   : > { %4359 = vmatmul.msk.bf16.gmra.mxu2 %vm690_vm3, %v1442_v39  ;;  %v727_v39 = vpop.f32.mrf.mxu0  ;;  %v5803_v61 = vsel %vm1573_vm4, %v5780_v5, %v3911_v36 }
 0x112   : > { %v813_v29 = vpop.f32.mrf.mxu1  ;;  %v812_v30 = vadd.f32 %v811_v25, %v727_v39  ;;  %7214 = vst [vmem:[#allocation69_spill] sm:$0xff] %v5803_v61  ;;  %v5813_v25 = vsel %vm1007_vm6, %v7215_v47, %v1013_v54 }
 0x113   : > { %7216 = vst [vmem:[#allocation70_spill] sm:$0xff] %v5813_v25 }
 0x114   : > { %v939_v4 = vpop.f32.mrf.mxu2 }
 0x115   : > { %v5805_v20 = vadd.f32 %v939_v4, %v812_v30  ;;  %4317 = vmatmul.msk.bf16.gmra.mxu0 %vm690_vm3, %v5357_v41  ;;  %v3916_v30 = vshll.u32 %v5469_v52, 16  ;;  %v1443_v41 = vrot.slane %v5259_v53, 2  ;;  %v3915_v4 = vrot.slane %v3913_v37, 2 }
 0x116   : > { %v3923_v37 = vrot.slane %v3921_v59, 2 }
 0x117   : > { %v3918_v38 = vrot.slane %v3916_v30, 3  ;;  %v5830_v28 = vsel %vm1437_vm9, %v7217_v56, %v1443_v41  ;;  %v3924_v30 = vshll.u32 %v5493_v45, 16  ;;  %v7086_v56 = vrot.slane %v5493_v45, 2 }
 0x118   : > { %7218 = vst [vmem:[#allocation71_spill] sm:$0xff] %v5830_v28 }
 0x119   : > { %v729_v49 = vpop.f32.mrf.mxu0  ;;  %v3919_v47 = vor.u32 %v3918_v38, %v3915_v4  ;;  %v7084_v38 = vrot.slane %v5493_v45, 3  ;;  %v7087_v4 = vrot.slane %v5469_v52, 2  ;;  %v3926_v18 = vrot.slane %v3924_v30, 3 }
 0x11a   : > { %v816_v21 = vpop.f32.mrf.mxu1  ;;  %v814_v3 = vadd.f32 %v813_v29, %v729_v49  ;;  %v7085_v49 = vrot.slane %v5469_v52, 3  ;;  %v1015_v30 = vrot.slane %v5302_v46, 3  ;;  %v1445_v45 = vrot.slane %v5314_v50, 2 }
 0x11b   : > { %4297 = vmatmul.msk.bf16.gmra.mxu3 %vm690_vm3, %v5813_v25  ;;  %v5835_v29 = vsel %vm1573_vm4, %v3911_v36, %v3919_v47  ;;  %v5854_v59 = vsel %vm1437_vm9, %v7087_v4, %v7086_v56 }
 0x11c   : > { %v941_v39 = vpop.f32.mrf.mxu2  ;;  %7219 = vst [vmem:[#allocation72_spill] sm:$0xff] %v5835_v29  ;;  %v5847_v36 = vsel %vm1007_vm6, %v7085_v49, %v7084_v38  ;;  %v5864_v38 = vor.u32 %v3926_v18, %v3923_v37  ;;  %v4809_v18 = vld [vmem:[%s7030_s4 + $0xa0] sm:$0xff] }
 0x11d   : > { %v5820_v61 = vadd.f32 %v941_v39, %v814_v3  ;;  %4339 = vmatmul.msk.bf16.gmra.mxu1 %vm690_vm3, %v5215_v13  ;;  %7220 = vst [vmem:[#allocation73_spill] sm:$0xff] %v5847_v36  ;;  %2146 = vmatpush.bf16.msra.mxu2 %v4809_v18  ;;  %v1017_v36 = vrot.slane %v5319_v58, 3 }
 0x11e   : > { %v5822_v35 = vpop.f32.mrf.mxu3  ;;  %7221 = vst [vmem:[#allocation74_spill] sm:$0xff] %v5854_v59  ;;  %v5868_v49 = vsel %vm1573_vm4, %v3919_v47, %v5864_v38 }
 0x11f   : > { %7222 = vst [vmem:[#allocation75_spill] sm:$0xff] %v5864_v38 }
 0x120   : > { %7223 = vst [vmem:[#allocation76_spill] sm:$0xff] %v5868_v49 }
 0x121   : > { %4360 = vmatmul.msk.bf16.gmra.mxu2 %vm690_vm3, %v5830_v28  ;;  %v732_v3 = vpop.f32.mrf.mxu0 }
 0x122   : > { %v818_v39 = vpop.f32.mrf.mxu1  ;;  %v817_v26 = vadd.f32 %v816_v21, %v732_v3  ;;  %v4803_v3 = vld [vmem:[%s7030_s4 + $0x70] sm:$0xff] }
 0x123   : > { %1700 = vmatpush.bf16.msra.mxu3 %v4803_v3  ;;  %v5890_v3 = vsel %vm1437_vm9, %v1443_v41, %v1445_v45  ;;  %v5900_v41 = vsel %vm1007_vm6, %v1015_v30, %v1017_v36 }
 0x124   : > { %v944_v23 = vpop.f32.mrf.mxu2  ;;  %7225 = vst [vmem:[#allocation78_spill] sm:$0xff] %v5890_v3 }
 0x125   : > { %v5856_v29 = vadd.f32 %v944_v23, %v817_v26  ;;  %4318 = vmatmul.msk.bf16.gmra.mxu0 %vm690_vm3, %v5384_v60  ;;  %v5871_v26 = vsel %vm1007_vm6, %v1013_v54, %v1015_v30  ;;  %v4805_v54 = vld [vmem:[%s7030_s4 + $0x80] sm:$0xff]  ;;  %7226 = vst [vmem:[#allocation79_spill] sm:$0xff] %v5900_v41 }
 0x126   : > { %v764_v21 = vpop.f32.mrf.mxu3  ;;  %7224 = vst [vmem:[#allocation77_spill] sm:$0xff] %v5871_v26  ;;  %1835 = vmatpush.bf16.msra.mxu0 %v4805_v54 }
 0x129   : > { %v734_v23 = vpop.f32.mrf.mxu0 }
 0x12a   : > { %v821_v56 = vpop.f32.mrf.mxu1  ;;  %v819_v60 = vadd.f32 %v818_v39, %v734_v23  ;;  %v4807_v39 = vld [vmem:[%s7030_s4 + $0x90] sm:$0xff] }
 0x12b   : > { %4298 = vmatmul.msk.bf16.gmra.mxu3 %vm690_vm3, %v5871_v26  ;;  %1976 = vmatpush.bf16.msra.mxu1 %v4807_v39 }
 0x12c   : > { %v946_v4 = vpop.f32.mrf.mxu2 }
 0x12d   : > { %v5879_v37 = vadd.f32 %v946_v4, %v819_v60  ;;  %4340 = vmatmul.msk.bf16.gmra.mxu1 %vm690_vm3, %v5259_v53 }
 0x12e   : > { %v767_v47 = vpop.f32.mrf.mxu3 }
 0x131   : > { %4361 = vmatmul.msk.bf16.gmra.mxu2 %vm690_vm3, %v5890_v3  ;;  %v5965_v3 = vrot.slane %v5163_v31, 3 }
 0x132   : > { %v737_v4 = vpop.f32.mrf.mxu0  ;;  %v823_v23 = vpop.f32.mrf.mxu1 }
 0x133   : > { %v822_v60 = vadd.f32 %v821_v56, %v737_v4  ;;  %v1447_v56 = vrot.slane %v5307_v27, 2  ;;  %7233 = vst [vmem:[#allocation86_spill] sm:$0xff] %v5965_v3 }
 0x134   : > { %v949_v18 = vpop.f32.mrf.mxu2 }
 0x135   : > { %v5894_v38 = vadd.f32 %v949_v18, %v822_v60  ;;  %4319 = vmatmul.msk.bf16.gmra.mxu0 %vm690_vm3, %v5402_v9  ;;  %v5911_v30 = vsel %vm1437_vm9, %v1445_v45, %v1447_v56 }
 0x136   : > { %v769_v59 = vpop.f32.mrf.mxu3  ;;  %7227 = vst [vmem:[#allocation80_spill] sm:$0xff] %v5911_v30 }
 0x13a   : > { %v739_v54 = vpop.f32.mrf.mxu0  ;;  %v826_v49 = vpop.f32.mrf.mxu1 }
 0x13b   : > { %4299 = vmatmul.msk.bf16.gmra.mxu3 %vm690_vm3, %v5900_v41  ;;  %v824_v39 = vadd.f32 %v823_v23, %v739_v54 }
 0x13c   : > { %v951_v52 = vpop.f32.mrf.mxu2 }
 0x13d   : > { %v5905_v4 = vadd.f32 %v951_v52, %v824_v39  ;;  %4341 = vmatmul.msk.bf16.gmra.mxu1 %vm690_vm3, %v5314_v50  ;;  %v1019_v39 = vrot.slane %v5380_v11, 3 }
 0x13e   : > { %v846_v60 = vpop.f32.mrf.mxu3 }
 0x13f   : > { %v847_v9 = vadd.f32 %v846_v60, %v5822_v35  ;;  %v5921_v35 = vsel %vm1007_vm6, %v1017_v36, %v1019_v39 }
 0x140   : > { %7228 = vst [vmem:[#allocation81_spill] sm:$0xff] %v5921_v35 }
 0x141   : > { %4362 = vmatmul.msk.bf16.gmra.mxu2 %vm690_vm3, %v5911_v30  ;;  %v1021_v30 = vrot.slane %v5130_v62, 3 }
 0x142   : > { %v742_v18 = vpop.f32.mrf.mxu0  ;;  %v828_v19 = vpop.f32.mrf.mxu1 }
 0x143   : > { %v827_v23 = vadd.f32 %v826_v49, %v742_v18  ;;  %v1449_v18 = vrot.slane %v5583_v14, 2 }
 0x144   : > { %v954_v54 = vpop.f32.mrf.mxu2 }
 0x145   : > { %v5915_v40 = vadd.f32 %v954_v54, %v827_v23  ;;  %4320 = vmatmul.msk.bf16.gmra.mxu0 %vm690_vm3, %v5423_v42 }
 0x146   : > { %v848_v52 = vpop.f32.mrf.mxu3 }
 0x147   : > { %v849_v51 = vadd.f32 %v848_v52, %v764_v21  ;;  %v5931_v21 = vsel %vm1437_vm9, %v1447_v56, %v1449_v18 }
 0x148   : > { %7229 = vst [vmem:[#allocation82_spill] sm:$0xff] %v5931_v21 }
 0x14a   : > { %v744_v45 = vpop.f32.mrf.mxu0  ;;  %v831_v60 = vpop.f32.mrf.mxu1 }
 0x14b   : > { %4300 = vmatmul.msk.bf16.gmra.mxu3 %vm690_vm3, %v5921_v35  ;;  %v829_v48 = vadd.f32 %v828_v19, %v744_v45 }
 0x14c   : > { %v956_v49 = vpop.f32.mrf.mxu2 }
 0x14d   : > { %v5926_v23 = vadd.f32 %v956_v49, %v829_v48  ;;  %4342 = vmatmul.msk.bf16.gmra.mxu1 %vm690_vm3, %v5307_v27 }
 0x14e   : > { %v851_v54 = vpop.f32.mrf.mxu3 }
 0x14f   : > { %v852_v42 = vadd.f32 %v851_v54, %v767_v47  ;;  %v5941_v47 = vsel %vm1007_vm6, %v1019_v39, %v1021_v30  ;;  %v1171_v39 = vrot.slane %v5169_v34, 3 }
 0x150   : > { %7230 = vst [vmem:[#allocation83_spill] sm:$0xff] %v5941_v47 }
 0x151   : > { %4363 = vmatmul.msk.bf16.gmra.mxu2 %vm690_vm3, %v5931_v21 }
 0x152   : > { %v747_v36 = vpop.f32.mrf.mxu0  ;;  %v833_v52 = vpop.f32.mrf.mxu1 }
 0x153   : > { %v832_v35 = vadd.f32 %v831_v60, %v747_v36 }
 0x154   : > { %v959_v19 = vpop.f32.mrf.mxu2 }
 0x155   : > { %v5935_v45 = vadd.f32 %v959_v19, %v832_v35  ;;  %4321 = vmatmul.msk.bf16.gmra.mxu0 %vm690_vm3, %v5452_v8  ;;  %v1451_v8 = vrot.slane %v5165_v32, 2  ;;  %v1172_v19 = vrot.slane %v5149_v16, 4 }
 0x156   : > { %v853_v48 = vpop.f32.mrf.mxu3 }
 0x157   : > { %v854_v49 = vadd.f32 %v853_v48, %v769_v59  ;;  %v5955_v48 = vsel %vm1437_vm9, %v1449_v18, %v1451_v8 }
 0x158   : > { %7232 = vst [vmem:[#allocation85_spill] sm:$0xff] %v5955_v48 }
 0x15a   : > { %v749_v56 = vpop.f32.mrf.mxu0  ;;  %v836_v54 = vpop.f32.mrf.mxu1 }
 0x15b   : > { %4301 = vmatmul.msk.bf16.gmra.mxu3 %vm690_vm3, %v5941_v47  ;;  %v834_v21 = vadd.f32 %v833_v52, %v749_v56  ;;  %v1173_v56 = vor.u32 %v1172_v19, %v1171_v39  ;;  %v5976_v19 = vrot.slane %v5205_v6, 2 }
 0x15c   : > { %v961_v60 = vpop.f32.mrf.mxu2 }
 0x15d   : > { %v5945_v36 = vadd.f32 %v961_v60, %v834_v21  ;;  %4343 = vmatmul.msk.bf16.gmra.mxu1 %vm690_vm3, %v5583_v14  ;;  %v1174_v41 = vsel %vm1143_vm13, %v5437_v0, %v1173_v56 }
 0x15e   : > { %v974_v35 = vpop.f32.mrf.mxu3 }
 0x15f   : > { %v5950_v59 = vadd.f32 %v974_v35, %v847_v9 }
 0x161   : > { %7231 = vst [vmem:[#allocation84_spill] sm:$0xff] %v5950_v59  ;;  %4364 = vmatmul.msk.bf16.gmra.mxu2 %vm690_vm3, %v5955_v48  ;;  %v5971_v48 = vsel %vm1007_vm6, %v1021_v30, %v5965_v3 }
 0x162   : > { %v752_v21 = vpop.f32.mrf.mxu0  ;;  %v838_v52 = vpop.f32.mrf.mxu1  ;;  %7235 = vst [vmem:[#allocation88_spill] sm:$0xff] %v5971_v48 }
 0x163   : > { %v837_v60 = vadd.f32 %v836_v54, %v752_v21 }
 0x164   : > { %v964_v47 = vpop.f32.mrf.mxu2 }
 0x165   : > { %v5961_v9 = vadd.f32 %v964_v47, %v837_v60  ;;  %4322 = vmatmul.msk.bf16.gmra.mxu0 %vm690_vm3, %v1174_v41  ;;  %v7236_v41 = vld [vmem:[#allocation6_spill] sm:$0xff]  ;;  %v7237_v60 = vld [vmem:[#allocation3_spill] sm:$0xff] }
 0x166   : > { %v976_v35 = vpop.f32.mrf.mxu3  ;;  %v1175_v21 = vrot.slane %v7236_v41, 3  ;;  %v1176_v26 = vrot.slane %v7237_v60, 4 }
 0x167   : > { %v5967_v18 = vadd.f32 %v976_v35, %v849_v51 }
 0x169   : > { %7234 = vst [vmem:[#allocation87_spill] sm:$0xff] %v5967_v18 }
 0x16a   : > { %v754_v39 = vpop.f32.mrf.mxu0  ;;  %v841_v54 = vpop.f32.mrf.mxu1 }
 0x16b   : > { %4302 = vmatmul.msk.bf16.gmra.mxu3 %vm690_vm3, %v5971_v48  ;;  %v839_v0 = vadd.f32 %v838_v52, %v754_v39  ;;  %v5988_v48 = vsel %vm1437_vm9, %v1451_v8, %v5976_v19  ;;  %v4812_v52 = vld [vmem:[%s7030_s4 + $0xb8] sm:$0xff]  ;;  %v1177_v39 = vor.u32 %v1176_v26, %v1175_v21  ;;  %v7241_v21 = vld [vmem:[#allocation8_spill] sm:$0xff] }
 0x16c   : > { %v966_v47 = vpop.f32.mrf.mxu2  ;;  %7239 = vst [vmem:[#allocation3_spill] sm:$0xff] %v5988_v48  ;;  %2249 = vmatpush.bf16.msrb.mxu3 %v4812_v52  ;;  %v4814_v52 = vld [vmem:[%s7030_s4 + $0xc8] sm:$0xff] }
 0x16d   : > { %v5980_v51 = vadd.f32 %v966_v47, %v839_v0  ;;  %4344 = vmatmul.msk.bf16.gmra.mxu1 %vm690_vm3, %v5165_v32  ;;  %v1178_v8 = vsel %vm1143_vm13, %v1173_v56, %v1177_v39  ;;  %2390 = vmatpush.bf16.msrb.mxu0 %v4814_v52 }
 0x16e   : > { %v979_v35 = vpop.f32.mrf.mxu3 }
 0x16f   : > { %v5984_v30 = vadd.f32 %v979_v35, %v852_v42  ;;  %v4818_v42 = vld [vmem:[%s7030_s4 + $0xe8] sm:$0xff] }
 0x170   : > { %2665 = vmatpush.bf16.msrb.mxu2 %v4818_v42  ;;  %v1581_v42 = vshrl.u32 %v5125_v57, 16 }
 0x171   : > { %7238 = vst [vmem:[#allocation6_spill] sm:$0xff] %v5984_v30  ;;  %4365 = vmatmul.msk.bf16.gmra.mxu2 %vm690_vm3, %v5988_v48  ;;  %v1025_v30 = vrot.slane %v5221_v15, 3  ;;  %v1577_v48 = vshll.u32 %v5134_v2, 16 }
 0x172   : > { %v757_v0 = vpop.f32.mrf.mxu0  ;;  %v843_v47 = vpop.f32.mrf.mxu1 }
 0x173   : > { %v842_v28 = vadd.f32 %v841_v54, %v757_v0  ;;  %v6007_v54 = vpack.c.bf16 %v7241_v21, %v7241_v21  ;;  %v1574_v21 = vshrl.u32 %v5134_v2, 16 }
 0x174   : > { %v969_v25 = vpop.f32.mrf.mxu2 }
 0x175   : > { %v5999_v35 = vadd.f32 %v969_v25, %v842_v28  ;;  %4323 = vmatmul.msk.bf16.gmra.mxu0 %vm690_vm3, %v1178_v8  ;;  %7242 = vst [vmem:[#allocation8_spill] sm:$0xff] %v6007_v54  ;;  %v4816_v28 = vld [vmem:[%s7030_s4 + $0xd8] sm:$0xff]  ;;  %v1026_v25 = vsel %vm1007_vm6, %v5965_v3, %v1025_v30  ;;  %v1455_v0 = vrot.slane %v6007_v54, 2  ;;  %v1584_v8 = vshll.u32 %v5125_v57, 16 }
 0x176   : > { %v981_v5 = vpop.f32.mrf.mxu3  ;;  %2561 = vmatpush.bf16.msrb.mxu1 %v4816_v28  ;;  %v1576_v28 = vrot.slane %v1574_v21, 2 }
 0x177   : > { %v6003_v26 = vadd.f32 %v981_v5, %v854_v49  ;;  %v1586_v3 = vrot.slane %v1584_v8, 3 }
 0x179   : > { %7240 = vst [vmem:[#allocation89_spill] sm:$0xff] %v6003_v26 }
 0x17a   : > { %v759_v15 = vpop.f32.mrf.mxu0  ;;  %v1358_v5 = vpop.f32.mrf.mxu1 }
 0x17b   : > { %4303 = vmatmul.msk.bf16.gmra.mxu3 %vm690_vm3, %v1026_v25  ;;  %v844_v49 = vadd.f32 %v843_v47, %v759_v15  ;;  %v1456_v47 = vsel %vm1437_vm9, %v5976_v19, %v1455_v0  ;;  %v1579_v25 = vrot.slane %v1577_v48, 3  ;;  %v1583_v15 = vrot.slane %v1581_v42, 2 }
 0x17c   : > { %v971_v56 = vpop.f32.mrf.mxu2  ;;  %v1912_v42 = vrot.slane %v5279_v7, 2 }
 0x17d   : > { %v6023_v26 = vadd.f32 %v971_v56, %v844_v49  ;;  %4345 = vmatmul.msk.bf16.gmra.mxu1 %vm690_vm3, %v5205_v6  ;;  %v7243_v56 = vld [vmem:[#allocation16_spill] sm:$0xff]  ;;  %v1580_v0 = vor.u32 %v1579_v25, %v1576_v28  ;;  %v1771_v28 = vrot.slane %v5125_v57, 3 }
 0x17e   : > { %v1075_v30 = vpop.f32.mrf.mxu3  ;;  %v7245_v59 = vor.u32 %v7243_v56, %v7244_v43  ;;  %v1911_v43 = vrot.slane %v5213_v12, 2  ;;  %v7247_v12 = vshrl.u32 %v5215_v13, 16 }
 0x17f   : > { %v1120_v52 = vadd.f32 %v1075_v30, %v5805_v20  ;;  %v1587_v30 = vor.u32 %v1586_v3, %v1583_v15  ;;  %v7248_v15 = vshll.u32 %v5215_v13, 16 }
 0x180   : > { %v1184_v6 = vsel %vm1143_vm13, %v1177_v39, %v7245_v59  ;;  %v1591_v25 = vrot.slane %v7247_v12, 2  ;;  %v7249_v12 = vld [vmem:[#allocation27_spill] sm:$0xff] }
 0x181   : > { %4366 = vmatmul.msk.bf16.gmra.mxu2 %vm690_vm3, %v1456_v47  ;;  %v1770_v47 = vrot.slane %v5134_v2, 3 }
 0x182   : > { %v1233_v54 = vpop.f32.mrf.mxu0  ;;  %v1360_v18 = vpop.f32.mrf.mxu1 }
 0x183   : > { %v1278_v32 = vadd.f32 %v1233_v54, %v1120_v52  ;;  %v1588_v54 = vsel %vm1573_vm4, %v1580_v0, %v1587_v30 }
 0x184   : > { %v1505_v49 = vpop.f32.mrf.mxu2 }
 0x185   : > { %v1403_v63 = vadd.f32 %v1358_v5, %v1278_v32  ;;  %4324 = vmatmul.msk.bf16.gmra.mxu0 %vm690_vm3, %v1184_v6  ;;  %v1913_v6 = vsel %vm1437_vm9, %v1911_v43, %v1912_v42  ;;  %v7246_v5 = vld [vmem:[#allocation25_spill] sm:$0xff]  ;;  %v1914_v43 = vrot.slane %v5302_v46, 2 }
 0x186   : > { %v1077_v20 = vpop.f32.mrf.mxu3 }
 0x187   : > { %v1121_v21 = vadd.f32 %v1077_v20, %v5820_v61  ;;  %v6037_v48 = vadd.f32 %v1505_v49, %v1403_v63 }
 0x18a   : > { %v1235_v8 = vpop.f32.mrf.mxu0  ;;  %v1363_v52 = vpop.f32.mrf.mxu1 }
 0x18b   : > { %4379 = vmatmul.msk.bf16.vlgmr.msra.gmra.mxu3 %vm690_vm3, %v1588_v54  ;;  %v1279_v32 = vadd.f32 %v1235_v8, %v1121_v21 }
 0x18c   : > { %v1507_v59 = vpop.f32.mrf.mxu2 }
 0x18d   : > { %v1404_v39 = vadd.f32 %v1360_v18, %v1279_v32  ;;  %4421 = vmatmul.msk.bf16.vlgmr.msra.gmra.mxu1 %vm690_vm3, %v1913_v6  ;;  %v1594_v18 = vrot.slane %v7248_v15, 3 }
 0x18e   : > { %v1080_v3 = vpop.f32.mrf.mxu3 }
 0x18f   : > { %v1122_v63 = vadd.f32 %v1080_v3, %v5856_v29  ;;  %v6046_v61 = vadd.f32 %v1507_v59, %v1404_v39  ;;  %v1772_v29 = vsel %vm1007_vm6, %v1770_v47, %v1771_v28  ;;  %v1595_v8 = vor.u32 %v1594_v18, %v1591_v25 }
 0x190   : > { %v7250_v25 = vshrl.u32 %v5259_v53, 16  ;;  %v7251_v18 = vshll.u32 %v5259_v53, 16 }
 0x191   : > { %4442 = vmatmul.msk.bf16.vlgmr.msra.gmra.mxu2 %vm690_vm3, %v7246_v5  ;;  %v1596_v32 = vsel %vm1573_vm4, %v1587_v30, %v1595_v8  ;;  %v1773_v30 = vrot.slane %v5215_v13, 3 }
 0x192   : > { %v1238_v49 = vpop.f32.mrf.mxu0  ;;  %v1365_v56 = vpop.f32.mrf.mxu1  ;;  %v1599_v15 = vrot.slane %v7250_v25, 2  ;;  %v7252_v25 = vld [vmem:[#allocation30_spill] sm:$0xff] }
 0x193   : > { %v1280_v20 = vadd.f32 %v1238_v49, %v1122_v63  ;;  %v1602_v49 = vrot.slane %v7251_v18, 3  ;;  %v1610_v18 = vrot.slane %v5591_v24, 3  ;;  %v1918_v24 = vrot.slane %v5380_v11, 2 }
 0x194   : > { %v1510_v0 = vpop.f32.mrf.mxu2 }
 0x195   : > { %v1405_v21 = vadd.f32 %v1363_v52, %v1280_v20  ;;  %4400 = vmatmul.msk.bf16.vlgmr.msra.gmra.mxu0 %vm690_vm3, %v1772_v29  ;;  %v1915_v52 = vsel %vm1437_vm9, %v1912_v42, %v1914_v43  ;;  %v1774_v29 = vsel %vm1007_vm6, %v1771_v28, %v1773_v30 }
 0x196   : > { %v1082_v54 = vpop.f32.mrf.mxu3 }
 0x197   : > { %v1123_v2 = vadd.f32 %v1082_v54, %v5879_v37  ;;  %v6059_v57 = vadd.f32 %v1510_v0, %v1405_v21  ;;  %v1603_v54 = vor.u32 %v1602_v49, %v1599_v15  ;;  %v1607_v15 = vrot.slane %v5586_v1, 2  ;;  %v4811_v1 = vld [vmem:[%s7030_s4 + $0xb0] sm:$0xff] }
 0x198   : > { %2250 = vmatpush.bf16.msrb.mxu3 %v4811_v1 }
 0x19a   : > { %v1240_v59 = vpop.f32.mrf.mxu0  ;;  %v1368_v6 = vpop.f32.mrf.mxu1 }
 0x19b   : > { %4380 = vmatmul.msk.bf16.gmra.mxu3 %vm690_vm3, %v1596_v32  ;;  %v1281_v39 = vadd.f32 %v1240_v59, %v1123_v2  ;;  %v1916_v59 = vrot.slane %v5319_v58, 2 }
 0x19c   : > { %v1512_v3 = vpop.f32.mrf.mxu2 }
 0x19d   : > { %v1406_v63 = vadd.f32 %v1365_v56, %v1281_v39  ;;  %4422 = vmatmul.msk.bf16.gmra.mxu1 %vm690_vm3, %v1915_v52  ;;  %v1604_v39 = vsel %vm1573_vm4, %v1595_v8, %v1603_v54  ;;  %v1917_v28 = vsel %vm1437_vm9, %v1914_v43, %v1916_v59  ;;  %v1775_v8 = vrot.slane %v5259_v53, 3 }
 0x19e   : > { %v1085_v5 = vpop.f32.mrf.mxu3 }
 0x19f   : > { %v1124_v37 = vadd.f32 %v1085_v5, %v5894_v38  ;;  %v6067_v47 = vadd.f32 %v1512_v3, %v1406_v63 }
 0x1a1   : > { %4443 = vmatmul.msk.bf16.gmra.mxu2 %vm690_vm3, %v7249_v12 }
 0x1a2   : > { %v1243_v42 = vpop.f32.mrf.mxu0  ;;  %v1370_v56 = vpop.f32.mrf.mxu1 }
 0x1a3   : > { %v1282_v20 = vadd.f32 %v1243_v42, %v1124_v37 }
 0x1a4   : > { %v1515_v0 = vpop.f32.mrf.mxu2 }
 0x1a5   : > { %v1407_v38 = vadd.f32 %v1368_v6, %v1282_v20  ;;  %4401 = vmatmul.msk.bf16.gmra.mxu0 %vm690_vm3, %v1774_v29  ;;  %v1776_v20 = vsel %vm1007_vm6, %v1773_v30, %v1775_v8  ;;  %v1611_v29 = vor.u32 %v1610_v18, %v1607_v15  ;;  %v1615_v15 = vrot.slane %v5594_v10, 2 }
 0x1a6   : > { %v1087_v21 = vpop.f32.mrf.mxu3  ;;  %v1618_v18 = vrot.slane %v5598_v44, 3  ;;  %v2065_v44 = vrot.slane %v5169_v34, 2 }
 0x1a7   : > { %v1125_v2 = vadd.f32 %v1087_v21, %v5905_v4  ;;  %v6079_v32 = vadd.f32 %v1515_v0, %v1407_v38 }
 0x1aa   : > { %v1245_v3 = vpop.f32.mrf.mxu0  ;;  %v1373_v52 = vpop.f32.mrf.mxu1 }
 0x1ab   : > { %4381 = vmatmul.msk.bf16.gmra.mxu3 %vm690_vm3, %v1604_v39  ;;  %v1283_v63 = vadd.f32 %v1245_v3, %v1125_v2  ;;  %v1612_v2 = vsel %vm1573_vm4, %v1603_v54, %v1611_v29 }
 0x1ac   : > { %v1517_v5 = vpop.f32.mrf.mxu2 }
 0x1ad   : > { %v1408_v6 = vadd.f32 %v1370_v56, %v1283_v63  ;;  %4423 = vmatmul.msk.bf16.gmra.mxu1 %vm690_vm3, %v1917_v28  ;;  %v6109_v63 = vsel %vm1437_vm9, %v1916_v59, %v1918_v24  ;;  %v7254_v59 = vld [vmem:[#allocation33_spill] sm:$0xff] }
 0x1ae   : > { %v1090_v37 = vpop.f32.mrf.mxu3  ;;  %7253 = vst [vmem:[#allocation16_spill] sm:$0xff] %v6109_v63 }
 0x1af   : > { %v1126_v4 = vadd.f32 %v1090_v37, %v5915_v40  ;;  %v6087_v12 = vadd.f32 %v1517_v5, %v1408_v6  ;;  %v4813_v37 = vld [vmem:[%s7030_s4 + $0xc0] sm:$0xff] }
 0x1b0   : > { %2391 = vmatpush.bf16.msrb.mxu0 %v4813_v37  ;;  %v1623_v37 = vrot.slane %v5601_v55, 2  ;;  %v2069_v55 = vrot.slane %v7236_v41, 2 }
 0x1b1   : > { %4444 = vmatmul.msk.bf16.gmra.mxu2 %vm690_vm3, %v7252_v25  ;;  %v1777_v25 = vrot.slane %v5314_v50, 3 }
 0x1b2   : > { %v1248_v49 = vpop.f32.mrf.mxu0  ;;  %v1375_v42 = vpop.f32.mrf.mxu1 }
 0x1b3   : > { %v1284_v43 = vadd.f32 %v1248_v49, %v1126_v4  ;;  %v4815_v4 = vld [vmem:[%s7030_s4 + $0xd0] sm:$0xff] }
 0x1b4   : > { %v1520_v56 = vpop.f32.mrf.mxu2  ;;  %2562 = vmatpush.bf16.msrb.mxu1 %v4815_v4  ;;  %v1626_v4 = vrot.slane %v5607_v22, 3  ;;  %v2070_v22 = vrot.slane %v7237_v60, 3 }
 0x1b5   : > { %v1409_v0 = vadd.f32 %v1373_v52, %v1284_v43  ;;  %4402 = vmatmul.msk.bf16.gmra.mxu0 %vm690_vm3, %v1776_v20 }
 0x1b6   : > { %v1092_v40 = vpop.f32.mrf.mxu3 }
 0x1b7   : > { %v1127_v38 = vadd.f32 %v1092_v40, %v5926_v23  ;;  %v6097_v21 = vadd.f32 %v1520_v56, %v1409_v0  ;;  %v4817_v23 = vld [vmem:[%s7030_s4 + $0xe0] sm:$0xff]  ;;  %v1778_v56 = vsel %vm1007_vm6, %v1775_v8, %v1777_v25  ;;  %v1619_v40 = vor.u32 %v1618_v18, %v1615_v15 }
 0x1b8   : > { %2666 = vmatpush.bf16.msrb.mxu2 %v4817_v23  ;;  %v1920_v8 = vrot.slane %v5130_v62, 2 }
 0x1b9   : > { %v1620_v10 = vsel %vm1573_vm4, %v1611_v29, %v1619_v40 }
 0x1ba   : > { %v1250_v39 = vpop.f32.mrf.mxu0  ;;  %v1378_v30 = vpop.f32.mrf.mxu1  ;;  %v6138_v23 = vsel %vm1437_vm9, %v1918_v24, %v1920_v8  ;;  %v1779_v24 = vrot.slane %v5307_v27, 3 }
 0x1bb   : > { %4382 = vmatmul.msk.bf16.gmra.mxu3 %vm690_vm3, %v1612_v2  ;;  %v1285_v3 = vadd.f32 %v1250_v39, %v1127_v38  ;;  %v2066_v2 = vrot.slane %v5149_v16, 3  ;;  %7255 = vst [vmem:[#allocation19_spill] sm:$0xff] %v6138_v23 }
 0x1bc   : > { %v1522_v52 = vpop.f32.mrf.mxu2 }
 0x1bd   : > { %v1410_v5 = vadd.f32 %v1375_v42, %v1285_v3  ;;  %4424 = vmatmul.msk.bf16.gmra.mxu1 %vm690_vm3, %v6109_v63  ;;  %v2067_v29 = vor.u32 %v2066_v2, %v2065_v44 }
 0x1be   : > { %v1095_v28 = vpop.f32.mrf.mxu3 }
 0x1bf   : > { %v1128_v54 = vadd.f32 %v1095_v28, %v5935_v45  ;;  %v6114_v6 = vadd.f32 %v1522_v52, %v1410_v5  ;;  %v7256_v28 = vld [vmem:[#allocation31_spill] sm:$0xff] }
 0x1c1   : > { %4445 = vmatmul.msk.bf16.gmra.mxu2 %vm690_vm3, %v7254_v59 }
 0x1c2   : > { %v1253_v45 = vpop.f32.mrf.mxu0  ;;  %v1380_v49 = vpop.f32.mrf.mxu1 }
 0x1c3   : > { %v1286_v42 = vadd.f32 %v1253_v45, %v1128_v54  ;;  %v6147_v54 = vsel %vm1573_vm4, %v7256_v28, %v2067_v29 }
 0x1c4   : > { %v1525_v43 = vpop.f32.mrf.mxu2  ;;  %7257 = vst [vmem:[#allocation25_spill] sm:$0xff] %v6147_v54 }
 0x1c5   : > { %v1411_v20 = vadd.f32 %v1378_v30, %v1286_v42  ;;  %4403 = vmatmul.msk.bf16.gmra.mxu0 %vm690_vm3, %v1778_v56  ;;  %v1627_v56 = vor.u32 %v1626_v4, %v1623_v37  ;;  %v1631_v37 = vrot.slane %v5613_v33, 2  ;;  %v1634_v4 = vrot.slane %v5616_v17, 3 }
 0x1c6   : > { %v1097_v0 = vpop.f32.mrf.mxu3 }
 0x1c7   : > { %v1129_v38 = vadd.f32 %v1097_v0, %v5945_v36  ;;  %v6130_v1 = vadd.f32 %v1525_v43, %v1411_v20 }
 0x1ca   : > { %v1255_v39 = vpop.f32.mrf.mxu0  ;;  %v1383_v3 = vpop.f32.mrf.mxu1 }
 0x1cb   : > { %4383 = vmatmul.msk.bf16.gmra.mxu3 %vm690_vm3, %v1620_v10  ;;  %v1287_v30 = vadd.f32 %v1255_v39, %v1129_v38  ;;  %v1922_v38 = vrot.slane %v5163_v31, 2  ;;  %v1628_v10 = vsel %vm1573_vm4, %v1619_v40, %v1627_v56 }
 0x1cc   : > { %v1527_v52 = vpop.f32.mrf.mxu2 }
 0x1cd   : > { %v1412_v36 = vadd.f32 %v1380_v49, %v1287_v30  ;;  %4425 = vmatmul.msk.bf16.gmra.mxu1 %vm690_vm3, %v6138_v23  ;;  %v6168_v30 = vsel %vm1437_vm9, %v1920_v8, %v1922_v38  ;;  %v4822_v23 = vld [vmem:[%s7030_s4 + $0x108] sm:$0xff] }
 0x1ce   : > { %v1100_v5 = vpop.f32.mrf.mxu3  ;;  %7258 = vst [vmem:[#allocation27_spill] sm:$0xff] %v6168_v30  ;;  %2882 = vmatpush.bf16.msra.mxu0 %v4822_v23 }
 0x1cf   : > { %v1130_v34 = vadd.f32 %v1100_v5, %v5961_v9  ;;  %v6143_v16 = vadd.f32 %v1527_v52, %v1412_v36  ;;  %v6155_v9 = vsel %vm1007_vm6, %v1777_v25, %v1779_v24  ;;  %v1781_v36 = vrot.slane %v5583_v14, 3 }
 0x1d1   : > { %4446 = vmatmul.msk.bf16.gmra.mxu2 %vm690_vm3, %v6147_v54 }
 0x1d2   : > { %v1258_v15 = vpop.f32.mrf.mxu0  ;;  %v1385_v18 = vpop.f32.mrf.mxu1 }
 0x1d3   : > { %v1288_v45 = vadd.f32 %v1258_v15, %v1130_v34 }
 0x1d4   : > { %v1530_v49 = vpop.f32.mrf.mxu2 }
 0x1d5   : > { %v1413_v42 = vadd.f32 %v1383_v3, %v1288_v45  ;;  %4404 = vmatmul.msk.bf16.gmra.mxu0 %vm690_vm3, %v6155_v9  ;;  %v2071_v3 = vor.u32 %v2070_v22, %v2069_v55 }
 0x1d6   : > { %v1102_v43 = vpop.f32.mrf.mxu3 }
 0x1d7   : > { %v1131_v20 = vadd.f32 %v1102_v43, %v5980_v51  ;;  %v6160_v0 = vadd.f32 %v1530_v49, %v1413_v42  ;;  %v6176_v40 = vsel %vm1573_vm4, %v2067_v29, %v2071_v3  ;;  %v1635_v49 = vor.u32 %v1634_v4, %v1631_v37  ;;  %v7260_v42 = vld [vmem:[#allocation9_spill] sm:$0xff]  ;;  %v7267_v37 = vld [vmem:[#allocation39_spill] sm:$0xff] }
 0x1d8   : > { %7259 = vst [vmem:[#allocation30_spill] sm:$0xff] %v6176_v40  ;;  %v7261_v43 = vshrl.u32 %v7260_v42, 16  ;;  %v7262_v33 = vshll.u32 %v7260_v42, 16  ;;  %v1924_v17 = vrot.slane %v7260_v42, 2 }
 0x1da   : > { %v1260_v25 = vpop.f32.mrf.mxu0  ;;  %v1388_v44 = vpop.f32.mrf.mxu1  ;;  %v2079_v55 = vrot.slane %v7262_v33, 3 }
 0x1db   : > { %4384 = vmatmul.msk.bf16.gmra.mxu3 %vm690_vm3, %v1628_v10  ;;  %v1289_v2 = vadd.f32 %v1260_v25, %v1131_v20  ;;  %v2076_v20 = vrot.slane %v7261_v43, 2 }
 0x1dc   : > { %v1532_v39 = vpop.f32.mrf.mxu2 }
 0x1dd   : > { %v1414_v51 = vadd.f32 %v1385_v18, %v1289_v2  ;;  %4426 = vmatmul.msk.bf16.gmra.mxu1 %vm690_vm3, %v6168_v30  ;;  %v6199_v2 = vsel %vm1437_vm9, %v1922_v38, %v1924_v17  ;;  %v1642_v38 = vrot.slane %v7267_v37, 3 }
 0x1de   : > { %v1105_v52 = vpop.f32.mrf.mxu3  ;;  %7263 = vst [vmem:[#allocation31_spill] sm:$0xff] %v6199_v2 }
 0x1df   : > { %v1132_v41 = vadd.f32 %v1105_v52, %v5999_v35  ;;  %v6173_v60 = vadd.f32 %v1532_v39, %v1414_v51  ;;  %v6184_v35 = vsel %vm1007_vm6, %v1779_v24, %v1781_v36  ;;  %v1636_v24 = vsel %vm1573_vm4, %v1627_v56, %v1635_v49  ;;  %v7264_v52 = vld [vmem:[#allocation84_spill] sm:$0xff] }
 0x1e1   : > { %4447 = vmatmul.msk.bf16.gmra.mxu2 %vm690_vm3, %v6176_v40 }
 0x1e2   : > { %v1263_v5 = vpop.f32.mrf.mxu0  ;;  %v1390_v8 = vpop.f32.mrf.mxu1 }
 0x1e3   : > { %v1290_v34 = vadd.f32 %v1263_v5, %v1132_v41 }
 0x1e4   : > { %v1535_v28 = vpop.f32.mrf.mxu2 }
 0x1e5   : > { %v1415_v15 = vadd.f32 %v1388_v44, %v1290_v34  ;;  %4405 = vmatmul.msk.bf16.gmra.mxu0 %vm690_vm3, %v6184_v35  ;;  %v7266_v34 = vld [vmem:[#allocation37_spill] sm:$0xff] }
 0x1e6   : > { %v1107_v29 = vpop.f32.mrf.mxu3 }
 0x1e7   : > { %v1133_v18 = vadd.f32 %v1107_v29, %v6023_v26  ;;  %v6189_v45 = vadd.f32 %v1535_v28, %v1415_v15  ;;  %v2080_v26 = vor.u32 %v2079_v55, %v2076_v20  ;;  %v1639_v28 = vrot.slane %v7266_v34, 2  ;;  %v7268_v15 = vld [vmem:[#allocation2_spill] sm:$0xff] }
 0x1e8   : > { %v1783_v29 = vrot.slane %v7268_v15, 3 }
 0x1e9   : > { %v6207_v56 = vsel %vm1573_vm4, %v2071_v3, %v2080_v26  ;;  %v1643_v55 = vor.u32 %v1642_v38, %v1639_v28  ;;  %v7273_v38 = vld [vmem:[#allocation8_spill] sm:$0xff] }
 0x1ea   : > { %v1265_v22 = vpop.f32.mrf.mxu0  ;;  %v1393_v10 = vpop.f32.mrf.mxu1  ;;  %7265 = vst [vmem:[#allocation9_spill] sm:$0xff] %v6207_v56  ;;  %v6215_v20 = vsel %vm1007_vm6, %v1781_v36, %v1783_v29 }
 0x1eb   : > { %4385 = vmatmul.msk.bf16.gmra.mxu3 %vm690_vm3, %v1636_v24  ;;  %v1291_v25 = vadd.f32 %v1265_v22, %v1133_v18  ;;  %v7269_v24 = vld [vmem:[#allocation87_spill] sm:$0xff] }
 0x1ec   : > { %v1537_v44 = vpop.f32.mrf.mxu2 }
 0x1ed   : > { %v1416_v39 = vadd.f32 %v1390_v8, %v1291_v25  ;;  %4427 = vmatmul.msk.bf16.gmra.mxu1 %vm690_vm3, %v6199_v2  ;;  %v4826_v2 = vld [vmem:[%s7030_s4 + $0x128] sm:$0xff] }
 0x1ee   : > { %v1110_v51 = vpop.f32.mrf.mxu3  ;;  %3094 = vmatpush.bf16.msra.mxu2 %v4826_v2 }
 0x1ef   : > { %v1134_v41 = vadd.f32 %v1110_v51, %v7264_v52  ;;  %v6204_v5 = vadd.f32 %v1537_v44, %v1416_v39  ;;  %v7270_v44 = vld [vmem:[#allocation45_spill] sm:$0xff]  ;;  %v1644_v51 = vsel %vm1573_vm4, %v1635_v49, %v1643_v55  ;;  %v7274_v49 = vld [vmem:[#allocation6_spill] sm:$0xff] }
 0x1f0   : > { %v6223_v39 = vrot.slane %v7270_v44, 2 }
 0x1f1   : > { %4448 = vmatmul.msk.bf16.gmra.mxu2 %vm690_vm3, %v6207_v56 }
 0x1f2   : > { %v1268_v4 = vpop.f32.mrf.mxu0  ;;  %v1395_v8 = vpop.f32.mrf.mxu1  ;;  %7271 = vst [vmem:[#allocation84_spill] sm:$0xff] %v6223_v39  ;;  %v6229_v34 = vsel %vm1437_vm9, %v1924_v17, %v6223_v39 }
 0x1f3   : > { %v1292_v18 = vadd.f32 %v1268_v4, %v1134_v41  ;;  %7272 = vst [vmem:[#allocation37_spill] sm:$0xff] %v6229_v34  ;;  %v1646_v4 = vshrl.u32 %v7273_v38, 16 }
 0x1f4   : > { %v1540_v43 = vpop.f32.mrf.mxu2 }
 0x1f5   : > { %v1417_v33 = vadd.f32 %v1393_v10, %v1292_v18  ;;  %4406 = vmatmul.msk.bf16.gmra.mxu0 %vm690_vm3, %v6215_v20  ;;  %v1649_v18 = vshll.u32 %v7273_v38, 16 }
 0x1f6   : > { %v1112_v3 = vpop.f32.mrf.mxu3 }
 0x1f7   : > { %v1135_v22 = vadd.f32 %v1112_v3, %v7269_v24  ;;  %v6220_v25 = vadd.f32 %v1540_v43, %v1417_v33  ;;  %v7275_v33 = vld [vmem:[#allocation12_spill] sm:$0xff] }
 0x1f8   : > { %v6238_v3 = vpack.c.bf16 %v7275_v33, %v7275_v33 }
 0x1fa   : > { %v1270_v52 = vpop.f32.mrf.mxu0  ;;  %v1398_v41 = vpop.f32.mrf.mxu1 }
 0x1fb   : > { %4386 = vmatmul.msk.bf16.gmra.mxu3 %vm690_vm3, %v1644_v51  ;;  %v1293_v36 = vadd.f32 %v1270_v52, %v1135_v22  ;;  %v7276_v22 = vld [vmem:[#allocation63_spill] sm:$0xff]  ;;  %v7278_v51 = vld [vmem:[#allocation5_spill] sm:$0xff] }
 0x1fc   : > { %v1542_v10 = vpop.f32.mrf.mxu2  ;;  %v6244_v17 = vsel %vm1573_vm4, %v2080_v26, %v7276_v22  ;;  %v6252_v52 = vrot.slane %v7278_v51, 3  ;;  %v2092_v26 = vshrl.u32 %v6238_v3, 16 }
 0x1fd   : > { %v1418_v28 = vadd.f32 %v1395_v8, %v1293_v36  ;;  %4428 = vmatmul.msk.bf16.gmra.mxu1 %vm690_vm3, %v6229_v34  ;;  %7277 = vst [vmem:[#allocation39_spill] sm:$0xff] %v6244_v17  ;;  %v4820_v8 = vld [vmem:[%s7030_s4 + $0xf8] sm:$0xff]  ;;  %v1648_v36 = vrot.slane %v1646_v4, 2  ;;  %v2095_v34 = vshll.u32 %v6238_v3, 16 }
 0x1fe   : > { %v1115_v37 = vpop.f32.mrf.mxu3  ;;  %7279 = vst [vmem:[#allocation2_spill] sm:$0xff] %v6252_v52  ;;  %2762 = vmatpush.bf16.msra.mxu3 %v4820_v8  ;;  %v2094_v30 = vrot.slane %v2092_v26, 2 }
 0x1ff   : > { %v1136_v43 = vadd.f32 %v1115_v37, %v7274_v49  ;;  %v6240_v24 = vadd.f32 %v1542_v10, %v1418_v28  ;;  %v1651_v37 = vrot.slane %v1649_v18, 3  ;;  %v2097_v40 = vrot.slane %v2095_v34, 3 }
 0x201   : > { %4449 = vmatmul.msk.bf16.gmra.mxu2 %vm690_vm3, %v6244_v17  ;;  %v6261_v17 = vsel %vm1007_vm6, %v1783_v29, %v6252_v52  ;;  %v1652_v18 = vor.u32 %v1651_v37, %v1648_v36  ;;  %v4824_v29 = vld [vmem:[%s7030_s4 + $0x118] sm:$0xff]  ;;  %v2098_v37 = vor.u32 %v2097_v40, %v2094_v30 }
 0x202   : > { %v1273_v49 = vpop.f32.mrf.mxu0  ;;  %v1400_v10 = vpop.f32.mrf.mxu1  ;;  %2993 = vmatpush.bf16.msra.mxu1 %v4824_v29 }
 0x203   : > { %v1294_v28 = vadd.f32 %v1273_v49, %v1136_v43  ;;  %v7280_v43 = vld [vmem:[#allocation89_spill] sm:$0xff]  ;;  %v2099_v23 = vsel %vm1573_vm4, %v7276_v22, %v2098_v37 }
 0x204   : > { %v1545_v33 = vpop.f32.mrf.mxu2 }
 0x205   : > { %v1419_v56 = vadd.f32 %v1398_v41, %v1294_v28  ;;  %4407 = vmatmul.msk.bf16.gmra.mxu0 %vm690_vm3, %v6261_v17  ;;  %v1928_v41 = vrot.slane %v6238_v3, 2  ;;  %v1653_v28 = vsel %vm1573_vm4, %v1643_v55, %v1652_v18  ;;  %v1787_v55 = vrot.slane %v7273_v38, 3 }
 0x206   : > { %v1117_v4 = vpop.f32.mrf.mxu3 }
 0x207   : > { %v1137_v8 = vadd.f32 %v1117_v4, %v7280_v43  ;;  %v6266_v49 = vadd.f32 %v1545_v33, %v1419_v56  ;;  %v1929_v33 = vsel %vm1437_vm9, %v6223_v39, %v1928_v41 }
 0x20a   : > { %v1275_v2 = vpop.f32.mrf.mxu0  ;;  %v1978_v56 = vpop.f32.mrf.mxu1 }
 0x20b   : > { %4387 = vmatmul.msk.bf16.gmra.mxu3 %vm690_vm3, %v1653_v28  ;;  %v1295_v36 = vadd.f32 %v1275_v2, %v1137_v8 }
 0x20c   : > { %v1547_v34 = vpop.f32.mrf.mxu2 }
 0x20d   : > { %v1420_v26 = vadd.f32 %v1400_v10, %v1295_v36  ;;  %4429 = vmatmul.msk.bf16.gmra.mxu1 %vm690_vm3, %v1929_v33  ;;  %v1788_v10 = vsel %vm1007_vm6, %v6252_v52, %v1787_v55  ;;  %v7281_v36 = vld [vmem:[#allocation70_spill] sm:$0xff]  ;;  %v4830_v52 = vld [vmem:[%s7030_s4 + $0x148] sm:$0xff] }
 0x20e   : > { %v1702_v4 = vpop.f32.mrf.mxu3 }
 0x20f   : > { %v1747_v43 = vadd.f32 %v1702_v4, %v6037_v48  ;;  %v6281_v54 = vadd.f32 %v1547_v34, %v1420_v26  ;;  %v7282_v26 = vld [vmem:[#allocation36_spill] sm:$0xff] }
 0x211   : > { %4450 = vmatmul.msk.bf16.gmra.mxu2 %vm690_vm3, %v2099_v23 }
 0x212   : > { %v1837_v18 = vpop.f32.mrf.mxu0  ;;  %v1980_v30 = vpop.f32.mrf.mxu1 }
 0x213   : > { %v1882_v40 = vadd.f32 %v1837_v18, %v1747_v43  ;;  %v7283_v43 = vld [vmem:[#allocation71_spill] sm:$0xff]  ;;  %v2326_v18 = vrot.slane %v5215_v13, 1 }
 0x214   : > { %v2148_v8 = vpop.f32.mrf.mxu2 }
 0x215   : > { %v2023_v29 = vadd.f32 %v1978_v56, %v1882_v40  ;;  %4408 = vmatmul.msk.bf16.gmra.mxu0 %vm690_vm3, %v1788_v10 }
 0x216   : > { %v1704_v48 = vpop.f32.mrf.mxu3 }
 0x217   : > { %v1748_v41 = vadd.f32 %v1704_v48, %v6046_v61  ;;  %v6291_v28 = vadd.f32 %v2148_v8, %v2023_v29  ;;  %v2327_v61 = vrot.slane %v5259_v53, 1 }
 0x21a   : > { %v1839_v22 = vpop.f32.mrf.mxu0  ;;  %v1983_v2 = vpop.f32.mrf.mxu1 }
 0x21b   : > { %4463 = vmatmul.msk.bf16.vlgmr.msrb.gmra.mxu3 %vm690_vm3, %v7281_v36  ;;  %v1883_v38 = vadd.f32 %v1839_v22, %v1748_v41  ;;  %v7284_v36 = vld [vmem:[#allocation77_spill] sm:$0xff] }
 0x21c   : > { %v2150_v34 = vpop.f32.mrf.mxu2 }
 0x21d   : > { %v2024_v37 = vadd.f32 %v1980_v30, %v1883_v38  ;;  %4505 = vmatmul.msk.bf16.vlgmr.msrb.gmra.mxu1 %vm690_vm3, %v7282_v26  ;;  %v2328_v30 = vsel %vm871_vm5, %v2326_v18, %v2327_v61  ;;  %v7286_v26 = vld [vmem:[#allocation78_spill] sm:$0xff] }
 0x21e   : > { %v1707_v33 = vpop.f32.mrf.mxu3 }
 0x21f   : > { %v1749_v56 = vadd.f32 %v1707_v33, %v6059_v57  ;;  %v6298_v4 = vadd.f32 %v2150_v34, %v2024_v37  ;;  %v7285_v37 = vld [vmem:[#allocation40_spill] sm:$0xff] }
 0x221   : > { %4526 = vmatmul.msk.bf16.vlgmr.msrb.gmra.mxu2 %vm690_vm3, %v7283_v43 }
 0x222   : > { %v1842_v23 = vpop.f32.mrf.mxu0  ;;  %v1985_v55 = vpop.f32.mrf.mxu1 }
 0x223   : > { %v1884_v40 = vadd.f32 %v1842_v23, %v1749_v56 }
 0x224   : > { %v2153_v8 = vpop.f32.mrf.mxu2 }
 0x225   : > { %v2025_v10 = vadd.f32 %v1983_v2, %v1884_v40  ;;  %4484 = vmatmul.msk.bf16.vlgmr.msrb.gmra.mxu0 %vm690_vm3, %v2328_v30 }
 0x226   : > { %v1709_v29 = vpop.f32.mrf.mxu3 }
 0x227   : > { %v1750_v57 = vadd.f32 %v1709_v29, %v6067_v47  ;;  %v6307_v48 = vadd.f32 %v2153_v8, %v2025_v10  ;;  %v2329_v47 = vrot.slane %v5314_v50, 1 }
 0x229   : > { %v2330_v40 = vsel %vm871_vm5, %v2327_v61, %v2329_v47 }
 0x22a   : > { %v1844_v41 = vpop.f32.mrf.mxu0  ;;  %v1988_v22 = vpop.f32.mrf.mxu1 }
 0x22b   : > { %4464 = vmatmul.msk.bf16.gmra.mxu3 %vm690_vm3, %v7284_v36  ;;  %v1885_v53 = vadd.f32 %v1844_v41, %v1750_v57  ;;  %v7287_v57 = vld [vmem:[#allocation79_spill] sm:$0xff] }
 0x22c   : > { %v2155_v38 = vpop.f32.mrf.mxu2 }
 0x22d   : > { %v2026_v13 = vadd.f32 %v1985_v55, %v1885_v53  ;;  %4506 = vmatmul.msk.bf16.gmra.mxu1 %vm690_vm3, %v7285_v37 }
 0x22e   : > { %v1712_v34 = vpop.f32.mrf.mxu3 }
 0x22f   : > { %v1751_v2 = vadd.f32 %v1712_v34, %v6079_v32  ;;  %v6314_v33 = vadd.f32 %v2155_v38, %v2026_v13  ;;  %v7288_v13 = vld [vmem:[#allocation41_spill] sm:$0xff]  ;;  %v7289_v34 = vld [vmem:[#allocation80_spill] sm:$0xff] }
 0x231   : > { %4527 = vmatmul.msk.bf16.gmra.mxu2 %vm690_vm3, %v7286_v26 }
 0x232   : > { %v1847_v56 = vpop.f32.mrf.mxu0  ;;  %v1990_v43 = vpop.f32.mrf.mxu1 }
 0x233   : > { %v1886_v23 = vadd.f32 %v1847_v56, %v1751_v2 }
 0x234   : > { %v2158_v18 = vpop.f32.mrf.mxu2 }
 0x235   : > { %v2027_v55 = vadd.f32 %v1988_v22, %v1886_v23  ;;  %4485 = vmatmul.msk.bf16.gmra.mxu0 %vm690_vm3, %v2330_v40 }
 0x236   : > { %v1714_v8 = vpop.f32.mrf.mxu3 }
 0x237   : > { %v1752_v30 = vadd.f32 %v1714_v8, %v6087_v12  ;;  %v6322_v32 = vadd.f32 %v2158_v18, %v2027_v55  ;;  %v2331_v12 = vrot.slane %v5307_v27, 1  ;;  %v4819_v55 = vld [vmem:[%s7030_s4 + $0xf0] sm:$0xff] }
 0x238   : > { %2763 = vmatpush.bf16.msra.mxu3 %v4819_v55 }
 0x239   : > { %v6335_v23 = vsel %vm871_vm5, %v2329_v47, %v2331_v12 }
 0x23a   : > { %v1849_v10 = vpop.f32.mrf.mxu0  ;;  %v1993_v29 = vpop.f32.mrf.mxu1 }
 0x23b   : > { %4465 = vmatmul.msk.bf16.gmra.mxu3 %vm690_vm3, %v7287_v57  ;;  %v1887_v41 = vadd.f32 %v1849_v10, %v1752_v30  ;;  %v7290_v10 = vld [vmem:[#allocation81_spill] sm:$0xff]  ;;  %v4825_v57 = vld [vmem:[%s7030_s4 + $0x120] sm:$0xff] }
 0x23c   : > { %v2160_v36 = vpop.f32.mrf.mxu2  ;;  %3095 = vmatpush.bf16.msra.mxu2 %v4825_v57  ;;  %v7293_v57 = vld [vmem:[#allocation83_spill] sm:$0xff] }
 0x23d   : > { %v2028_v53 = vadd.f32 %v1990_v43, %v1887_v41  ;;  %4507 = vmatmul.msk.bf16.gmra.mxu1 %vm690_vm3, %v7288_v13  ;;  %v4821_v13 = vld [vmem:[%s7030_s4 + $0x100] sm:$0xff] }
 0x23e   : > { %v1717_v38 = vpop.f32.mrf.mxu3  ;;  %2883 = vmatpush.bf16.msra.mxu0 %v4821_v13 }
 0x23f   : > { %v1753_v61 = vadd.f32 %v1717_v38, %v6097_v21  ;;  %v6329_v22 = vadd.f32 %v2160_v36, %v2028_v53  ;;  %v7291_v36 = vld [vmem:[#allocation43_spill] sm:$0xff] }
 0x241   : > { %4528 = vmatmul.msk.bf16.gmra.mxu2 %vm690_vm3, %v7289_v34  ;;  %v7292_v34 = vld [vmem:[#allocation82_spill] sm:$0xff] }
 0x242   : > { %v1852_v37 = vpop.f32.mrf.mxu0  ;;  %v1995_v2 = vpop.f32.mrf.mxu1  ;;  %3357 = vmatpush.bf16.msrb.mxu0 %v4830_v52 }
 0x243   : > { %v1888_v26 = vadd.f32 %v1852_v37, %v1753_v61  ;;  %v4823_v61 = vld [vmem:[%s7030_s4 + $0x110] sm:$0xff]  ;;  %v2333_v37 = vrot.slane %v5583_v14, 1 }
 0x244   : > { %v2163_v56 = vpop.f32.mrf.mxu2  ;;  %2994 = vmatpush.bf16.msra.mxu1 %v4823_v61  ;;  %v7295_v61 = vld [vmem:[#allocation85_spill] sm:$0xff] }
 0x245   : > { %v2029_v43 = vadd.f32 %v1993_v29, %v1888_v26  ;;  %4486 = vmatmul.msk.bf16.gmra.mxu0 %vm690_vm3, %v6335_v23 }
 0x246   : > { %v1719_v18 = vpop.f32.mrf.mxu3 }
 0x247   : > { %v1754_v21 = vadd.f32 %v1719_v18, %v6114_v6  ;;  %v6340_v40 = vadd.f32 %v2163_v56, %v2029_v43  ;;  %v6365_v43 = vsel %vm871_vm5, %v2331_v12, %v2333_v37  ;;  %v7294_v12 = vld [vmem:[#allocation44_spill] sm:$0xff] }
 0x24a   : > { %v1854_v8 = vpop.f32.mrf.mxu0  ;;  %v1998_v30 = vpop.f32.mrf.mxu1 }
 0x24b   : > { %4466 = vmatmul.msk.bf16.gmra.mxu3 %vm690_vm3, %v7290_v10  ;;  %v1889_v47 = vadd.f32 %v1854_v8, %v1754_v21  ;;  %v7309_v10 = vld [vmem:[#allocation47_spill] sm:$0xff] }
 0x24c   : > { %v2165_v29 = vpop.f32.mrf.mxu2 }
 0x24d   : > { %v2030_v41 = vadd.f32 %v1995_v2, %v1889_v47  ;;  %4508 = vmatmul.msk.bf16.gmra.mxu1 %vm690_vm3, %v7291_v36 }
 0x24e   : > { %v1722_v6 = vpop.f32.mrf.mxu3 }
 0x24f   : > { %v1755_v53 = vadd.f32 %v1722_v6, %v6130_v1  ;;  %v6353_v38 = vadd.f32 %v2165_v29, %v2030_v41 }
 0x251   : > { %4529 = vmatmul.msk.bf16.gmra.mxu2 %vm690_vm3, %v7292_v34 }
 0x252   : > { %v1857_v2 = vpop.f32.mrf.mxu0  ;;  %v2000_v26 = vpop.f32.mrf.mxu1 }
 0x253   : > { %v1890_v1 = vadd.f32 %v1857_v2, %v1755_v53  ;;  %v2335_v2 = vrot.slane %v7268_v15, 1 }
 0x254   : > { %v2168_v56 = vpop.f32.mrf.mxu2 }
 0x255   : > { %v2031_v18 = vadd.f32 %v1998_v30, %v1890_v1  ;;  %4487 = vmatmul.msk.bf16.gmra.mxu0 %vm690_vm3, %v6365_v43 }
 0x256   : > { %v1724_v21 = vpop.f32.mrf.mxu3 }
 0x257   : > { %v1756_v55 = vadd.f32 %v1724_v21, %v6143_v16  ;;  %v6370_v8 = vadd.f32 %v2168_v56, %v2031_v18  ;;  %v6383_v18 = vsel %vm871_vm5, %v2333_v37, %v2335_v2  ;;  %v7297_v37 = vld [vmem:[#allocation46_spill] sm:$0xff] }
 0x25a   : > { %v1859_v47 = vpop.f32.mrf.mxu0  ;;  %v2003_v29 = vpop.f32.mrf.mxu1 }
 0x25b   : > { %4467 = vmatmul.msk.bf16.gmra.mxu3 %vm690_vm3, %v7293_v57  ;;  %v1891_v41 = vadd.f32 %v1859_v47, %v1756_v55  ;;  %v7306_v57 = vld [vmem:[#allocation56_spill] sm:$0xff] }
 0x25c   : > { %v2170_v6 = vpop.f32.mrf.mxu2 }
 0x25d   : > { %v2032_v36 = vadd.f32 %v2000_v26, %v1891_v41  ;;  %4509 = vmatmul.msk.bf16.gmra.mxu1 %vm690_vm3, %v7294_v12 }
 0x25e   : > { %v1727_v53 = vpop.f32.mrf.mxu3 }
 0x25f   : > { %v1757_v30 = vadd.f32 %v1727_v53, %v6160_v0  ;;  %v6377_v13 = vadd.f32 %v2170_v6, %v2032_v36  ;;  %v7296_v6 = vld [vmem:[#allocation88_spill] sm:$0xff] }
 0x261   : > { %4530 = vmatmul.msk.bf16.gmra.mxu2 %vm690_vm3, %v7295_v61 }
 0x262   : > { %v1862_v16 = vpop.f32.mrf.mxu0  ;;  %v2005_v34 = vpop.f32.mrf.mxu1 }
 0x263   : > { %v1892_v1 = vadd.f32 %v1862_v16, %v1757_v30  ;;  %v7298_v16 = vld [vmem:[#allocation3_spill] sm:$0xff] }
 0x264   : > { %v2173_v56 = vpop.f32.mrf.mxu2 }
 0x265   : > { %v2033_v26 = vadd.f32 %v2003_v29, %v1892_v1  ;;  %4488 = vmatmul.msk.bf16.gmra.mxu0 %vm690_vm3, %v6383_v18 }
 0x266   : > { %v1729_v21 = vpop.f32.mrf.mxu3 }
 0x267   : > { %v1758_v0 = vadd.f32 %v1729_v21, %v6173_v60  ;;  %v6388_v55 = vadd.f32 %v2173_v56, %v2033_v26  ;;  %v2337_v60 = vrot.slane %v7278_v51, 1 }
 0x26a   : > { %v1864_v47 = vpop.f32.mrf.mxu0  ;;  %v2008_v41 = vpop.f32.mrf.mxu1 }
 0x26b   : > { %4468 = vmatmul.msk.bf16.gmra.mxu3 %vm690_vm3, %v7296_v6  ;;  %v1893_v36 = vadd.f32 %v1864_v47, %v1758_v0  ;;  %v6401_v0 = vsel %vm871_vm5, %v2335_v2, %v2337_v60  ;;  %v7303_v6 = vld [vmem:[#allocation48_spill] sm:$0xff] }
 0x26c   : > { %v2175_v53 = vpop.f32.mrf.mxu2  ;;  %7299 = vst [vmem:[#allocation87_spill] sm:$0xff] %v6401_v0 }
 0x26d   : > { %v2034_v12 = vadd.f32 %v2005_v34, %v1893_v36  ;;  %4510 = vmatmul.msk.bf16.gmra.mxu1 %vm690_vm3, %v7297_v37 }
 0x26e   : > { %v1732_v30 = vpop.f32.mrf.mxu3 }
 0x26f   : > { %v1759_v29 = vadd.f32 %v1732_v30, %v6189_v45  ;;  %v6395_v61 = vadd.f32 %v2175_v53, %v2034_v12  ;;  %v2216_v45 = vrot.slane %v7260_v42, 3  ;;  %v7300_v12 = vld [vmem:[#allocation86_spill] sm:$0xff] }
 0x271   : > { %4531 = vmatmul.msk.bf16.gmra.mxu2 %vm690_vm3, %v7298_v16  ;;  %v6411_v30 = vsel %vm1007_vm6, %v7300_v12, %v2216_v45  ;;  %v7302_v16 = vld [vmem:[#allocation10_spill] sm:$0xff] }
 0x272   : > { %v1867_v1 = vpop.f32.mrf.mxu0  ;;  %v2010_v56 = vpop.f32.mrf.mxu1  ;;  %7301 = vst [vmem:[#allocation45_spill] sm:$0xff] %v6411_v30 }
 0x273   : > { %v1894_v26 = vadd.f32 %v1867_v1, %v1759_v29  ;;  %v2632_v1 = vrot.slane %v7302_v16, 2 }
 0x274   : > { %v2178_v21 = vpop.f32.mrf.mxu2 }
 0x275   : > { %v2035_v34 = vadd.f32 %v2008_v41, %v1894_v26  ;;  %4489 = vmatmul.msk.bf16.gmra.mxu0 %vm690_vm3, %v6401_v0 }
 0x276   : > { %v1734_v47 = vpop.f32.mrf.mxu3 }
 0x277   : > { %v1760_v36 = vadd.f32 %v1734_v47, %v6204_v5  ;;  %v6407_v53 = vadd.f32 %v2178_v21, %v2035_v34  ;;  %v2633_v34 = vsel %vm1437_vm9, %v5976_v19, %v2632_v1  ;;  %v2339_v47 = vrot.slane %v7302_v16, 1 }
 0x27a   : > { %v1869_v37 = vpop.f32.mrf.mxu0  ;;  %v2013_v29 = vpop.f32.mrf.mxu1 }
 0x27b   : > { %4469 = vmatmul.msk.bf16.gmra.mxu3 %vm690_vm3, %v6411_v30  ;;  %v1895_v2 = vadd.f32 %v1869_v37, %v1760_v36 }
 0x27c   : > { %v2180_v41 = vpop.f32.mrf.mxu2 }
 0x27d   : > { %v2036_v26 = vadd.f32 %v2010_v56, %v1895_v2  ;;  %4511 = vmatmul.msk.bf16.gmra.mxu1 %vm690_vm3, %v7303_v6  ;;  %v6426_v56 = vsel %vm871_vm5, %v2337_v60, %v2339_v47  ;;  %v7305_v2 = vld [vmem:[#allocation54_spill] sm:$0xff] }
 0x27e   : > { %v1737_v39 = vpop.f32.mrf.mxu3  ;;  %7304 = vst [vmem:[#allocation8_spill] sm:$0xff] %v6426_v56  ;;  %v2501_v6 = vrot.slane %v7305_v2, 1 }
 0x27f   : > { %v1761_v5 = vadd.f32 %v1737_v39, %v6220_v25  ;;  %v6419_v21 = vadd.f32 %v2180_v41, %v2036_v26  ;;  %v2504_v25 = vrot.slane %v7306_v57, 2  ;;  %v6433_v41 = vrot.slane %v7270_v44, 3 }
 0x281   : > { %4532 = vmatmul.msk.bf16.gmra.mxu2 %vm690_vm3, %v2633_v34  ;;  %v6440_v60 = vsel %vm1007_vm6, %v2216_v45, %v6433_v41 }
 0x282   : > { %v1872_v36 = vpop.f32.mrf.mxu0  ;;  %v2015_v12 = vpop.f32.mrf.mxu1  ;;  %7307 = vst [vmem:[#allocation6_spill] sm:$0xff] %v6440_v60 }
 0x283   : > { %v1896_v37 = vadd.f32 %v1872_v36, %v1761_v5  ;;  %v2505_v5 = vor.u32 %v2504_v25, %v2501_v6  ;;  %v7310_v6 = vld [vmem:[#allocation11_spill] sm:$0xff] }
 0x284   : > { %v2183_v30 = vpop.f32.mrf.mxu2  ;;  %v2317_v45 = vpack.c.bf16 %v7310_v6, %v7310_v6 }
 0x285   : > { %v2037_v39 = vadd.f32 %v2013_v29, %v1896_v37  ;;  %4490 = vmatmul.msk.bf16.gmra.mxu0 %vm690_vm3, %v6426_v56  ;;  %v7308_v37 = vld [vmem:[#allocation14_spill] sm:$0xff]  ;;  %v2506_v59 = vsel %vm2461_vm7, %v7309_v10, %v2505_v5 }
 0x286   : > { %v1739_v19 = vpop.f32.mrf.mxu3  ;;  %v2634_v63 = vrot.slane %v7308_v37, 2  ;;  %v6459_v10 = vrot.slane %v7308_v37, 1 }
 0x287   : > { %v1762_v26 = vadd.f32 %v1739_v19, %v6240_v24  ;;  %v6436_v34 = vadd.f32 %v2183_v30, %v2037_v39 }
 0x288   : > { %v2635_v19 = vsel %vm1437_vm9, %v2632_v1, %v2634_v63  ;;  %v4834_v1 = vld [vmem:[%s7030_s4 + $0x168] sm:$0xff] }
 0x289   : > { %3628 = vmatpush.bf16.msrb.mxu2 %v4834_v1 }
 0x28a   : > { %v1874_v36 = vpop.f32.mrf.mxu0  ;;  %v2018_v2 = vpop.f32.mrf.mxu1 }
 0x28b   : > { %4470 = vmatmul.msk.bf16.gmra.mxu3 %vm690_vm3, %v6440_v60  ;;  %v1897_v57 = vadd.f32 %v1874_v36, %v1762_v26  ;;  %v4828_v26 = vld [vmem:[%s7030_s4 + $0x138] sm:$0xff]  ;;  %v2508_v36 = vshrl.u32 %v2317_v45, 16 }
 0x28c   : > { %v2185_v29 = vpop.f32.mrf.mxu2  ;;  %3250 = vmatpush.bf16.msrb.mxu3 %v4828_v26 }
 0x28d   : > { %v2038_v24 = vadd.f32 %v2015_v12, %v1897_v57  ;;  %4512 = vmatmul.msk.bf16.gmra.mxu1 %vm690_vm3, %v2506_v59  ;;  %v2511_v57 = vshll.u32 %v2317_v45, 16 }
 0x28e   : > { %v1742_v30 = vpop.f32.mrf.mxu3 }
 0x28f   : > { %v1763_v25 = vadd.f32 %v1742_v30, %v6266_v49  ;;  %v6451_v39 = vadd.f32 %v2185_v29, %v2038_v24  ;;  %v6466_v29 = vsel %vm871_vm5, %v2339_v47, %v6459_v10  ;;  %v4832_v47 = vld [vmem:[%s7030_s4 + $0x158] sm:$0xff] }
 0x290   : > { %7311 = vst [vmem:[#allocation12_spill] sm:$0xff] %v6466_v29  ;;  %3471 = vmatpush.bf16.msrb.mxu1 %v4832_v47 }
 0x291   : > { %4533 = vmatmul.msk.bf16.gmra.mxu2 %vm690_vm3, %v2635_v19  ;;  %v2220_v19 = vrot.slane %v6238_v3, 3 }
 0x292   : > { %v1877_v59 = vpop.f32.mrf.mxu0  ;;  %v2020_v12 = vpop.f32.mrf.mxu1 }
 0x293   : > { %v1898_v60 = vadd.f32 %v1877_v59, %v1763_v25  ;;  %v2510_v25 = vrot.slane %v2508_v36, 1  ;;  %v2513_v59 = vrot.slane %v2511_v57, 2 }
 0x294   : > { %v2188_v49 = vpop.f32.mrf.mxu2 }
 0x295   : > { %v2039_v24 = vadd.f32 %v2018_v2, %v1898_v60  ;;  %4491 = vmatmul.msk.bf16.gmra.mxu0 %vm690_vm3, %v6466_v29  ;;  %v2221_v60 = vsel %vm1007_vm6, %v6433_v41, %v2220_v19  ;;  %v2514_v2 = vor.u32 %v2513_v59, %v2510_v25  ;;  %v2343_v25 = vrot.slane %v2317_v45, 1 }
 0x296   : > { %v1744_v30 = vpop.f32.mrf.mxu3 }
 0x297   : > { %v1764_v26 = vadd.f32 %v1744_v30, %v6281_v54  ;;  %v6472_v56 = vadd.f32 %v2188_v49, %v2039_v24  ;;  %v2515_v49 = vsel %vm2461_vm7, %v2505_v5, %v2514_v2  ;;  %v2636_v30 = vrot.slane %v2317_v45, 2 }
 0x298   : > { %v2344_v5 = vsel %vm871_vm5, %v6459_v10, %v2343_v25 }
 0x299   : > { %v2637_v52 = vsel %vm1437_vm9, %v2634_v63, %v2636_v30 }
 0x29a   : > { %v1879_v3 = vpop.f32.mrf.mxu0  ;;  %v2564_v54 = vpop.f32.mrf.mxu1 }
 0x29b   : > { %4471 = vmatmul.msk.bf16.gmra.mxu3 %vm690_vm3, %v2221_v60  ;;  %v1899_v36 = vadd.f32 %v1879_v3, %v1764_v26 }
 0x29c   : > { %v2190_v57 = vpop.f32.mrf.mxu2 }
 0x29d   : > { %v2040_v1 = vadd.f32 %v2020_v12, %v1899_v36  ;;  %4513 = vmatmul.msk.bf16.gmra.mxu1 %vm690_vm3, %v2515_v49  ;;  %v7312_v49 = vld [vmem:[#allocation15_spill] sm:$0xff] }
 0x29e   : > { %v2252_v24 = vpop.f32.mrf.mxu3 }
 0x29f   : > { %v2297_v29 = vadd.f32 %v2252_v24, %v6291_v28  ;;  %v6486_v0 = vadd.f32 %v2190_v57, %v2040_v1 }
 0x2a1   : > { %4534 = vmatmul.msk.bf16.gmra.mxu2 %vm690_vm3, %v2637_v52 }
 0x2a2   : > { %v2393_v19 = vpop.f32.mrf.mxu0  ;;  %v2566_v47 = vpop.f32.mrf.mxu1 }
 0x2a3   : > { %v2438_v26 = vadd.f32 %v2393_v19, %v2297_v29 }
 0x2a4   : > { %v2668_v59 = vpop.f32.mrf.mxu2 }
 0x2a5   : > { %v2609_v12 = vadd.f32 %v2564_v54, %v2438_v26  ;;  %4492 = vmatmul.msk.bf16.gmra.mxu0 %vm690_vm3, %v2344_v5 }
 0x2a6   : > { %v2254_v60 = vpop.f32.mrf.mxu3 }
 0x2a7   : > { %v2298_v28 = vadd.f32 %v2254_v60, %v6298_v4  ;;  %v6494_v3 = vadd.f32 %v2668_v59, %v2609_v12 }
 0x2aa   : > { %v2395_v2 = vpop.f32.mrf.mxu0  ;;  %v2569_v63 = vpop.f32.mrf.mxu1 }
 0x2ab   : > { %4547 = vmatmul.msk.bf16.vlgmr.msra.gmra.mxu3 %vm690_vm3, %v5279_v7  ;;  %v2439_v36 = vadd.f32 %v2395_v2, %v2298_v28  ;;  %v7313_v7 = vld [vmem:[#allocation21_spill] sm:$0xff]  ;;  %v7314_v28 = vld [vmem:[#allocation26_spill] sm:$0xff] }
 0x2ac   : > { %v2670_v45 = vpop.f32.mrf.mxu2 }
 0x2ad   : > { %v2610_v29 = vadd.f32 %v2566_v47, %v2439_v36  ;;  %4589 = vmatmul.msk.bf16.vlgmr.msra.gmra.mxu1 %vm690_vm3, %v7312_v49 }
 0x2ae   : > { %v2257_v57 = vpop.f32.mrf.mxu3 }
 0x2af   : > { %v2299_v54 = vadd.f32 %v2257_v57, %v6307_v48  ;;  %v6501_v1 = vadd.f32 %v2670_v45, %v2610_v29 }
 0x2b1   : > { %4610 = vmatmul.msk.bf16.vlgmr.msra.gmra.mxu2 %vm690_vm3, %v5314_v50 }
 0x2b2   : > { %v2398_v4 = vpop.f32.mrf.mxu0  ;;  %v2571_v24 = vpop.f32.mrf.mxu1 }
 0x2b3   : > { %v2440_v30 = vadd.f32 %v2398_v4, %v2299_v54 }
 0x2b4   : > { %v2673_v52 = vpop.f32.mrf.mxu2 }
 0x2b5   : > { %v2611_v19 = vadd.f32 %v2569_v63, %v2440_v30  ;;  %4568 = vmatmul.msk.bf16.vlgmr.msra.gmra.mxu0 %vm690_vm3, %v7313_v7  ;;  %v7316_v7 = vld [vmem:[#allocation34_spill] sm:$0xff] }
 0x2b6   : > { %v2259_v47 = vpop.f32.mrf.mxu3 }
 0x2b7   : > { %v2300_v25 = vadd.f32 %v2259_v47, %v6314_v33  ;;  %v6508_v26 = vadd.f32 %v2673_v52, %v2611_v19 }
 0x2ba   : > { %v2400_v59 = vpop.f32.mrf.mxu0  ;;  %v2574_v48 = vpop.f32.mrf.mxu1 }
 0x2bb   : > { %4548 = vmatmul.msk.bf16.gmra.mxu3 %vm690_vm3, %v5302_v46  ;;  %v2441_v5 = vadd.f32 %v2400_v59, %v2300_v25  ;;  %v7315_v46 = vld [vmem:[#allocation28_spill] sm:$0xff] }
 0x2bc   : > { %v2675_v50 = vpop.f32.mrf.mxu2 }
 0x2bd   : > { %v2612_v12 = vadd.f32 %v2571_v24, %v2441_v5  ;;  %4590 = vmatmul.msk.bf16.gmra.mxu1 %vm690_vm3, %v7314_v28 }
 0x2be   : > { %v2262_v60 = vpop.f32.mrf.mxu3 }
 0x2bf   : > { %v2301_v2 = vadd.f32 %v2262_v60, %v6322_v32  ;;  %v6515_v63 = vadd.f32 %v2675_v50, %v2612_v12  ;;  %v7317_v12 = vld [vmem:[#allocation35_spill] sm:$0xff] }
 0x2c1   : > { %4611 = vmatmul.msk.bf16.gmra.mxu2 %vm690_vm3, %v5307_v27 }
 0x2c2   : > { %v2403_v33 = vpop.f32.mrf.mxu0  ;;  %v2576_v36 = vpop.f32.mrf.mxu1 }
 0x2c3   : > { %v2442_v45 = vadd.f32 %v2403_v33, %v2301_v2 }
 0x2c4   : > { %v2678_v29 = vpop.f32.mrf.mxu2 }
 0x2c5   : > { %v2613_v57 = vadd.f32 %v2574_v48, %v2442_v45  ;;  %4569 = vmatmul.msk.bf16.gmra.mxu0 %vm690_vm3, %v7315_v46  ;;  %v7318_v46 = vld [vmem:[#allocation38_spill] sm:$0xff] }
 0x2c6   : > { %v2264_v49 = vpop.f32.mrf.mxu3 }
 0x2c7   : > { %v2302_v54 = vadd.f32 %v2264_v49, %v6329_v22  ;;  %v6522_v4 = vadd.f32 %v2678_v29, %v2613_v57  ;;  %v4833_v29 = vld [vmem:[%s7030_s4 + $0x160] sm:$0xff] }
 0x2c8   : > { %3629 = vmatpush.bf16.msrb.mxu2 %v4833_v29 }
 0x2ca   : > { %v2405_v24 = vpop.f32.mrf.mxu0  ;;  %v2579_v32 = vpop.f32.mrf.mxu1 }
 0x2cb   : > { %4549 = vmatmul.msk.bf16.gmra.mxu3 %vm690_vm3, %v5319_v58  ;;  %v2443_v30 = vadd.f32 %v2405_v24, %v2302_v54  ;;  %v4829_v24 = vld [vmem:[%s7030_s4 + $0x140] sm:$0xff] }
 0x2cc   : > { %v2680_v27 = vpop.f32.mrf.mxu2  ;;  %3358 = vmatpush.bf16.msrb.mxu0 %v4829_v24 }
 0x2cd   : > { %v2614_v52 = vadd.f32 %v2576_v36, %v2443_v30  ;;  %4591 = vmatmul.msk.bf16.gmra.mxu1 %vm690_vm3, %v7316_v7  ;;  %v7319_v7 = vld [vmem:[#allocation42_spill] sm:$0xff] }
 0x2ce   : > { %v2267_v19 = vpop.f32.mrf.mxu3 }
 0x2cf   : > { %v2303_v47 = vadd.f32 %v2267_v19, %v6340_v40  ;;  %v6529_v25 = vadd.f32 %v2680_v27, %v2614_v52  ;;  %v4827_v40 = vld [vmem:[%s7030_s4 + $0x130] sm:$0xff] }
 0x2d0   : > { %3251 = vmatpush.bf16.msrb.mxu3 %v4827_v40 }
 0x2d1   : > { %4612 = vmatmul.msk.bf16.gmra.mxu2 %vm690_vm3, %v5583_v14 }
 0x2d2   : > { %v2408_v22 = vpop.f32.mrf.mxu0  ;;  %v2581_v59 = vpop.f32.mrf.mxu1 }
 0x2d3   : > { %v2444_v48 = vadd.f32 %v2408_v22, %v2303_v47 }
 0x2d4   : > { %v2683_v5 = vpop.f32.mrf.mxu2 }
 0x2d5   : > { %v2615_v50 = vadd.f32 %v2579_v32, %v2444_v48  ;;  %4570 = vmatmul.msk.bf16.gmra.mxu0 %vm690_vm3, %v7317_v12  ;;  %v4831_v32 = vld [vmem:[%s7030_s4 + $0x150] sm:$0xff] }
 0x2d6   : > { %v2269_v60 = vpop.f32.mrf.mxu3  ;;  %3472 = vmatpush.bf16.msrb.mxu1 %v4831_v32 }
 0x2d7   : > { %v2304_v28 = vadd.f32 %v2269_v60, %v6353_v38  ;;  %v6536_v2 = vadd.f32 %v2683_v5, %v2615_v50 }
 0x2da   : > { %v2410_v33 = vpop.f32.mrf.mxu0  ;;  %v2584_v14 = vpop.f32.mrf.mxu1 }
 0x2db   : > { %4550 = vmatmul.msk.bf16.gmra.mxu3 %vm690_vm3, %v5380_v11  ;;  %v2445_v36 = vadd.f32 %v2410_v33, %v2304_v28  ;;  %v7320_v28 = vld [vmem:[#allocation32_spill] sm:$0xff] }
 0x2dc   : > { %v2685_v45 = vpop.f32.mrf.mxu2 }
 0x2dd   : > { %v2616_v57 = vadd.f32 %v2581_v59, %v2445_v36  ;;  %4592 = vmatmul.msk.bf16.gmra.mxu1 %vm690_vm3, %v7318_v46 }
 0x2de   : > { %v2272_v38 = vpop.f32.mrf.mxu3 }
 0x2df   : > { %v2305_v49 = vadd.f32 %v2272_v38, %v6370_v8  ;;  %v6549_v54 = vadd.f32 %v2685_v45, %v2616_v57  ;;  %v7321_v57 = vld [vmem:[#allocation4_spill] sm:$0xff] }
 0x2e1   : > { %4613 = vmatmul.msk.bf16.gmra.mxu2 %vm690_vm3, %v7268_v15 }
 0x2e2   : > { %v2413_v30 = vpop.f32.mrf.mxu0  ;;  %v2586_v27 = vpop.f32.mrf.mxu1 }
 0x2e3   : > { %v2446_v52 = vadd.f32 %v2413_v30, %v2305_v49 }
 0x2e4   : > { %v2688_v19 = vpop.f32.mrf.mxu2 }
 0x2e5   : > { %v2617_v8 = vadd.f32 %v2584_v14, %v2446_v52  ;;  %4571 = vmatmul.msk.bf16.gmra.mxu0 %vm690_vm3, %v7319_v7 }
 0x2e6   : > { %v2274_v47 = vpop.f32.mrf.mxu3 }
 0x2e7   : > { %v2306_v22 = vadd.f32 %v2274_v47, %v6377_v13  ;;  %v6562_v59 = vadd.f32 %v2688_v19, %v2617_v8 }
 0x2ea   : > { %v2415_v48 = vpop.f32.mrf.mxu0  ;;  %v2589_v5 = vpop.f32.mrf.mxu1 }
 0x2eb   : > { %4551 = vmatmul.msk.bf16.gmra.mxu3 %vm690_vm3, %v5130_v62  ;;  %v2447_v15 = vadd.f32 %v2415_v48, %v2306_v22 }
 0x2ec   : > { %v2690_v50 = vpop.f32.mrf.mxu2 }
 0x2ed   : > { %v2618_v12 = vadd.f32 %v2586_v27, %v2447_v15  ;;  %4593 = vmatmul.msk.bf16.gmra.mxu1 %vm690_vm3, %v7320_v28  ;;  %v7322_v27 = vld [vmem:[#allocation29_spill] sm:$0xff] }
 0x2ee   : > { %v2277_v60 = vpop.f32.mrf.mxu3  ;;  %v7323_v15 = vld [vmem:[#allocation49_spill] sm:$0xff] }
 0x2ef   : > { %v2307_v40 = vadd.f32 %v2277_v60, %v6388_v55  ;;  %v6569_v33 = vadd.f32 %v2690_v50, %v2618_v12  ;;  %v2955_v55 = vrot.slane %v7260_v42, 1  ;;  %v7324_v50 = vld [vmem:[#allocation7_spill] sm:$0xff] }
 0x2f0   : > { %v2835_v12 = vsel %vm601_vm8, %v7324_v50, %v7323_v15 }
 0x2f1   : > { %4614 = vmatmul.msk.bf16.gmra.mxu2 %vm690_vm3, %v7278_v51  ;;  %v2956_v52 = vsel %vm871_vm5, %v7322_v27, %v2955_v55 }
 0x2f2   : > { %v2418_v13 = vpop.f32.mrf.mxu0  ;;  %v2591_v14 = vpop.f32.mrf.mxu1 }
 0x2f3   : > { %v2448_v36 = vadd.f32 %v2418_v13, %v2307_v40  ;;  %v2957_v13 = vrot.slane %v7270_v44, 1 }
 0x2f4   : > { %v2693_v45 = vpop.f32.mrf.mxu2 }
 0x2f5   : > { %v2619_v29 = vadd.f32 %v2589_v5, %v2448_v36  ;;  %4572 = vmatmul.msk.bf16.gmra.mxu0 %vm690_vm3, %v7321_v57  ;;  %v2958_v57 = vsel %vm871_vm5, %v2955_v55, %v2957_v13 }
 0x2f6   : > { %v2279_v38 = vpop.f32.mrf.mxu3 }
 0x2f7   : > { %v2308_v46 = vadd.f32 %v2279_v38, %v6395_v61  ;;  %v6576_v49 = vadd.f32 %v2693_v45, %v2619_v29 }
 0x2fa   : > { %v2420_v24 = vpop.f32.mrf.mxu0  ;;  %v2594_v32 = vpop.f32.mrf.mxu1 }
 0x2fb   : > { %4552 = vmatmul.msk.bf16.gmra.mxu3 %vm690_vm3, %v5163_v31  ;;  %v2449_v51 = vadd.f32 %v2420_v24, %v2308_v46 }
 0x2fc   : > { %v2695_v30 = vpop.f32.mrf.mxu2 }
 0x2fd   : > { %v2620_v19 = vadd.f32 %v2591_v14, %v2449_v51  ;;  %4594 = vmatmul.msk.bf16.gmra.mxu1 %vm690_vm3, %v2956_v52 }
 0x2fe   : > { %v2282_v8 = vpop.f32.mrf.mxu3 }
 0x2ff   : > { %v2309_v61 = vadd.f32 %v2282_v8, %v6407_v53  ;;  %v6585_v7 = vadd.f32 %v2695_v30, %v2620_v19  ;;  %v7325_v19 = vld [vmem:[#allocation51_spill] sm:$0xff] }
 0x301   : > { %4615 = vmatmul.msk.bf16.gmra.mxu2 %vm690_vm3, %v7302_v16 }
 0x302   : > { %v2423_v47 = vpop.f32.mrf.mxu0  ;;  %v2596_v22 = vpop.f32.mrf.mxu1 }
 0x303   : > { %v2450_v48 = vadd.f32 %v2423_v47, %v2309_v61  ;;  %v7326_v47 = vld [vmem:[#allocation13_spill] sm:$0xff] }
 0x304   : > { %v2698_v5 = vpop.f32.mrf.mxu2 }
 0x305   : > { %v2621_v60 = vadd.f32 %v2594_v32, %v2450_v48  ;;  %4573 = vmatmul.msk.bf16.gmra.mxu0 %vm690_vm3, %v2835_v12 }
 0x306   : > { %v2284_v28 = vpop.f32.mrf.mxu3 }
 0x307   : > { %v2310_v40 = vadd.f32 %v2284_v28, %v6419_v21  ;;  %v6594_v53 = vadd.f32 %v2698_v5, %v2621_v60  ;;  %v7327_v28 = vld [vmem:[#allocation18_spill] sm:$0xff] }
 0x30a   : > { %v2425_v14 = vpop.f32.mrf.mxu0  ;;  %v2599_v36 = vpop.f32.mrf.mxu1 }
 0x30b   : > { %4553 = vmatmul.msk.bf16.gmra.mxu3 %vm690_vm3, %v7260_v42  ;;  %v2451_v45 = vadd.f32 %v2425_v14, %v2310_v40 }
 0x30c   : > { %v2700_v29 = vpop.f32.mrf.mxu2 }
 0x30d   : > { %v2622_v38 = vadd.f32 %v2596_v22, %v2451_v45  ;;  %4595 = vmatmul.msk.bf16.gmra.mxu1 %vm690_vm3, %v2958_v57 }
 0x30e   : > { %v2287_v46 = vpop.f32.mrf.mxu3 }
 0x30f   : > { %v2311_v24 = vadd.f32 %v2287_v46, %v6436_v34  ;;  %v6602_v21 = vadd.f32 %v2700_v29, %v2622_v38  ;;  %v2959_v34 = vrot.slane %v7326_v47, 1  ;;  %v7328_v29 = vshll.u32 %v7326_v47, 16 }
 0x310   : > { %v2828_v46 = vpack.c.bf16 %v7327_v28, %v7327_v28 }
 0x311   : > { %4616 = vmatmul.msk.bf16.gmra.mxu2 %vm690_vm3, %v7308_v37  ;;  %v2960_v50 = vsel %vm871_vm5, %v2957_v13, %v2959_v34  ;;  %v2842_v57 = vrot.slane %v7328_v29, 1 }
 0x312   : > { %v2428_v32 = vpop.f32.mrf.mxu0  ;;  %v2601_v51 = vpop.f32.mrf.mxu1 }
 0x313   : > { %v2452_v30 = vadd.f32 %v2428_v32, %v2311_v24  ;;  %v7329_v24 = vld [vmem:[#allocation50_spill] sm:$0xff] }
 0x314   : > { %v2703_v27 = vpop.f32.mrf.mxu2  ;;  %v2843_v32 = vsel %vm601_vm8, %v7329_v24, %v2842_v57 }
 0x315   : > { %v2623_v52 = vadd.f32 %v2599_v36, %v2452_v30  ;;  %4574 = vmatmul.msk.bf16.gmra.mxu0 %vm690_vm3, %v7325_v19  ;;  %v4836_v36 = vld [vmem:[%s7030_s4 + $0x178] sm:$0xff]  ;;  %v4838_v19 = vld [vmem:[%s7030_s4 + $0x188] sm:$0xff] }
 0x316   : > { %v2289_v55 = vpop.f32.mrf.mxu3  ;;  %3725 = vmatpush.bf16.msra.mxu3 %v4836_v36  ;;  %3838 = vmatpush.bf16.msra.mxu0 %v4838_v19 }
 0x317   : > { %v2312_v8 = vadd.f32 %v2289_v55, %v6451_v39  ;;  %v6609_v61 = vadd.f32 %v2703_v27, %v2623_v52  ;;  %v6618_v39 = vpack.c.bf16 %v7327_v28, %v7310_v6  ;;  %v4840_v55 = vld [vmem:[%s7030_s4 + $0x198] sm:$0xff] }
 0x318   : > { %3968 = vmatpush.bf16.msra.mxu1 %v4840_v55  ;;  %v7330_v28 = vld [vmem:[#allocation17_spill] sm:$0xff] }
 0x31a   : > { %v2430_v22 = vpop.f32.mrf.mxu0  ;;  %v2604_v48 = vpop.f32.mrf.mxu1 }
 0x31b   : > { %4554 = vmatmul.msk.bf16.gmra.mxu3 %vm690_vm3, %v7270_v44  ;;  %v2453_v5 = vadd.f32 %v2430_v22, %v2312_v8  ;;  %v2961_v8 = vrot.slane %v2828_v46, 1 }
 0x31c   : > { %v2705_v15 = vpop.f32.mrf.mxu2 }
 0x31d   : > { %v2624_v12 = vadd.f32 %v2601_v51, %v2453_v5  ;;  %4596 = vmatmul.msk.bf16.gmra.mxu1 %vm690_vm3, %v2960_v50  ;;  %v2962_v50 = vsel %vm871_vm5, %v2959_v34, %v2961_v8  ;;  %v7332_v34 = vshrl.u32 %v7326_v47, 16  ;;  %v7333_v8 = vld [vmem:[#allocation52_spill] sm:$0xff] }
 0x31e   : > { %v2292_v60 = vpop.f32.mrf.mxu3 }
 0x31f   : > { %v2313_v40 = vadd.f32 %v2292_v60, %v6472_v56  ;;  %v6621_v14 = vadd.f32 %v2705_v15, %v2624_v12  ;;  %v4842_v56 = vld [vmem:[%s7030_s4 + $0x1a8] sm:$0xff]  ;;  %v2848_v15 = vshll.u32 %v2828_v46, 16 }
 0x320   : > { %4077 = vmatpush.bf16.msra.mxu2 %v4842_v56 }
 0x321   : > { %4617 = vmatmul.msk.bf16.gmra.mxu2 %vm690_vm3, %v6618_v39 }
 0x322   : > { %v2433_v13 = vpop.f32.mrf.mxu0  ;;  %v2606_v45 = vpop.f32.mrf.mxu1 }
 0x323   : > { %v2454_v38 = vadd.f32 %v2433_v13, %v2313_v40  ;;  %v7331_v40 = vld [vmem:[#allocation22_spill] sm:$0xff] }
 0x324   : > { %v2708_v6 = vpop.f32.mrf.mxu2  ;;  %v6653_v36 = vpack.c.bf16 %v7331_v40, %v7330_v28 }
 0x325   : > { %v2625_v51 = vadd.f32 %v2604_v48, %v2454_v38  ;;  %4575 = vmatmul.msk.bf16.gmra.mxu0 %vm690_vm3, %v2843_v32  ;;  %v2850_v38 = vrot.slane %v2848_v15, 1 }
 0x326   : > { %v2294_v30 = vpop.f32.mrf.mxu3 }
 0x327   : > { %v2314_v27 = vadd.f32 %v2294_v30, %v6486_v0  ;;  %v6639_v52 = vadd.f32 %v2708_v6, %v2625_v51 }
 0x32a   : > { %v2435_v22 = vpop.f32.mrf.mxu0  ;;  %v2996_v48 = vpop.f32.mrf.mxu1 }
 0x32b   : > { %4555 = vmatmul.msk.bf16.gmra.mxu3 %vm690_vm3, %v7326_v47  ;;  %v2455_v5 = vadd.f32 %v2435_v22, %v2314_v27 }
 0x32c   : > { %v2710_v0 = vpop.f32.mrf.mxu2 }
 0x32d   : > { %v2626_v12 = vadd.f32 %v2606_v45, %v2455_v5  ;;  %4597 = vmatmul.msk.bf16.gmra.mxu1 %vm690_vm3, %v2962_v50  ;;  %v2846_v45 = vor.u32 %v7332_v34, %v2842_v57  ;;  %v7334_v50 = vld [vmem:[#allocation55_spill] sm:$0xff] }
 0x32e   : > { %v2765_v60 = vpop.f32.mrf.mxu3 }
 0x32f   : > { %v2810_v13 = vadd.f32 %v2765_v60, %v6494_v3  ;;  %v6656_v29 = vadd.f32 %v2710_v0, %v2626_v12  ;;  %v2851_v32 = vsel %vm601_vm8, %v2846_v45, %v2850_v38 }
 0x331   : > { %4618 = vmatmul.msk.bf16.gmra.mxu2 %vm690_vm3, %v6653_v36 }
 0x332   : > { %v2885_v6 = vpop.f32.mrf.mxu0  ;;  %v2998_v56 = vpop.f32.mrf.mxu1 }
 0x333   : > { %v2930_v46 = vadd.f32 %v2885_v6, %v2810_v13 }
 0x334   : > { %v3097_v24 = vpop.f32.mrf.mxu2 }
 0x335   : > { %v3041_v51 = vadd.f32 %v2996_v48, %v2930_v46  ;;  %4576 = vmatmul.msk.bf16.gmra.mxu0 %vm690_vm3, %v2851_v32 }
 0x336   : > { %v2767_v30 = vpop.f32.mrf.mxu3 }
 0x337   : > { %v2811_v3 = vadd.f32 %v2767_v30, %v6501_v1  ;;  %v6665_v27 = vadd.f32 %v3097_v24, %v3041_v51  ;;  %v7336_v51 = vld [vmem:[#allocation57_spill] sm:$0xff] }
 0x33a   : > { %v2887_v19 = vpop.f32.mrf.mxu0  ;;  %v3001_v55 = vpop.f32.mrf.mxu1 }
 0x33b   : > { %4631 = vmatmul.msk.bf16.vlgmr.msrb.gmra.mxu3 %vm690_vm3, %v7333_v8  ;;  %v2931_v22 = vadd.f32 %v2887_v19, %v2811_v3 }
 0x33c   : > { %v3099_v5 = vpop.f32.mrf.mxu2 }
 0x33d   : > { %v3042_v57 = vadd.f32 %v2998_v56, %v2931_v22  ;;  %4673 = vmatmul.msk.bf16.vlgmr.msrb.gmra.mxu1 %vm690_vm3, %v6155_v9  ;;  %v7335_v56 = vld [vmem:[#allocation53_spill] sm:$0xff] }
 0x33e   : > { %v2770_v0 = vpop.f32.mrf.mxu3 }
 0x33f   : > { %v2812_v48 = vadd.f32 %v2770_v0, %v6508_v26  ;;  %v6672_v15 = vadd.f32 %v3099_v5, %v3042_v57  ;;  %v7337_v57 = vld [vmem:[#allocation58_spill] sm:$0xff] }
 0x341   : > { %4694 = vmatmul.msk.bf16.vlgmr.msrb.gmra.mxu2 %vm690_vm3, %v7334_v50 }
 0x342   : > { %v2890_v1 = vpop.f32.mrf.mxu0  ;;  %v3003_v12 = vpop.f32.mrf.mxu1 }
 0x343   : > { %v2932_v60 = vadd.f32 %v2890_v1, %v2812_v48 }
 0x344   : > { %v3102_v28 = vpop.f32.mrf.mxu2 }
 0x345   : > { %v3043_v40 = vadd.f32 %v3001_v55, %v2932_v60  ;;  %4652 = vmatmul.msk.bf16.vlgmr.msrb.gmra.mxu0 %vm690_vm3, %v6335_v23  ;;  %v7338_v60 = vld [vmem:[#allocation60_spill] sm:$0xff] }
 0x346   : > { %v2772_v13 = vpop.f32.mrf.mxu3 }
 0x347   : > { %v2813_v38 = vadd.f32 %v2772_v13, %v6515_v63  ;;  %v6679_v6 = vadd.f32 %v3102_v28, %v3043_v40 }
 0x34a   : > { %v2892_v9 = vpop.f32.mrf.mxu0  ;;  %v3006_v26 = vpop.f32.mrf.mxu1 }
 0x34b   : > { %4632 = vmatmul.msk.bf16.gmra.mxu3 %vm690_vm3, %v7335_v56  ;;  %v2933_v34 = vadd.f32 %v2892_v9, %v2813_v38 }
 0x34c   : > { %v3104_v45 = vpop.f32.mrf.mxu2 }
 0x34d   : > { %v3044_v46 = vadd.f32 %v3003_v12, %v2933_v34  ;;  %4674 = vmatmul.msk.bf16.gmra.mxu1 %vm690_vm3, %v6184_v35 }
 0x34e   : > { %v2775_v24 = vpop.f32.mrf.mxu3 }
 0x34f   : > { %v2814_v32 = vadd.f32 %v2775_v24, %v6522_v4  ;;  %v6686_v23 = vadd.f32 %v3104_v45, %v3044_v46  ;;  %v7339_v45 = vld [vmem:[#allocation59_spill] sm:$0xff] }
 0x351   : > { %4695 = vmatmul.msk.bf16.gmra.mxu2 %vm690_vm3, %v7336_v51 }
 0x352   : > { %v2895_v63 = vpop.f32.mrf.mxu0  ;;  %v3008_v30 = vpop.f32.mrf.mxu1 }
 0x353   : > { %v2934_v3 = vadd.f32 %v2895_v63, %v2814_v32 }
 0x354   : > { %v3107_v19 = vpop.f32.mrf.mxu2 }
 0x355   : > { %v3045_v55 = vadd.f32 %v3006_v26, %v2934_v3  ;;  %4653 = vmatmul.msk.bf16.gmra.mxu0 %vm690_vm3, %v6365_v43  ;;  %v4839_v3 = vld [vmem:[%s7030_s4 + $0x190] sm:$0xff] }
 0x356   : > { %v2777_v8 = vpop.f32.mrf.mxu3  ;;  %3969 = vmatpush.bf16.msra.mxu1 %v4839_v3 }
 0x357   : > { %v2815_v22 = vadd.f32 %v2777_v8, %v6529_v25  ;;  %v6693_v5 = vadd.f32 %v3107_v19, %v3045_v55  ;;  %v7340_v19 = vld [vmem:[#allocation62_spill] sm:$0xff] }
 0x35a   : > { %v2897_v35 = vpop.f32.mrf.mxu0  ;;  %v3011_v4 = vpop.f32.mrf.mxu1 }
 0x35b   : > { %4633 = vmatmul.msk.bf16.gmra.mxu3 %vm690_vm3, %v7337_v57  ;;  %v2935_v0 = vadd.f32 %v2897_v35, %v2815_v22  ;;  %v7341_v35 = vld [vmem:[#allocation87_spill] sm:$0xff] }
 0x35c   : > { %v3109_v48 = vpop.f32.mrf.mxu2 }
 0x35d   : > { %v3046_v50 = vadd.f32 %v3008_v30, %v2935_v0  ;;  %4675 = vmatmul.msk.bf16.gmra.mxu1 %vm690_vm3, %v6215_v20  ;;  %v4835_v20 = vld [vmem:[%s7030_s4 + $0x170] sm:$0xff]  ;;  %v4837_v30 = vld [vmem:[%s7030_s4 + $0x180] sm:$0xff] }
 0x35e   : > { %v2780_v1 = vpop.f32.mrf.mxu3  ;;  %3726 = vmatpush.bf16.msra.mxu3 %v4835_v20  ;;  %3839 = vmatpush.bf16.msra.mxu0 %v4837_v30  ;;  %v7346_v30 = vld [vmem:[#allocation65_spill] sm:$0xff] }
 0x35f   : > { %v2816_v12 = vadd.f32 %v2780_v1, %v6536_v2  ;;  %v6700_v43 = vadd.f32 %v3109_v48, %v3046_v50  ;;  %v3428_v48 = vrot.slane %v7302_v16, 3 }
 0x361   : > { %4696 = vmatmul.msk.bf16.gmra.mxu2 %vm690_vm3, %v7338_v60 }
 0x362   : > { %v2900_v25 = vpop.f32.mrf.mxu0  ;;  %v3013_v28 = vpop.f32.mrf.mxu1 }
 0x363   : > { %v2936_v40 = vadd.f32 %v2900_v25, %v2816_v12  ;;  %v7342_v12 = vld [vmem:[#allocation61_spill] sm:$0xff] }
 0x364   : > { %v3112_v13 = vpop.f32.mrf.mxu2 }
 0x365   : > { %v3047_v38 = vadd.f32 %v3011_v4, %v2936_v40  ;;  %4654 = vmatmul.msk.bf16.gmra.mxu0 %vm690_vm3, %v6383_v18  ;;  %v4841_v18 = vld [vmem:[%s7030_s4 + $0x1a0] sm:$0xff] }
 0x366   : > { %v2782_v9 = vpop.f32.mrf.mxu3  ;;  %4078 = vmatpush.bf16.msra.mxu2 %v4841_v18 }
 0x367   : > { %v2817_v26 = vadd.f32 %v2782_v9, %v6549_v54  ;;  %v6707_v56 = vadd.f32 %v3112_v13, %v3047_v38 }
 0x36a   : > { %v2902_v2 = vpop.f32.mrf.mxu0  ;;  %v3016_v34 = vpop.f32.mrf.mxu1 }
 0x36b   : > { %4634 = vmatmul.msk.bf16.gmra.mxu3 %vm690_vm3, %v7339_v45  ;;  %v2937_v46 = vadd.f32 %v2902_v2, %v2817_v26  ;;  %v7344_v26 = vld [vmem:[#allocation64_spill] sm:$0xff] }
 0x36c   : > { %v3114_v24 = vpop.f32.mrf.mxu2 }
 0x36d   : > { %v3048_v32 = vadd.f32 %v3013_v28, %v2937_v46  ;;  %4676 = vmatmul.msk.bf16.gmra.mxu1 %vm690_vm3, %v6261_v17  ;;  %v7343_v28 = vld [vmem:[#allocation2_spill] sm:$0xff]  ;;  %v7345_v46 = vld [vmem:[#allocation8_spill] sm:$0xff] }
 0x36e   : > { %v2785_v54 = vpop.f32.mrf.mxu3  ;;  %v3429_v40 = vsel %vm1007_vm6, %v7343_v28, %v3428_v48 }
 0x36f   : > { %v2818_v51 = vadd.f32 %v2785_v54, %v6562_v59  ;;  %v6720_v63 = vadd.f32 %v3114_v24, %v3048_v32 }
 0x371   : > { %4697 = vmatmul.msk.bf16.gmra.mxu2 %vm690_vm3, %v7340_v19 }
 0x372   : > { %v2905_v55 = vpop.f32.mrf.mxu0  ;;  %v3018_v17 = vpop.f32.mrf.mxu1 }
 0x373   : > { %v2938_v8 = vadd.f32 %v2905_v55, %v2818_v51 }
 0x374   : > { %v3117_v22 = vpop.f32.mrf.mxu2 }
 0x375   : > { %v3049_v59 = vadd.f32 %v3016_v34, %v2938_v8  ;;  %4655 = vmatmul.msk.bf16.gmra.mxu0 %vm690_vm3, %v7341_v35 }
 0x376   : > { %v2787_v4 = vpop.f32.mrf.mxu3 }
 0x377   : > { %v2819_v57 = vadd.f32 %v2787_v4, %v6569_v33  ;;  %v6733_v0 = vadd.f32 %v3117_v22, %v3049_v59  ;;  %v7347_v59 = vld [vmem:[#allocation68_spill] sm:$0xff] }
 0x37a   : > { %v2907_v50 = vpop.f32.mrf.mxu0  ;;  %v3021_v1 = vpop.f32.mrf.mxu1 }
 0x37b   : > { %4635 = vmatmul.msk.bf16.gmra.mxu3 %vm690_vm3, %v7342_v12  ;;  %v2939_v60 = vadd.f32 %v2907_v50, %v2819_v57  ;;  %v7348_v12 = vld [vmem:[#allocation12_spill] sm:$0xff] }
 0x37c   : > { %v3119_v25 = vpop.f32.mrf.mxu2 }
 0x37d   : > { %v3050_v13 = vadd.f32 %v3018_v17, %v2939_v60  ;;  %4677 = vmatmul.msk.bf16.gmra.mxu1 %vm690_vm3, %v3429_v40 }
 0x37e   : > { %v2790_v38 = vpop.f32.mrf.mxu3 }
 0x37f   : > { %v2820_v33 = vadd.f32 %v2790_v38, %v6576_v49  ;;  %v6742_v9 = vadd.f32 %v3119_v25, %v3050_v13  ;;  %v3430_v49 = vrot.slane %v7308_v37, 3  ;;  %v3186_v37 = vshll.u32 %v6618_v39, 16 }
 0x380   : > { %v3432_v38 = vrot.slane %v6618_v39, 3 }
 0x381   : > { %4698 = vmatmul.msk.bf16.gmra.mxu2 %vm690_vm3, %v7344_v26  ;;  %v3431_v55 = vsel %vm1007_vm6, %v3428_v48, %v3430_v49  ;;  %v3188_v25 = vrot.slane %v3186_v37, 1  ;;  %v3570_v13 = vrot.slane %v3186_v37, 4 }
 0x382   : > { %v2910_v16 = vpop.f32.mrf.mxu0  ;;  %v3023_v20 = vpop.f32.mrf.mxu1 }
 0x383   : > { %v2940_v2 = vadd.f32 %v2910_v16, %v2820_v33  ;;  %v7349_v33 = vld [vmem:[#allocation67_spill] sm:$0xff] }
 0x384   : > { %v3122_v34 = vpop.f32.mrf.mxu2  ;;  %v3189_v26 = vsel %vm601_vm8, %v7349_v33, %v3188_v25 }
 0x385   : > { %v3051_v45 = vadd.f32 %v3021_v1, %v2940_v2  ;;  %4656 = vmatmul.msk.bf16.gmra.mxu0 %vm690_vm3, %v7345_v46  ;;  %v3190_v1 = vshrl.u32 %v6618_v39, 16  ;;  %v3433_v46 = vsel %vm1007_vm6, %v3430_v49, %v3432_v38  ;;  %v3193_v49 = vshll.u32 %v6653_v36, 16 }
 0x386   : > { %v2792_v24 = vpop.f32.mrf.mxu3 }
 0x387   : > { %v2821_v18 = vadd.f32 %v2792_v24, %v6585_v7  ;;  %v6749_v32 = vadd.f32 %v3122_v34, %v3051_v45  ;;  %v3569_v40 = vrot.slane %v3190_v1, 3 }
 0x389   : > { %v3571_v45 = vor.u32 %v3570_v13, %v3569_v40 }
 0x38a   : > { %v2912_v54 = vpop.f32.mrf.mxu0  ;;  %v3026_v51 = vpop.f32.mrf.mxu1 }
 0x38b   : > { %4636 = vmatmul.msk.bf16.gmra.mxu3 %vm690_vm3, %v7346_v30  ;;  %v2941_v3 = vadd.f32 %v2912_v54, %v2821_v18 }
 0x38c   : > { %v3124_v19 = vpop.f32.mrf.mxu2 }
 0x38d   : > { %v3052_v17 = vadd.f32 %v3023_v20, %v2941_v3  ;;  %4678 = vmatmul.msk.bf16.gmra.mxu1 %vm690_vm3, %v3431_v55  ;;  %v3324_v3 = vrot.slane %v6618_v39, 1  ;;  %v3195_v39 = vrot.slane %v3193_v49, 1 }
 0x38e   : > { %v2795_v8 = vpop.f32.mrf.mxu3 }
 0x38f   : > { %v2822_v22 = vadd.f32 %v2795_v8, %v6594_v53  ;;  %v6757_v7 = vadd.f32 %v3124_v19, %v3052_v17 }
 0x391   : > { %4699 = vmatmul.msk.bf16.gmra.mxu2 %vm690_vm3, %v7347_v59 }
 0x392   : > { %v2915_v35 = vpop.f32.mrf.mxu0  ;;  %v3028_v4 = vpop.f32.mrf.mxu1 }
 0x393   : > { %v2942_v57 = vadd.f32 %v2915_v35, %v2822_v22  ;;  %v3197_v22 = vshrl.u32 %v6653_v36, 16  ;;  %v3192_v35 = vor.u32 %v3190_v1, %v3188_v25  ;;  %v7351_v25 = vld [vmem:[#allocation23_spill] sm:$0xff] }
 0x394   : > { %v3127_v50 = vpop.f32.mrf.mxu2 }
 0x395   : > { %v3053_v48 = vadd.f32 %v3026_v51, %v2942_v57  ;;  %4657 = vmatmul.msk.bf16.gmra.mxu0 %vm690_vm3, %v7348_v12  ;;  %v7350_v51 = vld [vmem:[#allocation66_spill] sm:$0xff]  ;;  %v3434_v12 = vrot.slane %v6653_v36, 3 }
 0x396   : > { %v2797_v60 = vpop.f32.mrf.mxu3  ;;  %v3572_v30 = vsel %vm1143_vm13, %v7350_v51, %v3571_v45 }
 0x397   : > { %v2823_v53 = vadd.f32 %v2797_v60, %v6602_v21  ;;  %v6766_v28 = vadd.f32 %v3127_v50, %v3053_v48  ;;  %v3573_v50 = vrot.slane %v3197_v22, 3  ;;  %v3574_v48 = vrot.slane %v3193_v49, 4 }
 0x398   : > { %v3196_v60 = vsel %vm601_vm8, %v3192_v35, %v3195_v39  ;;  %v3435_v1 = vsel %vm1007_vm6, %v3432_v38, %v3434_v12  ;;  %v3199_v49 = vor.u32 %v3197_v22, %v3195_v39 }
 0x399   : > { %v3575_v33 = vor.u32 %v3574_v48, %v3573_v50 }
 0x39a   : > { %v2917_v16 = vpop.f32.mrf.mxu0  ;;  %v3031_v20 = vpop.f32.mrf.mxu1 }
 0x39b   : > { %4637 = vmatmul.msk.bf16.gmra.mxu3 %vm690_vm3, %v3189_v26  ;;  %v2943_v2 = vadd.f32 %v2917_v16, %v2823_v53 }
 0x39c   : > { %v3129_v34 = vpop.f32.mrf.mxu2 }
 0x39d   : > { %v3054_v24 = vadd.f32 %v3028_v4, %v2943_v2  ;;  %4679 = vmatmul.msk.bf16.gmra.mxu1 %vm690_vm3, %v3433_v46  ;;  %v3326_v46 = vrot.slane %v6653_v36, 1 }
 0x39e   : > { %v2800_v21 = vpop.f32.mrf.mxu3 }
 0x39f   : > { %v2824_v18 = vadd.f32 %v2800_v21, %v6609_v61  ;;  %v6775_v54 = vadd.f32 %v3129_v34, %v3054_v24  ;;  %v3325_v61 = vsel %vm871_vm5, %v6459_v10, %v3324_v3  ;;  %v3576_v34 = vsel %vm1143_vm13, %v3571_v45, %v3575_v33 }
 0x3a1   : > { %4700 = vmatmul.msk.bf16.gmra.mxu2 %vm690_vm3, %v3572_v30 }
 0x3a2   : > { %v2920_v19 = vpop.f32.mrf.mxu0  ;;  %v3033_v55 = vpop.f32.mrf.mxu1 }
 0x3a3   : > { %v2944_v17 = vadd.f32 %v2920_v19, %v2824_v18  ;;  %v3327_v19 = vsel %vm871_vm5, %v3324_v3, %v3326_v46 }
 0x3a4   : > { %v3132_v8 = vpop.f32.mrf.mxu2 }
 0x3a5   : > { %v3055_v59 = vadd.f32 %v3031_v20, %v2944_v17  ;;  %4658 = vmatmul.msk.bf16.gmra.mxu0 %vm690_vm3, %v3325_v61 }
 0x3a6   : > { %v2802_v37 = vpop.f32.mrf.mxu3 }
 0x3a7   : > { %v2825_v4 = vadd.f32 %v2802_v37, %v6621_v14  ;;  %v6787_v57 = vadd.f32 %v3132_v8, %v3055_v59  ;;  %v3160_v14 = vpack.c.bf16 %v7351_v25, %v7351_v25 }
 0x3a9   : > { %v3201_v24 = vshll.u32 %v3160_v14, 16  ;;  %v3577_v18 = vshrl.u32 %v3160_v14, 16  ;;  %v3436_v59 = vrot.slane %v3160_v14, 3 }
 0x3aa   : > { %v2922_v53 = vpop.f32.mrf.mxu0  ;;  %v3036_v40 = vpop.f32.mrf.mxu1 }
 0x3ab   : > { %4638 = vmatmul.msk.bf16.gmra.mxu3 %vm690_vm3, %v3196_v60  ;;  %v2945_v10 = vadd.f32 %v2922_v53, %v2825_v4  ;;  %v3203_v17 = vrot.slane %v3201_v24, 1  ;;  %v3579_v61 = vrot.slane %v3577_v18, 3  ;;  %v3580_v36 = vrot.slane %v3201_v24, 4 }
 0x3ac   : > { %v3134_v13 = vpop.f32.mrf.mxu2  ;;  %v3437_v60 = vsel %vm1007_vm6, %v3434_v12, %v3436_v59 }
 0x3ad   : > { %v3056_v26 = vadd.f32 %v3033_v55, %v2945_v10  ;;  %4680 = vmatmul.msk.bf16.gmra.mxu1 %vm690_vm3, %v3435_v1  ;;  %v3204_v37 = vsel %vm601_vm8, %v3199_v49, %v3203_v17  ;;  %v3581_v48 = vor.u32 %v3580_v36, %v3579_v61  ;;  %v3328_v10 = vrot.slane %v3160_v14, 1 }
 0x3ae   : > { %v2805_v16 = vpop.f32.mrf.mxu3 }
 0x3af   : > { %v2826_v20 = vadd.f32 %v2805_v16, %v6639_v52  ;;  %v6797_v2 = vadd.f32 %v3134_v13, %v3056_v26  ;;  %v3582_v39 = vsel %vm1143_vm13, %v3575_v33, %v3581_v48  ;;  %v3329_v16 = vsel %vm871_vm5, %v3326_v46, %v3328_v10 }
 0x3b1   : > { %4701 = vmatmul.msk.bf16.gmra.mxu2 %vm690_vm3, %v3576_v34 }
 0x3b2   : > { %v2925_v21 = vpop.f32.mrf.mxu0  ;;  %v3038_v38 = vpop.f32.mrf.mxu1 }
 0x3b3   : > { %v2946_v51 = vadd.f32 %v2925_v21, %v2826_v20 }
 0x3b4   : > { %v3137_v30 = vpop.f32.mrf.mxu2 }
 0x3b5   : > { %v3057_v55 = vadd.f32 %v3036_v40, %v2946_v51  ;;  %4659 = vmatmul.msk.bf16.gmra.mxu0 %vm690_vm3, %v3327_v19  ;;  %v7352_v51 = vld [vmem:[#allocation33_spill] sm:$0xff] }
 0x3b6   : > { %v2807_v52 = vpop.f32.mrf.mxu3  ;;  %v7353_v19 = vld [vmem:[#allocation81_spill] sm:$0xff] }
 0x3b7   : > { %v2827_v8 = vadd.f32 %v2807_v52, %v6656_v29  ;;  %v6805_v45 = vadd.f32 %v3137_v30, %v3057_v55 }
 0x3ba   : > { %v2927_v35 = vpop.f32.mrf.mxu0  ;;  %v3474_v4 = vpop.f32.mrf.mxu1 }
 0x3bb   : > { %4639 = vmatmul.msk.bf16.gmra.mxu3 %vm690_vm3, %v3204_v37  ;;  %v2947_v3 = vadd.f32 %v2927_v35, %v2827_v8 }
 0x3bc   : > { %v3139_v50 = vpop.f32.mrf.mxu2 }
 0x3bd   : > { %v3058_v53 = vadd.f32 %v3038_v38, %v2947_v3  ;;  %4681 = vmatmul.msk.bf16.gmra.mxu1 %vm690_vm3, %v3437_v60 }
 0x3be   : > { %v3253_v40 = vpop.f32.mrf.mxu3 }
 0x3bf   : > { %v3298_v29 = vadd.f32 %v3253_v40, %v6665_v27  ;;  %v6812_v22 = vadd.f32 %v3139_v50, %v3058_v53  ;;  %v7355_v50 = vld [vmem:[#allocation25_spill] sm:$0xff]  ;;  %v7356_v53 = vld [vmem:[#allocation83_spill] sm:$0xff] }
 0x3c1   : > { %4702 = vmatmul.msk.bf16.gmra.mxu2 %vm690_vm3, %v3582_v39 }
 0x3c2   : > { %v3360_v13 = vpop.f32.mrf.mxu0  ;;  %v3476_v1 = vpop.f32.mrf.mxu1 }
 0x3c3   : > { %v3405_v25 = vadd.f32 %v3360_v13, %v3298_v29 }
 0x3c4   : > { %v3631_v26 = vpop.f32.mrf.mxu2 }
 0x3c5   : > { %v3519_v12 = vadd.f32 %v3474_v4, %v3405_v25  ;;  %4660 = vmatmul.msk.bf16.gmra.mxu0 %vm690_vm3, %v3329_v16 }
 0x3c6   : > { %v3255_v20 = vpop.f32.mrf.mxu3 }
 0x3c7   : > { %v3299_v34 = vadd.f32 %v3255_v20, %v6672_v15  ;;  %v6819_v27 = vadd.f32 %v3631_v26, %v3519_v12 }
 0x3ca   : > { %v3362_v24 = vpop.f32.mrf.mxu0  ;;  %v3479_v21 = vpop.f32.mrf.mxu1 }
 0x3cb   : > { %4715 = vmatmul.msk.bf16.vlgmr.msra.gmra.mxu3 %vm690_vm3, %v5319_v58  ;;  %v3406_v33 = vadd.f32 %v3362_v24, %v3299_v34  ;;  %v7354_v58 = vld [vmem:[#allocation16_spill] sm:$0xff]  ;;  %v7358_v24 = vld [vmem:[#allocation30_spill] sm:$0xff] }
 0x3cc   : > { %v3633_v14 = vpop.f32.mrf.mxu2 }
 0x3cd   : > { %v3520_v38 = vadd.f32 %v3476_v1, %v3406_v33  ;;  %4757 = vmatmul.msk.bf16.vlgmr.msra.gmra.mxu1 %vm690_vm3, %v7352_v51 }
 0x3ce   : > { %v3258_v18 = vpop.f32.mrf.mxu3 }
 0x3cf   : > { %v3300_v46 = vadd.f32 %v3258_v18, %v6679_v6  ;;  %v6826_v30 = vadd.f32 %v3633_v14, %v3520_v38  ;;  %v7359_v14 = vld [vmem:[#allocation88_spill] sm:$0xff] }
 0x3d1   : > { %4778 = vmatmul.msk.bf16.vlgmr.msra.gmra.mxu2 %vm690_vm3, %v7353_v19 }
 0x3d2   : > { %v3365_v15 = vpop.f32.mrf.mxu0  ;;  %v3481_v55 = vpop.f32.mrf.mxu1 }
 0x3d3   : > { %v3407_v52 = vadd.f32 %v3365_v15, %v3300_v46 }
 0x3d4   : > { %v3636_v17 = vpop.f32.mrf.mxu2 }
 0x3d5   : > { %v3521_v8 = vadd.f32 %v3479_v21, %v3407_v52  ;;  %4736 = vmatmul.msk.bf16.vlgmr.msra.gmra.mxu0 %vm690_vm3, %v7354_v58 }
 0x3d6   : > { %v3260_v49 = vpop.f32.mrf.mxu3 }
 0x3d7   : > { %v3301_v61 = vadd.f32 %v3260_v49, %v6686_v23  ;;  %v6833_v36 = vadd.f32 %v3636_v17, %v3521_v8 }
 0x3da   : > { %v3367_v59 = vpop.f32.mrf.mxu0  ;;  %v3484_v6 = vpop.f32.mrf.mxu1 }
 0x3db   : > { %4716 = vmatmul.msk.bf16.gmra.mxu3 %vm690_vm3, %v5380_v11  ;;  %v3408_v37 = vadd.f32 %v3367_v59, %v3301_v61  ;;  %v7357_v11 = vld [vmem:[#allocation19_spill] sm:$0xff]  ;;  %v7361_v61 = vld [vmem:[#allocation9_spill] sm:$0xff] }
 0x3dc   : > { %v3638_v35 = vpop.f32.mrf.mxu2 }
 0x3dd   : > { %v3522_v4 = vadd.f32 %v3481_v55, %v3408_v37  ;;  %4758 = vmatmul.msk.bf16.gmra.mxu1 %vm690_vm3, %v7355_v50  ;;  %v7362_v37 = vld [vmem:[#allocation45_spill] sm:$0xff] }
 0x3de   : > { %v3263_v3 = vpop.f32.mrf.mxu3 }
 0x3df   : > { %v3302_v48 = vadd.f32 %v3263_v3, %v6693_v5  ;;  %v6840_v60 = vadd.f32 %v3638_v35, %v3522_v4 }
 0x3e1   : > { %4779 = vmatmul.msk.bf16.gmra.mxu2 %vm690_vm3, %v7356_v53 }
 0x3e2   : > { %v3370_v23 = vpop.f32.mrf.mxu0  ;;  %v3486_v40 = vpop.f32.mrf.mxu1 }
 0x3e3   : > { %v3409_v29 = vadd.f32 %v3370_v23, %v3302_v48 }
 0x3e4   : > { %v3641_v39 = vpop.f32.mrf.mxu2 }
 0x3e5   : > { %v3523_v10 = vadd.f32 %v3484_v6, %v3409_v29  ;;  %4737 = vmatmul.msk.bf16.gmra.mxu0 %vm690_vm3, %v7357_v11 }
 0x3e6   : > { %v3265_v13 = vpop.f32.mrf.mxu3 }
 0x3e7   : > { %v3303_v1 = vadd.f32 %v3265_v13, %v6700_v43  ;;  %v6847_v25 = vadd.f32 %v3641_v39, %v3523_v10  ;;  %v7364_v13 = vld [vmem:[#allocation39_spill] sm:$0xff] }
 0x3ea   : > { %v3372_v26 = vpop.f32.mrf.mxu0  ;;  %v3489_v5 = vpop.f32.mrf.mxu1 }
 0x3eb   : > { %4717 = vmatmul.msk.bf16.gmra.mxu3 %vm690_vm3, %v5130_v62  ;;  %v3410_v16 = vadd.f32 %v3372_v26, %v3303_v1  ;;  %v7360_v62 = vld [vmem:[#allocation27_spill] sm:$0xff] }
 0x3ec   : > { %v3643_v12 = vpop.f32.mrf.mxu2 }
 0x3ed   : > { %v3524_v20 = vadd.f32 %v3486_v40, %v3410_v16  ;;  %4759 = vmatmul.msk.bf16.gmra.mxu1 %vm690_vm3, %v7358_v24 }
 0x3ee   : > { %v3268_v34 = vpop.f32.mrf.mxu3 }
 0x3ef   : > { %v3304_v21 = vadd.f32 %v3268_v34, %v6707_v56  ;;  %v6854_v33 = vadd.f32 %v3643_v12, %v3524_v20 }
 0x3f1   : > { %4780 = vmatmul.msk.bf16.gmra.mxu2 %vm690_vm3, %v7359_v14 }
 0x3f2   : > { %v3375_v43 = vpop.f32.mrf.mxu0  ;;  %v3491_v38 = vpop.f32.mrf.mxu1 }
 0x3f3   : > { %v3411_v18 = vadd.f32 %v3375_v43, %v3304_v21 }
 0x3f4   : > { %v3646_v51 = vpop.f32.mrf.mxu2 }
 0x3f5   : > { %v3525_v46 = vadd.f32 %v3489_v5, %v3411_v18  ;;  %4738 = vmatmul.msk.bf16.gmra.mxu0 %vm690_vm3, %v7360_v62  ;;  %v7365_v5 = vld [vmem:[#allocation6_spill] sm:$0xff] }
 0x3f6   : > { %v3270_v19 = vpop.f32.mrf.mxu3 }
 0x3f7   : > { %v3305_v15 = vadd.f32 %v3270_v19, %v6720_v63  ;;  %v6861_v55 = vadd.f32 %v3646_v51, %v3525_v46  ;;  %v4039_v51 = vrot.slane %v7326_v47, 3  ;;  %v7367_v19 = vld [vmem:[#allocation69_spill] sm:$0xff] }
 0x3fa   : > { %v3377_v52 = vpop.f32.mrf.mxu0  ;;  %v3494_v56 = vpop.f32.mrf.mxu1 }
 0x3fb   : > { %4718 = vmatmul.msk.bf16.gmra.mxu3 %vm690_vm3, %v5163_v31  ;;  %v3412_v17 = vadd.f32 %v3377_v52, %v3305_v15  ;;  %v7363_v31 = vld [vmem:[#allocation31_spill] sm:$0xff]  ;;  %v4040_v52 = vsel %vm1007_vm6, %v6433_v41, %v4039_v51  ;;  %v254_v41 = vld [vmem:[%s5076_s30 + $0xe0] sm:$0x3f] }
 0x3fc   : > { %v3648_v8 = vpop.f32.mrf.mxu2 }
 0x3fd   : > { %v3526_v58 = vadd.f32 %v3491_v38, %v3412_v17  ;;  %4760 = vmatmul.msk.bf16.gmra.mxu1 %vm690_vm3, %v7361_v61 }
 0x3fe   : > { %v3273_v49 = vpop.f32.mrf.mxu3 }
 0x3ff   : > { %v3306_v59 = vadd.f32 %v3273_v49, %v6733_v0  ;;  %v6868_v6 = vadd.f32 %v3648_v8, %v3526_v58  ;;  %v7368_v49 = vld [vmem:[#allocation84_spill] sm:$0xff] }
 0x401   : > { %4781 = vmatmul.msk.bf16.gmra.mxu2 %vm690_vm3, %v7362_v37 }
 0x402   : > { %v3380_v63 = vpop.f32.mrf.mxu0  ;;  %v3496_v35 = vpop.f32.mrf.mxu1 }
 0x403   : > { %v3413_v4 = vadd.f32 %v3380_v63, %v3306_v59 }
 0x404   : > { %v3651_v3 = vpop.f32.mrf.mxu2 }
 0x405   : > { %v3527_v50 = vadd.f32 %v3494_v56, %v3413_v4  ;;  %4739 = vmatmul.msk.bf16.gmra.mxu0 %vm690_vm3, %v7363_v31  ;;  %v4865_v31 = vld [vmem:[%s7027_s1] ss:$0 sm:$0xff] }
 0x406   : > { %v3275_v48 = vpop.f32.mrf.mxu3 }
 0x407   : > { %v3307_v53 = vadd.f32 %v3275_v48, %v6742_v9  ;;  %v6875_v23 = vadd.f32 %v3651_v3, %v3527_v50  ;;  %v287_v48 = vmul.f32 %v4865_v31, %v254_v41 }
 0x40a   : > { %v3382_v40 = vpop.f32.mrf.mxu0  ;;  %v3499_v0 = vpop.f32.mrf.mxu1 }
 0x40b   : > { %4719 = vmatmul.msk.bf16.gmra.mxu3 %vm690_vm3, %v7260_v42  ;;  %v3414_v29 = vadd.f32 %v3382_v40, %v3307_v53  ;;  %v7366_v42 = vld [vmem:[#allocation37_spill] sm:$0xff] }
 0x40c   : > { %v3653_v39 = vpop.f32.mrf.mxu2 }
 0x40d   : > { %v3528_v10 = vadd.f32 %v3496_v35, %v3414_v29  ;;  %4761 = vmatmul.msk.bf16.gmra.mxu1 %vm690_vm3, %v7364_v13 }
 0x40e   : > { %v3278_v11 = vpop.f32.mrf.mxu3 }
 0x40f   : > { %v3308_v1 = vadd.f32 %v3278_v11, %v6749_v32  ;;  %v6882_v26 = vadd.f32 %v3653_v39, %v3528_v10  ;;  %v7370_v39 = vld [vmem:[#allocation20_spill] sm:$0xff]  ;;  %v4866_v11 = vld [vmem:[%s7028_s2] ss:$0 sm:$0xff] }
 0x410   : > { %v7371_v10 = vrot.slane %v7370_v39, 3  ;;  %v320_v13 = vadd.f32 %v4866_v11, %v287_v48  ;;  %v7376_v48 = vld [vmem:[#allocation24_spill] sm:$0xff] }
 0x411   : > { %4782 = vmatmul.msk.bf16.gmra.mxu2 %vm690_vm3, %v7365_v5 }
 0x412   : > { %v3385_v9 = vpop.f32.mrf.mxu0  ;;  %v3501_v16 = vpop.f32.mrf.mxu1 }
 0x413   : > { %v3415_v12 = vadd.f32 %v3385_v9, %v3308_v1  ;;  %v523_v9 = vpop.permute.xlu1 %522 }
 0x414   : > { %v3656_v20 = vpop.f32.mrf.mxu2  ;;  %vm552_vm5 = vcmp.eq.s32.totalorder %v523_v9, 1 }
 0x415   : > { %v3529_v34 = vadd.f32 %v3499_v0, %v3415_v12  ;;  %4740 = vmatmul.msk.bf16.gmra.mxu0 %vm690_vm3, %v7366_v42  ;;  %v7369_v0 = vld [vmem:[#allocation72_spill] sm:$0xff] }
 0x416   : > { %v3280_v24 = vpop.f32.mrf.mxu3 }
 0x417   : > { %v3309_v21 = vadd.f32 %v3280_v24, %v6757_v7  ;;  %v6889_v14 = vadd.f32 %v3656_v20, %v3529_v34  ;;  %v349_v34 = vmax.f32 %v320_v13, 0.0  ;;  %v7378_v13 = vrot.slane %v7376_v48, 3 }
 0x41a   : > { %v3387_v43 = vpop.f32.mrf.mxu0  ;;  %v3504_v32 = vpop.f32.mrf.mxu1 }
 0x41b   : > { %4720 = vmatmul.msk.bf16.gmra.mxu3 %vm690_vm3, %v7270_v44  ;;  %v3416_v38 = vadd.f32 %v3387_v43, %v3309_v21  ;;  %v3800_v44 = vrot.slane %v7326_v47, 2 }
 0x41c   : > { %v3658_v18 = vpop.f32.mrf.mxu2 }
 0x41d   : > { %v3530_v46 = vadd.f32 %v3501_v16, %v3416_v38  ;;  %4762 = vmatmul.msk.bf16.gmra.mxu1 %vm690_vm3, %v7367_v19  ;;  %v3801_v61 = vsel %vm1437_vm9, %v7368_v49, %v3800_v44 }
 0x41e   : > { %v3283_v62 = vpop.f32.mrf.mxu3 }
 0x41f   : > { %v3310_v15 = vadd.f32 %v3283_v62, %v6766_v28  ;;  %v6897_v7 = vadd.f32 %v3658_v18, %v3530_v46 }
 0x421   : > { %4783 = vmatmul.msk.bf16.gmra.mxu2 %vm690_vm3, %v4040_v52  ;;  %v7373_v52 = vld [vmem:[#allocation76_spill] sm:$0xff] }
 0x422   : > { %v3390_v56 = vpop.f32.mrf.mxu0  ;;  %v3506_v17 = vpop.f32.mrf.mxu1 }
 0x423   : > { %v3417_v8 = vadd.f32 %v3390_v56, %v3310_v15 }
 0x424   : > { %v3661_v58 = vpop.f32.mrf.mxu2 }
 0x425   : > { %v3531_v59 = vadd.f32 %v3504_v32, %v3417_v8  ;;  %4741 = vmatmul.msk.bf16.gmra.mxu0 %vm690_vm3, %v3801_v61  ;;  %v581_v32 = vsel %vm552_vm5, %v349_v34, 0.0  ;;  %v7374_v8 = vld [vmem:[#allocation73_spill] sm:$0xff]  ;;  %v7379_v34 = vrot.slane %v7376_v48, 2 }
 0x426   : > { %v3285_v28 = vpop.f32.mrf.mxu3  ;;  %v3791_v62 = vpack.c.bf16 %v581_v32, %v581_v32 }
 0x427   : > { %v3311_v37 = vadd.f32 %v3285_v28, %v6775_v54  ;;  %v6907_v63 = vadd.f32 %v3661_v58, %v3531_v59 }
 0x42a   : > { %v3392_v35 = vpop.f32.mrf.mxu0  ;;  %v3509_v4 = vpop.f32.mrf.mxu1 }
 0x42b   : > { %4721 = vmatmul.msk.bf16.gmra.mxu3 %vm690_vm3, %v7326_v47  ;;  %v3418_v3 = vadd.f32 %v3392_v35, %v3311_v37  ;;  %v4042_v47 = vsel %vm1007_vm6, %v4039_v51, %v7371_v10  ;;  %v7375_v35 = vld [vmem:[#allocation74_spill] sm:$0xff] }
 0x42c   : > { %v3663_v50 = vpop.f32.mrf.mxu2 }
 0x42d   : > { %v3532_v53 = vadd.f32 %v3506_v17, %v3418_v3  ;;  %4763 = vmatmul.msk.bf16.gmra.mxu1 %vm690_vm3, %v7369_v0  ;;  %v3933_v17 = vshll.u32 %v3791_v62, 16 }
 0x42e   : > { %v3288_v40 = vpop.f32.mrf.mxu3 }
 0x42f   : > { %v3312_v54 = vadd.f32 %v3288_v40, %v6787_v57  ;;  %v6918_v29 = vadd.f32 %v3663_v50, %v3532_v53  ;;  %v7372_v57 = vrot.slane %v7370_v39, 2  ;;  %v3935_v37 = vrot.slane %v3933_v17, 3 }
 0x431   : > { %4784 = vmatmul.msk.bf16.gmra.mxu2 %vm690_vm3, %v4042_v47  ;;  %v3803_v20 = vsel %vm1437_vm9, %v3800_v44, %v7372_v57 }
 0x432   : > { %v3395_v1 = vpop.f32.mrf.mxu0  ;;  %v3511_v5 = vpop.f32.mrf.mxu1 }
 0x433   : > { %v3419_v16 = vadd.f32 %v3395_v1, %v3312_v54  ;;  %v4045_v54 = vrot.slane %v3791_v62, 3 }
 0x434   : > { %v3666_v12 = vpop.f32.mrf.mxu2 }
 0x435   : > { %v3533_v42 = vadd.f32 %v3509_v4, %v3419_v16  ;;  %4742 = vmatmul.msk.bf16.gmra.mxu0 %vm690_vm3, %v3803_v20  ;;  %v4046_v1 = vsel %vm1007_vm6, %v7378_v13, %v4045_v54  ;;  %vm4143_vm6 = vcmask 7168  }
 0x436   : > { %v3290_v24 = vpop.f32.mrf.mxu3 }
 0x437   : > { %v3313_v21 = vadd.f32 %v3290_v24, %v6797_v2  ;;  %v6932_v43 = vadd.f32 %v3666_v12, %v3533_v42  ;;  %v3930_v2 = vshrl.u32 %v3791_v62, 16 }
 0x439   : > { %v3932_v28 = vrot.slane %v3930_v2, 2 }
 0x43a   : > { %v3397_v38 = vpop.f32.mrf.mxu0  ;;  %v3514_v18 = vpop.f32.mrf.mxu1 }
 0x43b   : > { %4722 = vmatmul.msk.bf16.gmra.mxu3 %vm690_vm3, %v7370_v39  ;;  %v3420_v51 = vadd.f32 %v3397_v38, %v3313_v21  ;;  %v3936_v50 = vor.u32 %v3935_v37, %v3932_v28  ;;  %v7377_v39 = vld [vmem:[#allocation75_spill] sm:$0xff] }
 0x43c   : > { %v3668_v46 = vpop.f32.mrf.mxu2 }
 0x43d   : > { %v3534_v19 = vadd.f32 %v3511_v5, %v3420_v51  ;;  %4764 = vmatmul.msk.bf16.gmra.mxu1 %vm690_vm3, %v7373_v52  ;;  %v3937_v10 = vsel %vm1573_vm4, %v7377_v39, %v3936_v50  ;;  %v3806_v5 = vrot.slane %v3791_v62, 2 }
 0x43e   : > { %v3293_v15 = vpop.f32.mrf.mxu3 }
 0x43f   : > { %v3314_v44 = vadd.f32 %v3293_v15, %v6805_v45  ;;  %v6939_v56 = vadd.f32 %v3668_v46, %v3534_v19  ;;  %v3807_v42 = vsel %vm1437_vm9, %v7379_v34, %v3806_v5 }
 0x441   : > { %4785 = vmatmul.msk.bf16.gmra.mxu2 %vm690_vm3, %v7374_v8 }
 0x442   : > { %v3400_v58 = vpop.f32.mrf.mxu0  ;;  %v3516_v49 = vpop.f32.mrf.mxu1 }
 0x443   : > { %v3421_v61 = vadd.f32 %v3400_v58, %v3314_v44 }
 0x444   : > { %v3671_v59 = vpop.f32.mrf.mxu2 }
 0x445   : > { %v3535_v41 = vadd.f32 %v3514_v18, %v3421_v61  ;;  %4743 = vmatmul.msk.bf16.gmra.mxu0 %vm690_vm3, %v7375_v35 }
 0x446   : > { %v3295_v4 = vpop.f32.mrf.mxu3 }
 0x447   : > { %v3315_v45 = vadd.f32 %v3295_v4, %v6812_v22  ;;  %v6946_v3 = vadd.f32 %v3671_v59, %v3535_v41 }
 0x44a   : > { %v3402_v31 = vpop.f32.mrf.mxu0  ;;  %v3971_v53 = vpop.f32.mrf.mxu1 }
 0x44b   : > { %4723 = vmatmul.msk.bf16.gmra.mxu3 %vm690_vm3, %v7376_v48  ;;  %v3422_v40 = vadd.f32 %v3402_v31, %v3315_v45 }
 0x44c   : > { %v3673_v0 = vpop.f32.mrf.mxu2 }
 0x44d   : > { %v3536_v47 = vadd.f32 %v3516_v49, %v3422_v40  ;;  %4765 = vmatmul.msk.bf16.gmra.mxu1 %vm690_vm3, %v3937_v10 }
 0x44e   : > { %v3728_v11 = vpop.f32.mrf.mxu3 }
 0x44f   : > { %v6953_v22 = vadd.f32 %v3673_v0, %v3536_v47  ;;  %v3773_v9 = vadd.f32 %v3728_v11, %v6819_v27 }
 0x451   : > { %4786 = vmatmul.msk.bf16.gmra.mxu2 %vm690_vm3, %v4046_v1 }
 0x452   : > { %v3841_v16 = vpop.f32.mrf.mxu0  ;;  %v3973_v12 = vpop.f32.mrf.mxu1 }
 0x453   : > { %v3886_v57 = vadd.f32 %v3841_v16, %v3773_v9 }
 0x454   : > { %v4080_v20 = vpop.f32.mrf.mxu2 }
 0x455   : > { %v4016_v24 = vadd.f32 %v3971_v53, %v3886_v57  ;;  %4744 = vmatmul.msk.bf16.gmra.mxu0 %vm690_vm3, %v3807_v42 }
 0x456   : > { %v3730_v21 = vpop.f32.mrf.mxu3 }
 0x457   : > { %v4125_v27 = vadd.f32 %v4080_v20, %v4016_v24  ;;  %v3774_v32 = vadd.f32 %v3730_v21, %v6826_v30 }
 0x459   : > { %4144 = vst.msk [vmem:[%s6968_s20] sm:$0xff] %vm4143_vm6, %v4125_v27 }
 0x45a   : > { %v3843_v38 = vpop.f32.mrf.mxu0  ;;  %v3976_v18 = vpop.f32.mrf.mxu1 }
 0x45b   : > { %v3887_v51 = vadd.f32 %v3843_v38, %v3774_v32 }
 0x45c   : > { %v4082_v46 = vpop.f32.mrf.mxu2 }
 0x45d   : > { %v4017_v62 = vadd.f32 %v3973_v12, %v3887_v51 }
 0x45e   : > { %v3733_v19 = vpop.f32.mrf.mxu3 }
 0x45f   : > { %v4126_v15 = vadd.f32 %v4082_v46, %v4017_v62  ;;  %v3775_v52 = vadd.f32 %v3733_v19, %v6833_v36 }
 0x461   : > { %4145 = vst.msk [vmem:[%s6968_s20 + $0x8] sm:$0xff] %vm4143_vm6, %v4126_v15 }
 0x462   : > { %v3846_v44 = vpop.f32.mrf.mxu0  ;;  %v3978_v2 = vpop.f32.mrf.mxu1 }
 0x463   : > { %v3888_v17 = vadd.f32 %v3846_v44, %v3775_v52 }
 0x464   : > { %v4085_v8 = vpop.f32.mrf.mxu2 }
 0x465   : > { %v4018_v58 = vadd.f32 %v3976_v18, %v3888_v17 }
 0x466   : > { %v3735_v49 = vpop.f32.mrf.mxu3 }
 0x467   : > { %v4127_v30 = vadd.f32 %v4085_v8, %v4018_v58  ;;  %v3776_v61 = vadd.f32 %v3735_v49, %v6840_v60 }
 0x469   : > { %4146 = vst.msk [vmem:[%s6968_s20 + $0x10] sm:$0xff] %vm4143_vm6, %v4127_v30 }
 0x46a   : > { %v3848_v59 = vpop.f32.mrf.mxu0  ;;  %v3981_v28 = vpop.f32.mrf.mxu1 }
 0x46b   : > { %v3889_v37 = vadd.f32 %v3848_v59, %v3776_v61 }
 0x46c   : > { %v4087_v41 = vpop.f32.mrf.mxu2 }
 0x46d   : > { %v4019_v35 = vadd.f32 %v3978_v2, %v3889_v37 }
 0x46e   : > { %v3738_v4 = vpop.f32.mrf.mxu3 }
 0x46f   : > { %v4128_v36 = vadd.f32 %v4087_v41, %v4019_v35  ;;  %v3777_v45 = vadd.f32 %v3738_v4, %v6847_v25 }
 0x471   : > { %4147 = vst.msk [vmem:[%s6968_s20 + $0x18] sm:$0xff] %vm4143_vm6, %v4128_v36 }
 0x472   : > { %v3851_v50 = vpop.f32.mrf.mxu0  ;;  %v3983_v31 = vpop.f32.mrf.mxu1 }
 0x473   : > { %v3890_v48 = vadd.f32 %v3851_v50, %v3777_v45 }
 0x474   : > { %v4090_v53 = vpop.f32.mrf.mxu2 }
 0x475   : > { %v4020_v40 = vadd.f32 %v3981_v28, %v3890_v48 }
 0x476   : > { %v3740_v0 = vpop.f32.mrf.mxu3 }
 0x477   : > { %v4129_v60 = vadd.f32 %v4090_v53, %v4020_v40  ;;  %v3778_v54 = vadd.f32 %v3740_v0, %v6854_v33 }
 0x479   : > { %4148 = vst.msk [vmem:[%s6968_s20 + $0x20] sm:$0xff] %vm4143_vm6, %v4129_v60 }
 0x47a   : > { %v3853_v39 = vpop.f32.mrf.mxu0  ;;  %v3986_v10 = vpop.f32.mrf.mxu1 }
 0x47b   : > { %v3891_v47 = vadd.f32 %v3853_v39, %v3778_v54 }
 0x47c   : > { %v4092_v11 = vpop.f32.mrf.mxu2 }
 0x47d   : > { %v4021_v13 = vadd.f32 %v3983_v31, %v3891_v47 }
 0x47e   : > { %v3743_v1 = vpop.f32.mrf.mxu3 }
 0x47f   : > { %v4130_v25 = vadd.f32 %v4092_v11, %v4021_v13  ;;  %v3779_v5 = vadd.f32 %v3743_v1, %v6861_v55 }
 0x481   : > { %4149 = vst.msk [vmem:[%s6968_s20 + $0x28] sm:$0xff] %vm4143_vm6, %v4130_v25 }
 0x482   : > { %v3856_v9 = vpop.f32.mrf.mxu0  ;;  %v3988_v16 = vpop.f32.mrf.mxu1 }
 0x483   : > { %v3892_v12 = vadd.f32 %v3856_v9, %v3779_v5 }
 0x484   : > { %v4095_v57 = vpop.f32.mrf.mxu2 }
 0x485   : > { %v4022_v20 = vadd.f32 %v3986_v10, %v3892_v12 }
 0x486   : > { %v3745_v34 = vpop.f32.mrf.mxu3 }
 0x487   : > { %v4131_v33 = vadd.f32 %v4095_v57, %v4022_v20  ;;  %v3780_v42 = vadd.f32 %v3745_v34, %v6868_v6 }
 0x489   : > { %4150 = vst.msk [vmem:[%s6968_s20 + $0x30] sm:$0xff] %vm4143_vm6, %v4131_v33 }
 0x48a   : > { %v3858_v24 = vpop.f32.mrf.mxu0  ;;  %v3991_v21 = vpop.f32.mrf.mxu1 }
 0x48b   : > { %v3893_v27 = vadd.f32 %v3858_v24, %v3780_v42 }
 0x48c   : > { %v4097_v32 = vpop.f32.mrf.mxu2 }
 0x48d   : > { %v4023_v38 = vadd.f32 %v3988_v16, %v3893_v27 }
 0x48e   : > { %v3748_v18 = vpop.f32.mrf.mxu3 }
 0x48f   : > { %v4132_v55 = vadd.f32 %v4097_v32, %v4023_v38  ;;  %v3781_v51 = vadd.f32 %v3748_v18, %v6875_v23 }
 0x491   : > { %4151 = vst.msk [vmem:[%s6968_s20 + $0x38] sm:$0xff] %vm4143_vm6, %v4132_v55 }
 0x492   : > { %v3861_v46 = vpop.f32.mrf.mxu0  ;;  %v3993_v62 = vpop.f32.mrf.mxu1 }
 0x493   : > { %v3894_v19 = vadd.f32 %v3861_v46, %v3781_v51 }
 0x494   : > { %v4100_v15 = vpop.f32.mrf.mxu2 }
 0x495   : > { %v4024_v52 = vadd.f32 %v3991_v21, %v3894_v19 }
 0x496   : > { %v3750_v44 = vpop.f32.mrf.mxu3 }
 0x497   : > { %v4133_v6 = vadd.f32 %v4100_v15, %v4024_v52  ;;  %v3782_v2 = vadd.f32 %v3750_v44, %v6882_v26 }
 0x499   : > { %4152 = vst.msk [vmem:[%s6968_s20 + $0x40] sm:$0xff] %vm4143_vm6, %v4133_v6 }
 0x49a   : > { %v3863_v17 = vpop.f32.mrf.mxu0  ;;  %v3996_v8 = vpop.f32.mrf.mxu1 }
 0x49b   : > { %v3895_v58 = vadd.f32 %v3863_v17, %v3782_v2 }
 0x49c   : > { %v4102_v49 = vpop.f32.mrf.mxu2 }
 0x49d   : > { %v4025_v30 = vadd.f32 %v3993_v62, %v3895_v58 }
 0x49e   : > { %v3753_v61 = vpop.f32.mrf.mxu3 }
 0x49f   : > { %v4134_v23 = vadd.f32 %v4102_v49, %v4025_v30  ;;  %v3783_v59 = vadd.f32 %v3753_v61, %v6889_v14 }
 0x4a1   : > { %4153 = vst.msk [vmem:[%s6968_s20 + $0x48] sm:$0xff] %vm4143_vm6, %v4134_v23 }
 0x4a2   : > { %v3866_v28 = vpop.f32.mrf.mxu0  ;;  %v3998_v37 = vpop.f32.mrf.mxu1 }
 0x4a3   : > { %v3896_v41 = vadd.f32 %v3866_v28, %v3783_v59 }
 0x4a4   : > { %v4105_v35 = vpop.f32.mrf.mxu2 }
 0x4a5   : > { %v4026_v4 = vadd.f32 %v3996_v8, %v3896_v41 }
 0x4a6   : > { %v3755_v36 = vpop.f32.mrf.mxu3 }
 0x4a7   : > { %v4135_v26 = vadd.f32 %v4105_v35, %v4026_v4  ;;  %v3784_v45 = vadd.f32 %v3755_v36, %v6897_v7 }
 0x4a9   : > { %4154 = vst.msk [vmem:[%s6968_s20 + $0x50] sm:$0xff] %vm4143_vm6, %v4135_v26 }
 0x4aa   : > { %v3868_v50 = vpop.f32.mrf.mxu0  ;;  %v4001_v31 = vpop.f32.mrf.mxu1 }
 0x4ab   : > { %v3897_v48 = vadd.f32 %v3868_v50, %v3784_v45 }
 0x4ac   : > { %v4107_v53 = vpop.f32.mrf.mxu2 }
 0x4ad   : > { %v4027_v40 = vadd.f32 %v3998_v37, %v3897_v48 }
 0x4ae   : > { %v3758_v0 = vpop.f32.mrf.mxu3 }
 0x4af   : > { %v4136_v14 = vadd.f32 %v4107_v53, %v4027_v40  ;;  %v3785_v60 = vadd.f32 %v3758_v0, %v6907_v63 }
 0x4b1   : > { %4155 = vst.msk [vmem:[%s6968_s20 + $0x58] sm:$0xff] %vm4143_vm6, %v4136_v14 }
 0x4b2   : > { %v3871_v54 = vpop.f32.mrf.mxu0  ;;  %v4003_v47 = vpop.f32.mrf.mxu1 }
 0x4b3   : > { %v3898_v39 = vadd.f32 %v3871_v54, %v3785_v60 }
 0x4b4   : > { %v4110_v10 = vpop.f32.mrf.mxu2 }
 0x4b5   : > { %v4028_v11 = vadd.f32 %v4001_v31, %v3898_v39 }
 0x4b6   : > { %v3760_v13 = vpop.f32.mrf.mxu3 }
 0x4b7   : > { %v4137_v7 = vadd.f32 %v4110_v10, %v4028_v11  ;;  %v3786_v1 = vadd.f32 %v3760_v13, %v6918_v29 }
 0x4b9   : > { %4156 = vst.msk [vmem:[%s6968_s20 + $0x60] sm:$0xff] %vm4143_vm6, %v4137_v7 }
 0x4ba   : > { %v3873_v25 = vpop.f32.mrf.mxu0  ;;  %v4006_v57 = vpop.f32.mrf.mxu1 }
 0x4bb   : > { %v3899_v5 = vadd.f32 %v3873_v25, %v3786_v1 }
 0x4bc   : > { %v4112_v9 = vpop.f32.mrf.mxu2 }
 0x4bd   : > { %v4029_v16 = vadd.f32 %v4003_v47, %v3899_v5 }
 0x4be   : > { %v3763_v12 = vpop.f32.mrf.mxu3 }
 0x4bf   : > { %v4138_v63 = vadd.f32 %v4112_v9, %v4029_v16  ;;  %v3787_v20 = vadd.f32 %v3763_v12, %v6932_v43 }
 0x4c1   : > { %4157 = vst.msk [vmem:[%s6968_s20 + $0x68] sm:$0xff] %vm4143_vm6, %v4138_v63 }
 0x4c2   : > { %v3876_v34 = vpop.f32.mrf.mxu0  ;;  %v4008_v29 = vpop.f32.mrf.mxu1 }
 0x4c3   : > { %v3900_v33 = vadd.f32 %v3876_v34, %v3787_v20 }
 0x4c4   : > { %v4115_v42 = vpop.f32.mrf.mxu2 }
 0x4c5   : > { %v4030_v24 = vadd.f32 %v4006_v57, %v3900_v33 }
 0x4c6   : > { %v3765_v21 = vpop.f32.mrf.mxu3 }
 0x4c7   : > { %v4139_v27 = vadd.f32 %v4115_v42, %v4030_v24  ;;  %v3788_v32 = vadd.f32 %v3765_v21, %v6939_v56 }
 0x4c9   : > { %4158 = vst.msk [vmem:[%s6968_s20 + $0x70] sm:$0xff] %vm4143_vm6, %v4139_v27 }
 0x4ca   : > { %v3878_v38 = vpop.f32.mrf.mxu0  ;;  %v4011_v19 = vpop.f32.mrf.mxu1 }
 0x4cb   : > { %v3901_v18 = vadd.f32 %v3878_v38, %v3788_v32 }
 0x4cc   : > { %v4117_v55 = vpop.f32.mrf.mxu2 }
 0x4cd   : > { %v4031_v51 = vadd.f32 %v4008_v29, %v3901_v18 }
 0x4ce   : > { %v3768_v46 = vpop.f32.mrf.mxu3 }
 0x4cf   : > { %v4140_v62 = vadd.f32 %v4117_v55, %v4031_v51  ;;  %v3789_v43 = vadd.f32 %v3768_v46, %v6946_v3 }
 0x4d1   : > { %4159 = vst.msk [vmem:[%s6968_s20 + $0x78] sm:$0xff] %vm4143_vm6, %v4140_v62 }
 0x4d2   : > { %v3881_v15 = vpop.f32.mrf.mxu0  ;;  %v4013_v49 = vpop.f32.mrf.mxu1 }
 0x4d3   : > { %v3902_v52 = vadd.f32 %v3881_v15, %v3789_v43 }
 0x4d4   : > { %v4120_v44 = vpop.f32.mrf.mxu2 }
 0x4d5   : > { %v4032_v6 = vadd.f32 %v4011_v19, %v3902_v52 }
 0x4d6   : > { %v3770_v2 = vpop.f32.mrf.mxu3 }
 0x4d7   : > { %v4141_v17 = vadd.f32 %v4120_v44, %v4032_v6  ;;  %v3790_v56 = vadd.f32 %v3770_v2, %v6953_v22 }
 0x4d9   : > { %4160 = vst.msk [vmem:[%s6968_s20 + $0x80] sm:$0xff] %vm4143_vm6, %v4141_v17 }
 0x4da   : > { %v3883_v8 = vpop.f32.mrf.mxu0 }
 0x4db   : > { %v3903_v58 = vadd.f32 %v3883_v8, %v3790_v56 }
 0x4dc   : > { %v4122_v61 = vpop.f32.mrf.mxu2 }
 0x4dd   : > { %v4033_v30 = vadd.f32 %v4013_v49, %v3903_v58 }
 0x4df   : > { %v4142_v23 = vadd.f32 %v4122_v61, %v4033_v30 }
 0x4e1   : > { %4161 = vst.msk [vmem:[%s6968_s20 + $0x88] sm:$0xff] %vm4143_vm6, %v4142_v23 }
 0x4e2 PF: > { %s15_s18 = sadd.s32 1, %s4873_s18  }
 0x4e3   : > { %p12_p4 = scmp.ge.s32.totalorder %s15_s18, 4  }
 0x4e5   :  { %14 = sbr.rel (!%p12_p4) target bundleno = 1 (0x1), region = 96 }

</bundles_post_ra>
